<compile_context>
chip_gen: v6e
topology: v6e:2x2x1
jax: 0.10.0
libtpu: 0.0.40
codegen_flags: <defaults>
</compile_context>

<pallas_src>
import jax
import jax.numpy as jnp
from jax.experimental import pallas as pl
from jax.experimental.pallas import tpu as pltpu


def _round_up(x, m):
    return (x + m - 1) // m * m


# Adaptive VMEM budget: generous on v5e/v6e (128 MiB physical), capped so the
# 64 MiB v7x part keeps double-buffering headroom.
try:
    _VMEM_LIMIT = int(min(100 * 2 ** 20,
                          pltpu.get_tpu_info().vmem_capacity_bytes * 3 // 4))
except Exception:  # pragma: no cover - conservative fallback
    _VMEM_LIMIT = 48 * 2 ** 20


# ---------------------------------------------------------------------------
# Kernel 1: plain GEMM + bias (ConvTranspose2d with k=2,s=2 is a pure GEMM)
# ---------------------------------------------------------------------------
def _gemm_bias_kernel(x_ref, w_ref, b_ref, o_ref):
    acc = jnp.dot(x_ref[...], w_ref[...], preferred_element_type=jnp.float32)
    o_ref[...] = (acc + b_ref[...]).astype(o_ref.dtype)


def pallas_gemm_bias(x, w, b, *, out_dtype=jnp.bfloat16):
    """y = x @ w + b.  x:(M,K) bf16, w:(K,N) bf16, b:(1,N) f32.

    Weight + bias stay resident in VMEM (conv-sized K,N), grid is 1-D over M
    (cdiv grid, edge blocks masked), x streams through HBM exactly once.
    """
    M, K = x.shape
    K2, N = w.shape
    assert K == K2
    # >=2 M-tiles whenever possible so both v7x TensorCores get work.
    tm = max(8, min(512, _round_up(pl.cdiv(M, 2), 8)))
    grid = (pl.cdiv(M, tm),)
    return pl.pallas_call(
        _gemm_bias_kernel,
        out_shape=jax.ShapeDtypeStruct((M, N), out_dtype),
        grid_spec=pltpu.PrefetchScalarGridSpec(
            num_scalar_prefetch=0,
            grid=grid,
            in_specs=[
                pl.BlockSpec((tm, K), lambda i: (i, 0)),
                pl.BlockSpec((K, N), lambda i: (0, 0)),   # resident weight
                pl.BlockSpec((1, N), lambda i: (0, 0)),   # resident bias
            ],
            out_specs=pl.BlockSpec((tm, N), lambda i: (i, 0)),
        ),
        compiler_params=pltpu.CompilerParams(
            dimension_semantics=("parallel",),
            vmem_limit_bytes=_VMEM_LIMIT,
        ),
    )(x, w, b)


# ---------------------------------------------------------------------------
# Kernel 2: fused Conv3x3 (pad=1) + BN-shift + ReLU, multi-source (fused concat)
# ---------------------------------------------------------------------------
def _make_conv3x3_kernel(num_src, th, W, cout):
    def kernel(*refs):
        x_refs = refs[: 2 * num_src]            # (main, halo) per source
        w_refs = refs[2 * num_src: 3 * num_src]  # (3,3,Ci,Cout) per source
        s_ref = refs[3 * num_src]                # (1, Cout) BN shift
        o_ref = refs[3 * num_src + 1]            # (th, W, Cout)

        acc = jnp.zeros((th * W, cout), jnp.float32)
        for s in range(num_src):
            xm = x_refs[2 * s][...]              # (th, W+2, C)  main rows
            xh = x_refs[2 * s + 1][...]          # (2,  W+2, C)  halo rows
            x = jnp.concatenate([xm, xh], axis=0)  # (th+2, W+2, C)
            c = x.shape[-1]
            for kj in range(3):
                # one column-shifted flattening serves all 3 row taps
                xw = x[:, kj:kj + W, :].reshape((th + 2) * W, c)
                for ki in range(3):
                    acc = acc + jnp.dot(
                        xw[ki * W:(ki + th) * W, :],
                        w_refs[s][ki, kj],
                        preferred_element_type=jnp.float32)
        y = jnp.maximum(acc + s_ref[...], 0.0)    # BN shift + ReLU fused
        o_ref[...] = y.reshape(th, W, cout).astype(o_ref.dtype)

    return kernel


def conv3x3_bn_relu(inputs, weights, shift, *, out_dtype=jnp.bfloat16):
    """Fused 3x3 conv (pad=1) + BN shift + ReLU over NHWC sources.

    `inputs` are logically channel-concatenated (concat is fused: each source
    has its own weight slab, all taps accumulate into one VMEM accumulator).
    The halo is read via a main-rows block plus a 2-row halo block of the same
    padded HBM array -- no im2col materialisation.
    """
    N, H, W, _ = inputs[0].shape
    for x in inputs:
        assert x.shape[:3] == (N, H, W), "source spatial/batch mismatch"
    cout = weights[0].shape[-1]
    c_total = sum(x.shape[-1] for x in inputs)

    # Row-tile size: multiple of 8 (even, for halo block indexing), grown while
    # the per-step blocks stay small vs. VMEM to amortise grid-step overhead.
    th = 8
    while th < 64 and th < H and (2 * th + 4) * (W + 2) * c_total * 2 <= (1 << 20):
        th *= 2
    th = min(th, _round_up(H, 8))
    T = pl.cdiv(H, th)
    Hp = T * th

    # 1-pixel zero halo (+ bottom rows up to Hp) -- tiny vs. the 9x im2col it replaces.
    padded = [jnp.pad(x.astype(jnp.bfloat16),
                      ((0, 0), (1, Hp - H + 1), (1, 1), (0, 0)))
              for x in inputs]

    in_specs, operands = [], []
    for xp in padded:
        c = xp.shape[-1]
        in_specs.append(
            pl.BlockSpec((None, th, W + 2, c), lambda n, i: (n, i, 0, 0)))
        in_specs.append(
            pl.BlockSpec((None, 2, W + 2, c),
                         lambda n, i: (n, (i + 1) * (th // 2), 0, 0)))
        operands.append(xp)
        operands.append(xp)  # same HBM array, re-read only for the 2 halo rows
    for w in weights:
        in_specs.append(pl.BlockSpec(w.shape, lambda n, i: (0, 0, 0, 0)))
        operands.append(w)
    in_specs.append(pl.BlockSpec((1, cout), lambda n, i: (0, 0)))
    operands.append(shift.reshape(1, cout).astype(jnp.float32))

    out = pl.pallas_call(
        _make_conv3x3_kernel(len(inputs), th, W, cout),
        out_shape=jax.ShapeDtypeStruct((N, Hp, W, cout), out_dtype),
        grid_spec=pltpu.PrefetchScalarGridSpec(
            num_scalar_prefetch=0,
            grid=(N, T),
            in_specs=in_specs,
            out_specs=pl.BlockSpec((None, th, W, cout),
                                   lambda n, i: (n, i, 0, 0)),
        ),
        compiler_params=pltpu.CompilerParams(
            dimension_semantics=("parallel", "parallel"),
            vmem_limit_bytes=_VMEM_LIMIT,
        ),
    )(*operands)
    return out if Hp == H else out[:, :H]


# ---------------------------------------------------------------------------
# NHWC building blocks
# ---------------------------------------------------------------------------
def conv_transpose2x2(x_nhwc, up_wm, up_b):
    """ConvTranspose2d(k=2, s=2): GEMM + pixel shuffle.  Returns (N,2H,2W,Cup) bf16."""
    N, H, W, Cin = x_nhwc.shape
    cup = up_wm.shape[1] // 4
    y = pallas_gemm_bias(
        x_nhwc.reshape(N * H * W, Cin).astype(jnp.bfloat16),
        up_wm, up_b, out_dtype=jnp.bfloat16)
    y = y.reshape(N, H, W, 2, 2, cup)
    # TODO(synk): fold this pixel-shuffle relayout into the conv1 halo read (or
    # write the (N,H,2,W,2,Cup) layout straight from the GEMM kernel).
    return y.transpose(0, 1, 3, 2, 4, 5).reshape(N, 2 * H, 2 * W, cup)


# ---------------------------------------------------------------------------
# Parameter folding (once, outside the forward pass): BN folded, bf16 pre-cast
# ---------------------------------------------------------------------------
def fold_params(params, eps=1e-5):
    f32 = jnp.float32
    in_ch, cup = params["up_w"].shape[0], params["up_w"].shape[1]
    # ConvTranspose2d weight (Cin, Cup, 2, 2) -> (Cin, 4*Cup), cols (ki,kj,co)
    up_wm = params["up_w"].transpose(0, 2, 3, 1).reshape(in_ch, 4 * cup)
    up_b = jnp.tile(params["up_b"].astype(f32), 4).reshape(1, 4 * cup)

    def fold_conv(w, g, b, m, v):
        scale = g / jnp.sqrt(v + eps)                 # (Cout,)
        shift = (b - m * scale).astype(f32)           # (Cout,)
        wf = w * scale[:, None, None, None]           # BN scale folded into weight
        w4 = wf.transpose(2, 3, 1, 0)                 # (3, 3, Cin, Cout)
        return w4.astype(jnp.bfloat16), shift

    w1, shift1 = fold_conv(params["c1_w"], params["bn1_g"], params["bn1_b"],
                           params["bn1_m"], params["bn1_v"])
    w2, shift2 = fold_conv(params["c2_w"], params["bn2_g"], params["bn2_b"],
                           params["bn2_m"], params["bn2_v"])
    c_skip = w1.shape[2] - cup   # concat order is [x2 (skip), x1 (upsampled)]
    return {
        "up_wm": up_wm.astype(jnp.bfloat16), "up_b": up_b,
        "w1_skip": w1[:, :, :c_skip, :], "w1_up": w1[:, :, c_skip:, :],
        "shift1": shift1, "w2": w2, "shift2": shift2,
    }


# ---------------------------------------------------------------------------
# Forward pass (public API is NCHW, like PyTorch)
# ---------------------------------------------------------------------------
@jax.jit
def upconv_forward(folded, x1, x2):
    x1 = x1.transpose(0, 2, 3, 1)                     # -> NHWC once
    x2 = x2.transpose(0, 2, 3, 1)

    # 1) 2x2 / stride-2 transposed conv (upsample)
    x1u = conv_transpose2x2(x1, folded["up_wm"], folded["up_b"])

    # 2) center-crop x2 to x1u's spatial size (same arithmetic as the PyTorch module)
    diffY = x2.shape[1] - x1u.shape[1]
    diffX = x2.shape[2] - x1u.shape[2]
    x2c = x2[:, diffY // 2: x2.shape[1] - diffY // 2,
             diffX // 2: x2.shape[2] - diffX // 2, :]

    # 3+4) channel concat + [Conv3x3 -> BN -> ReLU]: concat fused into conv1
    h = conv3x3_bn_relu([x2c, x1u],
                        [folded["w1_skip"], folded["w1_up"]],
                        folded["shift1"], out_dtype=jnp.bfloat16)
    # 5) second [Conv3x3 -> BN -> ReLU]
    out = conv3x3_bn_relu([h], [folded["w2"]], folded["shift2"],
                          out_dtype=jnp.float32)
    return out.transpose(0, 3, 1, 2)                  # -> NCHW once


def init_params(key, in_channels, out_channels):
    cup = in_channels // 2
    ks = jax.random.split(key, 10)
    f32 = jnp.float32
    return {
        # ConvTranspose2d(in_channels, in_channels//2, k=2, s=2)
        "up_w": 0.1 * jax.random.normal(ks[0], (in_channels, cup, 2, 2), f32),
        "up_b": 0.1 * jax.random.normal(ks[1], (cup,), f32),
        # Conv2d(in_channels, out_channels, 3, pad=1, bias=False) + BN
        "c1_w": 0.1 * jax.random.normal(ks[2], (out_channels, in_channels, 3, 3), f32),
        "bn1_g": 1.0 + 0.1 * jax.random.normal(ks[3], (out_channels,), f32),
        "bn1_b": 0.1 * jax.random.normal(ks[4], (out_channels,), f32),
        "bn1_m": 0.1 * jax.random.normal(ks[5], (out_channels,), f32),
        "bn1_v": 0.5 + jnp.abs(0.1 * jax.random.normal(ks[6], (out_channels,), f32)),
        # Conv2d(out_channels, out_channels, 3, pad=1, bias=False) + BN
        "c2_w": 0.1 * jax.random.normal(ks[7], (out_channels, out_channels, 3, 3), f32),
        "bn2_g": 1.0 + 0.1 * jax.random.normal(ks[8], (out_channels,), f32),
        "bn2_b": 0.1 * jax.random.normal(ks[9], (out_channels,), f32),
        "bn2_m": jnp.zeros((out_channels,), f32),
        "bn2_v": jnp.ones((out_channels,), f32),
    }


if __name__ == "__main__":
    key = jax.random.PRNGKey(0)
    in_channels, out_channels = 8, 4
    k_p, k_x1, k_x2 = jax.random.split(key, 3)

    params = init_params(k_p, in_channels, out_channels)
    folded = fold_params(params)

    # x1: low-res feature map (N, in_channels, 8, 8) -> upsampled to 16x16
    # x2: skip connection (N, in_channels//2, 18, 18) -> center-cropped to 16x16
    x1 = jax.random.normal(k_x1, (2, in_channels, 8, 8), jnp.float32)
    x2 = jax.random.normal(k_x2, (2, in_channels // 2, 18, 18), jnp.float32)

    out = upconv_forward(folded, x1, x2)
    jax.block_until_ready(out)

    assert out.shape == (2, out_channels, 16, 16), out.shape
    assert bool(jnp.all(out >= 0.0))  # ReLU output
    print("KERNEL_OK")
</pallas_src>

<mosaic_0001>
module attributes {stable_mosaic.version = 11 : i64} {
  func.func @_gemm_bias_kernel(%arg0: i32, %arg1: memref<64x8xbf16, #tpu.memory_space<vmem>>, %arg2: memref<8x16xbf16, #tpu.memory_space<vmem>>, %arg3: memref<1x16xf32, #tpu.memory_space<vmem>>, %arg4: memref<64x16xbf16, #tpu.memory_space<vmem>>) attributes {dimension_semantics = [#tpu.dimension_semantics<parallel>], iteration_bounds = array<i64: 2>, scalar_prefetch = 0 : i64, scratch_operands = 0 : i64, tpu.core_type = #tpu.core_type<tc>, window_params = [{transform_indices = @transform_0, window_bounds = array<i64: 64, 8>}, {pipeline_mode = #tpu.pipeline_mode<synchronous>, transform_indices = @transform_1, window_bounds = array<i64: 8, 16>}, {pipeline_mode = #tpu.pipeline_mode<synchronous>, transform_indices = @transform_2, window_bounds = array<i64: 1, 16>}, {transform_indices = @transform_3, window_bounds = array<i64: 64, 16>}]} {
    %c0 = arith.constant 0 : index
    %c0_0 = arith.constant 0 : index
    %0 = vector.load %arg1[%c0, %c0_0] : memref<64x8xbf16, #tpu.memory_space<vmem>>, vector<64x8xbf16>
    %c0_1 = arith.constant 0 : index
    %c0_2 = arith.constant 0 : index
    %1 = vector.load %arg2[%c0_1, %c0_2] : memref<8x16xbf16, #tpu.memory_space<vmem>>, vector<8x16xbf16>
    %cst = arith.constant dense<0.000000e+00> : vector<64x16xf32>
    %2 = tpu.matmul %0, %1, %cst {dimension_numbers = #tpu.dot_dimension_numbers<[1], [0], [0], [1], [0, 0, 1, 1], [], []>} : vector<64x8xbf16>, vector<8x16xbf16>, vector<64x16xf32> -> vector<64x16xf32>
    %c0_3 = arith.constant 0 : index
    %c0_4 = arith.constant 0 : index
    %3 = vector.load %arg3[%c0_3, %c0_4] : memref<1x16xf32, #tpu.memory_space<vmem>>, vector<1x16xf32>
    %4 = vector.broadcast %3 : vector<1x16xf32> to vector<64x16xf32>
    %5 = arith.addf %2, %4 : vector<64x16xf32>
    %6 = arith.truncf %5 : vector<64x16xf32> to vector<64x16xbf16>
    %c0_5 = arith.constant 0 : index
    %c0_6 = arith.constant 0 : index
    %7 = vector.load %arg4[%c0_5, %c0_6] : memref<64x16xbf16, #tpu.memory_space<vmem>>, vector<64x16xbf16>
    tpu.vector_store %arg4[%c0_5, %c0_6], %6 {strides = array<i32>} : memref<64x16xbf16, #tpu.memory_space<vmem>>, vector<64x16xbf16>,
    return
  }
  func.func @transform_0(%arg0: i32) -> (i32, i32) {
    %c0_i32 = arith.constant 0 : i32
    %c0_i32_0 = arith.constant 0 : i32
    return %arg0, %c0_i32 : i32, i32
  }
  func.func @transform_1(%arg0: i32) -> (i32, i32) {
    %c0_i32 = arith.constant 0 : i32
    %c0_i32_0 = arith.constant 0 : i32
    %c0_i32_1 = arith.constant 0 : i32
    return %c0_i32, %c0_i32_0 : i32, i32
  }
  func.func @transform_2(%arg0: i32) -> (i32, i32) {
    %c0_i32 = arith.constant 0 : i32
    %c0_i32_0 = arith.constant 0 : i32
    %c0_i32_1 = arith.constant 0 : i32
    return %c0_i32, %c0_i32_0 : i32, i32
  }
  func.func @transform_3(%arg0: i32) -> (i32, i32) {
    %c0_i32 = arith.constant 0 : i32
    %c0_i32_0 = arith.constant 0 : i32
    return %arg0, %c0_i32 : i32, i32
  }
}

module attributes {stable_mosaic.version = 11 : i64} {
  func.func @kernel(%arg0: i32, %arg1: i32, %arg2: memref<1x16x18x4xbf16, #tpu.memory_space<vmem>>, %arg3: memref<1x2x18x4xbf16, #tpu.memory_space<vmem>>, %arg4: memref<1x16x18x4xbf16, #tpu.memory_space<vmem>>, %arg5: memref<1x2x18x4xbf16, #tpu.memory_space<vmem>>, %arg6: memref<3x3x4x4xbf16, #tpu.memory_space<vmem>>, %arg7: memref<3x3x4x4xbf16, #tpu.memory_space<vmem>>, %arg8: memref<1x4xf32, #tpu.memory_space<vmem>>, %arg9: memref<1x16x16x4xbf16, #tpu.memory_space<vmem>>) attributes {dimension_semantics = [#tpu.dimension_semantics<parallel>, #tpu.dimension_semantics<parallel>], iteration_bounds = array<i64: 2, 1>, scalar_prefetch = 0 : i64, scratch_operands = 0 : i64, tpu.core_type = #tpu.core_type<tc>, window_params = [{transform_indices = @transform_0, window_bounds = array<i64: 1, 16, 18, 4>}, {transform_indices = @transform_1, window_bounds = array<i64: 1, 2, 18, 4>}, {transform_indices = @transform_2, window_bounds = array<i64: 1, 16, 18, 4>}, {transform_indices = @transform_3, window_bounds = array<i64: 1, 2, 18, 4>}, {pipeline_mode = #tpu.pipeline_mode<synchronous>, transform_indices = @transform_4, window_bounds = array<i64: 3, 3, 4, 4>}, {pipeline_mode = #tpu.pipeline_mode<synchronous>, transform_indices = @transform_5, window_bounds = array<i64: 3, 3, 4, 4>}, {pipeline_mode = #tpu.pipeline_mode<synchronous>, transform_indices = @transform_6, window_bounds = array<i64: 1, 4>}, {transform_indices = @transform_7, window_bounds = array<i64: 1, 16, 16, 4>}]} {
    %cst = arith.constant 0.000000e+00 : f32
    %0 = vector.broadcast %cst : f32 to vector<256x4xf32>
    %c0 = arith.constant 0 : index
    %c0_0 = arith.constant 0 : index
    %c0_1 = arith.constant 0 : index
    %c0_2 = arith.constant 0 : index
    %1 = vector.load %arg2[%c0, %c0_0, %c0_1, %c0_2] : memref<1x16x18x4xbf16, #tpu.memory_space<vmem>>, vector<1x16x18x4xbf16>
    %2 = vector.shape_cast %1 : vector<1x16x18x4xbf16> to vector<16x18x4xbf16>
    %c0_3 = arith.constant 0 : index
    %c0_4 = arith.constant 0 : index
    %c0_5 = arith.constant 0 : index
    %c0_6 = arith.constant 0 : index
    %3 = vector.load %arg3[%c0_3, %c0_4, %c0_5, %c0_6] : memref<1x2x18x4xbf16, #tpu.memory_space<vmem>>, vector<1x2x18x4xbf16>
    %4 = vector.shape_cast %3 : vector<1x2x18x4xbf16> to vector<2x18x4xbf16>
    %5 = tpu.concatenate %2, %4 in 0 : vector<16x18x4xbf16>, vector<2x18x4xbf16> -> vector<18x18x4xbf16>
    %6 = vector.extract_strided_slice %5 {offsets = [0, 0, 0], sizes = [18, 16, 4], strides = [1, 1, 1]} : vector<18x18x4xbf16> to vector<18x16x4xbf16>
    %7 = vector.shape_cast %6 : vector<18x16x4xbf16> to vector<288x4xbf16>
    %8 = vector.extract_strided_slice %7 {offsets = [0, 0], sizes = [256, 4], strides = [1, 1]} : vector<288x4xbf16> to vector<256x4xbf16>
    %c0_7 = arith.constant 0 : index
    %c0_8 = arith.constant 0 : index
    %c0_9 = arith.constant 0 : index
    %c0_10 = arith.constant 0 : index
    %9 = vector.load %arg6[%c0_7, %c0_8, %c0_9, %c0_10] : memref<3x3x4x4xbf16, #tpu.memory_space<vmem>>, vector<1x1x4x4xbf16>
    %10 = vector.shape_cast %9 : vector<1x1x4x4xbf16> to vector<4x4xbf16>
    %cst_11 = arith.constant dense<0.000000e+00> : vector<256x4xf32>
    %11 = tpu.matmul %8, %10, %cst_11 {dimension_numbers = #tpu.dot_dimension_numbers<[1], [0], [0], [1], [0, 0, 1, 1], [], []>} : vector<256x4xbf16>, vector<4x4xbf16>, vector<256x4xf32> -> vector<256x4xf32>
    %12 = arith.addf %0, %11 : vector<256x4xf32>
    %13 = vector.extract_strided_slice %7 {offsets = [16, 0], sizes = [256, 4], strides = [1, 1]} : vector<288x4xbf16> to vector<256x4xbf16>
    %c1 = arith.constant 1 : index
    %c0_12 = arith.constant 0 : index
    %c0_13 = arith.constant 0 : index
    %c0_14 = arith.constant 0 : index
    %14 = vector.load %arg6[%c1, %c0_12, %c0_13, %c0_14] : memref<3x3x4x4xbf16, #tpu.memory_space<vmem>>, vector<1x1x4x4xbf16>
    %15 = vector.shape_cast %14 : vector<1x1x4x4xbf16> to vector<4x4xbf16>
    %cst_15 = arith.constant dense<0.000000e+00> : vector<256x4xf32>
    %16 = tpu.matmul %13, %15, %cst_15 {dimension_numbers = #tpu.dot_dimension_numbers<[1], [0], [0], [1], [0, 0, 1, 1], [], []>} : vector<256x4xbf16>, vector<4x4xbf16>, vector<256x4xf32> -> vector<256x4xf32>
    %17 = arith.addf %12, %16 : vector<256x4xf32>
    %18 = vector.extract_strided_slice %7 {offsets = [32, 0], sizes = [256, 4], strides = [1, 1]} : vector<288x4xbf16> to vector<256x4xbf16>
    %c2 = arith.constant 2 : index
    %c0_16 = arith.constant 0 : index
    %c0_17 = arith.constant 0 : index
    %c0_18 = arith.constant 0 : index
    %19 = vector.load %arg6[%c2, %c0_16, %c0_17, %c0_18] : memref<3x3x4x4xbf16, #tpu.memory_space<vmem>>, vector<1x1x4x4xbf16>
    %20 = vector.shape_cast %19 : vector<1x1x4x4xbf16> to vector<4x4xbf16>
    %cst_19 = arith.constant dense<0.000000e+00> : vector<256x4xf32>
    %21 = tpu.matmul %18, %20, %cst_19 {dimension_numbers = #tpu.dot_dimension_numbers<[1], [0], [0], [1], [0, 0, 1, 1], [], []>} : vector<256x4xbf16>, vector<4x4xbf16>, vector<256x4xf32> -> vector<256x4xf32>
    %22 = arith.addf %17, %21 : vector<256x4xf32>
    %23 = vector.extract_strided_slice %5 {offsets = [0, 1, 0], sizes = [18, 16, 4], strides = [1, 1, 1]} : vector<18x18x4xbf16> to vector<18x16x4xbf16>
    %24 = vector.shape_cast %23 : vector<18x16x4xbf16> to vector<288x4xbf16>
    %25 = vector.extract_strided_slice %24 {offsets = [0, 0], sizes = [256, 4], strides = [1, 1]} : vector<288x4xbf16> to vector<256x4xbf16>
    %c0_20 = arith.constant 0 : index
    %c1_21 = arith.constant 1 : index
    %c0_22 = arith.constant 0 : index
    %c0_23 = arith.constant 0 : index
    %26 = vector.load %arg6[%c0_20, %c1_21, %c0_22, %c0_23] : memref<3x3x4x4xbf16, #tpu.memory_space<vmem>>, vector<1x1x4x4xbf16>
    %27 = vector.shape_cast %26 : vector<1x1x4x4xbf16> to vector<4x4xbf16>
    %cst_24 = arith.constant dense<0.000000e+00> : vector<256x4xf32>
    %28 = tpu.matmul %25, %27, %cst_24 {dimension_numbers = #tpu.dot_dimension_numbers<[1], [0], [0], [1], [0, 0, 1, 1], [], []>} : vector<256x4xbf16>, vector<4x4xbf16>, vector<256x4xf32> -> vector<256x4xf32>
    %29 = arith.addf %22, %28 : vector<256x4xf32>
    %30 = vector.extract_strided_slice %24 {offsets = [16, 0], sizes = [256, 4], strides = [1, 1]} : vector<288x4xbf16> to vector<256x4xbf16>
    %c1_25 = arith.constant 1 : index
    %c1_26 = arith.constant 1 : index
    %c0_27 = arith.constant 0 : index
    %c0_28 = arith.constant 0 : index
    %31 = vector.load %arg6[%c1_25, %c1_26, %c0_27, %c0_28] : memref<3x3x4x4xbf16, #tpu.memory_space<vmem>>, vector<1x1x4x4xbf16>
    %32 = vector.shape_cast %31 : vector<1x1x4x4xbf16> to vector<4x4xbf16>
    %cst_29 = arith.constant dense<0.000000e+00> : vector<256x4xf32>
    %33 = tpu.matmul %30, %32, %cst_29 {dimension_numbers = #tpu.dot_dimension_numbers<[1], [0], [0], [1], [0, 0, 1, 1], [], []>} : vector<256x4xbf16>, vector<4x4xbf16>, vector<256x4xf32> -> vector<256x4xf32>
    %34 = arith.addf %29, %33 : vector<256x4xf32>
    %35 = vector.extract_strided_slice %24 {offsets = [32, 0], sizes = [256, 4], strides = [1, 1]} : vector<288x4xbf16> to vector<256x4xbf16>
    %c2_30 = arith.constant 2 : index
    %c1_31 = arith.constant 1 : index
    %c0_32 = arith.constant 0 : index
    %c0_33 = arith.constant 0 : index
    %36 = vector.load %arg6[%c2_30, %c1_31, %c0_32, %c0_33] : memref<3x3x4x4xbf16, #tpu.memory_space<vmem>>, vector<1x1x4x4xbf16>
    %37 = vector.shape_cast %36 : vector<1x1x4x4xbf16> to vector<4x4xbf16>
    %cst_34 = arith.constant dense<0.000000e+00> : vector<256x4xf32>
    %38 = tpu.matmul %35, %37, %cst_34 {dimension_numbers = #tpu.dot_dimension_numbers<[1], [0], [0], [1], [0, 0, 1, 1], [], []>} : vector<256x4xbf16>, vector<4x4xbf16>, vector<256x4xf32> -> vector<256x4xf32>
    %39 = arith.addf %34, %38 : vector<256x4xf32>
    %40 = vector.extract_strided_slice %5 {offsets = [0, 2, 0], sizes = [18, 16, 4], strides = [1, 1, 1]} : vector<18x18x4xbf16> to vector<18x16x4xbf16>
    %41 = vector.shape_cast %40 : vector<18x16x4xbf16> to vector<288x4xbf16>
    %42 = vector.extract_strided_slice %41 {offsets = [0, 0], sizes = [256, 4], strides = [1, 1]} : vector<288x4xbf16> to vector<256x4xbf16>
    %c0_35 = arith.constant 0 : index
    %c2_36 = arith.constant 2 : index
    %c0_37 = arith.constant 0 : index
    %c0_38 = arith.constant 0 : index
    %43 = vector.load %arg6[%c0_35, %c2_36, %c0_37, %c0_38] : memref<3x3x4x4xbf16, #tpu.memory_space<vmem>>, vector<1x1x4x4xbf16>
    %44 = vector.shape_cast %43 : vector<1x1x4x4xbf16> to vector<4x4xbf16>
    %cst_39 = arith.constant dense<0.000000e+00> : vector<256x4xf32>
    %45 = tpu.matmul %42, %44, %cst_39 {dimension_numbers = #tpu.dot_dimension_numbers<[1], [0], [0], [1], [0, 0, 1, 1], [], []>} : vector<256x4xbf16>, vector<4x4xbf16>, vector<256x4xf32> -> vector<256x4xf32>
    %46 = arith.addf %39, %45 : vector<256x4xf32>
    %47 = vector.extract_strided_slice %41 {offsets = [16, 0], sizes = [256, 4], strides = [1, 1]} : vector<288x4xbf16> to vector<256x4xbf16>
    %c1_40 = arith.constant 1 : index
    %c2_41 = arith.constant 2 : index
    %c0_42 = arith.constant 0 : index
    %c0_43 = arith.constant 0 : index
    %48 = vector.load %arg6[%c1_40, %c2_41, %c0_42, %c0_43] : memref<3x3x4x4xbf16, #tpu.memory_space<vmem>>, vector<1x1x4x4xbf16>
    %49 = vector.shape_cast %48 : vector<1x1x4x4xbf16> to vector<4x4xbf16>
    %cst_44 = arith.constant dense<0.000000e+00> : vector<256x4xf32>
    %50 = tpu.matmul %47, %49, %cst_44 {dimension_numbers = #tpu.dot_dimension_numbers<[1], [0], [0], [1], [0, 0, 1, 1], [], []>} : vector<256x4xbf16>, vector<4x4xbf16>, vector<256x4xf32> -> vector<256x4xf32>
    %51 = arith.addf %46, %50 : vector<256x4xf32>
    %52 = vector.extract_strided_slice %41 {offsets = [32, 0], sizes = [256, 4], strides = [1, 1]} : vector<288x4xbf16> to vector<256x4xbf16>
    %c2_45 = arith.constant 2 : index
    %c2_46 = arith.constant 2 : index
    %c0_47 = arith.constant 0 : index
    %c0_48 = arith.constant 0 : index
    %53 = vector.load %arg6[%c2_45, %c2_46, %c0_47, %c0_48] : memref<3x3x4x4xbf16, #tpu.memory_space<vmem>>, vector<1x1x4x4xbf16>
    %54 = vector.shape_cast %53 : vector<1x1x4x4xbf16> to vector<4x4xbf16>
    %cst_49 = arith.constant dense<0.000000e+00> : vector<256x4xf32>
    %55 = tpu.matmul %52, %54, %cst_49 {dimension_numbers = #tpu.dot_dimension_numbers<[1], [0], [0], [1], [0, 0, 1, 1], [], []>} : vector<256x4xbf16>, vector<4x4xbf16>, vector<256x4xf32> -> vector<256x4xf32>
    %56 = arith.addf %51, %55 : vector<256x4xf32>
    %c0_50 = arith.constant 0 : index
    %c0_51 = arith.constant 0 : index
    %c0_52 = arith.constant 0 : index
    %c0_53 = arith.constant 0 : index
    %57 = vector.load %arg4[%c0_50, %c0_51, %c0_52, %c0_53] : memref<1x16x18x4xbf16, #tpu.memory_space<vmem>>, vector<1x16x18x4xbf16>
    %58 = vector.shape_cast %57 : vector<1x16x18x4xbf16> to vector<16x18x4xbf16>
    %c0_54 = arith.constant 0 : index
    %c0_55 = arith.constant 0 : index
    %c0_56 = arith.constant 0 : index
    %c0_57 = arith.constant 0 : index
    %59 = vector.load %arg5[%c0_54, %c0_55, %c0_56, %c0_57] : memref<1x2x18x4xbf16, #tpu.memory_space<vmem>>, vector<1x2x18x4xbf16>
    %60 = vector.shape_cast %59 : vector<1x2x18x4xbf16> to vector<2x18x4xbf16>
    %61 = tpu.concatenate %58, %60 in 0 : vector<16x18x4xbf16>, vector<2x18x4xbf16> -> vector<18x18x4xbf16>
    %62 = vector.extract_strided_slice %61 {offsets = [0, 0, 0], sizes = [18, 16, 4], strides = [1, 1, 1]} : vector<18x18x4xbf16> to vector<18x16x4xbf16>
    %63 = vector.shape_cast %62 : vector<18x16x4xbf16> to vector<288x4xbf16>
    %64 = vector.extract_strided_slice %63 {offsets = [0, 0], sizes = [256, 4], strides = [1, 1]} : vector<288x4xbf16> to vector<256x4xbf16>
    %c0_58 = arith.constant 0 : index
    %c0_59 = arith.constant 0 : index
    %c0_60 = arith.constant 0 : index
    %c0_61 = arith.constant 0 : index
    %65 = vector.load %arg7[%c0_58, %c0_59, %c0_60, %c0_61] : memref<3x3x4x4xbf16, #tpu.memory_space<vmem>>, vector<1x1x4x4xbf16>
    %66 = vector.shape_cast %65 : vector<1x1x4x4xbf16> to vector<4x4xbf16>
    %cst_62 = arith.constant dense<0.000000e+00> : vector<256x4xf32>
    %67 = tpu.matmul %64, %66, %cst_62 {dimension_numbers = #tpu.dot_dimension_numbers<[1], [0], [0], [1], [0, 0, 1, 1], [], []>} : vector<256x4xbf16>, vector<4x4xbf16>, vector<256x4xf32> -> vector<256x4xf32>
    %68 = arith.addf %56, %67 : vector<256x4xf32>
    %69 = vector.extract_strided_slice %63 {offsets = [16, 0], sizes = [256, 4], strides = [1, 1]} : vector<288x4xbf16> to vector<256x4xbf16>
    %c1_63 = arith.constant 1 : index
    %c0_64 = arith.constant 0 : index
    %c0_65 = arith.constant 0 : index
    %c0_66 = arith.constant 0 : index
    %70 = vector.load %arg7[%c1_63, %c0_64, %c0_65, %c0_66] : memref<3x3x4x4xbf16, #tpu.memory_space<vmem>>, vector<1x1x4x4xbf16>
    %71 = vector.shape_cast %70 : vector<1x1x4x4xbf16> to vector<4x4xbf16>
    %cst_67 = arith.constant dense<0.000000e+00> : vector<256x4xf32>
    %72 = tpu.matmul %69, %71, %cst_67 {dimension_numbers = #tpu.dot_dimension_numbers<[1], [0], [0], [1], [0, 0, 1, 1], [], []>} : vector<256x4xbf16>, vector<4x4xbf16>, vector<256x4xf32> -> vector<256x4xf32>
    %73 = arith.addf %68, %72 : vector<256x4xf32>
    %74 = vector.extract_strided_slice %63 {offsets = [32, 0], sizes = [256, 4], strides = [1, 1]} : vector<288x4xbf16> to vector<256x4xbf16>
    %c2_68 = arith.constant 2 : index
    %c0_69 = arith.constant 0 : index
    %c0_70 = arith.constant 0 : index
    %c0_71 = arith.constant 0 : index
    %75 = vector.load %arg7[%c2_68, %c0_69, %c0_70, %c0_71] : memref<3x3x4x4xbf16, #tpu.memory_space<vmem>>, vector<1x1x4x4xbf16>
    %76 = vector.shape_cast %75 : vector<1x1x4x4xbf16> to vector<4x4xbf16>
    %cst_72 = arith.constant dense<0.000000e+00> : vector<256x4xf32>
    %77 = tpu.matmul %74, %76, %cst_72 {dimension_numbers = #tpu.dot_dimension_numbers<[1], [0], [0], [1], [0, 0, 1, 1], [], []>} : vector<256x4xbf16>, vector<4x4xbf16>, vector<256x4xf32> -> vector<256x4xf32>
    %78 = arith.addf %73, %77 : vector<256x4xf32>
    %79 = vector.extract_strided_slice %61 {offsets = [0, 1, 0], sizes = [18, 16, 4], strides = [1, 1, 1]} : vector<18x18x4xbf16> to vector<18x16x4xbf16>
    %80 = vector.shape_cast %79 : vector<18x16x4xbf16> to vector<288x4xbf16>
    %81 = vector.extract_strided_slice %80 {offsets = [0, 0], sizes = [256, 4], strides = [1, 1]} : vector<288x4xbf16> to vector<256x4xbf16>
    %c0_73 = arith.constant 0 : index
    %c1_74 = arith.constant 1 : index
    %c0_75 = arith.constant 0 : index
    %c0_76 = arith.constant 0 : index
    %82 = vector.load %arg7[%c0_73, %c1_74, %c0_75, %c0_76] : memref<3x3x4x4xbf16, #tpu.memory_space<vmem>>, vector<1x1x4x4xbf16>
    %83 = vector.shape_cast %82 : vector<1x1x4x4xbf16> to vector<4x4xbf16>
    %cst_77 = arith.constant dense<0.000000e+00> : vector<256x4xf32>
    %84 = tpu.matmul %81, %83, %cst_77 {dimension_numbers = #tpu.dot_dimension_numbers<[1], [0], [0], [1], [0, 0, 1, 1], [], []>} : vector<256x4xbf16>, vector<4x4xbf16>, vector<256x4xf32> -> vector<256x4xf32>
    %85 = arith.addf %78, %84 : vector<256x4xf32>
    %86 = vector.extract_strided_slice %80 {offsets = [16, 0], sizes = [256, 4], strides = [1, 1]} : vector<288x4xbf16> to vector<256x4xbf16>
    %c1_78 = arith.constant 1 : index
    %c1_79 = arith.constant 1 : index
    %c0_80 = arith.constant 0 : index
    %c0_81 = arith.constant 0 : index
    %87 = vector.load %arg7[%c1_78, %c1_79, %c0_80, %c0_81] : memref<3x3x4x4xbf16, #tpu.memory_space<vmem>>, vector<1x1x4x4xbf16>
    %88 = vector.shape_cast %87 : vector<1x1x4x4xbf16> to vector<4x4xbf16>
    %cst_82 = arith.constant dense<0.000000e+00> : vector<256x4xf32>
    %89 = tpu.matmul %86, %88, %cst_82 {dimension_numbers = #tpu.dot_dimension_numbers<[1], [0], [0], [1], [0, 0, 1, 1], [], []>} : vector<256x4xbf16>, vector<4x4xbf16>, vector<256x4xf32> -> vector<256x4xf32>
    %90 = arith.addf %85, %89 : vector<256x4xf32>
    %91 = vector.extract_strided_slice %80 {offsets = [32, 0], sizes = [256, 4], strides = [1, 1]} : vector<288x4xbf16> to vector<256x4xbf16>
    %c2_83 = arith.constant 2 : index
    %c1_84 = arith.constant 1 : index
    %c0_85 = arith.constant 0 : index
    %c0_86 = arith.constant 0 : index
    %92 = vector.load %arg7[%c2_83, %c1_84, %c0_85, %c0_86] : memref<3x3x4x4xbf16, #tpu.memory_space<vmem>>, vector<1x1x4x4xbf16>
    %93 = vector.shape_cast %92 : vector<1x1x4x4xbf16> to vector<4x4xbf16>
    %cst_87 = arith.constant dense<0.000000e+00> : vector<256x4xf32>
    %94 = tpu.matmul %91, %93, %cst_87 {dimension_numbers = #tpu.dot_dimension_numbers<[1], [0], [0], [1], [0, 0, 1, 1], [], []>} : vector<256x4xbf16>, vector<4x4xbf16>, vector<256x4xf32> -> vector<256x4xf32>
    %95 = arith.addf %90, %94 : vector<256x4xf32>
    %96 = vector.extract_strided_slice %61 {offsets = [0, 2, 0], sizes = [18, 16, 4], strides = [1, 1, 1]} : vector<18x18x4xbf16> to vector<18x16x4xbf16>
    %97 = vector.shape_cast %96 : vector<18x16x4xbf16> to vector<288x4xbf16>
    %98 = vector.extract_strided_slice %97 {offsets = [0, 0], sizes = [256, 4], strides = [1, 1]} : vector<288x4xbf16> to vector<256x4xbf16>
    %c0_88 = arith.constant 0 : index
    %c2_89 = arith.constant 2 : index
    %c0_90 = arith.constant 0 : index
    %c0_91 = arith.constant 0 : index
    %99 = vector.load %arg7[%c0_88, %c2_89, %c0_90, %c0_91] : memref<3x3x4x4xbf16, #tpu.memory_space<vmem>>, vector<1x1x4x4xbf16>
    %100 = vector.shape_cast %99 : vector<1x1x4x4xbf16> to vector<4x4xbf16>
    %cst_92 = arith.constant dense<0.000000e+00> : vector<256x4xf32>
    %101 = tpu.matmul %98, %100, %cst_92 {dimension_numbers = #tpu.dot_dimension_numbers<[1], [0], [0], [1], [0, 0, 1, 1], [], []>} : vector<256x4xbf16>, vector<4x4xbf16>, vector<256x4xf32> -> vector<256x4xf32>
    %102 = arith.addf %95, %101 : vector<256x4xf32>
    %103 = vector.extract_strided_slice %97 {offsets = [16, 0], sizes = [256, 4], strides = [1, 1]} : vector<288x4xbf16> to vector<256x4xbf16>
    %c1_93 = arith.constant 1 : index
    %c2_94 = arith.constant 2 : index
    %c0_95 = arith.constant 0 : index
    %c0_96 = arith.constant 0 : index
    %104 = vector.load %arg7[%c1_93, %c2_94, %c0_95, %c0_96] : memref<3x3x4x4xbf16, #tpu.memory_space<vmem>>, vector<1x1x4x4xbf16>
    %105 = vector.shape_cast %104 : vector<1x1x4x4xbf16> to vector<4x4xbf16>
    %cst_97 = arith.constant dense<0.000000e+00> : vector<256x4xf32>
    %106 = tpu.matmul %103, %105, %cst_97 {dimension_numbers = #tpu.dot_dimension_numbers<[1], [0], [0], [1], [0, 0, 1, 1], [], []>} : vector<256x4xbf16>, vector<4x4xbf16>, vector<256x4xf32> -> vector<256x4xf32>
    %107 = arith.addf %102, %106 : vector<256x4xf32>
    %108 = vector.extract_strided_slice %97 {offsets = [32, 0], sizes = [256, 4], strides = [1, 1]} : vector<288x4xbf16> to vector<256x4xbf16>
    %c2_98 = arith.constant 2 : index
    %c2_99 = arith.constant 2 : index
    %c0_100 = arith.constant 0 : index
    %c0_101 = arith.constant 0 : index
    %109 = vector.load %arg7[%c2_98, %c2_99, %c0_100, %c0_101] : memref<3x3x4x4xbf16, #tpu.memory_space<vmem>>, vector<1x1x4x4xbf16>
    %110 = vector.shape_cast %109 : vector<1x1x4x4xbf16> to vector<4x4xbf16>
    %cst_102 = arith.constant dense<0.000000e+00> : vector<256x4xf32>
    %111 = tpu.matmul %108, %110, %cst_102 {dimension_numbers = #tpu.dot_dimension_numbers<[1], [0], [0], [1], [0, 0, 1, 1], [], []>} : vector<256x4xbf16>, vector<4x4xbf16>, vector<256x4xf32> -> vector<256x4xf32>
    %112 = arith.addf %107, %111 : vector<256x4xf32>
    %c0_103 = arith.constant 0 : index
    %c0_104 = arith.constant 0 : index
    %113 = vector.load %arg8[%c0_103, %c0_104] : memref<1x4xf32, #tpu.memory_space<vmem>>, vector<1x4xf32>
    %114 = vector.broadcast %113 : vector<1x4xf32> to vector<256x4xf32>
    %115 = arith.addf %112, %114 : vector<256x4xf32>
    %cst_105 = arith.constant 0.000000e+00 : f32
    %116 = vector.broadcast %cst_105 : f32 to vector<256x4xf32>
    %117 = arith.maximumf %115, %116 : vector<256x4xf32>
    %118 = vector.shape_cast %117 : vector<256x4xf32> to vector<16x16x4xf32>
    %119 = arith.truncf %118 : vector<16x16x4xf32> to vector<16x16x4xbf16>
    %c0_106 = arith.constant 0 : index
    %c0_107 = arith.constant 0 : index
    %c0_108 = arith.constant 0 : index
    %c0_109 = arith.constant 0 : index
    %120 = vector.load %arg9[%c0_106, %c0_107, %c0_108, %c0_109] : memref<1x16x16x4xbf16, #tpu.memory_space<vmem>>, vector<1x16x16x4xbf16>
    %121 = vector.shape_cast %120 : vector<1x16x16x4xbf16> to vector<16x16x4xbf16>
    %122 = vector.shape_cast %119 : vector<16x16x4xbf16> to vector<1x16x16x4xbf16>
    tpu.vector_store %arg9[%c0_106, %c0_107, %c0_108, %c0_109], %122 {strides = array<i32>} : memref<1x16x16x4xbf16, #tpu.memory_space<vmem>>, vector<1x16x16x4xbf16>,
    return
  }
  func.func @transform_0(%arg0: i32, %arg1: i32) -> (i32, i32, i32, i32) {
    %c0_i32 = arith.constant 0 : i32
    %c0_i32_0 = arith.constant 0 : i32
    %c0_i32_1 = arith.constant 0 : i32
    return %arg0, %arg1, %c0_i32, %c0_i32_0 : i32, i32, i32, i32
  }
  func.func @transform_1(%arg0: i32, %arg1: i32) -> (i32, i32, i32, i32) {
    %c1_i32 = arith.constant 1 : i32
    %0 = arith.addi %arg1, %c1_i32 : i32
    %c8_i32 = arith.constant 8 : i32
    %1 = arith.muli %0, %c8_i32 : i32
    %c0_i32 = arith.constant 0 : i32
    %c0_i32_0 = arith.constant 0 : i32
    %c0_i32_1 = arith.constant 0 : i32
    return %arg0, %1, %c0_i32, %c0_i32_0 : i32, i32, i32, i32
  }
  func.func @transform_2(%arg0: i32, %arg1: i32) -> (i32, i32, i32, i32) {
    %c0_i32 = arith.constant 0 : i32
    %c0_i32_0 = arith.constant 0 : i32
    %c0_i32_1 = arith.constant 0 : i32
    return %arg0, %arg1, %c0_i32, %c0_i32_0 : i32, i32, i32, i32
  }
  func.func @transform_3(%arg0: i32, %arg1: i32) -> (i32, i32, i32, i32) {
    %c1_i32 = arith.constant 1 : i32
    %0 = arith.addi %arg1, %c1_i32 : i32
    %c8_i32 = arith.constant 8 : i32
    %1 = arith.muli %0, %c8_i32 : i32
    %c0_i32 = arith.constant 0 : i32
    %c0_i32_0 = arith.constant 0 : i32
    %c0_i32_1 = arith.constant 0 : i32
    return %arg0, %1, %c0_i32, %c0_i32_0 : i32, i32, i32, i32
  }
  func.func @transform_4(%arg0: i32, %arg1: i32) -> (i32, i32, i32, i32) {
    %c0_i32 = arith.constant 0 : i32
    %c0_i32_0 = arith.constant 0 : i32
    %c0_i32_1 = arith.constant 0 : i32
    %c0_i32_2 = arith.constant 0 : i32
    %c0_i32_3 = arith.constant 0 : i32
    return %c0_i32, %c0_i32_0, %c0_i32_1, %c0_i32_2 : i32, i32, i32, i32
  }
  func.func @transform_5(%arg0: i32, %arg1: i32) -> (i32, i32, i32, i32) {
    %c0_i32 = arith.constant 0 : i32
    %c0_i32_0 = arith.constant 0 : i32
    %c0_i32_1 = arith.constant 0 : i32
    %c0_i32_2 = arith.constant 0 : i32
    %c0_i32_3 = arith.constant 0 : i32
    return %c0_i32, %c0_i32_0, %c0_i32_1, %c0_i32_2 : i32, i32, i32, i32
  }
  func.func @transform_6(%arg0: i32, %arg1: i32) -> (i32, i32) {
    %c0_i32 = arith.constant 0 : i32
    %c0_i32_0 = arith.constant 0 : i32
    %c0_i32_1 = arith.constant 0 : i32
    return %c0_i32, %c0_i32_0 : i32, i32
  }
  func.func @transform_7(%arg0: i32, %arg1: i32) -> (i32, i32, i32, i32) {
    %c0_i32 = arith.constant 0 : i32
    %c0_i32_0 = arith.constant 0 : i32
    %c0_i32_1 = arith.constant 0 : i32
    return %arg0, %arg1, %c0_i32, %c0_i32_0 : i32, i32, i32, i32
  }
}

module attributes {stable_mosaic.version = 11 : i64} {
  func.func @kernel(%arg0: i32, %arg1: i32, %arg2: memref<1x16x18x4xbf16, #tpu.memory_space<vmem>>, %arg3: memref<1x2x18x4xbf16, #tpu.memory_space<vmem>>, %arg4: memref<3x3x4x4xbf16, #tpu.memory_space<vmem>>, %arg5: memref<1x4xf32, #tpu.memory_space<vmem>>, %arg6: memref<1x16x16x4xf32, #tpu.memory_space<vmem>>) attributes {dimension_semantics = [#tpu.dimension_semantics<parallel>, #tpu.dimension_semantics<parallel>], iteration_bounds = array<i64: 2, 1>, scalar_prefetch = 0 : i64, scratch_operands = 0 : i64, tpu.core_type = #tpu.core_type<tc>, window_params = [{transform_indices = @transform_0, window_bounds = array<i64: 1, 16, 18, 4>}, {transform_indices = @transform_1, window_bounds = array<i64: 1, 2, 18, 4>}, {pipeline_mode = #tpu.pipeline_mode<synchronous>, transform_indices = @transform_2, window_bounds = array<i64: 3, 3, 4, 4>}, {pipeline_mode = #tpu.pipeline_mode<synchronous>, transform_indices = @transform_3, window_bounds = array<i64: 1, 4>}, {transform_indices = @transform_4, window_bounds = array<i64: 1, 16, 16, 4>}]} {
    %cst = arith.constant 0.000000e+00 : f32
    %0 = vector.broadcast %cst : f32 to vector<256x4xf32>
    %c0 = arith.constant 0 : index
    %c0_0 = arith.constant 0 : index
    %c0_1 = arith.constant 0 : index
    %c0_2 = arith.constant 0 : index
    %1 = vector.load %arg2[%c0, %c0_0, %c0_1, %c0_2] : memref<1x16x18x4xbf16, #tpu.memory_space<vmem>>, vector<1x16x18x4xbf16>
    %2 = vector.shape_cast %1 : vector<1x16x18x4xbf16> to vector<16x18x4xbf16>
    %c0_3 = arith.constant 0 : index
    %c0_4 = arith.constant 0 : index
    %c0_5 = arith.constant 0 : index
    %c0_6 = arith.constant 0 : index
    %3 = vector.load %arg3[%c0_3, %c0_4, %c0_5, %c0_6] : memref<1x2x18x4xbf16, #tpu.memory_space<vmem>>, vector<1x2x18x4xbf16>
    %4 = vector.shape_cast %3 : vector<1x2x18x4xbf16> to vector<2x18x4xbf16>
    %5 = tpu.concatenate %2, %4 in 0 : vector<16x18x4xbf16>, vector<2x18x4xbf16> -> vector<18x18x4xbf16>
    %6 = vector.extract_strided_slice %5 {offsets = [0, 0, 0], sizes = [18, 16, 4], strides = [1, 1, 1]} : vector<18x18x4xbf16> to vector<18x16x4xbf16>
    %7 = vector.shape_cast %6 : vector<18x16x4xbf16> to vector<288x4xbf16>
    %8 = vector.extract_strided_slice %7 {offsets = [0, 0], sizes = [256, 4], strides = [1, 1]} : vector<288x4xbf16> to vector<256x4xbf16>
    %c0_7 = arith.constant 0 : index
    %c0_8 = arith.constant 0 : index
    %c0_9 = arith.constant 0 : index
    %c0_10 = arith.constant 0 : index
    %9 = vector.load %arg4[%c0_7, %c0_8, %c0_9, %c0_10] : memref<3x3x4x4xbf16, #tpu.memory_space<vmem>>, vector<1x1x4x4xbf16>
    %10 = vector.shape_cast %9 : vector<1x1x4x4xbf16> to vector<4x4xbf16>
    %cst_11 = arith.constant dense<0.000000e+00> : vector<256x4xf32>
    %11 = tpu.matmul %8, %10, %cst_11 {dimension_numbers = #tpu.dot_dimension_numbers<[1], [0], [0], [1], [0, 0, 1, 1], [], []>} : vector<256x4xbf16>, vector<4x4xbf16>, vector<256x4xf32> -> vector<256x4xf32>
    %12 = arith.addf %0, %11 : vector<256x4xf32>
    %13 = vector.extract_strided_slice %7 {offsets = [16, 0], sizes = [256, 4], strides = [1, 1]} : vector<288x4xbf16> to vector<256x4xbf16>
    %c1 = arith.constant 1 : index
    %c0_12 = arith.constant 0 : index
    %c0_13 = arith.constant 0 : index
    %c0_14 = arith.constant 0 : index
    %14 = vector.load %arg4[%c1, %c0_12, %c0_13, %c0_14] : memref<3x3x4x4xbf16, #tpu.memory_space<vmem>>, vector<1x1x4x4xbf16>
    %15 = vector.shape_cast %14 : vector<1x1x4x4xbf16> to vector<4x4xbf16>
    %cst_15 = arith.constant dense<0.000000e+00> : vector<256x4xf32>
    %16 = tpu.matmul %13, %15, %cst_15 {dimension_numbers = #tpu.dot_dimension_numbers<[1], [0], [0], [1], [0, 0, 1, 1], [], []>} : vector<256x4xbf16>, vector<4x4xbf16>, vector<256x4xf32> -> vector<256x4xf32>
    %17 = arith.addf %12, %16 : vector<256x4xf32>
    %18 = vector.extract_strided_slice %7 {offsets = [32, 0], sizes = [256, 4], strides = [1, 1]} : vector<288x4xbf16> to vector<256x4xbf16>
    %c2 = arith.constant 2 : index
    %c0_16 = arith.constant 0 : index
    %c0_17 = arith.constant 0 : index
    %c0_18 = arith.constant 0 : index
    %19 = vector.load %arg4[%c2, %c0_16, %c0_17, %c0_18] : memref<3x3x4x4xbf16, #tpu.memory_space<vmem>>, vector<1x1x4x4xbf16>
    %20 = vector.shape_cast %19 : vector<1x1x4x4xbf16> to vector<4x4xbf16>
    %cst_19 = arith.constant dense<0.000000e+00> : vector<256x4xf32>
    %21 = tpu.matmul %18, %20, %cst_19 {dimension_numbers = #tpu.dot_dimension_numbers<[1], [0], [0], [1], [0, 0, 1, 1], [], []>} : vector<256x4xbf16>, vector<4x4xbf16>, vector<256x4xf32> -> vector<256x4xf32>
    %22 = arith.addf %17, %21 : vector<256x4xf32>
    %23 = vector.extract_strided_slice %5 {offsets = [0, 1, 0], sizes = [18, 16, 4], strides = [1, 1, 1]} : vector<18x18x4xbf16> to vector<18x16x4xbf16>
    %24 = vector.shape_cast %23 : vector<18x16x4xbf16> to vector<288x4xbf16>
    %25 = vector.extract_strided_slice %24 {offsets = [0, 0], sizes = [256, 4], strides = [1, 1]} : vector<288x4xbf16> to vector<256x4xbf16>
    %c0_20 = arith.constant 0 : index
    %c1_21 = arith.constant 1 : index
    %c0_22 = arith.constant 0 : index
    %c0_23 = arith.constant 0 : index
    %26 = vector.load %arg4[%c0_20, %c1_21, %c0_22, %c0_23] : memref<3x3x4x4xbf16, #tpu.memory_space<vmem>>, vector<1x1x4x4xbf16>
    %27 = vector.shape_cast %26 : vector<1x1x4x4xbf16> to vector<4x4xbf16>
    %cst_24 = arith.constant dense<0.000000e+00> : vector<256x4xf32>
    %28 = tpu.matmul %25, %27, %cst_24 {dimension_numbers = #tpu.dot_dimension_numbers<[1], [0], [0], [1], [0, 0, 1, 1], [], []>} : vector<256x4xbf16>, vector<4x4xbf16>, vector<256x4xf32> -> vector<256x4xf32>
    %29 = arith.addf %22, %28 : vector<256x4xf32>
    %30 = vector.extract_strided_slice %24 {offsets = [16, 0], sizes = [256, 4], strides = [1, 1]} : vector<288x4xbf16> to vector<256x4xbf16>
    %c1_25 = arith.constant 1 : index
    %c1_26 = arith.constant 1 : index
    %c0_27 = arith.constant 0 : index
    %c0_28 = arith.constant 0 : index
    %31 = vector.load %arg4[%c1_25, %c1_26, %c0_27, %c0_28] : memref<3x3x4x4xbf16, #tpu.memory_space<vmem>>, vector<1x1x4x4xbf16>
    %32 = vector.shape_cast %31 : vector<1x1x4x4xbf16> to vector<4x4xbf16>
    %cst_29 = arith.constant dense<0.000000e+00> : vector<256x4xf32>
    %33 = tpu.matmul %30, %32, %cst_29 {dimension_numbers = #tpu.dot_dimension_numbers<[1], [0], [0], [1], [0, 0, 1, 1], [], []>} : vector<256x4xbf16>, vector<4x4xbf16>, vector<256x4xf32> -> vector<256x4xf32>
    %34 = arith.addf %29, %33 : vector<256x4xf32>
    %35 = vector.extract_strided_slice %24 {offsets = [32, 0], sizes = [256, 4], strides = [1, 1]} : vector<288x4xbf16> to vector<256x4xbf16>
    %c2_30 = arith.constant 2 : index
    %c1_31 = arith.constant 1 : index
    %c0_32 = arith.constant 0 : index
    %c0_33 = arith.constant 0 : index
    %36 = vector.load %arg4[%c2_30, %c1_31, %c0_32, %c0_33] : memref<3x3x4x4xbf16, #tpu.memory_space<vmem>>, vector<1x1x4x4xbf16>
    %37 = vector.shape_cast %36 : vector<1x1x4x4xbf16> to vector<4x4xbf16>
    %cst_34 = arith.constant dense<0.000000e+00> : vector<256x4xf32>
    %38 = tpu.matmul %35, %37, %cst_34 {dimension_numbers = #tpu.dot_dimension_numbers<[1], [0], [0], [1], [0, 0, 1, 1], [], []>} : vector<256x4xbf16>, vector<4x4xbf16>, vector<256x4xf32> -> vector<256x4xf32>
    %39 = arith.addf %34, %38 : vector<256x4xf32>
    %40 = vector.extract_strided_slice %5 {offsets = [0, 2, 0], sizes = [18, 16, 4], strides = [1, 1, 1]} : vector<18x18x4xbf16> to vector<18x16x4xbf16>
    %41 = vector.shape_cast %40 : vector<18x16x4xbf16> to vector<288x4xbf16>
    %42 = vector.extract_strided_slice %41 {offsets = [0, 0], sizes = [256, 4], strides = [1, 1]} : vector<288x4xbf16> to vector<256x4xbf16>
    %c0_35 = arith.constant 0 : index
    %c2_36 = arith.constant 2 : index
    %c0_37 = arith.constant 0 : index
    %c0_38 = arith.constant 0 : index
    %43 = vector.load %arg4[%c0_35, %c2_36, %c0_37, %c0_38] : memref<3x3x4x4xbf16, #tpu.memory_space<vmem>>, vector<1x1x4x4xbf16>
    %44 = vector.shape_cast %43 : vector<1x1x4x4xbf16> to vector<4x4xbf16>
    %cst_39 = arith.constant dense<0.000000e+00> : vector<256x4xf32>
    %45 = tpu.matmul %42, %44, %cst_39 {dimension_numbers = #tpu.dot_dimension_numbers<[1], [0], [0], [1], [0, 0, 1, 1], [], []>} : vector<256x4xbf16>, vector<4x4xbf16>, vector<256x4xf32> -> vector<256x4xf32>
    %46 = arith.addf %39, %45 : vector<256x4xf32>
    %47 = vector.extract_strided_slice %41 {offsets = [16, 0], sizes = [256, 4], strides = [1, 1]} : vector<288x4xbf16> to vector<256x4xbf16>
    %c1_40 = arith.constant 1 : index
    %c2_41 = arith.constant 2 : index
    %c0_42 = arith.constant 0 : index
    %c0_43 = arith.constant 0 : index
    %48 = vector.load %arg4[%c1_40, %c2_41, %c0_42, %c0_43] : memref<3x3x4x4xbf16, #tpu.memory_space<vmem>>, vector<1x1x4x4xbf16>
    %49 = vector.shape_cast %48 : vector<1x1x4x4xbf16> to vector<4x4xbf16>
    %cst_44 = arith.constant dense<0.000000e+00> : vector<256x4xf32>
    %50 = tpu.matmul %47, %49, %cst_44 {dimension_numbers = #tpu.dot_dimension_numbers<[1], [0], [0], [1], [0, 0, 1, 1], [], []>} : vector<256x4xbf16>, vector<4x4xbf16>, vector<256x4xf32> -> vector<256x4xf32>
    %51 = arith.addf %46, %50 : vector<256x4xf32>
    %52 = vector.extract_strided_slice %41 {offsets = [32, 0], sizes = [256, 4], strides = [1, 1]} : vector<288x4xbf16> to vector<256x4xbf16>
    %c2_45 = arith.constant 2 : index
    %c2_46 = arith.constant 2 : index
    %c0_47 = arith.constant 0 : index
    %c0_48 = arith.constant 0 : index
    %53 = vector.load %arg4[%c2_45, %c2_46, %c0_47, %c0_48] : memref<3x3x4x4xbf16, #tpu.memory_space<vmem>>, vector<1x1x4x4xbf16>
    %54 = vector.shape_cast %53 : vector<1x1x4x4xbf16> to vector<4x4xbf16>
    %cst_49 = arith.constant dense<0.000000e+00> : vector<256x4xf32>
    %55 = tpu.matmul %52, %54, %cst_49 {dimension_numbers = #tpu.dot_dimension_numbers<[1], [0], [0], [1], [0, 0, 1, 1], [], []>} : vector<256x4xbf16>, vector<4x4xbf16>, vector<256x4xf32> -> vector<256x4xf32>
    %56 = arith.addf %51, %55 : vector<256x4xf32>
    %c0_50 = arith.constant 0 : index
    %c0_51 = arith.constant 0 : index
    %57 = vector.load %arg5[%c0_50, %c0_51] : memref<1x4xf32, #tpu.memory_space<vmem>>, vector<1x4xf32>
    %58 = vector.broadcast %57 : vector<1x4xf32> to vector<256x4xf32>
    %59 = arith.addf %56, %58 : vector<256x4xf32>
    %cst_52 = arith.constant 0.000000e+00 : f32
    %60 = vector.broadcast %cst_52 : f32 to vector<256x4xf32>
    %61 = arith.maximumf %59, %60 : vector<256x4xf32>
    %62 = vector.shape_cast %61 : vector<256x4xf32> to vector<16x16x4xf32>
    %c0_53 = arith.constant 0 : index
    %c0_54 = arith.constant 0 : index
    %c0_55 = arith.constant 0 : index
    %c0_56 = arith.constant 0 : index
    %63 = vector.load %arg6[%c0_53, %c0_54, %c0_55, %c0_56] : memref<1x16x16x4xf32, #tpu.memory_space<vmem>>, vector<1x16x16x4xf32>
    %64 = vector.shape_cast %63 : vector<1x16x16x4xf32> to vector<16x16x4xf32>
    %65 = vector.shape_cast %62 : vector<16x16x4xf32> to vector<1x16x16x4xf32>
    tpu.vector_store %arg6[%c0_53, %c0_54, %c0_55, %c0_56], %65 {strides = array<i32>} : memref<1x16x16x4xf32, #tpu.memory_space<vmem>>, vector<1x16x16x4xf32>,
    return
  }
  func.func @transform_0(%arg0: i32, %arg1: i32) -> (i32, i32, i32, i32) {
    %c0_i32 = arith.constant 0 : i32
    %c0_i32_0 = arith.constant 0 : i32
    %c0_i32_1 = arith.constant 0 : i32
    return %arg0, %arg1, %c0_i32, %c0_i32_0 : i32, i32, i32, i32
  }
  func.func @transform_1(%arg0: i32, %arg1: i32) -> (i32, i32, i32, i32) {
    %c1_i32 = arith.constant 1 : i32
    %0 = arith.addi %arg1, %c1_i32 : i32
    %c8_i32 = arith.constant 8 : i32
    %1 = arith.muli %0, %c8_i32 : i32
    %c0_i32 = arith.constant 0 : i32
    %c0_i32_0 = arith.constant 0 : i32
    %c0_i32_1 = arith.constant 0 : i32
    return %arg0, %1, %c0_i32, %c0_i32_0 : i32, i32, i32, i32
  }
  func.func @transform_2(%arg0: i32, %arg1: i32) -> (i32, i32, i32, i32) {
    %c0_i32 = arith.constant 0 : i32
    %c0_i32_0 = arith.constant 0 : i32
    %c0_i32_1 = arith.constant 0 : i32
    %c0_i32_2 = arith.constant 0 : i32
    %c0_i32_3 = arith.constant 0 : i32
    return %c0_i32, %c0_i32_0, %c0_i32_1, %c0_i32_2 : i32, i32, i32, i32
  }
  func.func @transform_3(%arg0: i32, %arg1: i32) -> (i32, i32) {
    %c0_i32 = arith.constant 0 : i32
    %c0_i32_0 = arith.constant 0 : i32
    %c0_i32_1 = arith.constant 0 : i32
    return %c0_i32, %c0_i32_0 : i32, i32
  }
  func.func @transform_4(%arg0: i32, %arg1: i32) -> (i32, i32, i32, i32) {
    %c0_i32 = arith.constant 0 : i32
    %c0_i32_0 = arith.constant 0 : i32
    %c0_i32_1 = arith.constant 0 : i32
    return %arg0, %arg1, %c0_i32, %c0_i32_0 : i32, i32, i32, i32
  }
}

</mosaic_0001>

<bundles_post_ra>
// kernel: upconv_forward.3
= control target key start
LH: loop header
LB: loop body
LE: loop exit
PB: predicated region body
PF: predicated region fallthrough
CT: control target
= control target key end

     0   :  { %s485_s12 = smov 0   ;;  %s516_s0 = inlined_call_operand.vmem [shape: bf16[128,8], index: 0, kind: input, shape index: {}]   ;;  %s517_s1 = inlined_call_operand.vmem [shape: bf16[8,16], index: 1, kind: input, shape index: {}]   ;;  %s518_s2 = inlined_call_operand.vmem [shape: f32[1,16], index: 2, kind: input, shape index: {}]   ;;  %s519_s3 = inlined_call_operand.vmem [shape: bf16[128,16], index: 3, kind: output, shape index: {}]  }
   0x1 LB: > { %s390_s13 = sadd.s32 4294967295, %s463_s12   ;;  %p394_p0 = scmp.ge.s32.totalorder %s463_s12, 1  ;;  %s463_s12 = sphi %s485_s12, %s13_s12  }
   0x2   : > { %p138_p1 = scmp.lt.s32.totalorder %s463_s12, 3 }
   0x4   : > { %p139_p2 = pnand %p394_p0, %p138_p1 }
   0x5   : > { %s395_s16 = sshll.u32 (!%p139_p2), %s390_s13, 3 }
   0x6   : > { %142 = sbr.rel (%p139_p2) target bundleno = 220 (0xdc), region = 32  ;;  %p163_p3 = scmp.lt.s32.totalorder (!%p139_p2), %s395_s16, 15 }
   0xb   : > { %v183_v0 = vld [vmem:[%s517_s1] sm:$0xf]  ;;  %vm224_vm0 = vcmask 1043456   ;;  %s521_s16 = smov (!%p163_p3, %s395_s16), 15  ;;  %vm211_vm1 = vcmask 64512   ;;  %vm325_vm2 = vcmask 125952  }
   0xc   : > { %443 = vmatprep.subr.msk.bf16.mxu0 %vm224_vm0, %v183_v0  ;;  %444 = vmatprep.subr.msk.bf16.mxu1 %vm224_vm0, %v183_v0  ;;  %v226_v1 = vsel %vm224_vm0, %v183_v0, 0  ;;  %s396_s17 = sshll.u32 %s521_s16, 2  ;;  %v399_v6 = vld [vmem:[%s518_s2] ss:$0 sm:$0xff] }
   0xd   : > { %432 = vmatpush3.bf16.msra.mxu0 %v226_v1  ;;  %442 = vmatpush3.bf16.msra.mxu1 %v226_v1  ;;  %s166_s20 = scalar_lea.vmem %s516_s0, %s396_s17  ;;  %s172_s25 = scalar_lea.vmem %s519_s3, %s396_s17 }
   0xe   : > { %v453_v2 = vld [vmem:[%s166_s20] sm:$0xff]   ;;  %v454_v3 = vld [vmem:[%s166_s20 + $0x10] sm:$0xff]   ;;  %v455_v4 = vld [vmem:[%s166_s20 + $0x8] sm:$0xff]  }
   0xf   : > { %433 = vmatprep.mubr.msk.bf16.mxu0 %vm211_vm1, %v453_v2  ;;  %437 = vmatprep.mubr.msk.bf16.mxu1 %vm211_vm1, %v454_v3  ;;  %v456_v5 = vld [vmem:[%s166_s20 + $0x18] sm:$0xff]  }
  0x10   : > { %434 = vmatmul.mubr.msk.bf16.vlgmr.msra.gmra.mxu0 %vm211_vm1, %v455_v4  ;;  %438 = vmatmul.mubr.msk.bf16.vlgmr.msra.gmra.mxu1 %vm211_vm1, %v456_v5 }
  0xd0   : > { %v435_v7 = vpop.f32.mrf.mxu0  ;;  %v439_v9 = vpop.f32.mrf.mxu1 }
  0xd1   : > { %v271_v8 = vadd.f32 %v435_v7, %v399_v6  ;;  %v287_v10 = vadd.f32 %v439_v9, %v399_v6 }
  0xd2   : > { %v262_v11 = vpop.f32.mrf.mxu0  ;;  %v278_v14 = vpop.f32.mrf.mxu1 }
  0xd3   : > { %v420_v12 = vpack.c.bf16 %v271_v8, %v271_v8  ;;  %v263_v13 = vadd.f32 %v399_v6, %v262_v11  ;;  %v424_v15 = vpack.c.bf16 %v287_v10, %v287_v10  ;;  %v279_v16 = vadd.f32 %v399_v6, %v278_v14 }
  0xd4   : > { %v436_v17 = vpop.f32.mrf.mxu0  ;;  %v440_v20 = vpop.f32.mrf.mxu1 }
  0xd5   : > { %328 = vst.msk [vmem:[%s172_s25 + $0x8] sm:$0xf] %vm325_vm2, %v420_v12  ;;  %v418_v18 = vpack.c.bf16 %v263_v13, %v263_v13  ;;  %v274_v19 = vadd.f32 %v436_v17, %v399_v6  ;;  %332 = vst.msk [vmem:[%s172_s25 + $0x18] sm:$0xf] %vm325_vm2, %v424_v15  ;;  %v422_v21 = vpack.c.bf16 %v279_v16, %v279_v16 }
  0xd6   : > { %v290_v22 = vadd.f32 %v440_v20, %v399_v6  ;;  %v265_v23 = vpop.f32.mrf.mxu0  ;;  %v281_v26 = vpop.f32.mrf.mxu1 }
  0xd7   : > { %326 = vst.msk [vmem:[%s172_s25] sm:$0xf] %vm325_vm2, %v418_v18  ;;  %v421_v24 = vpack.c.bf16 %v274_v19, %v274_v19  ;;  %v266_v25 = vadd.f32 %v399_v6, %v265_v23  ;;  %330 = vst.msk [vmem:[%s172_s25 + $0x10] sm:$0xf] %vm325_vm2, %v422_v21  ;;  %v282_v28 = vadd.f32 %v399_v6, %v281_v26 }
  0xd8   : > { %v425_v27 = vpack.c.bf16 %v290_v22, %v290_v22 }
  0xd9   : > { %329 = vst.msk [vmem:[%s172_s25 + $0xc] sm:$0xf] %vm325_vm2, %v421_v24  ;;  %v419_v29 = vpack.c.bf16 %v266_v25, %v266_v25  ;;  %v423_v30 = vpack.c.bf16 %v282_v28, %v282_v28 }
  0xda   : > { %333 = vst.msk [vmem:[%s172_s25 + $0x1c] sm:$0xf] %vm325_vm2, %v425_v27 }
  0xdb   : > { %327 = vst.msk [vmem:[%s172_s25 + $0x4] sm:$0xf] %vm325_vm2, %v419_v29  ;;  %331 = vst.msk [vmem:[%s172_s25 + $0x14] sm:$0xf] %vm325_vm2, %v423_v30 }
  0xdc PF: > { %s13_s12 = sadd.s32 1, %s463_s12  }
  0xdd   : > { %p10_p4 = scmp.ge.s32.totalorder %s13_s12, 4  }
  0xdf   :  { %12 = sbr.rel (!%p10_p4) target bundleno = 1 (0x1), region = 62 }

// kernel: upconv_forward.5
= control target key start
LH: loop header
LB: loop body
LE: loop exit
PB: predicated region body
PF: predicated region fallthrough
CT: control target
= control target key end

     0   :  { %s4074_s15 = smov 0   ;;  %s4076_s16 = smov 0   ;;  %s5703_s0 = inlined_call_operand.vmem [shape: bf16[2,18,18,4], index: 0, kind: input, shape index: {}, may-alias: {0,1}]   ;;  %s5704_s1 = inlined_call_operand.vmem [shape: bf16[2,18,18,4], index: 1, kind: input, shape index: {}, may-alias: {0,1}]   ;;  %s5705_s2 = inlined_call_operand.vmem [shape: bf16[3,3,4,4], index: 2, kind: input, shape index: {}]   ;;  %s5706_s3 = inlined_call_operand.vmem [shape: f32[1,4], index: 3, kind: input, shape index: {}]   ;;  %s5707_s4 = inlined_call_operand.vmem [shape: f32[2,16,16,4], index: 4, kind: output, shape index: {}]  }
   0x1   :  { %s4078_s17 = smov 0  }
   0x2 LB: > { %s26_s18 = sadd.s32 1, %s4043_s16  ;;  %p3260_p0 = scmp.ge.s32.totalorder %s4047_s17, 1  ;;  %s4047_s17 = sphi %s4078_s17, %s14_s17   ;;  %s4043_s16 = sphi %s4076_s16, %s5860_s16   ;;  %s4039_s15 = sphi %s4074_s15, %s5859_s15  }
   0x3   : > { %p28_p1 = scmp.ge.s32.totalorder %s26_s18, 2  ;;  %p220_p2 = scmp.lt.s32.totalorder %s4047_s17, 3 }
   0x5   : > { %s5862_s18 = smov (%p28_p1, %s26_s18), 0  ;;  %p221_p3 = pnand %p3260_p0, %p220_p2 }
   0x7   : > { %224 = sbr.rel (%p221_p3) target bundleno = 513 (0x201), region = 36 }
   0xc   : > { %v3265_v0 = vld [vmem:[%s5705_s2 + $0x6] sm:$0x3]  ;;  %vm507_vm0 = vcmask 1041408   ;;  %p279_p4 = scmp.lt.s32.totalorder %s4039_s15, 1  ;;  %v375_v2 = vld [vmem:[%s5705_s2] sm:$0x3] }
   0xd   : > { %3957 = vmatprep.subr.msk.bf16.mxu1 %vm507_vm0, %v3265_v0  ;;  %3956 = vmatprep.subr.msk.bf16.mxu0 %vm507_vm0, %v3265_v0  ;;  %v509_v1 = vsel %vm507_vm0, %v3265_v0, 0  ;;  %v3315_v3 = vld [vmem:[%s5705_s2 + $0xc] sm:$0x3]  ;;  %vm2205_vm1 = vcmask 1042432   ;;  %vm2206_vm2 = vcmask 1046532   ;;  %vm458_vm3 = vcmask 31744  }
   0xe   : > { %3955 = vmatpush3.bf16.msra.mxu1 %v509_v1  ;;  %3649 = vmatpush3.bf16.msra.mxu0 %v509_v1  ;;  %s5864_s15 = smov (!%p279_p4, %s4039_s15), 1  ;;  %vm4126_vm4 = vmor %vm2205_vm1, %vm2206_vm2  ;;  %v855_v23 = vsel %vm507_vm0, %v3315_v3, 0  ;;  %v4174_v26 = vld [vmem:[%s5705_s2 + $0x8] sm:$0x3]  ;;  %v681_v28 = vsel %vm507_vm0, %v375_v2, 0 }
   0xf   : > { %3958 = vmatprep.subr.msk.bf16.mxu1 %vm507_vm0, %v375_v2  ;;  %3959 = vmatprep.subr.msk.bf16.mxu0 %vm507_vm0, %v3315_v3  ;;  %s3966_s25 = smul.u32 216, %s5864_s15  ;;  %v4195_v32 = vld [vmem:[%s5705_s2 + $0x2] sm:$0x3]  ;;  %vm1050_vm5 = vsmask.f32 3328 }
  0x10   : > { %vm1051_vm6 = vsmask.f32 7440 }
  0x11   : > { %s4114_s28 = scalar_lea.vmem %s5703_s0, %s3966_s25  ;;  %vm4250_vm7 = vmor %vm1050_vm5, %vm1051_vm6  ;;  %s3493_s7 = sadd.s32 192, %s3966_s25 }
  0x12   : > { %v324_v4 = vld [vmem:[%s4114_s28 + $0xc] sm:$0xf]  ;;  %v4118_v5 = vld [vmem:[%s4114_s28 + $0x10] sm:$0xf]  ;;  %v4149_v16 = vld [vmem:[%s4114_s28 + $0x18] sm:$0xf]  ;;  %s4316_s10 = scalar_lea.vmem %s5704_s1, %s3493_s7 }
  0x13   : > { %v4121_v6 = vld [vmem:[%s4114_s28 + $0x6c] sm:$0xf]  ;;  %v4124_v7 = vcombine.low %v324_v4, %v4118_v5  ;;  %v4131_v9 = vld [vmem:[%s4114_s28 + $0x70] sm:$0xf]  ;;  %v3403_v10 = vrot.slane %v324_v4, 9  ;;  %v5708_v11 = vrot.slane %v4118_v5, 5 }
  0x14   : > { %v4136_v12 = vcombine.low %v4121_v6, %v4131_v9  ;;  %v1078_v13 = vshrl.u32 %v324_v4, 16  ;;  %v1081_v14 = vshll.u32 %v324_v4, 16  ;;  %5732 = vst [vmem:[#allocation2_spill] sm:$0xff] %v4149_v16  ;;  %v4152_v17 = vld [vmem:[%s4114_s28 + $0x1c] sm:$0xf]  ;;  %v1087_v39 = vshll.u32 %v4118_v5, 16 }
  0x15   : > { %3650 = vmatprep.mubr.msk.bf16.mxu0 %vm458_vm3, %v4124_v7  ;;  %v4144_v15 = vsel %vm4126_vm4, %v3403_v10, %v5708_v11  ;;  %5733 = vst [vmem:[#allocation3_spill] sm:$0xff] %v4152_v17  ;;  %v4155_v18 = vld [vmem:[%s4114_s28 + $0x78] sm:$0xf]  ;;  %v4158_v19 = vld [vmem:[%s4114_s28 + $0x7c] sm:$0xf]  ;;  %v4162_v22 = vcombine.low %v4149_v16, %v4152_v17  ;;  %v1091_v51 = vshrl.u32 %v4118_v5, 16 }
  0x16   : > { %3666 = vmatprep.mubr.msk.bf16.mxu1 %vm458_vm3, %v4136_v12  ;;  %v1080_v20 = vrot.slane %v1078_v13, 4  ;;  %v1083_v21 = vrot.slane %v1081_v14, 5  ;;  %v4166_v24 = vld [vmem:[%s4114_s28 + $0x24] sm:$0xf]  ;;  %v4169_v25 = vld [vmem:[%s4114_s28 + $0x28] sm:$0xf]  ;;  %v4180_v27 = vcombine.low %v4155_v18, %v4158_v19 }
  0x17   : > { %5734 = vst [vmem:[#allocation4_spill] sm:$0xff] %v4166_v24  ;;  %5735 = vst [vmem:[#allocation5_spill] sm:$0xff] %v4169_v25  ;;  %3651 = vmatmul.mubr.msk.bf16.vlgmr.msra.gmra.mxu0 %vm458_vm3, %v4162_v22  ;;  %v4184_v29 = vld [vmem:[%s4114_s28 + $0x84] sm:$0xf]  ;;  %v4187_v30 = vld [vmem:[%s4114_s28 + $0x88] sm:$0xf]  ;;  %v4201_v34 = vcombine.low %v4166_v24, %v4169_v25 }
  0x18   : > { %3717 = vmatpush3.bf16.msra.mxu0 %v855_v23  ;;  %v4190_v31 = vld [vmem:[%s4114_s28 + $0x30] sm:$0xf]  ;;  %v1084_v33 = vor.u32 %v1083_v21, %v1080_v20  ;;  %3667 = vmatmul.mubr.msk.bf16.vlgmr.msra.gmra.mxu1 %vm458_vm3, %v4180_v27  ;;  %v4204_v35 = vld [vmem:[%s4114_s28 + $0x34] sm:$0xf]  ;;  %v4210_v36 = vcombine.low %v4184_v29, %v4187_v30  ;;  %v4226_v41 = vld [vmem:[%s4114_s28 + $0x3c] sm:$0xf] }
  0x19   : > { %5736 = vst [vmem:[#allocation6_spill] sm:$0xff] %v4190_v31  ;;  %5737 = vst [vmem:[#allocation7_spill] sm:$0xff] %v4204_v35  ;;  %3961 = vmatprep.subr.msk.bf16.mxu0 %vm507_vm0, %v4174_v26  ;;  %3683 = vmatpush3.bf16.msra.mxu1 %v681_v28  ;;  %v4213_v37 = vld [vmem:[%s4114_s28 + $0x90] sm:$0xf]  ;;  %v4216_v38 = vld [vmem:[%s4114_s28 + $0x94] sm:$0xf]  ;;  %v4223_v40 = vcombine.low %v4190_v31, %v4204_v35 }
  0x1a   : > { %3654 = vmatprep.mubr.msk.bf16.mxu0 %vm458_vm3, %v4201_v34  ;;  %5738 = vst [vmem:[#allocation8_spill] sm:$0xff] %v4226_v41  ;;  %v4229_v42 = vld [vmem:[%s4114_s28 + $0x40] sm:$0xf]  ;;  %3960 = vmatprep.subr.msk.bf16.mxu1 %vm507_vm0, %v4195_v32  ;;  %v4236_v43 = vld [vmem:[%s4114_s28 + $0x9c] sm:$0xf]  ;;  %v1085_v44 = vrot.slane %v1084_v33, 4  ;;  %v4240_v45 = vcombine.low %v4213_v37, %v4216_v38 }
  0x1b   : > { %5739 = vst [vmem:[#allocation9_spill] sm:$0xff] %v4229_v42  ;;  %3670 = vmatprep.mubr.msk.bf16.mxu1 %vm458_vm3, %v4210_v36  ;;  %v4243_v46 = vld [vmem:[%s4114_s28 + $0xa0] sm:$0xf]  ;;  %v4247_v47 = vcombine.low %v4226_v41, %v4229_v42  ;;  %v1089_v49 = vrot.slane %v1087_v39, 5  ;;  %v4264_v52 = vld [vmem:[%s4114_s28 + $0x48] sm:$0xf] }
  0x1c   : > { %v4258_v50 = vcombine.low %v4236_v43, %v4243_v46  ;;  %v4267_v53 = vld [vmem:[%s4114_s28 + $0x4c] sm:$0xf]  ;;  %v4272_v54 = vld [vmem:[%s4114_s28 + $0xa8] sm:$0xf]  ;;  %v4282_v57 = vld [vmem:[%s4114_s28 + $0x54] sm:$0xf] }
  0x1d   : > { %v1090_v55 = vsel %vm4250_vm7, %v1085_v44, %v1089_v49  ;;  %v4279_v56 = vld [vmem:[%s4114_s28 + $0xac] sm:$0xf]  ;;  %5742 = vst [vmem:[#allocation10_spill] sm:$0xff] %v4282_v57  ;;  %v4285_v58 = vld [vmem:[%s4114_s28 + $0x58] sm:$0xf]  ;;  %v4289_v59 = vcombine.low %v4264_v52, %v4267_v53  ;;  %v1093_v61 = vrot.slane %v1091_v51, 4 }
  0x1e   : > { %v4292_v60 = vld [vmem:[%s4114_s28 + $0xb4] sm:$0xf]  ;;  %v4296_v62 = vcombine.low %v4282_v57, %v4285_v58  ;;  %v4299_v63 = vld [vmem:[%s4114_s28 + $0xb8] sm:$0xf]  ;;  %v4305_v0 = vcombine.low %v4272_v54, %v4279_v56  ;;  %v4321_v3 = vld [vmem:[%s4114_s28 + $0x60] sm:$0xf] }
  0x1f   : > { %3655 = vmatmul.mubr.msk.bf16.gmra.mxu0 %vm458_vm3, %v4223_v40  ;;  %5743 = vst [vmem:[#allocation11_spill] sm:$0xff] %v4299_v63  ;;  %v4309_v1 = vcombine.low %v4292_v60, %v4299_v63  ;;  %v1094_v2 = vor.u32 %v1093_v61, %v1089_v49  ;;  %v4324_v4 = vld [vmem:[%s4114_s28 + $0x64] sm:$0xf]  ;;  %v4331_v10 = vld [vmem:[%s4316_s10] sm:$0xf]  ;;  %v1273_v11 = vshll.u32 %v4121_v6, 16 }
  0x20   : > { %3658 = vmatprep.mubr.msk.bf16.mxu0 %vm458_vm3, %v4247_v47  ;;  %3671 = vmatmul.mubr.msk.bf16.gmra.mxu1 %vm458_vm3, %v4240_v45  ;;  %5744 = vst [vmem:[#allocation12_spill] sm:$0xff] %v4331_v10  ;;  %v4334_v13 = vld [vmem:[%s4316_s10 + $0x4] sm:$0xf]  ;;  %v3273_v14 = vcombine.low %v4321_v3, %v4324_v4  ;;  %v4339_v20 = vld [vmem:[%s4114_s28] sm:$0xf]  ;;  %s3494_s25 = sshll.u32 %s5864_s15, 8 }
  0x21   : > { %3674 = vmatprep.mubr.msk.bf16.mxu1 %vm458_vm3, %v4258_v50  ;;  %5745 = vst [vmem:[#allocation13_spill] sm:$0xff] %v4334_v13  ;;  %v4342_v21 = vld [vmem:[%s4114_s28 + $0x4] sm:$0xf]  ;;  %v4345_v23 = vld [vmem:[%s4114_s28 + $0x14] sm:$0x1]  ;;  %v1095_v28 = vrot.slane %v1094_v2, 4  ;;  %v4350_v39 = vcombine.low %v4331_v10, %v4334_v13  ;;  %s5520_s27 = scalar_lea.vmem %s5707_s4, %s3494_s25 }
  0x22   : > { %v1097_v33 = vshll.u32 %v4345_v23, 16  ;;  %v3298_v44 = vcombine.low %v4339_v20, %v4342_v21  ;;  %v1788_v2 = vsel %vm507_vm0, %v4174_v26, 0  ;;  %v3420_v13 = vld [vmem:[%s5705_s2 + $0x4] sm:$0x3]  ;;  %v4382_v26 = vld [vmem:[%s5705_s2 + $0xe] sm:$0x3] }
  0x24   : > { %v1099_v49 = vrot.slane %v1097_v33, 5  ;;  %v1270_v33 = vshrl.u32 %v4121_v6, 16 }
  0x26   : > { %v1100_v51 = vsel %vm4250_vm7, %v1095_v28, %v1099_v49  ;;  %v1279_v28 = vshll.u32 %v4131_v9, 16  ;;  %v1283_v49 = vshrl.u32 %v4131_v9, 16 }
  0x27   : > { %3659 = vmatmul.mubr.msk.bf16.gmra.mxu0 %vm458_vm3, %v4289_v59  ;;  %v4361_v61 = vcombine.low %v1090_v55, %v1100_v51  ;;  %v1584_v55 = vsel %vm507_vm0, %v4195_v32, 0  ;;  %v1275_v51 = vrot.slane %v1273_v11, 5 }
  0x28   : > { %3662 = vmatprep.mubr.msk.bf16.mxu0 %vm458_vm3, %v4296_v62  ;;  %3675 = vmatmul.mubr.msk.bf16.gmra.mxu1 %vm458_vm3, %v4305_v0  ;;  %v1281_v32 = vrot.slane %v1279_v28, 5 }
  0x29   : > { %3678 = vmatprep.mubr.msk.bf16.mxu1 %vm458_vm3, %v4309_v1 }
  0x2f   : > { %3663 = vmatmul.mubr.msk.bf16.gmra.mxu0 %vm458_vm3, %v3273_v14 }
  0x30   : > { %3718 = vmatprep.mubr.msk.bf16.mxu0 %vm458_vm3, %v4162_v22  ;;  %3679 = vmatmul.mubr.msk.bf16.gmra.mxu1 %vm458_vm3, %v4350_v39 }
  0x31   : > { %3684 = vmatprep.mubr.msk.bf16.mxu1 %vm458_vm3, %v3298_v44  ;;  %v1272_v44 = vrot.slane %v1270_v33, 4 }
  0x33   : > { %v1276_v10 = vor.u32 %v1275_v51, %v1272_v44  ;;  %v1115_v44 = vshrl.u32 %v4152_v17, 16  ;;  %v1054_v51 = vshrl.u32 %v4339_v20, 16 }
  0x35   : > { %v1277_v11 = vrot.slane %v1276_v10, 4  ;;  %v1111_v10 = vshll.u32 %v4152_v17, 16 }
  0x37   : > { %3719 = vmatmul.mubr.msk.bf16.vlgmr.msra.gmra.mxu0 %vm458_vm3, %v4201_v34  ;;  %v1282_v28 = vsel %vm4250_vm7, %v1277_v11, %v1281_v32  ;;  %v2220_v11 = vrot.slane %v4345_v23, 5  ;;  %v1139_v23 = vshrl.u32 %v4169_v25, 16 }
  0x38   : > { %3785 = vmatpush3.bf16.msra.mxu0 %v1788_v2  ;;  %3722 = vmatprep.mubr.msk.bf16.mxu0 %vm458_vm3, %v4223_v40  ;;  %v1285_v2 = vrot.slane %v1283_v49, 4 }
  0x39   : > { %3685 = vmatmul.mubr.msk.bf16.vlgmr.msra.gmra.mxu1 %vm458_vm3, %v4124_v7  ;;  %3963 = vmatprep.subr.msk.bf16.mxu0 %vm507_vm0, %v3420_v13  ;;  %v4396_v7 = vld [vmem:[%s4114_s28 + $0x74] sm:$0x1] }
  0x3a   : > { %3751 = vmatpush3.bf16.msra.mxu1 %v1584_v55  ;;  %3688 = vmatprep.mubr.msk.bf16.mxu1 %vm458_vm3, %v4162_v22  ;;  %v1286_v63 = vor.u32 %v1285_v2, %v1281_v32  ;;  %v1289_v33 = vshll.u32 %v4396_v7, 16  ;;  %v1057_v32 = vshll.u32 %v4339_v20, 16  ;;  %v1067_v2 = vshrl.u32 %v4342_v21, 16 }
  0x3b   : > { %3962 = vmatprep.subr.msk.bf16.mxu1 %vm507_vm0, %v4382_v26 }
  0x3c   : > { %v1287_v22 = vrot.slane %v1286_v63, 4  ;;  %v1291_v49 = vrot.slane %v1289_v33, 5  ;;  %v1105_v63 = vshll.u32 %v4149_v16, 16  ;;  %v4444_v33 = vsel %vm507_vm0, %v3420_v13, 0 }
  0x3d   : > { %v1059_v17 = vrot.slane %v1057_v32, 5  ;;  %v1069_v13 = vrot.slane %v1067_v2, 4  ;;  %v1150_v2 = vshrl.u32 %v4190_v31, 16 }
  0x3e   : > { %v1292_v55 = vsel %vm4250_vm7, %v1287_v22, %v1291_v49  ;;  %v4447_v49 = vrot.slane %v1111_v10, 5 }
  0x3f   : > { %3723 = vmatmul.mubr.msk.bf16.gmra.mxu0 %vm458_vm3, %v4247_v47 }
  0x40   : > { %3726 = vmatprep.mubr.msk.bf16.mxu0 %vm458_vm3, %v4289_v59 }
  0x41   : > { %3689 = vmatmul.mubr.msk.bf16.gmra.mxu1 %vm458_vm3, %v4201_v34  ;;  %v4410_v34 = vcombine.low %v1282_v28, %v1292_v55  ;;  %v1117_v55 = vrot.slane %v1115_v44, 4  ;;  %v2273_v44 = vrot.slane %v4131_v9, 5 }
  0x42   : > { %3692 = vmatprep.mubr.msk.bf16.mxu1 %vm458_vm3, %v4223_v40  ;;  %v1102_v40 = vshrl.u32 %v4149_v16, 16  ;;  %v1056_v16 = vrot.slane %v1054_v51, 4 }
  0x43   : > { %v1118_v32 = vor.u32 %v1117_v55, %v4447_v49  ;;  %v4486_v55 = vld [vmem:[%s4114_s28 + $0x20] sm:$0x1] }
  0x47   : > { %3727 = vmatmul.mubr.msk.bf16.gmra.mxu0 %vm458_vm3, %v4296_v62 }
  0x48   : > { %3730 = vmatprep.mubr.msk.bf16.mxu0 %vm458_vm3, %v3273_v14 }
  0x49   : > { %3693 = vmatmul.mubr.msk.bf16.gmra.mxu1 %vm458_vm3, %v4247_v47  ;;  %v1104_v47 = vrot.slane %v1102_v40, 4  ;;  %v1126_v40 = vshrl.u32 %v4166_v24, 16 }
  0x4a   : > { %3696 = vmatprep.mubr.msk.bf16.mxu1 %vm458_vm3, %v4289_v59  ;;  %v1107_v59 = vrot.slane %v1105_v63, 5  ;;  %v323_v63 = vld [vmem:[%s4114_s28 + $0x8] sm:$0x1] }
  0x4b   : > { %v2213_v22 = vrot.slane %v323_v63, 5 }
  0x4c   : > { %v1108_v28 = vor.u32 %v1107_v59, %v1104_v47  ;;  %v1135_v59 = vshll.u32 %v4169_v25, 16 }
  0x4e   : > { %v4466_v51 = vrot.slane %v1108_v28, 4  ;;  %v1163_v28 = vshrl.u32 %v4204_v35, 16 }
  0x4f   : > { %3731 = vmatmul.mubr.msk.bf16.gmra.mxu0 %vm458_vm3, %v4136_v12 }
  0x50   : > { %3734 = vmatprep.mubr.msk.bf16.mxu0 %vm458_vm3, %v4180_v27 }
  0x51   : > { %3697 = vmatmul.mubr.msk.bf16.gmra.mxu1 %vm458_vm3, %v4296_v62  ;;  %v5746_v62 = vrot.slane %v4118_v5, 5  ;;  %v1063_v5 = vshll.u32 %v4342_v21, 16 }
  0x52   : > { %3700 = vmatprep.mubr.msk.bf16.mxu1 %vm458_vm3, %v3273_v14 }
  0x53   : > { %v2219_v14 = vrot.slane %v5746_v62, 4  ;;  %v2210_v62 = vrot.slane %v4342_v21, 5  ;;  %v4458_v47 = vrot.slane %v1063_v5, 5 }
  0x55   : > { %v2212_v21 = vrot.slane %v2210_v62, 4 }
  0x57   : > { %3735 = vmatmul.mubr.msk.bf16.gmra.mxu0 %vm458_vm3, %v4210_v36  ;;  %v4479_v9 = vsel %vm4126_vm4, %v2212_v21, %v2213_v22  ;;  %v4492_v22 = vld [vmem:[%s4114_s28 + $0x2c] sm:$0x1]  ;;  %v4496_v21 = vrot.slane %v1118_v32, 4 }
  0x58   : > { %3738 = vmatprep.mubr.msk.bf16.mxu0 %vm458_vm3, %v4240_v45  ;;  %5749 = vst [vmem:[#allocation16_spill] sm:$0xff] %v4479_v9  ;;  %5750 = vst [vmem:[#allocation17_spill] sm:$0xff] %v4492_v22  ;;  %v1145_v32 = vshll.u32 %v4492_v22, 16  ;;  %v4537_v9 = vld [vmem:[%s4114_s28 + $0x38] sm:$0x1] }
  0x59   : > { %3701 = vmatmul.mubr.msk.bf16.gmra.mxu1 %vm458_vm3, %v4136_v12  ;;  %v3402_v12 = vrot.slane %v4339_v20, 9  ;;  %v2221_v20 = vsel %vm4126_vm4, %v2219_v14, %v2220_v11  ;;  %v1128_v11 = vrot.slane %v1126_v40, 4  ;;  %v1070_v40 = vor.u32 %v1069_v13, %v4458_v47 }
  0x5a   : > { %3704 = vmatprep.mubr.msk.bf16.mxu1 %vm458_vm3, %v4180_v27  ;;  %v1129_v27 = vshll.u32 %v4166_v24, 16  ;;  %v4472_v14 = vcombine.low %v4144_v15, %v2221_v20  ;;  %v1060_v15 = vor.u32 %v1059_v17, %v1056_v16  ;;  %v1141_v20 = vrot.slane %v1139_v23, 4 }
  0x5b   : > { %v4463_v10 = vsel %vm4126_vm4, %v3402_v12, %v2210_v62  ;;  %v1153_v12 = vshll.u32 %v4190_v31, 16  ;;  %v4494_v62 = vrot.slane %v1135_v59, 5  ;;  %v1177_v16 = vshll.u32 %v4226_v41, 16  ;;  %v4505_v31 = vld [vmem:[%s4316_s10 + $0xc] sm:$0xf] }
  0x5c   : > { %5747 = vst [vmem:[#allocation14_spill] sm:$0xff] %v4463_v10  ;;  %5748 = vst [vmem:[#allocation15_spill] sm:$0xff] %v4472_v14  ;;  %v1131_v5 = vrot.slane %v1129_v27, 5  ;;  %v1073_v27 = vshll.u32 %v323_v63, 16  ;;  %v1187_v17 = vshrl.u32 %v4229_v42, 16  ;;  %v1121_v13 = vshll.u32 %v4486_v55, 16 }
  0x5d   : > { %v4508_v59 = vld [vmem:[%s4316_s10 + $0x10] sm:$0xf]  ;;  %v1061_v23 = vrot.slane %v1060_v15, 4  ;;  %v1211_v24 = vshrl.u32 %v4267_v53, 16  ;;  %v1142_v14 = vor.u32 %v1141_v20, %v4494_v62  ;;  %v1159_v15 = vshll.u32 %v4204_v35, 16 }
  0x5e   : > { %v1132_v63 = vor.u32 %v1131_v5, %v1128_v11  ;;  %v1075_v25 = vrot.slane %v1073_v27, 5  ;;  %v1225_v11 = vshll.u32 %v4282_v57, 16  ;;  %v1114_v5 = vsel %vm4250_vm7, %v4466_v51, %v4447_v49 }
  0x5f   : > { %3739 = vmatmul.mubr.msk.bf16.gmra.mxu0 %vm458_vm3, %v4258_v50  ;;  %v1123_v27 = vrot.slane %v1121_v13, 5  ;;  %v1147_v49 = vrot.slane %v1145_v32, 5  ;;  %v1152_v51 = vrot.slane %v1150_v2, 4  ;;  %v1155_v22 = vrot.slane %v1153_v12, 5 }
  0x60   : > { %3742 = vmatprep.mubr.msk.bf16.mxu0 %vm458_vm3, %v4305_v0  ;;  %v1133_v20 = vrot.slane %v1132_v63, 4  ;;  %v1143_v35 = vrot.slane %v1142_v14, 4  ;;  %v1165_v13 = vrot.slane %v1163_v28, 4  ;;  %v1179_v10 = vrot.slane %v1177_v16, 5 }
  0x61   : > { %3705 = vmatmul.mubr.msk.bf16.gmra.mxu1 %vm458_vm3, %v4210_v36  ;;  %v1222_v36 = vshrl.u32 %v4282_v57, 16  ;;  %v1183_v57 = vshll.u32 %v4229_v42, 16  ;;  %v4539_v42 = vrot.slane %v1159_v15, 5  ;;  %v1235_v2 = vshrl.u32 %v4285_v58, 16 }
  0x62   : > { %3708 = vmatprep.mubr.msk.bf16.mxu1 %vm458_vm3, %v4240_v45  ;;  %v1174_v45 = vshrl.u32 %v4226_v41, 16  ;;  %v1071_v41 = vrot.slane %v1070_v40, 4  ;;  %v3316_v40 = vcombine.low %v4505_v31, %v4508_v59  ;;  %v1246_v12 = vshrl.u32 %v4321_v3, 16 }
  0x63   : > { %v1156_v32 = vor.u32 %v1155_v22, %v1152_v51  ;;  %v1169_v28 = vshll.u32 %v4537_v9, 16  ;;  %v2276_v16 = vrot.slane %v4396_v7, 5  ;;  %v1207_v22 = vshll.u32 %v4267_v53, 16 }
  0x64   : > { %v1176_v63 = vrot.slane %v1174_v45, 4  ;;  %v4551_v45 = vld [vmem:[%s4114_s28 + $0x44] sm:$0x1]  ;;  %v1148_v7 = vsel %vm4250_vm7, %v1143_v35, %v1147_v49  ;;  %v5753_v49 = vshrl.u32 %v4264_v52, 16 }
  0x66   : > { %v1180_v15 = vor.u32 %v1179_v10, %v1176_v63  ;;  %v1157_v10 = vrot.slane %v1156_v32, 4  ;;  %v1200_v51 = vrot.slane %v5753_v49, 4  ;;  %v4586_v63 = vrot.slane %v1207_v22, 5 }
  0x67   : > { %3743 = vmatmul.mubr.msk.bf16.gmra.mxu0 %vm458_vm3, %v4309_v1  ;;  %v1992_v22 = vsel %vm507_vm0, %v4382_v26, 0  ;;  %v1294_v49 = vshrl.u32 %v4155_v18, 16 }
  0x68   : > { %3746 = vmatprep.mubr.msk.bf16.mxu0 %vm458_vm3, %v4350_v39  ;;  %v1066_v39 = vsel %vm4250_vm7, %v1061_v23, %v4458_v47  ;;  %v2275_v23 = vrot.slane %v2273_v44, 4 }
  0x69   : > { %3709 = vmatmul.mubr.msk.bf16.gmra.mxu1 %vm458_vm3, %v4258_v50  ;;  %v1076_v50 = vsel %vm4250_vm7, %v1071_v41, %v1075_v25  ;;  %v4547_v25 = vrot.slane %v1183_v57, 5  ;;  %v1189_v41 = vrot.slane %v1187_v17, 4  ;;  %v1138_v57 = vsel %vm4250_vm7, %v1133_v20, %v4494_v62 }
  0x6a   : > { %3712 = vmatprep.mubr.msk.bf16.mxu1 %vm458_vm3, %v4305_v0  ;;  %v5751_v0 = vrot.slane %v4121_v6, 9  ;;  %v3334_v14 = vcombine.low %v1066_v39, %v1076_v50  ;;  %v1249_v6 = vshll.u32 %v4321_v3, 16  ;;  %v1166_v17 = vor.u32 %v1165_v13, %v4539_v42 }
  0x6b   : > { %v1190_v62 = vor.u32 %v1189_v41, %v4547_v25  ;;  %v1171_v39 = vrot.slane %v1169_v28, 5  ;;  %v5754_v50 = vshll.u32 %v4264_v52, 16  ;;  %v4589_v41 = vld [vmem:[%s4114_s28 + $0x50] sm:$0x1]  ;;  %v4592_v28 = vld [vmem:[%s4114_s28 + $0x5c] sm:$0x1] }
  0x6c   : > { %v2274_v47 = vsel %vm4126_vm4, %v5751_v0, %v2273_v44  ;;  %v1124_v44 = vsel %vm4250_vm7, %v4496_v21, %v1123_v27  ;;  %v1193_v21 = vshll.u32 %v4551_v45, 16  ;;  %v1231_v27 = vshll.u32 %v4285_v58, 16 }
  0x6d   : > { %v4578_v35 = vcombine.low %v1114_v5, %v1124_v44  ;;  %v1203_v13 = vrot.slane %v5754_v50, 5  ;;  %v1213_v0 = vrot.slane %v1211_v24, 4  ;;  %v1227_v5 = vrot.slane %v1225_v11, 5 }
  0x6e   : > { %v1195_v32 = vrot.slane %v1193_v21, 5  ;;  %v4594_v44 = vrot.slane %v1231_v27, 5  ;;  %v1255_v24 = vshll.u32 %v4324_v4, 16  ;;  %v1217_v26 = vshll.u32 %v4589_v41, 16  ;;  %v4624_v21 = vld [vmem:[%s5705_s2 + $0xa] sm:$0x3] }
  0x6f   : > { %3747 = vmatmul.mubr.msk.bf16.gmra.mxu0 %vm458_vm3, %v3316_v40  ;;  %v2277_v40 = vsel %vm4126_vm4, %v2275_v23, %v2276_v16  ;;  %v1181_v23 = vrot.slane %v1180_v15, 4  ;;  %v1191_v16 = vrot.slane %v1190_v62, 4  ;;  %v1204_v11 = vor.u32 %v1203_v13, %v1200_v51 }
  0x70   : > { %3786 = vmatprep.mubr.msk.bf16.mxu0 %vm458_vm3, %v4361_v61  ;;  %v4575_v20 = vcombine.low %v2274_v47, %v2277_v40  ;;  %v1167_v47 = vrot.slane %v1166_v17, 4  ;;  %v4603_v17 = vld [vmem:[%s5705_s2 + $0x10] sm:$0x3]  ;;  %v4639_v51 = vrot.slane %v1255_v24, 5 }
  0x71   : > { %3713 = vmatmul.mubr.msk.bf16.gmra.mxu1 %vm458_vm3, %v4309_v1  ;;  %v4582_v1 = vcombine.low %v1138_v57, %v1148_v7  ;;  %v1237_v57 = vrot.slane %v1235_v2, 4  ;;  %v1259_v7 = vshrl.u32 %v4324_v4, 16  ;;  %v1214_v2 = vor.u32 %v1213_v0, %v4586_v63 }
  0x72   : > { %5752 = vst [vmem:[#allocation18_spill] sm:$0xff] %v4575_v20  ;;  %3752 = vmatprep.mubr.msk.bf16.mxu1 %vm458_vm3, %v3334_v14  ;;  %v1224_v14 = vrot.slane %v1222_v36, 4  ;;  %v1162_v36 = vsel %vm4250_vm7, %v1157_v10, %v4539_v42  ;;  %v1172_v15 = vsel %vm4250_vm7, %v1167_v47, %v1171_v39  ;;  %v1186_v40 = vsel %vm4250_vm7, %v1181_v23, %v4547_v25  ;;  %v4632_v10 = vld [vmem:[%s4114_s28 + $0x68] sm:$0x1] }
  0x73   : > { %v1241_v42 = vshll.u32 %v4592_v28, 16  ;;  %v1238_v27 = vor.u32 %v1237_v57, %v4594_v44  ;;  %v1248_v39 = vrot.slane %v1246_v12, 4  ;;  %v1251_v25 = vrot.slane %v1249_v6, 5 }
  0x74   : > { %v1228_v62 = vor.u32 %v1227_v5, %v1224_v14  ;;  %v4641_v50 = vcombine.low %v1162_v36, %v1172_v15  ;;  %v1205_v13 = vrot.slane %v1204_v11, 4  ;;  %v1215_v0 = vrot.slane %v1214_v2, 4 }
  0x75   : > { %v1219_v47 = vrot.slane %v1217_v26, 5  ;;  %v1297_v12 = vshll.u32 %v4155_v18, 16  ;;  %v1265_v14 = vshll.u32 %v4632_v10, 16  ;;  %v1307_v5 = vshrl.u32 %v4158_v19, 16 }
  0x76   : > { %v1229_v23 = vrot.slane %v1228_v62, 4  ;;  %v1252_v57 = vor.u32 %v1251_v25, %v1248_v39  ;;  %v1303_v36 = vshll.u32 %v4158_v19, 16  ;;  %v1331_v18 = vshrl.u32 %v4187_v30, 16 }
  0x77   : > { %3787 = vmatmul.mubr.msk.bf16.vlgmr.msra.gmra.mxu0 %vm458_vm3, %v4578_v35  ;;  %v1210_v11 = vsel %vm4250_vm7, %v1205_v13, %v4586_v63  ;;  %v1220_v2 = vsel %vm4250_vm7, %v1215_v0, %v1219_v47  ;;  %v1296_v26 = vrot.slane %v1294_v49, 4  ;;  %v1327_v15 = vshll.u32 %v4187_v30, 16 }
  0x78   : > { %3853 = vmatpush3.bf16.msra.mxu0 %v4444_v33  ;;  %3790 = vmatprep.mubr.msk.bf16.mxu0 %vm458_vm3, %v4582_v1  ;;  %v1196_v33 = vsel %vm4250_vm7, %v1191_v16, %v1195_v32  ;;  %v1239_v16 = vrot.slane %v1238_v27, 4  ;;  %v1243_v32 = vrot.slane %v1241_v42, 5  ;;  %v1234_v19 = vsel %vm4250_vm7, %v1229_v23, %v4594_v44  ;;  %v4675_v27 = vld [vmem:[%s4114_s28 + $0x80] sm:$0x1] }
  0x79   : > { %3753 = vmatmul.mubr.msk.bf16.vlgmr.msra.gmra.mxu1 %vm458_vm3, %v4361_v61  ;;  %3965 = vmatprep.subr.msk.bf16.mxu0 %vm507_vm0, %v4603_v17  ;;  %v1261_v61 = vrot.slane %v1259_v7, 4  ;;  %v4646_v6 = vcombine.low %v1186_v40, %v1196_v33  ;;  %v1318_v7 = vshrl.u32 %v4184_v29, 16  ;;  %v1253_v40 = vrot.slane %v1252_v57, 4 }
  0x7a   : > { %3819 = vmatpush3.bf16.msra.mxu1 %v1992_v22  ;;  %3756 = vmatprep.mubr.msk.bf16.mxu1 %vm458_vm3, %v4578_v35  ;;  %v1321_v22 = vshll.u32 %v4184_v29, 16  ;;  %v1267_v29 = vrot.slane %v1265_v14, 5  ;;  %v1244_v63 = vsel %vm4250_vm7, %v1239_v16, %v1243_v32  ;;  %v1299_v62 = vrot.slane %v1297_v12, 5 }
  0x7b   : > { %3964 = vmatprep.subr.msk.bf16.mxu1 %vm507_vm0, %v4624_v21  ;;  %v1262_v24 = vor.u32 %v1261_v61, %v4639_v51  ;;  %v1309_v42 = vrot.slane %v1307_v5, 4  ;;  %v4677_v44 = vrot.slane %v1303_v36, 5  ;;  %v1320_v39 = vrot.slane %v1318_v7, 4  ;;  %v4684_v61 = vld [vmem:[%s4114_s28 + $0x8c] sm:$0x1] }
  0x7c   : > { %v1323_v25 = vrot.slane %v1321_v22, 5  ;;  %v4679_v30 = vcombine.low %v1210_v11, %v1220_v2  ;;  %v4681_v49 = vcombine.low %v1234_v19, %v1244_v63  ;;  %v4686_v13 = vrot.slane %v1327_v15, 5 }
  0x7d   : > { %v1263_v33 = vrot.slane %v1262_v24, 4  ;;  %v1333_v0 = vrot.slane %v1331_v18, 4  ;;  %v1342_v47 = vshrl.u32 %v4213_v37, 16  ;;  %v1345_v12 = vshll.u32 %v4213_v37, 16 }
  0x7e   : > { %v1300_v23 = vor.u32 %v1299_v62, %v1296_v26  ;;  %v1313_v14 = vshll.u32 %v4675_v27, 16  ;;  %v1258_v5 = vsel %vm4250_vm7, %v1253_v40, %v4639_v51  ;;  %v1310_v32 = vor.u32 %v1309_v42, %v4677_v44  ;;  %v4716_v40 = vld [vmem:[%s4114_s28 + $0x98] sm:$0x1] }
  0x7f   : > { %3791 = vmatmul.mubr.msk.bf16.gmra.mxu0 %vm458_vm3, %v4641_v50  ;;  %v1268_v16 = vsel %vm4250_vm7, %v1263_v33, %v1267_v29  ;;  %v1324_v57 = vor.u32 %v1323_v25, %v1320_v39  ;;  %v1355_v7 = vshrl.u32 %v4216_v38, 16  ;;  %v1366_v22 = vshrl.u32 %v4236_v43, 16  ;;  %v4721_v39 = vld [vmem:[%s4114_s28 + $0xa4] sm:$0x1] }
  0x80   : > { %3794 = vmatprep.mubr.msk.bf16.mxu0 %vm458_vm3, %v4646_v6  ;;  %v1337_v37 = vshll.u32 %v4684_v61, 16  ;;  %v1351_v24 = vshll.u32 %v4216_v38, 16  ;;  %v1369_v51 = vshll.u32 %v4236_v43, 16  ;;  %v1379_v36 = vshrl.u32 %v4243_v46, 16  ;;  %5755 = vst [vmem:[#allocation19_spill] sm:$0xff] %v4721_v39 }
  0x81   : > { %3757 = vmatmul.mubr.msk.bf16.gmra.mxu1 %vm458_vm3, %v4582_v1  ;;  %v1334_v18 = vor.u32 %v1333_v0, %v4686_v13  ;;  %v1375_v11 = vshll.u32 %v4243_v46, 16  ;;  %v4711_v2 = vcombine.low %v1258_v5, %v1268_v16  ;;  %v1301_v19 = vrot.slane %v1300_v23, 4 }
  0x82   : > { %3760 = vmatprep.mubr.msk.bf16.mxu1 %vm458_vm3, %v4641_v50  ;;  %v1315_v38 = vrot.slane %v1313_v14, 5  ;;  %v1311_v43 = vrot.slane %v1310_v32, 4  ;;  %v1325_v29 = vrot.slane %v1324_v57, 4  ;;  %v1344_v26 = vrot.slane %v1342_v47, 4 }
  0x83   : > { %v1347_v15 = vrot.slane %v1345_v12, 5  ;;  %v1339_v63 = vrot.slane %v1337_v37, 5  ;;  %v4718_v62 = vrot.slane %v1351_v24, 5  ;;  %v1357_v46 = vrot.slane %v1355_v7, 4 }
  0x84   : > { %v1368_v42 = vrot.slane %v1366_v22, 4  ;;  %v1335_v33 = vrot.slane %v1334_v18, 4  ;;  %v1371_v25 = vrot.slane %v1369_v51, 5  ;;  %v1377_v0 = vrot.slane %v1375_v11, 5 }
  0x85   : > { %v1381_v23 = vrot.slane %v1379_v36, 4  ;;  %v1390_v14 = vshrl.u32 %v4272_v54, 16  ;;  %v1393_v5 = vshll.u32 %v4272_v54, 16  ;;  %v1403_v47 = vshrl.u32 %v4279_v56, 16 }
  0x86   : > { %v1306_v12 = vsel %vm4250_vm7, %v1301_v19, %v4677_v44  ;;  %v1348_v16 = vor.u32 %v1347_v15, %v1344_v26  ;;  %v1361_v32 = vshll.u32 %v4716_v40, 16  ;;  %v1316_v57 = vsel %vm4250_vm7, %v1311_v43, %v1315_v38 }
  0x87   : > { %3795 = vmatmul.mubr.msk.bf16.gmra.mxu0 %vm458_vm3, %v4679_v30  ;;  %v1330_v7 = vsel %vm4250_vm7, %v1325_v29, %v4686_v13  ;;  %v1358_v54 = vor.u32 %v1357_v46, %v4718_v62  ;;  %v1385_v22 = vshll.u32 %v4721_v39, 16  ;;  %v1340_v44 = vsel %vm4250_vm7, %v1335_v33, %v1339_v63  ;;  %v5756_v13 = vld [vmem:[#allocation11_spill] sm:$0xff]  ;;  %v4757_v33 = vld [vmem:[%s4114_s28 + $0xb0] sm:$0x1] }
  0x88   : > { %3798 = vmatprep.mubr.msk.bf16.mxu0 %vm458_vm3, %v4681_v49  ;;  %v1372_v37 = vor.u32 %v1371_v25, %v1368_v42  ;;  %v1382_v24 = vor.u32 %v1381_v23, %v1377_v0  ;;  %v1399_v51 = vshll.u32 %v4279_v56, 16  ;;  %v1414_v36 = vshrl.u32 %v4292_v60, 16 }
  0x89   : > { %3761 = vmatmul.mubr.msk.bf16.gmra.mxu1 %vm458_vm3, %v4646_v6  ;;  %v1417_v18 = vshll.u32 %v4292_v60, 16  ;;  %v1427_v11 = vshrl.u32 %v5756_v13, 16  ;;  %v1423_v19 = vshll.u32 %v5756_v13, 16  ;;  %v4752_v38 = vcombine.low %v1306_v12, %v1316_v57  ;;  %v5757_v57 = vld [vmem:[#allocation12_spill] sm:$0xff] }
  0x8a   : > { %3764 = vmatprep.mubr.msk.bf16.mxu1 %vm458_vm3, %v4679_v30  ;;  %v1349_v43 = vrot.slane %v1348_v16, 4  ;;  %v1363_v29 = vrot.slane %v1361_v32, 5  ;;  %v1392_v56 = vrot.slane %v1390_v14, 4  ;;  %v4754_v26 = vcombine.low %v1330_v7, %v1340_v44  ;;  %v5758_v32 = vld [vmem:[#allocation13_spill] sm:$0xff] }
  0x8b   : > { %v1359_v15 = vrot.slane %v1358_v54, 4  ;;  %v1387_v60 = vrot.slane %v1385_v22, 5  ;;  %v1395_v63 = vrot.slane %v1393_v5, 5  ;;  %v1373_v46 = vrot.slane %v1372_v37, 4  ;;  %v4763_v44 = vld [vmem:[%s4114_s28 + $0xbc] sm:$0x1] }
  0x8c   : > { %v1383_v42 = vrot.slane %v1382_v24, 4  ;;  %v1401_v25 = vrot.slane %v1399_v51, 5  ;;  %v1405_v23 = vrot.slane %v1403_v47, 4  ;;  %v1416_v13 = vrot.slane %v1414_v36, 4 }
  0x8d   : > { %v1419_v39 = vrot.slane %v1417_v18, 5  ;;  %v1425_v20 = vrot.slane %v1423_v19, 5  ;;  %v1429_v12 = vrot.slane %v1427_v11, 4  ;;  %v1438_v16 = vshrl.u32 %v5757_v57, 16 }
  0x8e   : > { %v1441_v14 = vshll.u32 %v5757_v57, 16  ;;  %v1451_v7 = vshrl.u32 %v5758_v32, 16  ;;  %v1354_v5 = vsel %vm4250_vm7, %v1349_v43, %v4718_v62  ;;  %v1364_v47 = vsel %vm4250_vm7, %v1359_v15, %v1363_v29 }
  0x8f   : > { %3799 = vmatmul.mubr.msk.bf16.gmra.mxu0 %vm458_vm3, %v4711_v2  ;;  %v1396_v54 = vor.u32 %v1395_v63, %v1392_v56  ;;  %v1409_v22 = vshll.u32 %v4757_v33, 16  ;;  %v1378_v37 = vsel %vm4250_vm7, %v1373_v46, %v1377_v0  ;;  %v1388_v24 = vsel %vm4250_vm7, %v1383_v42, %v1387_v60 }
  0x90   : > { %3802 = vmatprep.mubr.msk.bf16.mxu0 %vm458_vm3, %v4410_v34  ;;  %v1406_v51 = vor.u32 %v1405_v23, %v1401_v25  ;;  %v1447_v36 = vshll.u32 %v5758_v32, 16  ;;  %v1420_v62 = vor.u32 %v1419_v39, %v1416_v13  ;;  %v1430_v18 = vor.u32 %v1429_v12, %v1425_v20  ;;  %v4790_v13 = vld [vmem:[%s4316_s10 + $0x8] sm:$0x1] }
  0x91   : > { %3765 = vmatmul.mubr.msk.bf16.gmra.mxu1 %vm458_vm3, %v4681_v49  ;;  %v1433_v11 = vshll.u32 %v4763_v44, 16  ;;  %v4785_v19 = vcombine.low %v1354_v5, %v1364_v47  ;;  %v4787_v0 = vcombine.low %v1378_v37, %v1388_v24  ;;  %v1397_v43 = vrot.slane %v1396_v54, 4 }
  0x92   : > { %3768 = vmatprep.mubr.msk.bf16.mxu1 %vm458_vm3, %v4711_v2  ;;  %v1411_v29 = vrot.slane %v1409_v22, 5  ;;  %v1440_v56 = vrot.slane %v1438_v16, 4  ;;  %v1407_v15 = vrot.slane %v1406_v51, 4  ;;  %v1443_v60 = vrot.slane %v1441_v14, 5 }
  0x93   : > { %v1449_v63 = vrot.slane %v1447_v36, 5  ;;  %v1453_v46 = vrot.slane %v1451_v7, 4  ;;  %v1421_v42 = vrot.slane %v1420_v62, 4  ;;  %v1431_v39 = vrot.slane %v1430_v18, 4  ;;  %v5759_v36 = vld [vmem:[#allocation3_spill] sm:$0xff] }
  0x94   : > { %v1435_v23 = vrot.slane %v1433_v11, 5  ;;  %v1402_v12 = vsel %vm4250_vm7, %v1397_v43, %v1401_v25  ;;  %v1412_v57 = vsel %vm4250_vm7, %v1407_v15, %v1411_v29  ;;  %v1444_v16 = vor.u32 %v1443_v60, %v1440_v56  ;;  %v4826_v18 = vld [vmem:[%s4316_s10 + $0x14] sm:$0x1]  ;;  %v5760_v15 = vld [vmem:[#allocation2_spill] sm:$0xff] }
  0x95   : > { %v1454_v14 = vor.u32 %v1453_v46, %v1449_v63  ;;  %v1457_v32 = vshll.u32 %v4790_v13, 16  ;;  %v1426_v7 = vsel %vm4250_vm7, %v1421_v42, %v1425_v20  ;;  %v4809_v5 = vcombine.low %v1402_v12, %v1412_v57  ;;  %v5761_v12 = vld [vmem:[#allocation14_spill] sm:$0xff]  ;;  %v5762_v57 = vld [vmem:[#allocation16_spill] sm:$0xff] }
  0x96   : > { %v1436_v25 = vsel %vm4250_vm7, %v1431_v39, %v1435_v23  ;;  %v1445_v54 = vrot.slane %v1444_v16, 4  ;;  %v2329_v24 = vrot.slane %v4508_v59, 5  ;;  %v2224_v62 = vrot.slane %v5759_v36, 5 }
  0x97   : > { %3803 = vmatmul.mubr.msk.bf16.gmra.mxu0 %vm458_vm3, %v4752_v38  ;;  %v4811_v47 = vcombine.low %v1426_v7, %v1436_v25  ;;  %v1455_v22 = vrot.slane %v1454_v14, 4  ;;  %v1459_v37 = vrot.slane %v1457_v32, 5  ;;  %v3419_v11 = vrot.slane %v4505_v31, 9  ;;  %v5765_v25 = vld [vmem:[#allocation7_spill] sm:$0xff] }
  0x98   : > { %3806 = vmatprep.mubr.msk.bf16.mxu0 %vm458_vm3, %v4754_v26  ;;  %v1450_v20 = vsel %vm4250_vm7, %v1445_v54, %v1449_v63  ;;  %v2332_v43 = vrot.slane %v4826_v18, 5  ;;  %v2331_v56 = vrot.slane %v2329_v24, 4  ;;  %v3404_v60 = vrot.slane %v5760_v15, 9 }
  0x99   : > { %3769 = vmatmul.mubr.msk.bf16.gmra.mxu1 %vm458_vm3, %v4410_v34  ;;  %v1460_v51 = vsel %vm4250_vm7, %v1455_v22, %v1459_v37  ;;  %v2226_v63 = vrot.slane %v2224_v62, 4  ;;  %v2227_v46 = vrot.slane %v4486_v55, 5  ;;  %v4838_v42 = vsel %vm4126_vm4, %v3419_v11, %v2329_v24  ;;  %v5764_v55 = vld [vmem:[#allocation5_spill] sm:$0xff]  ;;  %v5766_v37 = vld [vmem:[#allocation4_spill] sm:$0xff] }
  0x9a   : > { %3772 = vmatprep.mubr.msk.bf16.mxu1 %vm458_vm3, %v4752_v38  ;;  %v4832_v29 = vcombine.low %v1450_v20, %v1460_v51  ;;  %v4842_v39 = vsel %vm4126_vm4, %v2331_v56, %v2332_v43  ;;  %v5763_v16 = vcombine.low %v5761_v12, %v5762_v57  ;;  %v2231_v14 = vrot.slane %v5764_v55, 5  ;;  %v5767_v51 = vld [vmem:[#allocation17_spill] sm:$0xff]  ;;  %v5768_v43 = vld [vmem:[#allocation6_spill] sm:$0xff] }
  0x9b   : > { %v3472_v23 = vcombine.low %v4838_v42, %v4842_v39  ;;  %v2225_v32 = vsel %vm4126_vm4, %v3404_v60, %v2224_v62  ;;  %v2228_v7 = vsel %vm4126_vm4, %v2226_v63, %v2227_v46  ;;  %v2238_v54 = vrot.slane %v5765_v25, 5  ;;  %v5769_v60 = vld [vmem:[#allocation15_spill] sm:$0xff]  ;;  %v5770_v46 = vld [vmem:[#allocation9_spill] sm:$0xff] }
  0x9c   : > { %v4862_v22 = vcombine.low %v2225_v32, %v2228_v7  ;;  %v3405_v24 = vrot.slane %v5766_v37, 9  ;;  %v2233_v20 = vrot.slane %v2231_v14, 4  ;;  %v2234_v36 = vrot.slane %v5767_v51, 5 }
  0x9d   : > { %v2841_v11 = vsel %vm507_vm0, %v4603_v17, 0  ;;  %v3406_v62 = vrot.slane %v5768_v43, 9  ;;  %v2240_v56 = vrot.slane %v2238_v54, 4  ;;  %v2241_v15 = vrot.slane %v4537_v9, 5 }
  0x9e   : > { %v2232_v63 = vsel %vm4126_vm4, %v3405_v24, %v2231_v14  ;;  %v2235_v17 = vsel %vm4126_vm4, %v2233_v20, %v2234_v36  ;;  %v2245_v12 = vrot.slane %v5770_v46, 5  ;;  %v2252_v57 = vrot.slane %v4267_v53, 5  ;;  %v5771_v14 = vld [vmem:[#allocation8_spill] sm:$0xff] }
  0x9f   : > { %3807 = vmatmul.mubr.msk.bf16.gmra.mxu0 %vm458_vm3, %v4785_v19  ;;  %v2239_v9 = vsel %vm4126_vm4, %v3406_v62, %v2238_v54  ;;  %v3407_v32 = vrot.slane %v5771_v14, 9  ;;  %v3408_v25 = vrot.slane %v4264_v52, 9  ;;  %v2255_v37 = vrot.slane %v4589_v41, 5  ;;  %v4014_v14 = vld [vmem:[%s4114_s28 + $0x94] sm:$0xf] }
  0xa0   : > { %3810 = vmatprep.mubr.msk.bf16.mxu0 %vm458_vm3, %v4787_v0  ;;  %v2247_v7 = vrot.slane %v2245_v12, 4  ;;  %v2254_v54 = vrot.slane %v2252_v57, 4  ;;  %v2259_v24 = vrot.slane %v4285_v58, 5  ;;  %v2266_v41 = vrot.slane %v4324_v4, 5  ;;  %v5772_v58 = vld [vmem:[#allocation10_spill] sm:$0xff] }
  0xa1   : > { %3773 = vmatmul.mubr.msk.bf16.gmra.mxu1 %vm458_vm3, %v4754_v26  ;;  %v2246_v53 = vsel %vm4126_vm4, %v3407_v32, %v2245_v12  ;;  %v2253_v52 = vsel %vm4126_vm4, %v3408_v25, %v2252_v57  ;;  %v3409_v36 = vrot.slane %v5772_v58, 9  ;;  %v3410_v43 = vrot.slane %v4321_v3, 9 }
  0xa2   : > { %3776 = vmatprep.mubr.msk.bf16.mxu1 %vm458_vm3, %v4785_v19  ;;  %v2268_v62 = vrot.slane %v2266_v41, 4  ;;  %v2283_v12 = vrot.slane %v4675_v27, 5  ;;  %v2294_v27 = vrot.slane %v4014_v14, 5 }
  0xa3   : > { %v2260_v4 = vsel %vm4126_vm4, %v3409_v36, %v2259_v24  ;;  %v2267_v3 = vsel %vm4126_vm4, %v3410_v43, %v2266_v41 }
  0xa7   : > { %3811 = vmatmul.mubr.msk.bf16.gmra.mxu0 %vm458_vm3, %v4809_v5 }
  0xa8   : > { %3814 = vmatprep.mubr.msk.bf16.mxu0 %vm458_vm3, %v4811_v47 }
  0xa9   : > { %3777 = vmatmul.mubr.msk.bf16.gmra.mxu1 %vm458_vm3, %v4787_v0 }
  0xaa   : > { %3780 = vmatprep.mubr.msk.bf16.mxu1 %vm458_vm3, %v4809_v5 }
  0xaf   : > { %3815 = vmatmul.mubr.msk.bf16.gmra.mxu0 %vm458_vm3, %v4832_v29 }
  0xb0   : > { %3854 = vmatprep.mubr.msk.bf16.mxu0 %vm458_vm3, %v5763_v16  ;;  %v4890_v16 = vcombine.low %v2232_v63, %v2235_v17  ;;  %v4012_v17 = vld [vmem:[%s4114_s28 + $0x78] sm:$0xf] }
  0xb1   : > { %3781 = vmatmul.mubr.msk.bf16.gmra.mxu1 %vm458_vm3, %v4811_v47  ;;  %v3412_v46 = vrot.slane %v4012_v17, 9 }
  0xb2   : > { %3820 = vmatprep.mubr.msk.bf16.mxu1 %vm458_vm3, %v4578_v35  ;;  %v2637_v35 = vsel %vm507_vm0, %v4624_v21, 0  ;;  %v2242_v21 = vsel %vm4126_vm4, %v2240_v56, %v2241_v15  ;;  %v2269_v56 = vrot.slane %v4632_v10, 5  ;;  %v4011_v10 = vld [vmem:[%s4114_s28 + $0x7c] sm:$0xf] }
  0xb3   : > { %v4892_v55 = vcombine.low %v2239_v9, %v2242_v21  ;;  %v2280_v15 = vrot.slane %v4011_v10, 5  ;;  %v4013_v9 = vld [vmem:[%s4114_s28 + $0x88] sm:$0xf] }
  0xb4   : > { %v2287_v21 = vrot.slane %v4013_v9, 5 }
  0xb6   : > { %v2289_v25 = vrot.slane %v2287_v21, 4 }
  0xb7   : > { %3855 = vmatmul.mubr.msk.bf16.vlgmr.msra.gmra.mxu0 %vm458_vm3, %v5769_v60 }
  0xb8   : > { %3921 = vmatpush3.bf16.msra.mxu0 %v2841_v11  ;;  %3858 = vmatprep.mubr.msk.bf16.mxu0 %vm458_vm3, %v4862_v22  ;;  %v2261_v11 = vrot.slane %v2259_v24, 4 }
  0xb9   : > { %3821 = vmatmul.mubr.msk.bf16.vlgmr.msra.gmra.mxu1 %vm458_vm3, %v4582_v1  ;;  %v2248_v1 = vrot.slane %v4551_v45, 5  ;;  %v2256_v45 = vsel %vm4126_vm4, %v2254_v54, %v2255_v37  ;;  %v2290_v54 = vrot.slane %v4684_v61, 5 }
  0xba   : > { %3887 = vmatpush3.bf16.msra.mxu1 %v2637_v35  ;;  %3824 = vmatprep.mubr.msk.bf16.mxu1 %vm458_vm3, %v4641_v50  ;;  %v4918_v51 = vcombine.low %v2253_v52, %v2256_v45  ;;  %v5773_v52 = vld [vmem:[#allocation18_spill] sm:$0xff] }
  0xbb   : > { %v2249_v50 = vsel %vm4126_vm4, %v2247_v7, %v2248_v1  ;;  %v4015_v7 = vld [vmem:[%s4114_s28 + $0x84] sm:$0xf]  ;;  %v2291_v61 = vsel %vm4126_vm4, %v2289_v25, %v2290_v54  ;;  %v4017_v45 = vld [vmem:[%s4114_s28 + $0xa0] sm:$0xf] }
  0xbc   : > { %v4916_v20 = vcombine.low %v2246_v53, %v2249_v50  ;;  %v3413_v1 = vrot.slane %v4015_v7, 9  ;;  %v2296_v53 = vrot.slane %v2294_v27, 4  ;;  %v2297_v50 = vrot.slane %v4716_v40, 5 }
  0xbd   : > { %v2301_v41 = vrot.slane %v4017_v45, 5 }
  0xbf   : > { %3859 = vmatmul.mubr.msk.bf16.gmra.mxu0 %vm458_vm3, %v4890_v16 }
  0xc0   : > { %3862 = vmatprep.mubr.msk.bf16.mxu0 %vm458_vm3, %v4892_v55 }
  0xc1   : > { %3825 = vmatmul.mubr.msk.bf16.gmra.mxu1 %vm458_vm3, %v4646_v6  ;;  %v2262_v6 = vrot.slane %v4592_v28, 5  ;;  %v2270_v28 = vsel %vm4126_vm4, %v2268_v62, %v2269_v56  ;;  %v1462_v62 = vshrl.u32 %v4505_v31, 16  ;;  %v1465_v56 = vshll.u32 %v4505_v31, 16 }
  0xc2   : > { %3828 = vmatprep.mubr.msk.bf16.mxu1 %vm458_vm3, %v4679_v30  ;;  %v4943_v63 = vcombine.low %v2267_v3, %v2270_v28 }
  0xc3   : > { %v2263_v30 = vsel %vm4126_vm4, %v2261_v11, %v2262_v6  ;;  %v2298_v11 = vsel %vm4126_vm4, %v2296_v53, %v2297_v50  ;;  %v4018_v6 = vld [vmem:[%s4114_s28 + $0xac] sm:$0xf]  ;;  %v1467_v14 = vrot.slane %v1465_v56, 5  ;;  %v4022_v56 = vld [vmem:[%s4114_s28 + $0xb4] sm:$0xf] }
  0xc4   : > { %v4941_v35 = vcombine.low %v2260_v4, %v2263_v30  ;;  %v2308_v43 = vrot.slane %v4018_v6, 5  ;;  %v1475_v4 = vshrl.u32 %v4508_v59, 16 }
  0xc6   : > { %v1477_v7 = vrot.slane %v1475_v4, 4 }
  0xc7   : > { %3863 = vmatmul.mubr.msk.bf16.gmra.mxu0 %vm458_vm3, %v4916_v20 }
  0xc8   : > { %3866 = vmatprep.mubr.msk.bf16.mxu0 %vm458_vm3, %v4918_v51 }
  0xc9   : > { %3829 = vmatmul.mubr.msk.bf16.gmra.mxu1 %vm458_vm3, %v4681_v49  ;;  %v2282_v49 = vrot.slane %v2280_v15, 4 }
  0xca   : > { %3832 = vmatprep.mubr.msk.bf16.mxu1 %vm458_vm3, %v4711_v2  ;;  %v2281_v2 = vsel %vm4126_vm4, %v3412_v46, %v2280_v15  ;;  %v4019_v15 = vld [vmem:[%s4114_s28 + $0x9c] sm:$0xf]  ;;  %v2303_v46 = vrot.slane %v2301_v41, 4 }
  0xcb   : > { %v2284_v57 = vsel %vm4126_vm4, %v2282_v49, %v2283_v12  ;;  %v3415_v17 = vrot.slane %v4019_v15, 9  ;;  %v5774_v49 = vld [vmem:[#allocation19_spill] sm:$0xff] }
  0xcc   : > { %v4961_v32 = vcombine.low %v2281_v2, %v2284_v57  ;;  %v2304_v31 = vrot.slane %v5774_v49, 5  ;;  %v2311_v2 = vrot.slane %v4757_v33, 5  ;;  %v1464_v57 = vrot.slane %v1462_v62, 4 }
  0xcd   : > { %v2302_v54 = vsel %vm4126_vm4, %v3415_v17, %v2301_v41 }
  0xce   : > { %v2305_v33 = vsel %vm4126_vm4, %v2303_v46, %v2304_v31  ;;  %v1468_v45 = vor.u32 %v1467_v14, %v1464_v57 }
  0xcf   : > { %3867 = vmatmul.mubr.msk.bf16.gmra.mxu0 %vm458_vm3, %v4941_v35 }
  0xd0   : > { %3870 = vmatprep.mubr.msk.bf16.mxu0 %vm458_vm3, %v4943_v63  ;;  %v1469_v17 = vrot.slane %v1468_v45, 4 }
  0xd1   : > { %3833 = vmatmul.mubr.msk.bf16.gmra.mxu1 %vm458_vm3, %v4410_v34  ;;  %v4016_v34 = vld [vmem:[%s4114_s28 + $0x90] sm:$0xf] }
  0xd2   : > { %3836 = vmatprep.mubr.msk.bf16.mxu1 %vm458_vm3, %v4752_v38  ;;  %v3414_v37 = vrot.slane %v4016_v34, 9  ;;  %v2288_v38 = vsel %vm4126_vm4, %v3413_v1, %v2287_v21  ;;  %v2310_v21 = vrot.slane %v2308_v43, 4  ;;  %v4021_v34 = vld [vmem:[%s4114_s28 + $0xb8] sm:$0xf] }
  0xd3   : > { %v4999_v28 = vcombine.low %v2288_v38, %v2291_v61 }
  0xd4   : > { %v2295_v36 = vsel %vm4126_vm4, %v3414_v37, %v2294_v27  ;;  %v2315_v37 = vrot.slane %v4021_v34, 5  ;;  %v2312_v61 = vsel %vm4126_vm4, %v2310_v21, %v2311_v2 }
  0xd5   : > { %v5001_v10 = vcombine.low %v2295_v36, %v2298_v11  ;;  %v1481_v36 = vshll.u32 %v4826_v18, 16 }
  0xd6   : > { %v2317_v4 = vrot.slane %v2315_v37, 4 }
  0xd7   : > { %v4967_v24 = vpop.f32.mrf.mxu0  ;;  %3871 = vmatmul.mubr.msk.bf16.gmra.mxu0 %vm458_vm3, %v5773_v52  ;;  %v1483_v18 = vrot.slane %v1481_v36, 5 }
  0xd8   : > { %3874 = vmatprep.mubr.msk.bf16.mxu0 %vm458_vm3, %v4961_v32  ;;  %v4978_v58 = vpop.f32.mrf.mxu1 }
  0xd9   : > { %3837 = vmatmul.mubr.msk.bf16.gmra.mxu1 %vm458_vm3, %v4754_v26  ;;  %v4982_v40 = vpop.f32.mrf.mxu0  ;;  %v1471_v26 = vshll.u32 %v4508_v59, 16 }
  0xda   : > { %3840 = vmatprep.mubr.msk.bf16.mxu1 %vm458_vm3, %v4785_v19  ;;  %v4995_v30 = vpop.f32.mrf.mxu1  ;;  %v4020_v19 = vld [vmem:[%s4114_s28 + $0xa8] sm:$0xf] }
  0xdb   : > { %v4997_v3 = vpop.f32.mrf.mxu0  ;;  %v3416_v59 = vrot.slane %v4020_v19, 9  ;;  %v1473_v27 = vrot.slane %v1471_v26, 5  ;;  %v2318_v26 = vrot.slane %v4763_v44, 5 }
  0xdc   : > { %v5005_v12 = vpop.f32.mrf.mxu1 }
  0xdd   : > { %v5007_v9 = vpop.f32.mrf.mxu0  ;;  %v2309_v38 = vsel %vm4126_vm4, %v3416_v59, %v2308_v43  ;;  %v1478_v41 = vor.u32 %v1477_v7, %v1473_v27  ;;  %v3417_v43 = vrot.slane %v4022_v56, 9  ;;  %v2319_v19 = vsel %vm4126_vm4, %v2317_v4, %v2318_v26 }
  0xde   : > { %v5011_v1 = vpop.f32.mrf.mxu1  ;;  %v5043_v62 = vcombine.low %v2309_v38, %v2312_v61  ;;  %v1474_v2 = vsel %vm4250_vm7, %v1469_v17, %v1473_v27 }
  0xdf   : > { %v5013_v25 = vpop.f32.mrf.mxu0  ;;  %3875 = vmatmul.mubr.msk.bf16.gmra.mxu0 %vm458_vm3, %v4999_v28  ;;  %v1479_v46 = vrot.slane %v1478_v41, 4  ;;  %v2316_v44 = vsel %vm4126_vm4, %v3417_v43, %v2315_v37 }
  0xe0   : > { %3878 = vmatprep.mubr.msk.bf16.mxu0 %vm458_vm3, %v5001_v10  ;;  %v5024_v53 = vpop.f32.mrf.mxu1 }
  0xe1   : > { %3841 = vmatmul.mubr.msk.bf16.gmra.mxu1 %vm458_vm3, %v4787_v0  ;;  %v5028_v50 = vpop.f32.mrf.mxu0  ;;  %v5041_v0 = vcombine.low %v2302_v54, %v2305_v33  ;;  %v1484_v57 = vsel %vm4250_vm7, %v1479_v46, %v1483_v18  ;;  %v5079_v54 = vcombine.low %v2316_v44, %v2319_v19 }
  0xe2   : > { %3844 = vmatprep.mubr.msk.bf16.mxu1 %vm458_vm3, %v4809_v5  ;;  %v5037_v11 = vpop.f32.mrf.mxu1  ;;  %v3385_v34 = vcombine.low %v1474_v2, %v1484_v57 }
  0xe3   : > { %v5039_v6 = vpop.f32.mrf.mxu0 }
  0xe4   : > { %v5047_v15 = vpop.f32.mrf.mxu1 }
  0xe5   : > { %v5049_v5 = vpop.f32.mrf.mxu0 }
  0xe6   : > { %v5051_v49 = vpop.f32.mrf.mxu1 }
  0xe7   : > { %v5053_v31 = vpop.f32.mrf.mxu0  ;;  %3879 = vmatmul.mubr.msk.bf16.gmra.mxu0 %vm458_vm3, %v5041_v0 }
  0xe8   : > { %3882 = vmatprep.mubr.msk.bf16.mxu0 %vm458_vm3, %v5043_v62  ;;  %v5063_v59 = vpop.f32.mrf.mxu1 }
  0xe9   : > { %3845 = vmatmul.mubr.msk.bf16.gmra.mxu1 %vm458_vm3, %v4811_v47  ;;  %v5067_v21 = vpop.f32.mrf.mxu0 }
  0xea   : > { %3848 = vmatprep.mubr.msk.bf16.mxu1 %vm458_vm3, %v4832_v29  ;;  %v5075_v14 = vpop.f32.mrf.mxu1 }
  0xeb   : > { %v5077_v7 = vpop.f32.mrf.mxu0 }
  0xec   : > { %v5081_v33 = vpop.f32.mrf.mxu1 }
  0xed   : > { %v5083_v47 = vpop.f32.mrf.mxu0 }
  0xee   : > { %v5085_v37 = vpop.f32.mrf.mxu1 }
  0xef   : > { %v5087_v29 = vpop.f32.mrf.mxu0  ;;  %3883 = vmatmul.mubr.msk.bf16.gmra.mxu0 %vm458_vm3, %v5079_v54 }
  0xf0   : > { %3922 = vmatprep.mubr.msk.bf16.mxu0 %vm458_vm3, %v4862_v22  ;;  %v5093_v48 = vpop.f32.mrf.mxu1 }
  0xf1   : > { %3849 = vmatmul.mubr.msk.bf16.gmra.mxu1 %vm458_vm3, %v3385_v34  ;;  %v5096_v27 = vpop.f32.mrf.mxu0 }
  0xf2   : > { %3888 = vmatprep.mubr.msk.bf16.mxu1 %vm458_vm3, %v5769_v60  ;;  %v5100_v38 = vpop.f32.mrf.mxu1 }
  0xf3   : > { %v5102_v61 = vpop.f32.mrf.mxu0 }
  0xf4   : > { %v5104_v45 = vpop.f32.mrf.mxu1 }
  0xf5   : > { %v5106_v41 = vpop.f32.mrf.mxu0 }
  0xf6   : > { %v5108_v36 = vpop.f32.mrf.mxu1 }
  0xf7   : > { %v3720_v56 = vpop.f32.mrf.mxu0  ;;  %3923 = vmatmul.mubr.msk.bf16.vlgmr.msra.gmra.mxu0 %vm458_vm3, %v4890_v16 }
  0xf8   : > { %3926 = vmatprep.mubr.msk.bf16.mxu0 %vm458_vm3, %v4892_v55 }
  0xf9   : > { %v3686_v43 = vpop.f32.mrf.mxu1  ;;  %3889 = vmatmul.mubr.msk.bf16.vlgmr.msra.gmra.mxu1 %vm458_vm3, %v4862_v22  ;;  %v891_v60 = vpop.f32.mrf.mxu0 }
  0xfa   : > { %v726_v4 = vadd.f32 %v3686_v43, %v4967_v24  ;;  %3892 = vmatprep.mubr.msk.bf16.mxu1 %vm458_vm3, %v4890_v16 }
  0xfb   : > { %v717_v26 = vpop.f32.mrf.mxu1  ;;  %v3721_v17 = vpop.f32.mrf.mxu0 }
  0xfc   : > { %v5119_v46 = vadd.f32 %v3720_v56, %v726_v4  ;;  %v718_v18 = vadd.f32 %v717_v26, %v4982_v40 }
  0xfd   : > { %v3687_v44 = vpop.f32.mrf.mxu1  ;;  %v894_v19 = vpop.f32.mrf.mxu0 }
  0xfe   : > { %v5122_v2 = vadd.f32 %v891_v60, %v718_v18  ;;  %v729_v57 = vadd.f32 %v3687_v44, %v4997_v3 }
  0xff   : > { %v720_v34 = vpop.f32.mrf.mxu1  ;;  %v3724_v22 = vpop.f32.mrf.mxu0  ;;  %3927 = vmatmul.mubr.msk.bf16.gmra.mxu0 %vm458_vm3, %v4916_v20 }
 0x100   : > { %v5127_v24 = vadd.f32 %v3721_v17, %v729_v57  ;;  %v721_v16 = vadd.f32 %v720_v34, %v5007_v9  ;;  %3930 = vmatprep.mubr.msk.bf16.mxu0 %vm458_vm3, %v4918_v51 }
 0x101   : > { %v3690_v56 = vpop.f32.mrf.mxu1  ;;  %3893 = vmatmul.mubr.msk.bf16.gmra.mxu1 %vm458_vm3, %v4892_v55  ;;  %v907_v40 = vpop.f32.mrf.mxu0 }
 0x102   : > { %v5134_v43 = vadd.f32 %v894_v19, %v721_v16  ;;  %v742_v3 = vadd.f32 %v3690_v56, %v5013_v25  ;;  %3896 = vmatprep.mubr.msk.bf16.mxu1 %vm458_vm3, %v4916_v20 }
 0x103   : > { %v733_v60 = vpop.f32.mrf.mxu1  ;;  %v3725_v4 = vpop.f32.mrf.mxu0 }
 0x104   : > { %v5139_v26 = vadd.f32 %v3724_v22, %v742_v3  ;;  %v734_v9 = vadd.f32 %v733_v60, %v5028_v50 }
 0x105   : > { %v3691_v17 = vpop.f32.mrf.mxu1  ;;  %v910_v18 = vpop.f32.mrf.mxu0 }
 0x106   : > { %v5142_v44 = vadd.f32 %v907_v40, %v734_v9  ;;  %v745_v55 = vadd.f32 %v3691_v17, %v5039_v6 }
 0x107   : > { %v736_v57 = vpop.f32.mrf.mxu1  ;;  %v3728_v19 = vpop.f32.mrf.mxu0  ;;  %3931 = vmatmul.mubr.msk.bf16.gmra.mxu0 %vm458_vm3, %v4941_v35 }
 0x108   : > { %v5147_v25 = vadd.f32 %v3725_v4, %v745_v55  ;;  %v737_v20 = vadd.f32 %v736_v57, %v5049_v5  ;;  %3934 = vmatprep.mubr.msk.bf16.mxu0 %vm458_vm3, %v4943_v63 }
 0x109   : > { %v3694_v34 = vpop.f32.mrf.mxu1  ;;  %3897 = vmatmul.mubr.msk.bf16.gmra.mxu1 %vm458_vm3, %v4918_v51  ;;  %v923_v50 = vpop.f32.mrf.mxu0 }
 0x10a   : > { %v5154_v22 = vadd.f32 %v910_v18, %v737_v20  ;;  %v758_v6 = vadd.f32 %v3694_v34, %v5053_v31  ;;  %3900 = vmatprep.mubr.msk.bf16.mxu1 %vm458_vm3, %v4941_v35 }
 0x10b   : > { %v749_v16 = vpop.f32.mrf.mxu1  ;;  %v3729_v56 = vpop.f32.mrf.mxu0 }
 0x10c   : > { %v5159_v40 = vadd.f32 %v3728_v19, %v758_v6  ;;  %v750_v5 = vadd.f32 %v749_v16, %v5067_v21 }
 0x10d   : > { %v3695_v3 = vpop.f32.mrf.mxu1  ;;  %v926_v60 = vpop.f32.mrf.mxu0 }
 0x10e   : > { %v5162_v4 = vadd.f32 %v923_v50, %v750_v5  ;;  %v761_v51 = vadd.f32 %v3695_v3, %v5077_v7  ;;  %v4023_v3 = vld [vmem:[%s4316_s10 + $0x4] sm:$0xf] }
 0x10f   : > { %v752_v9 = vpop.f32.mrf.mxu1  ;;  %v3732_v17 = vpop.f32.mrf.mxu0  ;;  %3935 = vmatmul.mubr.msk.bf16.gmra.mxu0 %vm458_vm3, %v5773_v52 }
 0x110   : > { %v5167_v31 = vadd.f32 %v3729_v56, %v761_v51  ;;  %v753_v35 = vadd.f32 %v752_v9, %v5083_v47  ;;  %3938 = vmatprep.mubr.msk.bf16.mxu0 %vm458_vm3, %v4961_v32 }
 0x111   : > { %v3698_v18 = vpop.f32.mrf.mxu1  ;;  %3901 = vmatmul.mubr.msk.bf16.gmra.mxu1 %vm458_vm3, %v4943_v63  ;;  %v939_v21 = vpop.f32.mrf.mxu0 }
 0x112   : > { %v5174_v55 = vadd.f32 %v926_v60, %v753_v35  ;;  %v774_v7 = vadd.f32 %v3698_v18, %v5087_v29  ;;  %3904 = vmatprep.mubr.msk.bf16.mxu1 %vm458_vm3, %v5773_v52 }
 0x113   : > { %v765_v57 = vpop.f32.mrf.mxu1  ;;  %v3733_v19 = vpop.f32.mrf.mxu0 }
 0x114   : > { %v5179_v20 = vadd.f32 %v3732_v17, %v774_v7  ;;  %v766_v47 = vadd.f32 %v765_v57, %v5096_v27  ;;  %v4024_v7 = vld [vmem:[%s4316_s10] sm:$0xf] }
 0x115   : > { %v3699_v34 = vpop.f32.mrf.mxu1  ;;  %v942_v50 = vpop.f32.mrf.mxu0 }
 0x116   : > { %v5182_v6 = vadd.f32 %v939_v21, %v766_v47  ;;  %v777_v63 = vadd.f32 %v3699_v34, %v5102_v61  ;;  %v2322_v61 = vrot.slane %v4023_v3, 5 }
 0x117   : > { %v768_v16 = vpop.f32.mrf.mxu1  ;;  %v3736_v56 = vpop.f32.mrf.mxu0  ;;  %3939 = vmatmul.mubr.msk.bf16.gmra.mxu0 %vm458_vm3, %v4999_v28 }
 0x118   : > { %v5187_v29 = vadd.f32 %v3733_v19, %v777_v63  ;;  %v769_v52 = vadd.f32 %v768_v16, %v5106_v41  ;;  %3942 = vmatprep.mubr.msk.bf16.mxu0 %vm458_vm3, %v5001_v10  ;;  %v2324_v57 = vrot.slane %v2322_v61, 4  ;;  %v2325_v19 = vrot.slane %v4790_v13, 5 }
 0x119   : > { %v3702_v27 = vpop.f32.mrf.mxu1  ;;  %3905 = vmatmul.mubr.msk.bf16.gmra.mxu1 %vm458_vm3, %v4961_v32  ;;  %v955_v5 = vpop.f32.mrf.mxu0  ;;  %v3418_v32 = vrot.slane %v4024_v7, 9 }
 0x11a   : > { %v5195_v60 = vadd.f32 %v942_v50, %v769_v52  ;;  %v790_v51 = vadd.f32 %v3702_v27, %v4978_v58  ;;  %3908 = vmatprep.mubr.msk.bf16.mxu1 %vm458_vm3, %v4999_v28  ;;  %v2326_v16 = vsel %vm4126_vm4, %v2324_v57, %v2325_v19 }
 0x11b   : > { %v781_v9 = vpop.f32.mrf.mxu1  ;;  %v3737_v41 = vpop.f32.mrf.mxu0 }
 0x11c   : > { %v5200_v17 = vadd.f32 %v3736_v56, %v790_v51  ;;  %v782_v35 = vadd.f32 %v781_v9, %v4995_v30 }
 0x11d   : > { %v3703_v18 = vpop.f32.mrf.mxu1  ;;  %v958_v21 = vpop.f32.mrf.mxu0 }
 0x11e   : > { %v5205_v47 = vadd.f32 %v955_v5, %v782_v35  ;;  %v793_v58 = vadd.f32 %v3703_v18, %v5005_v12  ;;  %v2323_v12 = vsel %vm4126_vm4, %v3418_v32, %v2322_v61 }
 0x11f   : > { %v784_v34 = vpop.f32.mrf.mxu1  ;;  %v3740_v50 = vpop.f32.mrf.mxu0  ;;  %3943 = vmatmul.mubr.msk.bf16.gmra.mxu0 %vm458_vm3, %v5041_v0  ;;  %v3454_v3 = vcombine.low %v2323_v12, %v2326_v16 }
 0x120   : > { %v5210_v28 = vadd.f32 %v3737_v41, %v793_v58  ;;  %v785_v30 = vadd.f32 %v784_v34, %v5011_v1  ;;  %3946 = vmatprep.mubr.msk.bf16.mxu0 %vm458_vm3, %v5043_v62 }
 0x121   : > { %v3706_v63 = vpop.f32.mrf.mxu1  ;;  %3909 = vmatmul.mubr.msk.bf16.gmra.mxu1 %vm458_vm3, %v5001_v10  ;;  %v971_v13 = vpop.f32.mrf.mxu0 }
 0x122   : > { %v5221_v56 = vadd.f32 %v958_v21, %v785_v30  ;;  %v806_v52 = vadd.f32 %v3706_v63, %v5024_v53  ;;  %3912 = vmatprep.mubr.msk.bf16.mxu1 %vm458_vm3, %v5041_v0 }
 0x123   : > { %v797_v1 = vpop.f32.mrf.mxu1  ;;  %v3741_v27 = vpop.f32.mrf.mxu0 }
 0x124   : > { %v5226_v5 = vadd.f32 %v3740_v50, %v806_v52  ;;  %v798_v10 = vadd.f32 %v797_v1, %v5037_v11 }
 0x125   : > { %v3707_v51 = vpop.f32.mrf.mxu1  ;;  %v974_v9 = vpop.f32.mrf.mxu0 }
 0x126   : > { %v5229_v61 = vadd.f32 %v971_v13, %v798_v10  ;;  %v809_v8 = vadd.f32 %v3707_v51, %v5047_v15 }
 0x127   : > { %v800_v41 = vpop.f32.mrf.mxu1  ;;  %v3744_v35 = vpop.f32.mrf.mxu0  ;;  %3947 = vmatmul.mubr.msk.bf16.gmra.mxu0 %vm458_vm3, %v5079_v54 }
 0x128   : > { %v5234_v53 = vadd.f32 %v3741_v27, %v809_v8  ;;  %v801_v0 = vadd.f32 %v800_v41, %v5051_v49  ;;  %3950 = vmatprep.mubr.msk.bf16.mxu0 %vm458_vm3, %v3454_v3 }
 0x129   : > { %v3710_v18 = vpop.f32.mrf.mxu1  ;;  %3913 = vmatmul.mubr.msk.bf16.gmra.mxu1 %vm458_vm3, %v5043_v62  ;;  %v987_v11 = vpop.f32.mrf.mxu0 }
 0x12a   : > { %v5240_v21 = vadd.f32 %v974_v9, %v801_v0  ;;  %v822_v15 = vadd.f32 %v3710_v18, %v5063_v59  ;;  %3916 = vmatprep.mubr.msk.bf16.mxu1 %vm458_vm3, %v5079_v54 }
 0x12b   : > { %v813_v7 = vpop.f32.mrf.mxu1  ;;  %v3745_v32 = vpop.f32.mrf.mxu0 }
 0x12c   : > { %v5245_v57 = vadd.f32 %v3744_v35, %v822_v15  ;;  %v814_v49 = vadd.f32 %v813_v7, %v5075_v14 }
 0x12d   : > { %v3711_v19 = vpop.f32.mrf.mxu1  ;;  %v990_v58 = vpop.f32.mrf.mxu0 }
 0x12e   : > { %v5248_v34 = vadd.f32 %v987_v11, %v814_v49  ;;  %v825_v62 = vadd.f32 %v3711_v19, %v5081_v33 }
 0x12f   : > { %v816_v50 = vpop.f32.mrf.mxu1  ;;  %v3748_v30 = vpop.f32.mrf.mxu0  ;;  %3951 = vmatmul.mubr.msk.bf16.gmra.mxu0 %vm458_vm3, %v3472_v23 }
 0x130   : > { %v5255_v59 = vadd.f32 %v3745_v32, %v825_v62  ;;  %v817_v54 = vadd.f32 %v816_v50, %v5085_v37 }
 0x131   : > { %v3714_v63 = vpop.f32.mrf.mxu1  ;;  %3917 = vmatmul.mubr.msk.bf16.gmra.mxu1 %vm458_vm3, %v3454_v3  ;;  %v1003_v14 = vpop.f32.mrf.mxu0 }
 0x132   : > { %v5259_v13 = vadd.f32 %v990_v58, %v817_v54  ;;  %v838_v12 = vadd.f32 %v3714_v63, %v5093_v48 }
 0x133   : > { %v829_v33 = vpop.f32.mrf.mxu1  ;;  %v3749_v16 = vpop.f32.mrf.mxu0 }
 0x134   : > { %v5262_v52 = vadd.f32 %v3748_v30, %v838_v12  ;;  %v830_v42 = vadd.f32 %v829_v33, %v5100_v38 }
 0x135   : > { %v3715_v39 = vpop.f32.mrf.mxu1  ;;  %v1006_v23 = vpop.f32.mrf.mxu0 }
 0x136   : > { %v5265_v1 = vadd.f32 %v1003_v14, %v830_v42  ;;  %v841_v37 = vadd.f32 %v3715_v39, %v5104_v45 }
 0x137   : > { %v832_v27 = vpop.f32.mrf.mxu1  ;;  %v3788_v10 = vpop.f32.mrf.mxu0 }
 0x138   : > { %v5268_v3 = vadd.f32 %v3749_v16, %v841_v37  ;;  %v833_v51 = vadd.f32 %v832_v27, %v5108_v36 }
 0x139   : > { %v3754_v9 = vpop.f32.mrf.mxu1  ;;  %v1824_v48 = vpop.f32.mrf.mxu0 }
 0x13a   : > { %v5271_v8 = vadd.f32 %v1006_v23, %v833_v51  ;;  %v1749_v41 = vadd.f32 %v3754_v9, %v5119_v46 }
 0x13b   : > { %v1620_v35 = vpop.f32.mrf.mxu1  ;;  %v3789_v38 = vpop.f32.mrf.mxu0 }
 0x13c   : > { %v5274_v0 = vadd.f32 %v3788_v10, %v1749_v41  ;;  %v1747_v18 = vadd.f32 %v1620_v35, %v5122_v2 }
 0x13d   : > { %v3755_v11 = vpop.f32.mrf.mxu1  ;;  %v1827_v45 = vpop.f32.mrf.mxu0 }
 0x13e   : > { %v5277_v15 = vadd.f32 %v1824_v48, %v1747_v18  ;;  %v1750_v7 = vadd.f32 %v3755_v11, %v5127_v24 }
 0x13f   : > { %v1623_v32 = vpop.f32.mrf.mxu1  ;;  %v3792_v36 = vpop.f32.mrf.mxu0 }
 0x140   : > { %v5280_v49 = vadd.f32 %v3789_v38, %v1750_v7  ;;  %v1748_v19 = vadd.f32 %v1623_v32, %v5134_v43 }
 0x141   : > { %v3758_v58 = vpop.f32.mrf.mxu1  ;;  %v1840_v46 = vpop.f32.mrf.mxu0 }
 0x142   : > { %v5283_v62 = vadd.f32 %v1827_v45, %v1748_v19  ;;  %v1753_v50 = vadd.f32 %v3758_v58, %v5139_v26 }
 0x143   : > { %v1636_v30 = vpop.f32.mrf.mxu1  ;;  %v3793_v2 = vpop.f32.mrf.mxu0 }
 0x144   : > { %v5286_v54 = vadd.f32 %v3792_v36, %v1753_v50  ;;  %v1751_v63 = vadd.f32 %v1636_v30, %v5142_v44 }
 0x145   : > { %v3759_v14 = vpop.f32.mrf.mxu1  ;;  %v1843_v24 = vpop.f32.mrf.mxu0 }
 0x146   : > { %v5289_v12 = vadd.f32 %v1840_v46, %v1751_v63  ;;  %v1754_v33 = vadd.f32 %v3759_v14, %v5147_v25 }
 0x147   : > { %v1639_v16 = vpop.f32.mrf.mxu1  ;;  %v3796_v43 = vpop.f32.mrf.mxu0 }
 0x148   : > { %v5292_v42 = vadd.f32 %v3793_v2, %v1754_v33  ;;  %v1752_v39 = vadd.f32 %v1639_v16, %v5154_v22 }
 0x149   : > { %v3762_v23 = vpop.f32.mrf.mxu1  ;;  %v1856_v26 = vpop.f32.mrf.mxu0 }
 0x14a   : > { %v5295_v37 = vadd.f32 %v1843_v24, %v1752_v39  ;;  %v1757_v27 = vadd.f32 %v3762_v23, %v5159_v40 }
 0x14b   : > { %v1652_v10 = vpop.f32.mrf.mxu1  ;;  %v3797_v44 = vpop.f32.mrf.mxu0 }
 0x14c   : > { %v5298_v51 = vadd.f32 %v3796_v43, %v1757_v27  ;;  %v1755_v9 = vadd.f32 %v1652_v10, %v5162_v4 }
 0x14d   : > { %v3763_v48 = vpop.f32.mrf.mxu1  ;;  %v1859_v25 = vpop.f32.mrf.mxu0 }
 0x14e   : > { %v5301_v41 = vadd.f32 %v1856_v26, %v1755_v9  ;;  %v1758_v35 = vadd.f32 %v3763_v48, %v5167_v31 }
 0x14f   : > { %v1655_v38 = vpop.f32.mrf.mxu1  ;;  %v3800_v22 = vpop.f32.mrf.mxu0 }
 0x150   : > { %v5304_v18 = vadd.f32 %v3797_v44, %v1758_v35  ;;  %v1756_v11 = vadd.f32 %v1655_v38, %v5174_v55 }
 0x151   : > { %v3766_v45 = vpop.f32.mrf.mxu1  ;;  %v1872_v40 = vpop.f32.mrf.mxu0 }
 0x152   : > { %v5307_v7 = vadd.f32 %v1859_v25, %v1756_v11  ;;  %v1761_v32 = vadd.f32 %v3766_v45, %v5179_v20 }
 0x153   : > { %v1668_v36 = vpop.f32.mrf.mxu1  ;;  %v3801_v4 = vpop.f32.mrf.mxu0 }
 0x154   : > { %v5310_v19 = vadd.f32 %v3800_v22, %v1761_v32  ;;  %v1759_v58 = vadd.f32 %v1668_v36, %v5182_v6 }
 0x155   : > { %v3767_v46 = vpop.f32.mrf.mxu1  ;;  %v1875_v31 = vpop.f32.mrf.mxu0 }
 0x156   : > { %v5313_v50 = vadd.f32 %v1872_v40, %v1759_v58  ;;  %v1762_v30 = vadd.f32 %v3767_v46, %v5187_v29 }
 0x157   : > { %v1671_v2 = vpop.f32.mrf.mxu1  ;;  %v3804_v55 = vpop.f32.mrf.mxu0 }
 0x158   : > { %v5316_v63 = vadd.f32 %v3801_v4, %v1762_v30  ;;  %v1760_v14 = vadd.f32 %v1671_v2, %v5195_v60 }
 0x159   : > { %v3770_v24 = vpop.f32.mrf.mxu1  ;;  %v1888_v20 = vpop.f32.mrf.mxu0 }
 0x15a   : > { %v5319_v33 = vadd.f32 %v1875_v31, %v1760_v14  ;;  %v1765_v16 = vadd.f32 %v3770_v24, %v5200_v17 }
 0x15b   : > { %v1684_v43 = vpop.f32.mrf.mxu1  ;;  %v3805_v6 = vpop.f32.mrf.mxu0 }
 0x15c   : > { %v5322_v39 = vadd.f32 %v3804_v55, %v1765_v16  ;;  %v1763_v23 = vadd.f32 %v1684_v43, %v5205_v47 }
 0x15d   : > { %v3771_v26 = vpop.f32.mrf.mxu1  ;;  %v1891_v29 = vpop.f32.mrf.mxu0 }
 0x15e   : > { %v5325_v27 = vadd.f32 %v1888_v20, %v1763_v23  ;;  %v1766_v10 = vadd.f32 %v3771_v26, %v5210_v28 }
 0x15f   : > { %v1687_v44 = vpop.f32.mrf.mxu1  ;;  %v3808_v60 = vpop.f32.mrf.mxu0 }
 0x160   : > { %v5328_v9 = vadd.f32 %v3805_v6, %v1766_v10  ;;  %v1764_v48 = vadd.f32 %v1687_v44, %v5221_v56 }
 0x161   : > { %v3774_v25 = vpop.f32.mrf.mxu1  ;;  %v1904_v17 = vpop.f32.mrf.mxu0 }
 0x162   : > { %5775 = vst [vmem:[#allocation11_spill] sm:$0xff] %v5328_v9  ;;  %v5331_v35 = vadd.f32 %v1891_v29, %v1764_v48  ;;  %v1769_v38 = vadd.f32 %v3774_v25, %v5226_v5 }
 0x163   : > { %v1700_v22 = vpop.f32.mrf.mxu1  ;;  %v3809_v47 = vpop.f32.mrf.mxu0 }
 0x164   : > { %5776 = vst [vmem:[#allocation12_spill] sm:$0xff] %v5331_v35  ;;  %v5334_v11 = vadd.f32 %v3808_v60, %v1769_v38  ;;  %v1767_v45 = vadd.f32 %v1700_v22, %v5229_v61 }
 0x165   : > { %v3775_v40 = vpop.f32.mrf.mxu1  ;;  %v1907_v28 = vpop.f32.mrf.mxu0 }
 0x166   : > { %5777 = vst [vmem:[#allocation13_spill] sm:$0xff] %v5334_v11  ;;  %v5337_v32 = vadd.f32 %v1904_v17, %v1767_v45  ;;  %v1770_v36 = vadd.f32 %v3775_v40, %v5234_v53 }
 0x167   : > { %v1703_v4 = vpop.f32.mrf.mxu1  ;;  %v3812_v56 = vpop.f32.mrf.mxu0 }
 0x168   : > { %5778 = vst [vmem:[#allocation3_spill] sm:$0xff] %v5337_v32  ;;  %v5340_v58 = vadd.f32 %v3809_v47, %v1770_v36  ;;  %v1768_v46 = vadd.f32 %v1703_v4, %v5240_v21 }
 0x169   : > { %v3778_v31 = vpop.f32.mrf.mxu1  ;;  %v1920_v5 = vpop.f32.mrf.mxu0 }
 0x16a   : > { %5779 = vst [vmem:[#allocation2_spill] sm:$0xff] %v5340_v58  ;;  %v5343_v30 = vadd.f32 %v1907_v28, %v1768_v46  ;;  %v1773_v2 = vadd.f32 %v3778_v31, %v5245_v57 }
 0x16b   : > { %v1716_v55 = vpop.f32.mrf.mxu1  ;;  %v3813_v61 = vpop.f32.mrf.mxu0 }
 0x16c   : > { %5780 = vst [vmem:[#allocation14_spill] sm:$0xff] %v5343_v30  ;;  %v5346_v14 = vadd.f32 %v3812_v56, %v1773_v2  ;;  %v1771_v24 = vadd.f32 %v1716_v55, %v5248_v34 }
 0x16d   : > { %v3779_v20 = vpop.f32.mrf.mxu1  ;;  %v1923_v53 = vpop.f32.mrf.mxu0 }
 0x16e   : > { %5781 = vst [vmem:[#allocation16_spill] sm:$0xff] %v5346_v14  ;;  %v5349_v16 = vadd.f32 %v1920_v5, %v1771_v24  ;;  %v1774_v43 = vadd.f32 %v3779_v20, %v5255_v59 }
 0x16f   : > { %v1719_v6 = vpop.f32.mrf.mxu1  ;;  %v3816_v21 = vpop.f32.mrf.mxu0 }
 0x170   : > { %5782 = vst [vmem:[#allocation5_spill] sm:$0xff] %v5349_v16  ;;  %v5352_v23 = vadd.f32 %v3813_v61, %v1774_v43  ;;  %v1772_v26 = vadd.f32 %v1719_v6, %v5259_v13 }
 0x171   : > { %v3782_v29 = vpop.f32.mrf.mxu1  ;;  %v1936_v57 = vpop.f32.mrf.mxu0 }
 0x172   : > { %5783 = vst [vmem:[#allocation7_spill] sm:$0xff] %v5352_v23  ;;  %v5355_v10 = vadd.f32 %v1923_v53, %v1772_v26  ;;  %v1777_v44 = vadd.f32 %v3782_v29, %v5262_v52 }
 0x173   : > { %v1732_v60 = vpop.f32.mrf.mxu1  ;;  %v3817_v34 = vpop.f32.mrf.mxu0 }
 0x174   : > { %5784 = vst [vmem:[#allocation4_spill] sm:$0xff] %v5355_v10  ;;  %v5358_v48 = vadd.f32 %v3816_v21, %v1777_v44  ;;  %v1775_v25 = vadd.f32 %v1732_v60, %v5265_v1 }
 0x175   : > { %v3783_v17 = vpop.f32.mrf.mxu1  ;;  %v1939_v59 = vpop.f32.mrf.mxu0 }
 0x176   : > { %5785 = vst [vmem:[#allocation17_spill] sm:$0xff] %v5358_v48  ;;  %v5361_v38 = vadd.f32 %v1936_v57, %v1775_v25  ;;  %v1778_v22 = vadd.f32 %v3783_v17, %v5268_v3 }
 0x177   : > { %v1735_v47 = vpop.f32.mrf.mxu1  ;;  %v5364_v13 = vpop.f32.mrf.mxu0 }
 0x178   : > { %5786 = vst [vmem:[#allocation6_spill] sm:$0xff] %v5361_v38  ;;  %v5366_v45 = vadd.f32 %v3817_v34, %v1778_v22  ;;  %v1776_v40 = vadd.f32 %v1735_v47, %v5271_v8 }
 0x179   : > { %v3822_v52 = vpop.f32.mrf.mxu1  ;;  %v5369_v28 = vpop.f32.mrf.mxu0 }
 0x17a   : > { %5787 = vst [vmem:[#allocation15_spill] sm:$0xff] %v5366_v45  ;;  %v5371_v36 = vadd.f32 %v1939_v59, %v1776_v40 }
 0x17b   : > { %v2028_v4 = vpop.f32.mrf.mxu1  ;;  %v5373_v1 = vpop.f32.mrf.mxu0 }
 0x17c   : > { %5788 = vst [vmem:[#allocation9_spill] sm:$0xff] %v5371_v36 }
 0x17d   : > { %v5375_v56 = vpop.f32.mrf.mxu1  ;;  %v5377_v46 = vpop.f32.mrf.mxu0 }
 0x17f   : > { %v5379_v3 = vpop.f32.mrf.mxu1  ;;  %v5381_v31 = vpop.f32.mrf.mxu0 }
 0x181   : > { %v5383_v5 = vpop.f32.mrf.mxu1  ;;  %v5385_v2 = vpop.f32.mrf.mxu0 }
 0x183   : > { %v5387_v8 = vpop.f32.mrf.mxu1  ;;  %v5389_v55 = vpop.f32.mrf.mxu0 }
 0x185   : > { %v5391_v61 = vpop.f32.mrf.mxu1  ;;  %v5393_v24 = vpop.f32.mrf.mxu0 }
 0x187   : > { %v5395_v20 = vpop.f32.mrf.mxu1  ;;  %v5397_v53 = vpop.f32.mrf.mxu0 }
 0x189   : > { %v5399_v43 = vpop.f32.mrf.mxu1  ;;  %v5401_v6 = vpop.f32.mrf.mxu0 }
 0x18b   : > { %v5403_v21 = vpop.f32.mrf.mxu1  ;;  %v5405_v26 = vpop.f32.mrf.mxu0 }
 0x18d   : > { %v5407_v29 = vpop.f32.mrf.mxu1  ;;  %v5409_v57 = vpop.f32.mrf.mxu0 }
 0x18f   : > { %v5411_v44 = vpop.f32.mrf.mxu1  ;;  %v5413_v60 = vpop.f32.mrf.mxu0 }
 0x191   : > { %v5415_v34 = vpop.f32.mrf.mxu1  ;;  %v5417_v25 = vpop.f32.mrf.mxu0 }
 0x193   : > { %v5419_v17 = vpop.f32.mrf.mxu1  ;;  %v5421_v59 = vpop.f32.mrf.mxu0 }
 0x195   : > { %v5423_v22 = vpop.f32.mrf.mxu1  ;;  %v5425_v47 = vpop.f32.mrf.mxu0 }
 0x197   : > { %v5427_v40 = vpop.f32.mrf.mxu1  ;;  %v5429_v36 = vpop.f32.mrf.mxu0 }
 0x199   : > { %v5431_v45 = vpop.f32.mrf.mxu1  ;;  %v5433_v38 = vpop.f32.mrf.mxu0 }
 0x19a   : > { %5789 = vst [vmem:[#allocation8_spill] sm:$0xff] %v5433_v38 }
 0x19b   : > { %v5435_v48 = vpop.f32.mrf.mxu1  ;;  %v5437_v10 = vpop.f32.mrf.mxu0 }
 0x19c   : > { %5790 = vst [vmem:[#allocation10_spill] sm:$0xff] %v5437_v10 }
 0x19d   : > { %v5439_v23 = vpop.f32.mrf.mxu1  ;;  %v5441_v16 = vpop.f32.mrf.mxu0 }
 0x19e   : > { %5791 = vst [vmem:[#allocation18_spill] sm:$0xff] %v5439_v23  ;;  %5792 = vst [vmem:[#allocation19_spill] sm:$0xff] %v5441_v16 }
 0x19f   : > { %v5443_v14 = vpop.f32.mrf.mxu1  ;;  %v5445_v30 = vpop.f32.mrf.mxu0 }
 0x1a0   : > { %5793 = vst [vmem:[#allocation20_spill] sm:$0xff] %v5443_v14  ;;  %5794 = vst [vmem:[#allocation21_spill] sm:$0xff] %v5445_v30 }
 0x1a1   : > { %v5447_v58 = vpop.f32.mrf.mxu1  ;;  %v5449_v32 = vpop.f32.mrf.mxu0 }
 0x1a2   : > { %5795 = vst [vmem:[#allocation22_spill] sm:$0xff] %v5447_v58  ;;  %5796 = vst [vmem:[#allocation23_spill] sm:$0xff] %v5449_v32 }
 0x1a3   : > { %v5451_v11 = vpop.f32.mrf.mxu1  ;;  %v5453_v35 = vpop.f32.mrf.mxu0 }
 0x1a4   : > { %5797 = vst [vmem:[#allocation24_spill] sm:$0xff] %v5451_v11  ;;  %5798 = vst [vmem:[#allocation25_spill] sm:$0xff] %v5453_v35 }
 0x1a5   : > { %v5455_v38 = vpop.f32.mrf.mxu1  ;;  %v5457_v9 = vpop.f32.mrf.mxu0 }
 0x1a6   : > { %5799 = vst [vmem:[#allocation26_spill] sm:$0xff] %v5455_v38  ;;  %5800 = vst [vmem:[#allocation27_spill] sm:$0xff] %v5457_v9 }
 0x1a7   : > { %v5459_v10 = vpop.f32.mrf.mxu1  ;;  %v5461_v23 = vpop.f32.mrf.mxu0 }
 0x1a8   : > { %5801 = vst [vmem:[#allocation28_spill] sm:$0xff] %v5459_v10  ;;  %5802 = vst [vmem:[#allocation29_spill] sm:$0xff] %v5461_v23 }
 0x1a9   : > { %v5463_v16 = vpop.f32.mrf.mxu1  ;;  %v5465_v14 = vpop.f32.mrf.mxu0 }
 0x1aa   : > { %5803 = vst [vmem:[#allocation30_spill] sm:$0xff] %v5463_v16  ;;  %5804 = vst [vmem:[#allocation31_spill] sm:$0xff] %v5465_v14  ;;  %v2157_v14 = vadd.f32 %v3822_v52, %v5274_v0  ;;  %v2156_v0 = vadd.f32 %v5379_v3, %v5283_v62 }
 0x1ab   : > { %v5467_v30 = vpop.f32.mrf.mxu1  ;;  %v5469_v58 = vpop.f32.mrf.mxu0 }
 0x1ac   : > { %5805 = vst [vmem:[#allocation32_spill] sm:$0xff] %v5467_v30  ;;  %5806 = vst [vmem:[#allocation33_spill] sm:$0xff] %v5469_v58 }
 0x1ad   : > { %v5471_v32 = vpop.f32.mrf.mxu1  ;;  %v5473_v11 = vpop.f32.mrf.mxu0 }
 0x1ae   : > { %5807 = vst [vmem:[#allocation34_spill] sm:$0xff] %v5471_v32  ;;  %5808 = vst [vmem:[#allocation35_spill] sm:$0xff] %v5473_v11  ;;  %v2155_v11 = vadd.f32 %v2028_v4, %v5277_v15  ;;  %v5506_v15 = vld [vmem:[%s5706_s3] ss:$0 sm:$0xff] }
 0x1af   : > { %v5475_v35 = vpop.f32.mrf.mxu1  ;;  %v5477_v38 = vpop.f32.mrf.mxu0 }
 0x1b0   : > { %5809 = vst [vmem:[#allocation36_spill] sm:$0xff] %v5475_v35  ;;  %5810 = vst [vmem:[#allocation37_spill] sm:$0xff] %v5477_v38 }
 0x1b1   : > { %v5479_v9 = vpop.f32.mrf.mxu1  ;;  %v5481_v10 = vpop.f32.mrf.mxu0 }
 0x1b2   : > { %5811 = vst [vmem:[#allocation38_spill] sm:$0xff] %v5479_v9  ;;  %5812 = vst [vmem:[#allocation39_spill] sm:$0xff] %v5481_v10  ;;  %v2598_v9 = vadd.f32 %v5364_v13, %v2157_v14  ;;  %v2158_v10 = vadd.f32 %v5375_v56, %v5280_v49 }
 0x1b3   : > { %v5483_v23 = vpop.f32.mrf.mxu1  ;;  %v5485_v16 = vpop.f32.mrf.mxu0 }
 0x1b4   : > { %5813 = vst [vmem:[#allocation40_spill] sm:$0xff] %v5483_v23  ;;  %5814 = vst [vmem:[#allocation41_spill] sm:$0xff] %v5485_v16  ;;  %v2596_v16 = vadd.f32 %v5369_v28, %v2155_v11  ;;  %v2599_v49 = vadd.f32 %v5373_v1, %v2158_v10  ;;  %v2159_v11 = vadd.f32 %v5387_v8, %v5289_v12 }
 0x1b5   : > { %v5488_v30 = vpop.f32.mrf.mxu1  ;;  %v5490_v58 = vpop.f32.mrf.mxu0 }
 0x1b6   : > { %5815 = vst [vmem:[#allocation42_spill] sm:$0xff] %v5490_v58  ;;  %v2161_v58 = vadd.f32 %v5383_v5, %v5286_v54 }
 0x1b7   : > { %v5493_v35 = vpop.f32.mrf.mxu1  ;;  %v3924_v38 = vpop.f32.mrf.mxu0 }
 0x1b8   : > { %5816 = vst [vmem:[#allocation43_spill] sm:$0xff] %v5493_v35  ;;  %v2602_v5 = vadd.f32 %v5381_v31, %v2161_v58  ;;  %v2162_v35 = vadd.f32 %v5391_v61, %v5292_v42  ;;  %v2160_v58 = vadd.f32 %v5395_v20, %v5295_v37 }
 0x1b9   : > { %v3890_v23 = vpop.f32.mrf.mxu1  ;;  %v2877_v32 = vpop.f32.mrf.mxu0 }
 0x1ba   : > { %v2802_v52 = vadd.f32 %v3890_v23, %v2598_v9  ;;  %v2597_v23 = vadd.f32 %v5377_v46, %v2156_v0  ;;  %v2600_v46 = vadd.f32 %v5385_v2, %v2159_v11  ;;  %v2601_v11 = vadd.f32 %v5393_v24, %v2160_v58 }
 0x1bb   : > { %v2673_v14 = vpop.f32.mrf.mxu1  ;;  %v3925_v13 = vpop.f32.mrf.mxu0  ;;  %v2169_v58 = vadd.f32 %v5415_v34, %v5310_v19 }
 0x1bc   : > { %v3006_v4 = vadd.f32 %v3924_v38, %v2802_v52  ;;  %v2800_v56 = vadd.f32 %v2673_v14, %v2596_v16  ;;  %v2603_v14 = vadd.f32 %v5389_v55, %v2162_v35 }
 0x1bd   : > { %v3891_v62 = vpop.f32.mrf.mxu1  ;;  %v2880_v9 = vpop.f32.mrf.mxu0 }
 0x1be   : > { %v3045_v54 = vadd.f32 %v5506_v15, %v3006_v4  ;;  %v3004_v28 = vadd.f32 %v2877_v32, %v2800_v56  ;;  %v2803_v3 = vadd.f32 %v3891_v62, %v2599_v49  ;;  %v2163_v62 = vadd.f32 %v5403_v21, %v5301_v41 }
 0x1bf   : > { %v2676_v12 = vpop.f32.mrf.mxu1  ;;  %v3928_v16 = vpop.f32.mrf.mxu0 }
 0x1c0   : > { %v3077_v10 = vmax.f32 %v3045_v54, 0.0  ;;  %v3043_v38 = vadd.f32 %v5506_v15, %v3004_v28  ;;  %v3007_v1 = vadd.f32 %v3925_v13, %v2803_v3  ;;  %v2801_v32 = vadd.f32 %v2676_v12, %v2597_v23 }
 0x1c1   : > { %v3894_v42 = vpop.f32.mrf.mxu1  ;;  %v2893_v31 = vpop.f32.mrf.mxu0  ;;  %v2165_v13 = vadd.f32 %v5399_v43, %v5298_v51  ;;  %v2166_v28 = vadd.f32 %v5407_v29, %v5304_v18 }
 0x1c2   : > { %3109 = vst.msk [vmem:[%s5520_s27 + $0x10] sm:$0xff] %vm458_vm3, %v3077_v10  ;;  %v3075_v8 = vmax.f32 %v3043_v38, 0.0  ;;  %v3046_v61 = vadd.f32 %v5506_v15, %v3007_v1  ;;  %v3005_v0 = vadd.f32 %v2880_v9, %v2801_v32  ;;  %v2806_v52 = vadd.f32 %v3894_v42, %v2602_v5 }
 0x1c3   : > { %v2689_v49 = vpop.f32.mrf.mxu1  ;;  %v3929_v2 = vpop.f32.mrf.mxu0  ;;  %v2606_v54 = vadd.f32 %v5397_v53, %v2165_v13  ;;  %v2164_v10 = vadd.f32 %v5411_v44, %v5307_v7 }
 0x1c4   : > { %3107 = vst.msk [vmem:[%s5520_s27] sm:$0xff] %vm458_vm3, %v3075_v8  ;;  %v3078_v37 = vmax.f32 %v3046_v61, 0.0  ;;  %v3044_v20 = vadd.f32 %v5506_v15, %v3005_v0  ;;  %v3010_v4 = vadd.f32 %v3928_v16, %v2806_v52  ;;  %v2804_v56 = vadd.f32 %v2689_v49, %v2600_v46 }
 0x1c5   : > { %v3895_v9 = vpop.f32.mrf.mxu1  ;;  %v2896_v35 = vpop.f32.mrf.mxu0  ;;  %v2604_v16 = vadd.f32 %v5401_v6, %v2163_v62  ;;  %v2607_v46 = vadd.f32 %v5405_v26, %v2166_v28  ;;  %v2605_v61 = vadd.f32 %v5409_v57, %v2164_v10  ;;  %v2167_v0 = vadd.f32 %v5419_v17, %v5313_v50 }
 0x1c6   : > { %3110 = vst.msk [vmem:[%s5520_s27 + $0x18] sm:$0xff] %vm458_vm3, %v3078_v37  ;;  %v3076_v51 = vmax.f32 %v3044_v20, 0.0  ;;  %v3049_v55 = vadd.f32 %v5506_v15, %v3010_v4  ;;  %v3008_v43 = vadd.f32 %v2893_v31, %v2804_v56  ;;  %v2807_v23 = vadd.f32 %v3895_v9, %v2603_v14 }
 0x1c7   : > { %v2692_v3 = vpop.f32.mrf.mxu1  ;;  %v3932_v24 = vpop.f32.mrf.mxu0  ;;  %v2610_v49 = vadd.f32 %v5413_v60, %v2169_v58  ;;  %v2608_v56 = vadd.f32 %v5417_v25, %v2167_v0  ;;  %v5823_v0 = vld [vmem:[#allocation13_spill] sm:$0xff] }
 0x1c8   : > { %3108 = vst.msk [vmem:[%s5520_s27 + $0x8] sm:$0xff] %vm458_vm3, %v3076_v51  ;;  %v3081_v41 = vmax.f32 %v3049_v55, 0.0  ;;  %v3047_v21 = vadd.f32 %v5506_v15, %v3008_v43  ;;  %v3011_v5 = vadd.f32 %v3929_v2, %v2807_v23  ;;  %v2805_v12 = vadd.f32 %v2692_v3, %v2601_v11 }
 0x1c9   : > { %v3898_v38 = vpop.f32.mrf.mxu1  ;;  %v2909_v53 = vpop.f32.mrf.mxu0  ;;  %v2170_v2 = vadd.f32 %v5423_v22, %v5316_v63  ;;  %v2168_v11 = vadd.f32 %v5427_v40, %v5319_v33  ;;  %v2173_v55 = vadd.f32 %v5431_v45, %v5322_v39  ;;  %v2171_v3 = vadd.f32 %v5435_v48, %v5325_v27 }
 0x1ca   : > { %3113 = vst.msk [vmem:[%s5520_s27 + $0x30] sm:$0xff] %vm458_vm3, %v3081_v41  ;;  %v3079_v18 = vmax.f32 %v3047_v21, 0.0  ;;  %v3050_v29 = vadd.f32 %v5506_v15, %v3011_v5  ;;  %v3009_v1 = vadd.f32 %v2896_v35, %v2805_v12  ;;  %v2810_v32 = vadd.f32 %v3898_v38, %v2606_v54  ;;  %v5817_v12 = vld [vmem:[#allocation11_spill] sm:$0xff] }
 0x1cb   : > { %v2705_v42 = vpop.f32.mrf.mxu1  ;;  %v3933_v6 = vpop.f32.mrf.mxu0  ;;  %v2611_v51 = vadd.f32 %v5421_v59, %v2170_v2  ;;  %v2609_v28 = vadd.f32 %v5425_v47, %v2168_v11  ;;  %v2614_v5 = vadd.f32 %v5429_v36, %v2173_v55 }
 0x1cc   : > { %3111 = vst.msk [vmem:[%s5520_s27 + $0x20] sm:$0xff] %vm458_vm3, %v3079_v18  ;;  %v3082_v7 = vmax.f32 %v3050_v29, 0.0  ;;  %v3048_v44 = vadd.f32 %v5506_v15, %v3009_v1  ;;  %v3014_v31 = vadd.f32 %v3932_v24, %v2810_v32  ;;  %v2808_v8 = vadd.f32 %v2705_v42, %v2604_v16  ;;  %v5818_v16 = vld [vmem:[#allocation18_spill] sm:$0xff]  ;;  %v5819_v29 = vld [vmem:[#allocation8_spill] sm:$0xff] }
 0x1cd   : > { %v3899_v52 = vpop.f32.mrf.mxu1  ;;  %v2912_v26 = vpop.f32.mrf.mxu0  ;;  %v2174_v10 = vadd.f32 %v5818_v16, %v5817_v12  ;;  %v2612_v1 = vadd.f32 %v5819_v29, %v2171_v3  ;;  %v5820_v32 = vld [vmem:[#allocation12_spill] sm:$0xff] }
 0x1ce   : > { %3114 = vst.msk [vmem:[%s5520_s27 + $0x38] sm:$0xff] %vm458_vm3, %v3082_v7  ;;  %v3080_v19 = vmax.f32 %v3048_v44, 0.0  ;;  %v3053_v34 = vadd.f32 %v5506_v15, %v3014_v31  ;;  %v3012_v14 = vadd.f32 %v2909_v53, %v2808_v8  ;;  %v2811_v13 = vadd.f32 %v3899_v52, %v2607_v46  ;;  %v5821_v46 = vld [vmem:[#allocation20_spill] sm:$0xff]  ;;  %v5822_v8 = vld [vmem:[#allocation10_spill] sm:$0xff] }
 0x1cf   : > { %v2708_v37 = vpop.f32.mrf.mxu1  ;;  %v3936_v57 = vpop.f32.mrf.mxu0  ;;  %v2172_v58 = vadd.f32 %v5821_v46, %v5820_v32  ;;  %v5824_v52 = vld [vmem:[#allocation22_spill] sm:$0xff] }
 0x1d0   : > { %3112 = vst.msk [vmem:[%s5520_s27 + $0x28] sm:$0xff] %vm458_vm3, %v3080_v19  ;;  %v3085_v50 = vmax.f32 %v3053_v34, 0.0  ;;  %v3051_v17 = vadd.f32 %v5506_v15, %v3012_v14  ;;  %v3015_v20 = vadd.f32 %v3933_v6, %v2811_v13  ;;  %v2809_v4 = vadd.f32 %v2708_v37, %v2605_v61  ;;  %v5825_v37 = vld [vmem:[#allocation19_spill] sm:$0xff] }
 0x1d1   : > { %v3902_v62 = vpop.f32.mrf.mxu1  ;;  %v2925_v60 = vpop.f32.mrf.mxu0  ;;  %v2615_v61 = vadd.f32 %v5822_v8, %v2174_v10  ;;  %v5834_v10 = vld [vmem:[#allocation25_spill] sm:$0xff] }
 0x1d2   : > { %3117 = vst.msk [vmem:[%s5520_s27 + $0x50] sm:$0xff] %vm458_vm3, %v3085_v50  ;;  %v3083_v63 = vmax.f32 %v3051_v17, 0.0  ;;  %v3054_v22 = vadd.f32 %v5506_v15, %v3015_v20  ;;  %v3013_v9 = vadd.f32 %v2912_v26, %v2809_v4  ;;  %v2814_v35 = vadd.f32 %v3902_v62, %v2610_v49  ;;  %v5826_v50 = vld [vmem:[#allocation3_spill] sm:$0xff]  ;;  %v5827_v17 = vld [vmem:[#allocation24_spill] sm:$0xff] }
 0x1d3   : > { %v2721_v43 = vpop.f32.mrf.mxu1  ;;  %v3937_v25 = vpop.f32.mrf.mxu0  ;;  %v2177_v26 = vadd.f32 %v5824_v52, %v5823_v0  ;;  %v2175_v20 = vadd.f32 %v5827_v17, %v5826_v50 }
 0x1d4   : > { %3115 = vst.msk [vmem:[%s5520_s27 + $0x40] sm:$0xff] %vm458_vm3, %v3083_v63  ;;  %v3086_v33 = vmax.f32 %v3054_v22, 0.0  ;;  %v3052_v40 = vadd.f32 %v5506_v15, %v3013_v9  ;;  %v3018_v23 = vadd.f32 %v3936_v57, %v2814_v35  ;;  %v2812_v54 = vadd.f32 %v2721_v43, %v2608_v56  ;;  %v5828_v22 = vld [vmem:[#allocation21_spill] sm:$0xff]  ;;  %v5829_v35 = vld [vmem:[#allocation2_spill] sm:$0xff] }
 0x1d5   : > { %v3903_v24 = vpop.f32.mrf.mxu1  ;;  %v2928_v59 = vpop.f32.mrf.mxu0  ;;  %v2613_v57 = vadd.f32 %v5825_v37, %v2172_v58  ;;  %v2618_v9 = vadd.f32 %v5828_v22, %v2177_v26  ;;  %v5837_v58 = vld [vmem:[#allocation27_spill] sm:$0xff]  ;;  %v5840_v26 = vld [vmem:[#allocation29_spill] sm:$0xff] }
 0x1d6   : > { %3118 = vst.msk [vmem:[%s5520_s27 + $0x58] sm:$0xff] %vm458_vm3, %v3086_v33  ;;  %v3084_v39 = vmax.f32 %v3052_v40, 0.0  ;;  %v3057_v45 = vadd.f32 %v5506_v15, %v3018_v23  ;;  %v3016_v41 = vadd.f32 %v2925_v60, %v2812_v54  ;;  %v2815_v21 = vadd.f32 %v3903_v24, %v2611_v51  ;;  %v5830_v51 = vld [vmem:[#allocation26_spill] sm:$0xff] }
 0x1d7   : > { %v2724_v38 = vpop.f32.mrf.mxu1  ;;  %v3940_v47 = vpop.f32.mrf.mxu0  ;;  %v2178_v55 = vadd.f32 %v5830_v51, %v5829_v35  ;;  %v5832_v24 = vld [vmem:[#allocation14_spill] sm:$0xff] }
 0x1d8   : > { %3116 = vst.msk [vmem:[%s5520_s27 + $0x48] sm:$0xff] %vm458_vm3, %v3084_v39  ;;  %v3089_v27 = vmax.f32 %v3057_v45, 0.0  ;;  %v3055_v48 = vadd.f32 %v5506_v15, %v3016_v41  ;;  %v3019_v53 = vadd.f32 %v3937_v25, %v2815_v21  ;;  %v2813_v18 = vadd.f32 %v2724_v38, %v2609_v28  ;;  %v5831_v28 = vld [vmem:[#allocation23_spill] sm:$0xff] }
 0x1d9   : > { %v3906_v42 = vpop.f32.mrf.mxu1  ;;  %v2941_v36 = vpop.f32.mrf.mxu0  ;;  %v2616_v3 = vadd.f32 %v5831_v28, %v2175_v20  ;;  %v2619_v38 = vadd.f32 %v5834_v10, %v2178_v55  ;;  %v5843_v20 = vld [vmem:[#allocation31_spill] sm:$0xff]  ;;  %v5846_v55 = vld [vmem:[#allocation33_spill] sm:$0xff] }
 0x1da   : > { %3121 = vst.msk [vmem:[%s5520_s27 + $0x70] sm:$0xff] %vm458_vm3, %v3089_v27  ;;  %v3087_v6 = vmax.f32 %v3055_v48, 0.0  ;;  %v3058_v7 = vadd.f32 %v5506_v15, %v3019_v53  ;;  %v3017_v44 = vadd.f32 %v2928_v59, %v2813_v18  ;;  %v2818_v31 = vadd.f32 %v3906_v42, %v2614_v5  ;;  %v5833_v59 = vld [vmem:[#allocation28_spill] sm:$0xff]  ;;  %v5836_v27 = vld [vmem:[#allocation30_spill] sm:$0xff] }
 0x1db   : > { %v2737_v19 = vpop.f32.mrf.mxu1  ;;  %v3941_v34 = vpop.f32.mrf.mxu0  ;;  %v2176_v39 = vadd.f32 %v5833_v59, %v5832_v24 }
 0x1dc   : > { %3119 = vst.msk [vmem:[%s5520_s27 + $0x60] sm:$0xff] %vm458_vm3, %v3087_v6  ;;  %v3090_v14 = vmax.f32 %v3058_v7, 0.0  ;;  %v3056_v13 = vadd.f32 %v5506_v15, %v3017_v44  ;;  %v3022_v49 = vadd.f32 %v3940_v47, %v2818_v31  ;;  %v2816_v2 = vadd.f32 %v2737_v19, %v2612_v1  ;;  %v5835_v47 = vld [vmem:[#allocation16_spill] sm:$0xff] }
 0x1dd   : > { %v3907_v4 = vpop.f32.mrf.mxu1  ;;  %v2944_v56 = vpop.f32.mrf.mxu0  ;;  %v2181_v48 = vadd.f32 %v5836_v27, %v5835_v47  ;;  %v2617_v42 = vadd.f32 %v5837_v58, %v2176_v39  ;;  %v5839_v6 = vld [vmem:[#allocation32_spill] sm:$0xff]  ;;  %v5849_v39 = vld [vmem:[#allocation35_spill] sm:$0xff] }
 0x1de   : > { %3122 = vst.msk [vmem:[%s5520_s27 + $0x78] sm:$0xff] %vm458_vm3, %v3090_v14  ;;  %v3088_v11 = vmax.f32 %v3056_v13, 0.0  ;;  %v3061_v62 = vadd.f32 %v5506_v15, %v3022_v49  ;;  %v3020_v60 = vadd.f32 %v2941_v36, %v2816_v2  ;;  %v2819_v63 = vadd.f32 %v3907_v4, %v2615_v61  ;;  %v5838_v36 = vld [vmem:[#allocation5_spill] sm:$0xff]  ;;  %v5842_v14 = vld [vmem:[#allocation34_spill] sm:$0xff] }
 0x1df   : > { %v2740_v43 = vpop.f32.mrf.mxu1  ;;  %v3944_v25 = vpop.f32.mrf.mxu0  ;;  %v2179_v7 = vadd.f32 %v5839_v6, %v5838_v36  ;;  %v2622_v19 = vadd.f32 %v5840_v26, %v2181_v48  ;;  %v5852_v48 = vld [vmem:[#allocation37_spill] sm:$0xff]  ;;  %v5854_v6 = vld [vmem:[#allocation39_spill] sm:$0xff] }
 0x1e0   : > { %3120 = vst.msk [vmem:[%s5520_s27 + $0x68] sm:$0xff] %vm458_vm3, %v3088_v11  ;;  %v3093_v33 = vmax.f32 %v3061_v62, 0.0  ;;  %v3059_v40 = vadd.f32 %v5506_v15, %v3020_v60  ;;  %v3023_v23 = vadd.f32 %v3941_v34, %v2819_v63  ;;  %v2817_v54 = vadd.f32 %v2740_v43, %v2613_v57  ;;  %v5841_v34 = vld [vmem:[#allocation7_spill] sm:$0xff]  ;;  %v5845_v11 = vld [vmem:[#allocation36_spill] sm:$0xff] }
 0x1e1   : > { %v3910_v45 = vpop.f32.mrf.mxu1  ;;  %v2957_v41 = vpop.f32.mrf.mxu0  ;;  %v2182_v13 = vadd.f32 %v5842_v14, %v5841_v34  ;;  %v2620_v4 = vadd.f32 %v5843_v20, %v2179_v7  ;;  %v5857_v34 = vld [vmem:[#allocation41_spill] sm:$0xff] }
 0x1e2   : > { %3125 = vst.msk [vmem:[%s5520_s27 + $0x90] sm:$0xff] %vm458_vm3, %v3093_v33  ;;  %v3091_v21 = vmax.f32 %v3059_v40, 0.0  ;;  %v3062_v5 = vadd.f32 %v5506_v15, %v3023_v23  ;;  %v3021_v12 = vadd.f32 %v2944_v56, %v2817_v54  ;;  %v2822_v16 = vadd.f32 %v3910_v45, %v2618_v9  ;;  %v5844_v56 = vld [vmem:[#allocation4_spill] sm:$0xff]  ;;  %v5848_v33 = vld [vmem:[#allocation38_spill] sm:$0xff] }
 0x1e3   : > { %v2753_v53 = vpop.f32.mrf.mxu1  ;;  %v3945_v18 = vpop.f32.mrf.mxu0  ;;  %v2180_v62 = vadd.f32 %v5845_v11, %v5844_v56  ;;  %v2623_v43 = vadd.f32 %v5846_v55, %v2182_v13 }
 0x1e4   : > { %3123 = vst.msk [vmem:[%s5520_s27 + $0x80] sm:$0xff] %vm458_vm3, %v3091_v21  ;;  %v3094_v29 = vmax.f32 %v3062_v5, 0.0  ;;  %v3060_v1 = vadd.f32 %v5506_v15, %v3021_v12  ;;  %v3026_v32 = vadd.f32 %v3944_v25, %v2822_v16  ;;  %v2820_v46 = vadd.f32 %v2753_v53, %v2616_v3  ;;  %v5847_v25 = vld [vmem:[#allocation17_spill] sm:$0xff]  ;;  %v5851_v21 = vld [vmem:[#allocation40_spill] sm:$0xff] }
 0x1e5   : > { %v3911_v44 = vpop.f32.mrf.mxu1  ;;  %v2960_v31 = vpop.f32.mrf.mxu0  ;;  %v2185_v40 = vadd.f32 %v5848_v33, %v5847_v25  ;;  %v2621_v45 = vadd.f32 %v5849_v39, %v2180_v62 }
 0x1e6   : > { %3126 = vst.msk [vmem:[%s5520_s27 + $0x98] sm:$0xff] %vm458_vm3, %v3094_v29  ;;  %v3092_v8 = vmax.f32 %v3060_v1, 0.0  ;;  %v3065_v61 = vadd.f32 %v5506_v15, %v3026_v32  ;;  %v3024_v0 = vadd.f32 %v2957_v41, %v2820_v46  ;;  %v2823_v52 = vadd.f32 %v3911_v44, %v2619_v38  ;;  %v5850_v41 = vld [vmem:[#allocation6_spill] sm:$0xff]  ;;  %v5855_v44 = vld [vmem:[#allocation9_spill] sm:$0xff] }
 0x1e7   : > { %v2756_v49 = vpop.f32.mrf.mxu1  ;;  %v3948_v2 = vpop.f32.mrf.mxu0  ;;  %v2183_v5 = vadd.f32 %v5851_v21, %v5850_v41  ;;  %v2626_v53 = vadd.f32 %v5852_v48, %v2185_v40 }
 0x1e8   : > { %3124 = vst.msk [vmem:[%s5520_s27 + $0x88] sm:$0xff] %vm458_vm3, %v3092_v8  ;;  %v3097_v37 = vmax.f32 %v3065_v61, 0.0  ;;  %v3063_v57 = vadd.f32 %v5506_v15, %v3024_v0  ;;  %v3027_v50 = vadd.f32 %v3945_v18, %v2823_v52  ;;  %v2821_v17 = vadd.f32 %v2756_v49, %v2617_v42  ;;  %v5853_v18 = vld [vmem:[#allocation15_spill] sm:$0xff] }
 0x1e9   : > { %v3914_v60 = vpop.f32.mrf.mxu1  ;;  %v2973_v63 = vpop.f32.mrf.mxu0  ;;  %v2186_v29 = vadd.f32 %v5488_v30, %v5853_v18  ;;  %v2624_v7 = vadd.f32 %v5854_v6, %v2183_v5 }
 0x1ea   : > { %3129 = vst.msk [vmem:[%s5520_s27 + $0xb0] sm:$0xff] %vm458_vm3, %v3097_v37  ;;  %v3095_v22 = vmax.f32 %v3063_v57, 0.0  ;;  %v3066_v9 = vadd.f32 %v5506_v15, %v3027_v50  ;;  %v3025_v35 = vadd.f32 %v2960_v31, %v2821_v17  ;;  %v2826_v51 = vadd.f32 %v3914_v60, %v2622_v19  ;;  %v5856_v31 = vld [vmem:[#allocation43_spill] sm:$0xff]  ;;  %v5858_v50 = vld [vmem:[#allocation42_spill] sm:$0xff] }
 0x1eb   : > { %v2769_v23 = vpop.f32.mrf.mxu1  ;;  %v3949_v54 = vpop.f32.mrf.mxu0  ;;  %v2184_v8 = vadd.f32 %v5856_v31, %v5855_v44  ;;  %v2627_v14 = vadd.f32 %v5857_v34, %v2186_v29 }
 0x1ec   : > { %3127 = vst.msk [vmem:[%s5520_s27 + $0xa0] sm:$0xff] %vm458_vm3, %v3095_v22  ;;  %v3098_v28 = vmax.f32 %v3066_v9, 0.0  ;;  %v3064_v3 = vadd.f32 %v5506_v15, %v3025_v35  ;;  %v3030_v24 = vadd.f32 %v3948_v2, %v2826_v51  ;;  %v2824_v59 = vadd.f32 %v2769_v23, %v2620_v4 }
 0x1ed   : > { %v3915_v12 = vpop.f32.mrf.mxu1  ;;  %v2976_v16 = vpop.f32.mrf.mxu0  ;;  %v2625_v17 = vadd.f32 %v5858_v50, %v2184_v8 }
 0x1ee   : > { %3130 = vst.msk [vmem:[%s5520_s27 + $0xb8] sm:$0xff] %vm458_vm3, %v3098_v28  ;;  %v3096_v10 = vmax.f32 %v3064_v3, 0.0  ;;  %v3069_v38 = vadd.f32 %v5506_v15, %v3030_v24  ;;  %v3028_v47 = vadd.f32 %v2973_v63, %v2824_v59  ;;  %v2827_v27 = vadd.f32 %v3915_v12, %v2623_v43 }
 0x1ef   : > { %v2772_v1 = vpop.f32.mrf.mxu1  ;;  %v3952_v32 = vpop.f32.mrf.mxu0 }
 0x1f0   : > { %3128 = vst.msk [vmem:[%s5520_s27 + $0xa8] sm:$0xff] %vm458_vm3, %v3096_v10  ;;  %v3101_v46 = vmax.f32 %v3069_v38, 0.0  ;;  %v3067_v58 = vadd.f32 %v5506_v15, %v3028_v47  ;;  %v3031_v42 = vadd.f32 %v3949_v54, %v2827_v27  ;;  %v2825_v36 = vadd.f32 %v2772_v1, %v2621_v45 }
 0x1f1   : > { %v3918_v61 = vpop.f32.mrf.mxu1  ;;  %v2989_v0 = vpop.f32.mrf.mxu0 }
 0x1f2   : > { %3133 = vst.msk [vmem:[%s5520_s27 + $0xd0] sm:$0xff] %vm458_vm3, %v3101_v46  ;;  %v3099_v30 = vmax.f32 %v3067_v58, 0.0  ;;  %v3070_v52 = vadd.f32 %v5506_v15, %v3031_v42  ;;  %v3029_v26 = vadd.f32 %v2976_v16, %v2825_v36  ;;  %v2830_v19 = vadd.f32 %v3918_v61, %v2626_v53 }
 0x1f3   : > { %v2785_v13 = vpop.f32.mrf.mxu1  ;;  %v3953_v4 = vpop.f32.mrf.mxu0 }
 0x1f4   : > { %3131 = vst.msk [vmem:[%s5520_s27 + $0xc0] sm:$0xff] %vm458_vm3, %v3099_v30  ;;  %v3102_v49 = vmax.f32 %v3070_v52, 0.0  ;;  %v3068_v2 = vadd.f32 %v5506_v15, %v3029_v26  ;;  %v3034_v37 = vadd.f32 %v3952_v32, %v2830_v19  ;;  %v2828_v57 = vadd.f32 %v2785_v13, %v2624_v7 }
 0x1f5   : > { %v3919_v20 = vpop.f32.mrf.mxu1  ;;  %v2992_v55 = vpop.f32.mrf.mxu0 }
 0x1f6   : > { %3134 = vst.msk [vmem:[%s5520_s27 + $0xd8] sm:$0xff] %vm458_vm3, %v3102_v49  ;;  %v3100_v56 = vmax.f32 %v3068_v2, 0.0  ;;  %v3073_v11 = vadd.f32 %v5506_v15, %v3034_v37  ;;  %v3032_v62 = vadd.f32 %v2989_v0, %v2828_v57  ;;  %v2831_v60 = vadd.f32 %v3919_v20, %v2627_v14 }
 0x1f7   : > { %v2788_v63 = vpop.f32.mrf.mxu1 }
 0x1f8   : > { %3132 = vst.msk [vmem:[%s5520_s27 + $0xc8] sm:$0xff] %vm458_vm3, %v3100_v56  ;;  %v3105_v22 = vmax.f32 %v3073_v11, 0.0  ;;  %v3071_v9 = vadd.f32 %v5506_v15, %v3032_v62  ;;  %v3035_v35 = vadd.f32 %v3953_v4, %v2831_v60  ;;  %v2829_v51 = vadd.f32 %v2788_v63, %v2625_v17 }
 0x1fa   : > { %3137 = vst.msk [vmem:[%s5520_s27 + $0xf0] sm:$0xff] %vm458_vm3, %v3105_v22  ;;  %v3103_v43 = vmax.f32 %v3071_v9, 0.0  ;;  %v3074_v25 = vadd.f32 %v5506_v15, %v3035_v35  ;;  %v3033_v33 = vadd.f32 %v2992_v55, %v2829_v51 }
 0x1fc   : > { %3135 = vst.msk [vmem:[%s5520_s27 + $0xe0] sm:$0xff] %vm458_vm3, %v3103_v43  ;;  %v3106_v40 = vmax.f32 %v3074_v25, 0.0  ;;  %v3072_v23 = vadd.f32 %v5506_v15, %v3033_v33 }
 0x1fe   : > { %3138 = vst.msk [vmem:[%s5520_s27 + $0xf8] sm:$0xff] %vm458_vm3, %v3106_v40  ;;  %v3104_v54 = vmax.f32 %v3072_v23, 0.0 }
 0x200   : > { %3136 = vst.msk [vmem:[%s5520_s27 + $0xe8] sm:$0xff] %vm458_vm3, %v3104_v54 }
 0x201 PF: > { %s14_s17 = sadd.s32 1, %s4047_s17   ;;  %s5859_s15 = smov %s4043_s16 }
 0x202   : > { %p11_p5 = scmp.ge.s32.totalorder %s14_s17, 4   ;;  %s5860_s16 = smov %s5862_s18 }
 0x204   :  { %13 = sbr.rel (!%p11_p5) target bundleno = 2 (0x2), region = 77 }

// kernel: upconv_forward.4
= control target key start
LH: loop header
LB: loop body
LE: loop exit
PB: predicated region body
PF: predicated region fallthrough
CT: control target
= control target key end

     0   :  { %s8047_s24 = smov 0   ;;  %s8049_s25 = smov 0   ;;  %s11305_s0 = inlined_call_operand.vmem [shape: bf16[2,18,18,4], index: 0, kind: input, shape index: {}, may-alias: {0,1}]   ;;  %s11306_s1 = inlined_call_operand.vmem [shape: bf16[2,18,18,4], index: 1, kind: input, shape index: {}, may-alias: {0,1}]   ;;  %s11307_s2 = inlined_call_operand.vmem [shape: bf16[2,18,18,4], index: 2, kind: input, shape index: {}, may-alias: {2,3}]   ;;  %s11308_s3 = inlined_call_operand.vmem [shape: bf16[2,18,18,4], index: 3, kind: input, shape index: {}, may-alias: {2,3}]   ;;  %s11309_s4 = inlined_call_operand.vmem [shape: bf16[3,3,4,4], index: 4, kind: input, shape index: {}]   ;;  %s11310_s5 = inlined_call_operand.vmem [shape: bf16[3,3,4,4], index: 5, kind: input, shape index: {}]   ;;  %s11311_s6 = inlined_call_operand.vmem [shape: f32[1,4], index: 6, kind: input, shape index: {}]   ;;  %s11312_s7 = inlined_call_operand.vmem [shape: bf16[2,16,16,4], index: 7, kind: output, shape index: {}]  }
   0x1   :  { %s8051_s26 = smov 0  }
   0x2 LB: > { %s29_s27 = sadd.s32 1, %s8001_s25  ;;  %p6400_p0 = scmp.ge.s32.totalorder %s8005_s26, 1  ;;  %s8005_s26 = sphi %s8051_s26, %s17_s26   ;;  %s8001_s25 = sphi %s8049_s25, %s11858_s25   ;;  %s7997_s24 = sphi %s8047_s24, %s11857_s24  }
   0x3   : > { %p31_p1 = scmp.ge.s32.totalorder %s29_s27, 2  ;;  %p349_p2 = scmp.lt.s32.totalorder %s8005_s26, 3 }
   0x5   : > { %s11860_s27 = smov (%p31_p1, %s29_s27), 0  ;;  %p350_p3 = pnand %p6400_p0, %p349_p2 }
   0x7   : > { %353 = sbr.rel (%p350_p3) target bundleno = 803 (0x323), region = 48 }
   0xc   : > { %v6407_v0 = vld [vmem:[%s11309_s4 + $0x6] sm:$0x3]  ;;  %vm705_vm0 = vcmask 1041408   ;;  %v573_v1 = vld [vmem:[%s11309_s4] sm:$0x3]  ;;  %p441_p4 = scmp.lt.s32.totalorder %s7997_s24, 1 }
   0xd   : > { %7845 = vmatprep.subr.msk.bf16.mxu0 %vm705_vm0, %v6407_v0  ;;  %v707_v2 = vsel %vm705_vm0, %v6407_v0, 0  ;;  %7846 = vmatprep.subr.msk.bf16.mxu1 %vm705_vm0, %v573_v1  ;;  %v879_v3 = vsel %vm705_vm0, %v573_v1, 0  ;;  %v6457_v4 = vld [vmem:[%s11309_s4 + $0xc] sm:$0x3]  ;;  %v6475_v5 = vld [vmem:[%s11309_s4 + $0x2] sm:$0x3] }
   0xe   : > { %7234 = vmatpush3.bf16.msra.mxu0 %v707_v2  ;;  %7268 = vmatpush3.bf16.msra.mxu1 %v879_v3  ;;  %s11862_s24 = smov (!%p441_p4, %s7997_s24), 1  ;;  %vm656_vm1 = vcmask 31744   ;;  %v1782_v12 = vsel %vm705_vm0, %v6475_v5, 0  ;;  %v8122_v15 = vld [vmem:[%s11309_s4 + $0xe] sm:$0x3]  ;;  %v1053_v17 = vsel %vm705_vm0, %v6457_v4, 0 }
   0xf   : > { %7847 = vmatprep.subr.msk.bf16.mxu0 %vm705_vm0, %v6457_v4  ;;  %s8085_s13 = smul.u32 216, %s11862_s24  ;;  %7848 = vmatprep.subr.msk.bf16.mxu1 %vm705_vm0, %v6475_v5  ;;  %v6508_v20 = vld [vmem:[%s11309_s4 + $0x8] sm:$0x3]  ;;  %vm1248_vm2 = vsmask.f32 3328  ;;  %v8265_v3 = vsel %vm705_vm0, %v8122_v15, 0 }
  0x10   : > { %vm1249_vm3 = vsmask.f32 7440  ;;  %v8252_v62 = vsel %vm705_vm0, %v6508_v20, 0  ;;  %vm2403_vm5 = vcmask 1042432   ;;  %vm2404_vm6 = vcmask 1046532   ;;  %s6894_s20 = sshll.u32 %s11862_s24, 7 }
  0x11   : > { %s8092_s16 = scalar_lea.vmem %s11305_s0, %s8085_s13  ;;  %vm8321_vm4 = vmor %vm1248_vm2, %vm1249_vm3  ;;  %s6891_s21 = sadd.s32 192, %s8085_s13  ;;  %vm6204_vm8 = vcmask 27648  }
  0x12   : > { %v8095_v6 = vld [vmem:[%s8092_s16 + $0xc] sm:$0xf]  ;;  %v8098_v7 = vld [vmem:[%s8092_s16 + $0x10] sm:$0xf]  ;;  %v8103_v9 = vld [vmem:[%s8092_s16] sm:$0xf]  ;;  %s8420_s28 = scalar_lea.vmem %s11306_s1, %s6891_s21  ;;  %s9238_s22 = scalar_lea.vmem %s11307_s2, %s8085_s13 }
  0x13   : > { %v6408_v8 = vcombine.low %v8095_v6, %v8098_v7  ;;  %v8106_v10 = vld [vmem:[%s8092_s16 + $0x4] sm:$0xf]  ;;  %v8114_v13 = vld [vmem:[%s8092_s16 + $0x18] sm:$0xf]  ;;  %v8117_v14 = vld [vmem:[%s8092_s16 + $0x1c] sm:$0xf]  ;;  %s9812_s15 = scalar_lea.vmem %s11308_s3, %s6891_s21  ;;  %s11126_s23 = scalar_lea.vmem %s11312_s7, %s6894_s20 }
  0x14   : > { %v6440_v11 = vcombine.low %v8103_v9, %v8106_v10  ;;  %11424 = vst [vmem:[#allocation2_spill] sm:$0xff] %v8114_v13  ;;  %11425 = vst [vmem:[#allocation3_spill] sm:$0xff] %v8117_v14  ;;  %v8127_v16 = vcombine.low %v8114_v13, %v8117_v14  ;;  %v8131_v18 = vld [vmem:[%s8092_s16 + $0x24] sm:$0xf]  ;;  %v8134_v19 = vld [vmem:[%s8092_s16 + $0x28] sm:$0xf] }
  0x15   : > { %7235 = vmatprep.mubr.msk.bf16.mxu0 %vm656_vm1, %v6408_v8  ;;  %v8146_v21 = vld [vmem:[%s8092_s16 + $0x30] sm:$0xf]  ;;  %v8149_v22 = vld [vmem:[%s8092_s16 + $0x34] sm:$0xf]  ;;  %v8153_v23 = vcombine.low %v8131_v18, %v8134_v19  ;;  %v8156_v24 = vld [vmem:[%s8092_s16 + $0x3c] sm:$0xf] }
  0x16   : > { %7269 = vmatprep.mubr.msk.bf16.mxu1 %vm656_vm1, %v6440_v11  ;;  %7236 = vmatmul.mubr.msk.bf16.vlgmr.msra.gmra.mxu0 %vm656_vm1, %v8127_v16  ;;  %v8159_v25 = vld [vmem:[%s8092_s16 + $0x40] sm:$0xf]  ;;  %v8166_v26 = vcombine.low %v8146_v21, %v8149_v22  ;;  %v8179_v28 = vld [vmem:[%s8092_s16 + $0x48] sm:$0xf]  ;;  %v8182_v29 = vld [vmem:[%s8092_s16 + $0x4c] sm:$0xf] }
  0x17   : > { %7270 = vmatmul.mubr.msk.bf16.vlgmr.msra.gmra.mxu1 %vm656_vm1, %v6408_v8  ;;  %7302 = vmatpush3.bf16.msra.mxu0 %v1053_v17  ;;  %v8172_v27 = vcombine.low %v8156_v24, %v8159_v25  ;;  %v8187_v30 = vld [vmem:[%s8092_s16 + $0x54] sm:$0xf]  ;;  %v8190_v31 = vld [vmem:[%s8092_s16 + $0x58] sm:$0xf]  ;;  %v8194_v32 = vcombine.low %v8179_v28, %v8182_v29  ;;  %v1276_v34 = vshrl.u32 %v8095_v6, 16  ;;  %v1279_v35 = vshll.u32 %v8095_v6, 16  ;;  %vm8696_vm7 = vmor %vm2403_vm5, %vm2404_vm6 }
  0x18   : > { %7336 = vmatpush3.bf16.msra.mxu1 %v1782_v12  ;;  %7273 = vmatprep.mubr.msk.bf16.mxu1 %vm656_vm1, %v8127_v16  ;;  %v8200_v33 = vcombine.low %v8187_v30, %v8190_v31  ;;  %v1285_v36 = vshll.u32 %v8098_v7, 16  ;;  %v1289_v37 = vshrl.u32 %v8098_v7, 16  ;;  %v1252_v38 = vshrl.u32 %v8103_v9, 16  ;;  %v8213_v40 = vld [vmem:[%s8092_s16 + $0x60] sm:$0xf] }
  0x19   : > { %7850 = vmatprep.subr.msk.bf16.mxu1 %vm705_vm0, %v8122_v15  ;;  %7849 = vmatprep.subr.msk.bf16.mxu0 %vm705_vm0, %v6508_v20  ;;  %v1255_v39 = vshll.u32 %v8103_v9, 16  ;;  %v8216_v41 = vld [vmem:[%s8092_s16 + $0x64] sm:$0xf]  ;;  %v8219_v42 = vld [vmem:[%s8092_s16 + $0x14] sm:$0x1]  ;;  %v1261_v43 = vshll.u32 %v8106_v10, 16 }
  0x1a   : > { %7239 = vmatprep.mubr.msk.bf16.mxu0 %vm656_vm1, %v8153_v23  ;;  %11426 = vst [vmem:[#allocation4_spill] sm:$0xff] %v8200_v33  ;;  %v1265_v44 = vshrl.u32 %v8106_v10, 16  ;;  %v1278_v45 = vrot.slane %v1276_v34, 4  ;;  %v1281_v46 = vrot.slane %v1279_v35, 5  ;;  %v8226_v47 = vld [vmem:[%s8092_s16 + $0x6c] sm:$0xf]  ;;  %v8235_v51 = vcombine.low %v8213_v40, %v8216_v41 }
  0x1b   : > { %v8229_v48 = vld [vmem:[%s8092_s16 + $0x70] sm:$0xf]  ;;  %v8231_v49 = vrot.slane %v1285_v36, 5  ;;  %v1291_v50 = vrot.slane %v1289_v37, 4  ;;  %v1295_v52 = vshll.u32 %v8219_v42, 16  ;;  %v1254_v53 = vrot.slane %v1252_v38, 4 }
  0x1c   : > { %11427 = vst [vmem:[#allocation5_spill] sm:$0xff] %v8235_v51  ;;  %v1257_v54 = vrot.slane %v1255_v39, 5  ;;  %v11314_v55 = vrot.slane %v8098_v7, 5  ;;  %v8241_v56 = vrot.slane %v1261_v43, 5  ;;  %v1267_v57 = vrot.slane %v1265_v44, 4 }
  0x1d   : > { %v8245_v58 = vcombine.low %v8226_v47, %v8229_v48  ;;  %v1282_v59 = vor.u32 %v1281_v46, %v1278_v45  ;;  %v1292_v60 = vor.u32 %v1291_v50, %v8231_v49  ;;  %v11315_v61 = vrot.slane %v8106_v10, 5  ;;  %v8258_v1 = vld [vmem:[%s8092_s16 + $0x78] sm:$0xf]  ;;  %v8261_v2 = vld [vmem:[%s8092_s16 + $0x7c] sm:$0xf] }
  0x1e   : > { %7240 = vmatmul.mubr.msk.bf16.gmra.mxu0 %vm656_vm1, %v8166_v26  ;;  %v1258_v0 = vor.u32 %v1257_v54, %v1254_v53  ;;  %v8267_v4 = vrot.slane %v1295_v52, 5  ;;  %v8271_v5 = vrot.slane %v11314_v55, 4  ;;  %v1268_v8 = vor.u32 %v1267_v57, %v8241_v56  ;;  %v8281_v20 = vld [vmem:[%s8092_s16 + $0x84] sm:$0xf]  ;;  %v8284_v15 = vld [vmem:[%s8092_s16 + $0x88] sm:$0xf] }
  0x1f   : > { %7274 = vmatmul.mubr.msk.bf16.gmra.mxu1 %vm656_vm1, %v8153_v23  ;;  %7243 = vmatprep.mubr.msk.bf16.mxu0 %vm656_vm1, %v8172_v27  ;;  %11428 = vst [vmem:[#allocation6_spill] sm:$0xff] %v8245_v58  ;;  %v11313_v11 = vrot.slane %v8117_v14, 5  ;;  %v8277_v12 = vrot.slane %v1282_v59, 4  ;;  %v1293_v34 = vrot.slane %v1292_v60, 4  ;;  %v8288_v35 = vrot.slane %v11315_v61, 4 }
  0x20   : > { %7277 = vmatprep.mubr.msk.bf16.mxu1 %vm656_vm1, %v8166_v26  ;;  %11429 = vst [vmem:[#allocation7_spill] sm:$0xff] %v8271_v5  ;;  %v1300_v36 = vshrl.u32 %v8114_v13, 16  ;;  %v8293_v37 = vcombine.low %v8258_v1, %v8261_v2  ;;  %v8295_v38 = vrot.slane %v1258_v0, 4  ;;  %v1303_v39 = vshll.u32 %v8114_v13, 16  ;;  %v8334_v55 = vld [vmem:[%s8092_s16 + $0x90] sm:$0xf] }
  0x21   : > { %11430 = vst [vmem:[#allocation8_spill] sm:$0xff] %v8288_v35  ;;  %v1313_v43 = vshrl.u32 %v8117_v14, 16  ;;  %v8302_v45 = vrot.slane %v1268_v8, 4  ;;  %v8306_v46 = vrot.slane %v11313_v11, 4  ;;  %v1324_v50 = vshrl.u32 %v8131_v18, 16 }
  0x22   : > { %11431 = vst [vmem:[#allocation9_spill] sm:$0xff] %v8293_v37  ;;  %v8311_v52 = vcombine.low %v8281_v20, %v8284_v15  ;;  %v1327_v53 = vshll.u32 %v8131_v18, 16  ;;  %v11434_v60 = vmov 0  ;;  %v8337_v17 = vld [vmem:[%s8092_s16 + $0x94] sm:$0xf]  ;;  %v1309_v63 = vshll.u32 %v8117_v14, 16 }
  0x23   : > { %11432 = vst [vmem:[#allocation10_spill] sm:$0xff] %v8306_v46  ;;  %v11435_v60 = vsel %vm8321_vm4, 4294967295, %v11434_v60  ;;  %v8345_v11 = vld [vmem:[%s8092_s16 + $0x8] sm:$0x1]  ;;  %v1288_v18 = vsel %vm8321_vm4, %v8277_v12, %v8231_v49  ;;  %v1298_v61 = vsel %vm8321_vm4, %v1293_v34, %v8267_v4  ;;  %v8358_v0 = vld [vmem:[%s8092_s16 + $0x9c] sm:$0xf]  ;;  %v8366_v54 = vcombine.low %v8334_v55, %v8337_v17 }
  0x24   : > { %11433 = vst [vmem:[#allocation11_spill] sm:$0xff] %v8311_v52  ;;  %11436 = vst [vmem:[#allocation12_spill] sm:$0xff] %v11435_v60  ;;  %v8361_v59 = vld [vmem:[%s8092_s16 + $0xa0] sm:$0xf]  ;;  %v1302_v49 = vrot.slane %v1300_v36, 4  ;;  %v1305_v12 = vrot.slane %v1303_v39, 5 }
  0x25   : > { %11437 = vst [vmem:[#allocation13_spill] sm:$0xff] %v8358_v0  ;;  %11438 = vst [vmem:[#allocation14_spill] sm:$0xff] %v8361_v59  ;;  %v1271_v44 = vshll.u32 %v8345_v11, 16  ;;  %v8375_v57 = vld [vmem:[%s8092_s16 + $0x20] sm:$0x1]  ;;  %v8380_v36 = vcombine.low %v8358_v0, %v8361_v59  ;;  %v8385_v39 = vrot.slane %v1309_v63, 5  ;;  %v8394_v59 = vcombine.low %v1288_v18, %v1298_v61 }
  0x26   : > { %7244 = vmatmul.mubr.msk.bf16.gmra.mxu0 %vm656_vm1, %v8194_v32  ;;  %11439 = vst [vmem:[#allocation15_spill] sm:$0xff] %v8366_v54  ;;  %v1315_v34 = vrot.slane %v1313_v43, 4  ;;  %v8398_v46 = vld [vmem:[%s8092_s16 + $0xac] sm:$0xf]  ;;  %v8401_v63 = vld [vmem:[%s8092_s16 + $0xb4] sm:$0xf]  ;;  %v1306_v43 = vor.u32 %v1305_v12, %v1302_v49  ;;  %v1264_v12 = vsel %vm8321_vm4, %v8295_v38, %v8241_v56 }
  0x27   : > { %7278 = vmatmul.mubr.msk.bf16.gmra.mxu1 %vm656_vm1, %v8172_v27  ;;  %7247 = vmatprep.mubr.msk.bf16.mxu0 %vm656_vm1, %v8200_v33  ;;  %11440 = vst [vmem:[#allocation16_spill] sm:$0xff] %v8380_v36  ;;  %11442 = vst [vmem:[#allocation18_spill] sm:$0xff] %v8398_v46  ;;  %v1319_v4 = vshll.u32 %v8375_v57, 16  ;;  %v1273_v8 = vrot.slane %v1271_v44, 5  ;;  %v1329_v13 = vrot.slane %v1327_v53, 5  ;;  %v1333_v61 = vshll.u32 %v8134_v19, 16 }
  0x28   : > { %7281 = vmatprep.mubr.msk.bf16.mxu1 %vm656_vm1, %v8194_v32  ;;  %11443 = vst [vmem:[#allocation19_spill] sm:$0xff] %v8401_v63  ;;  %v1316_v44 = vor.u32 %v1315_v34, %v8385_v39  ;;  %v1307_v34 = vrot.slane %v1306_v43, 4  ;;  %v8444_v49 = vld [vmem:[%s8420_s28] sm:$0xf]  ;;  %v8447_v53 = vld [vmem:[%s8420_s28 + $0x4] sm:$0xf] }
  0x29   : > { %v1321_v18 = vrot.slane %v1319_v4, 5  ;;  %v1274_v56 = vsel %vm8321_vm4, %v8302_v45, %v1273_v8  ;;  %v11448_v43 = vshrl.u32 %v8134_v19, 16  ;;  %v1357_v5 = vshll.u32 %v8149_v22, 16  ;;  %v8499_v35 = vld [vmem:[%s8092_s16 + $0x44] sm:$0x1] }
  0x2a   : > { %11456 = vst [vmem:[#allocation26_spill] sm:$0xff] %v8499_v35  ;;  %v9321_v60 = vld [vmem:[%s9238_s22 + $0x30] sm:$0xf] }
  0x2b   : > { %v1339_v4 = vrot.slane %v11448_v43, 4  ;;  %v8489_v8 = vrot.slane %v1357_v5, 5 }
  0x2e   : > { %7248 = vmatmul.mubr.msk.bf16.gmra.mxu0 %vm656_vm1, %v8235_v51 }
  0x2f   : > { %7282 = vmatmul.mubr.msk.bf16.gmra.mxu1 %vm656_vm1, %v8200_v33  ;;  %7251 = vmatprep.mubr.msk.bf16.mxu0 %vm656_vm1, %v8245_v58 }
  0x30   : > { %7285 = vmatprep.mubr.msk.bf16.mxu1 %vm656_vm1, %v8235_v51 }
  0x36   : > { %7252 = vmatmul.mubr.msk.bf16.gmra.mxu0 %vm656_vm1, %v8293_v37 }
  0x37   : > { %7286 = vmatmul.mubr.msk.bf16.gmra.mxu1 %vm656_vm1, %v8245_v58  ;;  %7255 = vmatprep.mubr.msk.bf16.mxu0 %vm656_vm1, %v8311_v52  ;;  %v8392_v58 = vld [vmem:[%s8092_s16 + $0xa8] sm:$0xf] }
  0x38   : > { %7289 = vmatprep.mubr.msk.bf16.mxu1 %vm656_vm1, %v8293_v37  ;;  %11441 = vst [vmem:[#allocation17_spill] sm:$0xff] %v8392_v58  ;;  %v1326_v37 = vrot.slane %v1324_v50, 4  ;;  %v8432_v14 = vcombine.low %v8392_v58, %v8398_v46  ;;  %v8439_v50 = vld [vmem:[%s8092_s16 + $0x2c] sm:$0x1]  ;;  %v11450_v46 = vshll.u32 %v8146_v21, 16 }
  0x39   : > { %11447 = vst [vmem:[#allocation23_spill] sm:$0xff] %v8439_v50  ;;  %v1343_v19 = vshll.u32 %v8439_v50, 16 }
  0x3a   : > { %11445 = vst [vmem:[#allocation21_spill] sm:$0xff] %v8432_v14  ;;  %v1330_v38 = vor.u32 %v1329_v13, %v1326_v37  ;;  %v1353_v58 = vrot.slane %v11450_v46, 5  ;;  %v8476_v46 = vld [vmem:[%s8092_s16 + $0x38] sm:$0x1]  ;;  %v1405_v13 = vshll.u32 %v8182_v29, 16  ;;  %v11453_v37 = vshrl.u32 %v8149_v22, 16 }
  0x3b   : > { %11452 = vst [vmem:[#allocation25_spill] sm:$0xff] %v8476_v46  ;;  %v11458_v22 = vshrl.u32 %v8179_v28, 16 }
  0x3c   : > { %v8481_v43 = vrot.slane %v1330_v38, 4  ;;  %v1363_v50 = vrot.slane %v11453_v37, 4 }
  0x3e   : > { %7256 = vmatmul.mubr.msk.bf16.gmra.mxu0 %vm656_vm1, %v8366_v54 }
  0x3f   : > { %7290 = vmatmul.mubr.msk.bf16.gmra.mxu1 %vm656_vm1, %v8311_v52  ;;  %v8407_v52 = vld [vmem:[%s8092_s16 + $0xb8] sm:$0xf]  ;;  %7259 = vmatprep.mubr.msk.bf16.mxu0 %vm656_vm1, %v8380_v36 }
  0x40   : > { %7293 = vmatprep.mubr.msk.bf16.mxu1 %vm656_vm1, %v8366_v54  ;;  %11444 = vst [vmem:[#allocation20_spill] sm:$0xff] %v8407_v52  ;;  %v8436_v51 = vcombine.low %v8401_v63, %v8407_v52  ;;  %v8452_v54 = vrot.slane %v1333_v61, 5  ;;  %v1317_v52 = vrot.slane %v1316_v44, 4  ;;  %v8470_v61 = vcombine.low %v8444_v49, %v8447_v53 }
  0x41   : > { %v6476_v44 = vcombine.low %v1264_v12, %v1274_v56  ;;  %v1367_v12 = vshll.u32 %v8476_v46, 16  ;;  %v11454_v56 = vshrl.u32 %v8156_v24, 16 }
  0x42   : > { %11446 = vst [vmem:[#allocation22_spill] sm:$0xff] %v8436_v51  ;;  %11451 = vst [vmem:[#allocation24_spill] sm:$0xff] %v8470_v61  ;;  %v1340_v45 = vor.u32 %v1339_v4, %v8452_v54  ;;  %v11455_v4 = vshll.u32 %v8156_v24, 16  ;;  %v8513_v24 = vrot.slane %v1405_v13, 5 }
  0x43   : > { %v1374_v38 = vrot.slane %v11454_v56, 4  ;;  %v1429_v56 = vshll.u32 %v8190_v31, 16  ;;  %v1369_v13 = vrot.slane %v1367_v12, 5 }
  0x44   : > { %v1377_v0 = vrot.slane %v11455_v4, 5 }
  0x45   : > { %v8541_v12 = vrot.slane %v1429_v56, 5  ;;  %v8554_v56 = vld [vmem:[%s8092_s16 + $0x68] sm:$0x1] }
  0x46   : > { %7260 = vmatmul.mubr.msk.bf16.gmra.mxu0 %vm656_vm1, %v8432_v14  ;;  %11468 = vst [vmem:[#allocation29_spill] sm:$0xff] %v8554_v56 }
  0x47   : > { %7294 = vmatmul.mubr.msk.bf16.gmra.mxu1 %vm656_vm1, %v8380_v36  ;;  %v11449_v36 = vshrl.u32 %v8146_v21, 16  ;;  %v1312_v21 = vsel %vm8321_vm4, %v1307_v34, %v8385_v39  ;;  %7263 = vmatprep.mubr.msk.bf16.mxu0 %vm656_vm1, %v8436_v51  ;;  %v1322_v39 = vsel %vm8321_vm4, %v1317_v52, %v1321_v18  ;;  %v1398_v52 = vrot.slane %v11458_v22, 4 }
  0x48   : > { %7297 = vmatprep.mubr.msk.bf16.mxu1 %vm656_vm1, %v8432_v14  ;;  %v1345_v14 = vrot.slane %v1343_v19, 5  ;;  %v8511_v37 = vcombine.low %v1312_v21, %v1322_v39  ;;  %v11460_v19 = vshrl.u32 %v8182_v29, 16  ;;  %v1364_v21 = vor.u32 %v1363_v50, %v8489_v8  ;;  %v8525_v39 = vld [vmem:[%s8092_s16 + $0x50] sm:$0x1] }
  0x49   : > { %v1350_v63 = vrot.slane %v11449_v36, 4  ;;  %v1381_v36 = vshll.u32 %v8159_v25, 16  ;;  %11461 = vst [vmem:[#allocation27_spill] sm:$0xff] %v8525_v39  ;;  %v1391_v29 = vshll.u32 %v8499_v35, 16  ;;  %v1453_v22 = vshll.u32 %v8216_v41, 16 }
  0x4b   : > { %v1354_v34 = vor.u32 %v1353_v58, %v1350_v63  ;;  %v8501_v33 = vrot.slane %v1381_v36, 5  ;;  %v11457_v58 = vshrl.u32 %v8159_v25, 16  ;;  %v11459_v63 = vshll.u32 %v8179_v28, 16 }
  0x4c   : > { %v1411_v36 = vrot.slane %v11460_v19, 4  ;;  %v1336_v25 = vsel %vm8321_vm4, %v8481_v43, %v8452_v54  ;;  %v1341_v28 = vrot.slane %v1340_v45, 4  ;;  %v11462_v19 = vshrl.u32 %v8187_v30, 16 }
  0x4d   : > { %v1387_v5 = vrot.slane %v11457_v58, 4  ;;  %v1401_v18 = vrot.slane %v11459_v63, 5  ;;  %v1355_v4 = vrot.slane %v1354_v34, 4  ;;  %v1378_v58 = vor.u32 %v1377_v0, %v1374_v38  ;;  %v8539_v34 = vld [vmem:[%s8092_s16 + $0x5c] sm:$0x1] }
  0x4e   : > { %v1422_v54 = vrot.slane %v11462_v19, 4  ;;  %v11463_v45 = vshll.u32 %v8187_v30, 16  ;;  %7264 = vmatmul.mubr.msk.bf16.gmra.mxu0 %vm656_vm1, %v8470_v61  ;;  %v1412_v50 = vor.u32 %v1411_v36, %v8513_v24  ;;  %v1415_v0 = vshll.u32 %v8525_v39, 16  ;;  %11464 = vst [vmem:[#allocation28_spill] sm:$0xff] %v8539_v34 }
  0x4f   : > { %7298 = vmatmul.mubr.msk.bf16.gmra.mxu1 %vm656_vm1, %v8436_v51  ;;  %v1402_v63 = vor.u32 %v1401_v18, %v1398_v52  ;;  %v11465_v38 = vshrl.u32 %v8190_v31, 16  ;;  %7303 = vmatprep.mubr.msk.bf16.mxu0 %vm656_vm1, %v8127_v16  ;;  %v1346_v30 = vsel %vm8321_vm4, %v1341_v28, %v1345_v14  ;;  %v1365_v52 = vrot.slane %v1364_v21, 4  ;;  %v8564_v28 = vld [vmem:[%s11309_s4 + $0xa] sm:$0x3] }
  0x50   : > { %7337 = vmatprep.mubr.msk.bf16.mxu1 %vm656_vm1, %v6476_v44  ;;  %v1388_v44 = vor.u32 %v1387_v5, %v8501_v33  ;;  %v1425_v43 = vrot.slane %v11463_v45, 5  ;;  %v11466_v18 = vshrl.u32 %v8213_v40, 16  ;;  %v11467_v36 = vshll.u32 %v8213_v40, 16 }
  0x51   : > { %v1435_v5 = vrot.slane %v11465_v38, 4  ;;  %v1379_v39 = vrot.slane %v1378_v58, 4  ;;  %v1393_v35 = vrot.slane %v1391_v29, 5  ;;  %v8556_v46 = vrot.slane %v1453_v22, 5 }
  0x52   : > { %v1446_v19 = vrot.slane %v11466_v18, 4  ;;  %v1449_v45 = vrot.slane %v11467_v36, 5  ;;  %v11469_v31 = vshrl.u32 %v8216_v41, 16  ;;  %v1389_v16 = vrot.slane %v1388_v44, 4 }
  0x53   : > { %v1403_v61 = vrot.slane %v1402_v63, 4  ;;  %v1426_v51 = vor.u32 %v1425_v43, %v1422_v54  ;;  %v1439_v14 = vshll.u32 %v8539_v34, 16  ;;  %v1636_v40 = vshrl.u32 %v8444_v49, 16 }
  0x54   : > { %v1459_v38 = vrot.slane %v11469_v31, 4  ;;  %v1413_v21 = vrot.slane %v1412_v50, 4  ;;  %v1417_v58 = vrot.slane %v1415_v0, 5  ;;  %v1436_v41 = vor.u32 %v1435_v5, %v8541_v12 }
  0x55   : > { %v8573_v29 = vcombine.low %v1336_v25, %v1346_v30  ;;  %v1360_v22 = vsel %vm8321_vm4, %v1355_v4, %v8489_v8  ;;  %v1450_v44 = vor.u32 %v1449_v45, %v1446_v19  ;;  %v1477_v63 = vshll.u32 %v8229_v48, 16 }
  0x56   : > { %v1370_v54 = vsel %vm8321_vm4, %v1365_v52, %v1369_v13  ;;  %v1384_v43 = vsel %vm8321_vm4, %v1379_v39, %v8501_v33  ;;  %v1463_v50 = vshll.u32 %v8554_v56, 16  ;;  %v1394_v8 = vsel %vm8321_vm4, %v1389_v16, %v1393_v35  ;;  %v8596_v33 = vld [vmem:[%s11309_s4 + $0x4] sm:$0x3]  ;;  %7304 = vmatmul.mubr.msk.bf16.vlgmr.msra.gmra.mxu0 %vm656_vm1, %v8153_v23  ;;  %v8612_v52 = vld [vmem:[%s8092_s16 + $0x74] sm:$0x1] }
  0x57   : > { %7338 = vmatmul.mubr.msk.bf16.vlgmr.msra.gmra.mxu1 %vm656_vm1, %v8394_v59  ;;  %v1408_v25 = vsel %vm8321_vm4, %v1403_v61, %v8513_v24  ;;  %v1427_v4 = vrot.slane %v1426_v51, 4  ;;  %v1441_v13 = vrot.slane %v1439_v14, 5  ;;  %v1418_v39 = vsel %vm8321_vm4, %v1413_v21, %v1417_v58  ;;  %7370 = vmatpush3.bf16.msra.mxu0 %v8252_v62  ;;  %11472 = vst [vmem:[#allocation30_spill] sm:$0xff] %v8612_v52 }
  0x58   : > { %7404 = vmatpush3.bf16.msra.mxu1 %v8265_v3  ;;  %7341 = vmatprep.mubr.msk.bf16.mxu1 %vm656_vm1, %v8511_v37  ;;  %v1460_v3 = vor.u32 %v1459_v38, %v8556_v46  ;;  %v1437_v0 = vrot.slane %v1436_v41, 4  ;;  %v11470_v35 = vshrl.u32 %v8226_v47, 16  ;;  %v11471_v30 = vshll.u32 %v8226_v47, 16  ;;  %v8637_v41 = vld [vmem:[%s8420_s28 + $0x8] sm:$0x1] }
  0x59   : > { %7852 = vmatprep.subr.msk.bf16.mxu1 %vm705_vm0, %v8564_v28  ;;  %7307 = vmatprep.mubr.msk.bf16.mxu0 %vm656_vm1, %v8166_v26  ;;  %v8609_v51 = vcombine.low %v1360_v22, %v1370_v54  ;;  %v1451_v24 = vrot.slane %v1450_v44, 4  ;;  %v8614_v23 = vrot.slane %v1477_v63, 5  ;;  %v11473_v18 = vshrl.u32 %v8229_v48, 16 }
  0x5a   : > { %v1470_v5 = vrot.slane %v11470_v35, 4  ;;  %v1473_v61 = vrot.slane %v11471_v30, 5  ;;  %v1639_v36 = vshll.u32 %v8444_v49, 16  ;;  %v1649_v47 = vshrl.u32 %v8447_v53, 16  ;;  %7851 = vmatprep.subr.msk.bf16.mxu0 %vm705_vm0, %v8596_v33 }
  0x5b   : > { %v1483_v19 = vrot.slane %v11473_v18, 4  ;;  %v1461_v45 = vrot.slane %v1460_v3, 4  ;;  %v1465_v62 = vrot.slane %v1463_v50, 5  ;;  %v2425_v26 = vrot.slane %v8375_v57, 5  ;;  %v8650_v3 = vld [vmem:[%s8092_s16 + $0x80] sm:$0x1] }
  0x5c   : > { %v8623_v31 = vcombine.low %v1384_v43, %v1394_v8  ;;  %v8625_v38 = vcombine.low %v1408_v25, %v1418_v39  ;;  %v1432_v48 = vsel %vm8321_vm4, %v1427_v4, %v8541_v12  ;;  %v1442_v16 = vsel %vm8321_vm4, %v1437_v0, %v1441_v13 }
  0x5d   : > { %v1474_v14 = vor.u32 %v1473_v61, %v1470_v5  ;;  %v1487_v21 = vshll.u32 %v8612_v52, 16  ;;  %v1501_v58 = vshll.u32 %v8261_v2, 16  ;;  %v1456_v12 = vsel %vm8321_vm4, %v1451_v24, %v8556_v46 }
  0x5e   : > { %v1484_v22 = vor.u32 %v1483_v19, %v8614_v23  ;;  %v11474_v44 = vshrl.u32 %v8258_v1, 16  ;;  %v1638_v54 = vrot.slane %v1636_v40, 4  ;;  %v1466_v43 = vsel %vm8321_vm4, %v1461_v45, %v1465_v62  ;;  %7308 = vmatmul.mubr.msk.bf16.gmra.mxu0 %vm656_vm1, %v8172_v27 }
  0x5f   : > { %7342 = vmatmul.mubr.msk.bf16.gmra.mxu1 %vm656_vm1, %v8573_v29  ;;  %v1641_v50 = vrot.slane %v1639_v36, 5  ;;  %v1645_v8 = vshll.u32 %v8447_v53, 16  ;;  %v1651_v25 = vrot.slane %v1649_v47, 4  ;;  %v8653_v4 = vcombine.low %v1432_v48, %v1442_v16  ;;  %7311 = vmatprep.mubr.msk.bf16.mxu0 %vm656_vm1, %v8194_v32 }
  0x60   : > { %7345 = vmatprep.mubr.msk.bf16.mxu1 %vm656_vm1, %v8609_v51  ;;  %v1494_v63 = vrot.slane %v11474_v44, 4  ;;  %v11475_v13 = vshll.u32 %v8258_v1, 16  ;;  %v11476_v39 = vshrl.u32 %v8261_v2, 16  ;;  %v1655_v35 = vshll.u32 %v8637_v41, 16 }
  0x61   : > { %v8662_v40 = vrot.slane %v1501_v58, 5  ;;  %v1525_v5 = vshll.u32 %v8284_v15, 16  ;;  %v1642_v30 = vor.u32 %v1641_v50, %v1638_v54  ;;  %v1647_v61 = vrot.slane %v1645_v8, 5 }
  0x62   : > { %v1497_v46 = vrot.slane %v11475_v13, 5  ;;  %v1507_v0 = vrot.slane %v11476_v39, 4  ;;  %v8667_v24 = vcombine.low %v1456_v12, %v1466_v43  ;;  %v8669_v18 = vrot.slane %v1474_v14, 4 }
  0x63   : > { %v8671_v19 = vrot.slane %v1487_v21, 5  ;;  %v1511_v36 = vshll.u32 %v8650_v3, 16  ;;  %v1485_v47 = vrot.slane %v1484_v22, 4  ;;  %v1643_v45 = vrot.slane %v1642_v30, 4 }
  0x64   : > { %v1652_v27 = vor.u32 %v1651_v25, %v1647_v61  ;;  %v1657_v62 = vrot.slane %v1655_v35, 5  ;;  %v1498_v48 = vor.u32 %v1497_v46, %v1494_v63  ;;  %v11477_v16 = vshrl.u32 %v8281_v20, 16 }
  0x65   : > { %v11478_v44 = vshll.u32 %v8281_v20, 16  ;;  %v11479_v32 = vshrl.u32 %v8284_v15, 16  ;;  %v1508_v14 = vor.u32 %v1507_v0, %v8662_v40  ;;  %v8683_v21 = vrot.slane %v1525_v5, 5 }
  0x66   : > { %v1518_v58 = vrot.slane %v11477_v16, 4  ;;  %v1648_v22 = vsel %vm8321_vm4, %v1643_v45, %v1647_v61  ;;  %v1653_v63 = vrot.slane %v1652_v27, 4  ;;  %v11480_v20 = vshrl.u32 %v8334_v55, 16  ;;  %v11491_v16 = vld [vmem:[#allocation8_spill] sm:$0xff] }
  0x67   : > { %v1521_v54 = vrot.slane %v11478_v44, 5  ;;  %v1531_v12 = vrot.slane %v11479_v32, 4  ;;  %7346 = vmatmul.mubr.msk.bf16.gmra.mxu1 %vm656_vm1, %v8623_v31  ;;  %v1549_v15 = vshll.u32 %v8337_v17, 16  ;;  %v11481_v50 = vshll.u32 %v8334_v55, 16  ;;  %v11493_v32 = vld [vmem:[#allocation3_spill] sm:$0xff] }
  0x68   : > { %7349 = vmatprep.mubr.msk.bf16.mxu1 %vm656_vm1, %v8625_v38  ;;  %v1542_v43 = vrot.slane %v11480_v20, 4  ;;  %v1658_v25 = vsel %vm8321_vm4, %v1653_v63, %v1657_v62  ;;  %v11482_v13 = vmov 0  ;;  %v2411_v46 = vrot.slane %v8345_v11, 5  ;;  %v11490_v11 = vld [vmem:[#allocation4_spill] sm:$0xff]  ;;  %v11497_v20 = vld [vmem:[#allocation10_spill] sm:$0xff] }
  0x69   : > { %v1545_v8 = vrot.slane %v11481_v50, 5  ;;  %v11483_v13 = vsel %vm8696_vm7, 4294967295, %v11482_v13  ;;  %v2418_v39 = vrot.slane %v8219_v42, 5  ;;  %v11485_v0 = vshrl.u32 %v8337_v17, 16  ;;  %7312 = vmatmul.mubr.msk.bf16.gmra.mxu0 %vm656_vm1, %v11490_v11 }
  0x6a   : > { %11484 = vst [vmem:[#allocation31_spill] sm:$0xff] %v11483_v13  ;;  %v8704_v5 = vcombine.low %v1648_v22, %v1658_v25  ;;  %v11486_v30 = vrot.slane %v8106_v10, 5  ;;  %v11487_v61 = vrot.slane %v8103_v9, 9  ;;  %v11488_v27 = vrot.slane %v8098_v7, 5  ;;  %v11492_v9 = vld [vmem:[#allocation7_spill] sm:$0xff]  ;;  %v11495_v22 = vld [vmem:[#allocation2_spill] sm:$0xff] }
  0x6b   : > { %v1555_v35 = vrot.slane %v11485_v0, 4  ;;  %v11489_v62 = vrot.slane %v8095_v6, 9  ;;  %v8725_v10 = vsel %vm8696_vm7, %v11491_v16, %v2411_v46  ;;  %v2419_v44 = vsel %vm8696_vm7, %v11492_v9, %v2418_v39  ;;  %v11498_v25 = vld [vmem:[#allocation5_spill] sm:$0xff]  ;;  %v8744_v46 = vld [vmem:[%s8092_s16 + $0x8c] sm:$0x1]  ;;  %v11508_v39 = vld [vmem:[#allocation6_spill] sm:$0xff] }
  0x6c   : > { %v8712_v45 = vsel %vm8696_vm7, %v11487_v61, %v11486_v30  ;;  %v11494_v7 = vrot.slane %v11493_v32, 5  ;;  %v11496_v6 = vrot.slane %v11495_v22, 9  ;;  %v2426_v50 = vsel %vm8696_vm7, %v11497_v20, %v2425_v26  ;;  %7315 = vmatprep.mubr.msk.bf16.mxu0 %vm656_vm1, %v11498_v25  ;;  %11499 = vst [vmem:[#allocation4_spill] sm:$0xff] %v8744_v46  ;;  %v8756_v26 = vld [vmem:[%s8092_s16 + $0x98] sm:$0x1]  ;;  %v11503_v22 = vld [vmem:[#allocation18_spill] sm:$0xff] }
  0x6d   : > { %v2416_v42 = vsel %vm8696_vm7, %v11489_v62, %v11488_v27  ;;  %v8746_v0 = vrot.slane %v1549_v15, 5  ;;  %v11501_v27 = vld [vmem:[#allocation14_spill] sm:$0xff]  ;;  %v1499_v62 = vrot.slane %v1498_v48, 4  ;;  %v1509_v11 = vrot.slane %v1508_v14, 4  ;;  %v11502_v9 = vld [vmem:[#allocation17_spill] sm:$0xff] }
  0x6e   : > { %v2423_v63 = vsel %vm8696_vm7, %v11496_v6, %v11494_v7  ;;  %v8750_v30 = vcombine.low %v2416_v42, %v2419_v44  ;;  %v1577_v57 = vshrl.u32 %v11501_v27, 16  ;;  %v1513_v16 = vrot.slane %v1511_v36, 5  ;;  %v11505_v25 = vld [vmem:[#allocation13_spill] sm:$0xff] }
  0x6f   : > { %v8752_v61 = vcombine.low %v2423_v63, %v2426_v50  ;;  %v1588_v32 = vshrl.u32 %v11502_v9, 16  ;;  %v1591_v7 = vshll.u32 %v11502_v9, 16  ;;  %v1480_v15 = vsel %vm8321_vm4, %v8669_v18, %v8614_v23  ;;  %7350 = vmatmul.mubr.msk.bf16.gmra.mxu1 %vm656_vm1, %v8653_v4  ;;  %11542 = vst [vmem:[#allocation13_spill] sm:$0xff] %v9321_v60 }
  0x70   : > { %v1522_v42 = vor.u32 %v1521_v54, %v1518_v58  ;;  %v1490_v48 = vsel %vm8321_vm4, %v1485_v47, %v8671_v19  ;;  %v1532_v36 = vor.u32 %v1531_v12, %v8683_v21  ;;  %v1535_v14 = vshll.u32 %v8744_v46, 16  ;;  %7353 = vmatprep.mubr.msk.bf16.mxu1 %vm656_vm1, %v8667_v24  ;;  %v11504_v54 = vld [vmem:[#allocation19_spill] sm:$0xff] }
  0x71   : > { %11500 = vst [vmem:[#allocation8_spill] sm:$0xff] %v8752_v61  ;;  %v1573_v44 = vshll.u32 %v11501_v27, 16  ;;  %v1601_v6 = vshrl.u32 %v11503_v22, 16  ;;  %v1546_v23 = vor.u32 %v1545_v8, %v1542_v43  ;;  %v1556_v18 = vor.u32 %v1555_v35, %v8746_v0  ;;  %7316 = vmatmul.mubr.msk.bf16.gmra.mxu0 %vm656_vm1, %v11508_v39 }
  0x72   : > { %v1559_v58 = vshll.u32 %v8756_v26, 16  ;;  %v1612_v63 = vshrl.u32 %v11504_v54, 16  ;;  %v1504_v19 = vsel %vm8321_vm4, %v1499_v62, %v8662_v40  ;;  %v1514_v47 = vsel %vm8321_vm4, %v1509_v11, %v1513_v16  ;;  %v8793_v40 = vld [vmem:[%s8092_s16 + $0xa4] sm:$0x1]  ;;  %v11509_v16 = vld [vmem:[#allocation9_spill] sm:$0xff] }
  0x73   : > { %v1597_v12 = vshll.u32 %v11503_v22, 16  ;;  %v8784_v20 = vcombine.low %v1480_v15, %v1490_v48  ;;  %v1523_v50 = vrot.slane %v1522_v42, 4  ;;  %v11506_v43 = vshrl.u32 %v11505_v25, 16  ;;  %7319 = vmatprep.mubr.msk.bf16.mxu0 %vm656_vm1, %v11509_v16  ;;  %v11514_v16 = vld [vmem:[#allocation11_spill] sm:$0xff] }
  0x74   : > { %v11507_v35 = vshll.u32 %v11505_v25, 16  ;;  %v1533_v46 = vrot.slane %v1532_v36, 4  ;;  %v1537_v52 = vrot.slane %v1535_v14, 5  ;;  %v8795_v62 = vrot.slane %v1573_v44, 5  ;;  %v11510_v14 = vld [vmem:[#allocation20_spill] sm:$0xff] }
  0x75   : > { %v1566_v8 = vrot.slane %v11506_v43, 4  ;;  %v1579_v11 = vrot.slane %v1577_v57, 4  ;;  %v8799_v15 = vcombine.low %v1504_v19, %v1514_v47  ;;  %v1547_v42 = vrot.slane %v1546_v23, 4  ;;  %v8805_v57 = vld [vmem:[%s8092_s16 + $0xb0] sm:$0x1] }
  0x76   : > { %v1569_v27 = vrot.slane %v11507_v35, 5  ;;  %v1557_v48 = vrot.slane %v1556_v18, 4  ;;  %v1561_v25 = vrot.slane %v1559_v58, 5  ;;  %v1590_v43 = vrot.slane %v1588_v32, 4 }
  0x77   : > { %v1593_v35 = vrot.slane %v1591_v7, 5  ;;  %v1599_v56 = vrot.slane %v1597_v12, 5  ;;  %v1603_v39 = vrot.slane %v1601_v6, 4  ;;  %v1615_v36 = vshll.u32 %v11504_v54, 16  ;;  %7354 = vmatmul.mubr.msk.bf16.gmra.mxu1 %vm656_vm1, %v8784_v20 }
  0x78   : > { %v1625_v34 = vshrl.u32 %v11510_v14, 16  ;;  %v1570_v61 = vor.u32 %v1569_v27, %v1566_v8  ;;  %v1583_v44 = vshll.u32 %v8793_v40, 16  ;;  %v2481_v23 = vrot.slane %v8650_v3, 5  ;;  %7357 = vmatprep.mubr.msk.bf16.mxu1 %vm656_vm1, %v8799_v15 }
  0x79   : > { %v1528_v32 = vsel %vm8321_vm4, %v1523_v50, %v8683_v21  ;;  %v1538_v7 = vsel %vm8321_vm4, %v1533_v46, %v1537_v52  ;;  %v1580_v6 = vor.u32 %v1579_v11, %v8795_v62  ;;  %v1552_v18 = vsel %vm8321_vm4, %v1547_v42, %v8746_v0  ;;  %7320 = vmatmul.mubr.msk.bf16.gmra.mxu0 %vm656_vm1, %v11514_v16 }
  0x7a   : > { %v1562_v58 = vsel %vm8321_vm4, %v1557_v48, %v1561_v25  ;;  %v1621_v3 = vshll.u32 %v11510_v14, 16  ;;  %v11511_v54 = vrot.slane %v8261_v2, 5  ;;  %v11512_v21 = vrot.slane %v8258_v1, 9  ;;  %v8845_v2 = vld [vmem:[%s8092_s16 + $0xbc] sm:$0x1] }
  0x7b   : > { %v1594_v46 = vor.u32 %v1593_v35, %v1590_v43  ;;  %v1604_v19 = vor.u32 %v1603_v39, %v1599_v56  ;;  %v1607_v47 = vshll.u32 %v8805_v57, 16  ;;  %v8833_v50 = vcombine.low %v1528_v32, %v1538_v7  ;;  %v11515_v43 = vld [vmem:[#allocation15_spill] sm:$0xff] }
  0x7c   : > { %v2479_v52 = vsel %vm8696_vm7, %v11512_v21, %v11511_v54  ;;  %v11513_v12 = vmov %v11511_v54  ;;  %v2495_v8 = vrot.slane %v8756_v26, 5  ;;  %v1571_v27 = vrot.slane %v1570_v61, 4  ;;  %7323 = vmatprep.mubr.msk.bf16.mxu0 %vm656_vm1, %v11515_v43  ;;  %v11521_v43 = vld [vmem:[#allocation22_spill] sm:$0xff] }
  0x7d   : > { %v2480_v0 = vrot.slane %v11513_v12, 4  ;;  %v1585_v11 = vrot.slane %v1583_v44, 5  ;;  %v8838_v1 = vcombine.low %v1552_v18, %v1562_v58  ;;  %v1581_v42 = vrot.slane %v1580_v6, 4 }
  0x7e   : > { %v1614_v48 = vrot.slane %v1612_v63, 4  ;;  %v1617_v35 = vrot.slane %v1615_v36, 5  ;;  %v1623_v39 = vrot.slane %v1621_v3, 5  ;;  %v1627_v26 = vrot.slane %v1625_v34, 4 }
  0x7f   : > { %v2482_v25 = vsel %vm8696_vm7, %v2480_v0, %v2481_v23  ;;  %v1595_v14 = vrot.slane %v1594_v46, 4  ;;  %v1605_v44 = vrot.slane %v1604_v19, 4  ;;  %v1609_v32 = vrot.slane %v1607_v47, 5  ;;  %7358 = vmatmul.mubr.msk.bf16.gmra.mxu1 %vm656_vm1, %v8833_v50  ;;  %v11519_v47 = vld [vmem:[#allocation16_spill] sm:$0xff]  ;;  %v11520_v0 = vld [vmem:[#allocation21_spill] sm:$0xff] }
  0x80   : > { %v8847_v61 = vcombine.low %v2479_v52, %v2482_v25  ;;  %v11516_v7 = vrot.slane %v8337_v17, 5  ;;  %v1576_v63 = vsel %vm8321_vm4, %v1571_v27, %v8795_v62  ;;  %v1586_v36 = vsel %vm8321_vm4, %v1581_v42, %v1585_v11  ;;  %7361 = vmatprep.mubr.msk.bf16.mxu1 %vm656_vm1, %v8838_v1 }
  0x81   : > { %v1631_v34 = vshll.u32 %v8845_v2, 16  ;;  %v1618_v23 = vor.u32 %v1617_v35, %v1614_v48  ;;  %v1628_v18 = vor.u32 %v1627_v26, %v1623_v39  ;;  %v11518_v3 = vrot.slane %v8334_v55, 9  ;;  %7324 = vmatmul.mubr.msk.bf16.gmra.mxu0 %vm656_vm1, %v11519_v47  ;;  %v11522_v26 = vld [vmem:[#allocation24_spill] sm:$0xff]  ;;  %v7927_v47 = vld [vmem:[%s8092_s16 + $0x24] sm:$0xf] }
  0x82   : > { %v2494_v6 = vrot.slane %v11516_v7, 4  ;;  %v11517_v58 = vmov %v11516_v7  ;;  %v1600_v21 = vsel %vm8321_vm4, %v1595_v14, %v1599_v56  ;;  %v1610_v52 = vsel %vm8321_vm4, %v1605_v44, %v1609_v32  ;;  %7327 = vmatprep.mubr.msk.bf16.mxu0 %vm656_vm1, %v11520_v0  ;;  %v8909_v14 = vld [vmem:[%s8420_s28 + $0xc] sm:$0xf]  ;;  %v8912_v44 = vld [vmem:[%s8420_s28 + $0x10] sm:$0xf] }
  0x83   : > { %v2493_v54 = vsel %vm8696_vm7, %v11518_v3, %v11517_v58  ;;  %v2506_v19 = vrot.slane %v11503_v22, 5  ;;  %v6558_v17 = vrot.slane %v11502_v9, 9  ;;  %v8879_v55 = vcombine.low %v1576_v63, %v1586_v36  ;;  %v8935_v36 = vld [vmem:[%s11310_s5] sm:$0x3]  ;;  %v11523_v0 = vld [vmem:[#allocation23_spill] sm:$0xff] }
  0x84   : > { %v2496_v62 = vsel %vm8696_vm7, %v2494_v6, %v2495_v8  ;;  %v2509_v12 = vrot.slane %v8805_v57, 5  ;;  %v8884_v56 = vcombine.low %v1600_v21, %v1610_v52  ;;  %v1619_v8 = vrot.slane %v1618_v23, 4 }
  0x85   : > { %v8873_v46 = vcombine.low %v2493_v54, %v2496_v62  ;;  %v1629_v27 = vrot.slane %v1628_v18, 4  ;;  %v1633_v11 = vrot.slane %v1631_v34, 5  ;;  %v2508_v22 = vrot.slane %v2506_v19, 4 }
  0x86   : > { %v1624_v9 = vsel %vm8321_vm4, %v1619_v8, %v1623_v39  ;;  %v2507_v16 = vsel %vm8696_vm7, %v6558_v17, %v2506_v19  ;;  %v2520_v25 = vrot.slane %v8447_v53, 5  ;;  %v6560_v39 = vrot.slane %v8444_v49, 9 }
  0x87   : > { %7362 = vmatmul.mubr.msk.bf16.gmra.mxu1 %vm656_vm1, %v8879_v55  ;;  %v1634_v57 = vsel %vm8321_vm4, %v1629_v27, %v1633_v11  ;;  %v2510_v42 = vsel %vm8696_vm7, %v2508_v22, %v2509_v12  ;;  %v2523_v32 = vrot.slane %v8637_v41, 5  ;;  %v6458_v53 = vcombine.low %v8909_v14, %v8912_v44 }
  0x88   : > { %7365 = vmatprep.mubr.msk.bf16.mxu1 %vm656_vm1, %v8884_v56  ;;  %v8898_v48 = vcombine.low %v2507_v16, %v2510_v42  ;;  %v8903_v35 = vcombine.low %v1624_v9, %v1634_v57  ;;  %v2522_v7 = vrot.slane %v2520_v25, 4  ;;  %v2521_v49 = vsel %vm8696_vm7, %v6560_v39, %v2520_v25  ;;  %v7929_v16 = vld [vmem:[%s8092_s16 + $0x40] sm:$0xf] }
  0x89   : > { %7328 = vmatmul.mubr.msk.bf16.gmra.mxu0 %vm656_vm1, %v11521_v43  ;;  %v2835_v41 = vsel %vm705_vm0, %v8564_v28, 0  ;;  %v2631_v34 = vsel %vm705_vm0, %v8596_v33, 0  ;;  %v1663_v28 = vshll.u32 %v8909_v14, 16  ;;  %v1669_v33 = vshll.u32 %v8912_v44, 16 }
  0x8a   : > { %7331 = vmatprep.mubr.msk.bf16.mxu0 %vm656_vm1, %v11522_v26  ;;  %v2524_v6 = vsel %vm8696_vm7, %v2522_v7, %v2523_v32  ;;  %v2527_v21 = vrot.slane %v8912_v44, 5  ;;  %v6561_v19 = vrot.slane %v8909_v14, 9  ;;  %v2432_v8 = vrot.slane %v11523_v0, 5  ;;  %v7930_v26 = vld [vmem:[%s8092_s16 + $0x30] sm:$0xf]  ;;  %v11525_v32 = vld [vmem:[#allocation25_spill] sm:$0xff] }
  0x8b   : > { %v8925_v63 = vcombine.low %v2521_v49, %v2524_v6  ;;  %v2443_v42 = vrot.slane %v7929_v16, 5  ;;  %v2439_v7 = vrot.slane %v11525_v32, 5  ;;  %v7931_v49 = vld [vmem:[%s8092_s16 + $0x3c] sm:$0xf] }
  0x8c   : > { %v2529_v27 = vrot.slane %v2527_v21, 4  ;;  %v9024_v22 = vsel %vm8696_vm7, %v6561_v19, %v2527_v21  ;;  %v6549_v6 = vrot.slane %v7931_v49, 9 }
  0x8f   : > { %7366 = vmatmul.mubr.msk.bf16.gmra.mxu1 %vm656_vm1, %v8903_v35 }
  0x90   : > { %7405 = vmatprep.mubr.msk.bf16.mxu1 %vm656_vm1, %v8511_v37 }
  0x91   : > { %7332 = vmatmul.mubr.msk.bf16.gmra.mxu0 %vm656_vm1, %v6458_v53  ;;  %v3418_v53 = vsel %vm705_vm0, %v8935_v36, 0 }
  0x92   : > { %7371 = vmatprep.mubr.msk.bf16.mxu0 %vm656_vm1, %v8394_v59  ;;  %v8948_v59 = vld [vmem:[%s11309_s4 + $0x10] sm:$0x3] }
  0x97   : > { %7406 = vmatmul.mubr.msk.bf16.vlgmr.msra.gmra.mxu1 %vm656_vm1, %v8573_v29 }
  0x98   : > { %7472 = vmatpush3.bf16.msra.mxu1 %v2835_v41  ;;  %7409 = vmatprep.mubr.msk.bf16.mxu1 %vm656_vm1, %v8609_v51  ;;  %v11526_v41 = vld [vmem:[#allocation26_spill] sm:$0xff] }
  0x99   : > { %7854 = vmatprep.subr.msk.bf16.mxu1 %vm705_vm0, %v8935_v36  ;;  %7372 = vmatmul.mubr.msk.bf16.vlgmr.msra.gmra.mxu0 %vm656_vm1, %v8511_v37  ;;  %v1660_v37 = vshrl.u32 %v8909_v14, 16  ;;  %v6548_v14 = vrot.slane %v7930_v26, 9 }
  0x9a   : > { %7438 = vmatpush3.bf16.msra.mxu0 %v2631_v34  ;;  %7375 = vmatprep.mubr.msk.bf16.mxu0 %vm656_vm1, %v8573_v29  ;;  %v1673_v29 = vshrl.u32 %v8912_v44, 16  ;;  %v2446_v34 = vrot.slane %v11526_v41, 5 }
  0x9b   : > { %7853 = vmatprep.subr.msk.bf16.mxu0 %vm705_vm0, %v8948_v59 }
  0x9f   : > { %7410 = vmatmul.mubr.msk.bf16.gmra.mxu1 %vm656_vm1, %v8623_v31 }
  0xa0   : > { %7413 = vmatprep.mubr.msk.bf16.mxu1 %vm656_vm1, %v8625_v38 }
  0xa1   : > { %7376 = vmatmul.mubr.msk.bf16.gmra.mxu0 %vm656_vm1, %v8609_v51  ;;  %v1662_v51 = vrot.slane %v1660_v37, 4  ;;  %v11527_v37 = vld [vmem:[#allocation8_spill] sm:$0xff] }
  0xa2   : > { %7379 = vmatprep.mubr.msk.bf16.mxu0 %vm656_vm1, %v8623_v31  ;;  %v1665_v31 = vrot.slane %v1663_v28, 5 }
  0xa7   : > { %7414 = vmatmul.mubr.msk.bf16.gmra.mxu1 %vm656_vm1, %v8653_v4 }
  0xa8   : > { %7417 = vmatprep.mubr.msk.bf16.mxu1 %vm656_vm1, %v8667_v24 }
  0xa9   : > { %7380 = vmatmul.mubr.msk.bf16.gmra.mxu0 %vm656_vm1, %v8625_v38  ;;  %v1671_v38 = vrot.slane %v1669_v33, 5 }
  0xaa   : > { %7383 = vmatprep.mubr.msk.bf16.mxu0 %vm656_vm1, %v8653_v4  ;;  %v1675_v4 = vrot.slane %v1673_v29, 4  ;;  %v7932_v29 = vld [vmem:[%s8092_s16 + $0x4c] sm:$0xf] }
  0xab   : > { %v2450_v33 = vrot.slane %v7932_v29, 5 }
  0xac   : > { %v1676_v23 = vor.u32 %v1675_v4, %v1671_v38 }
  0xaf   : > { %7418 = vmatmul.mubr.msk.bf16.gmra.mxu1 %vm656_vm1, %v8784_v20 }
  0xb0   : > { %7421 = vmatprep.mubr.msk.bf16.mxu1 %vm656_vm1, %v8799_v15 }
  0xb1   : > { %7384 = vmatmul.mubr.msk.bf16.gmra.mxu0 %vm656_vm1, %v8667_v24  ;;  %v572_v24 = vld [vmem:[%s8420_s28 + $0x14] sm:$0x1] }
  0xb2   : > { %7387 = vmatprep.mubr.msk.bf16.mxu0 %vm656_vm1, %v8784_v20  ;;  %v1666_v20 = vor.u32 %v1665_v31, %v1662_v51  ;;  %v1679_v18 = vshll.u32 %v572_v24, 16  ;;  %v2530_v17 = vrot.slane %v572_v24, 5  ;;  %v3039_v51 = vsel %vm705_vm0, %v8948_v59, 0  ;;  %v7933_v24 = vld [vmem:[%s8092_s16 + $0x58] sm:$0xf] }
  0xb4   : > { %v1681_v58 = vrot.slane %v1679_v18, 5  ;;  %v9033_v25 = vsel %vm8696_vm7, %v2529_v27, %v2530_v17 }
  0xb7   : > { %7422 = vmatmul.mubr.msk.bf16.gmra.mxu1 %vm656_vm1, %v8833_v50 }
  0xb8   : > { %7425 = vmatprep.mubr.msk.bf16.mxu1 %vm656_vm1, %v8838_v1 }
  0xb9   : > { %7388 = vmatmul.mubr.msk.bf16.gmra.mxu0 %vm656_vm1, %v8799_v15  ;;  %v1667_v15 = vrot.slane %v1666_v20, 4  ;;  %v2457_v20 = vrot.slane %v7933_v24, 5  ;;  %v11531_v24 = vld [vmem:[#allocation30_spill] sm:$0xff] }
  0xba   : > { %7391 = vmatprep.mubr.msk.bf16.mxu0 %vm656_vm1, %v8833_v50  ;;  %v1677_v50 = vrot.slane %v1676_v23, 4  ;;  %v9077_v23 = vld [vmem:[%s11310_s5 + $0x6] sm:$0x3] }
  0xbb   : > { %v1672_v3 = vsel %vm8321_vm4, %v1667_v15, %v1671_v38  ;;  %v2444_v38 = vsel %vm8696_vm7, %v6549_v6, %v2443_v42 }
  0xbc   : > { %v1682_v54 = vsel %vm8321_vm4, %v1677_v50, %v1681_v58  ;;  %v7934_v50 = vld [vmem:[%s8092_s16 + $0x48] sm:$0xf] }
  0xbd   : > { %v6527_v52 = vcombine.low %v1672_v3, %v1682_v54  ;;  %v6550_v58 = vrot.slane %v7934_v50, 9 }
  0xbf   : > { %7426 = vmatmul.mubr.msk.bf16.gmra.mxu1 %vm656_vm1, %v8879_v55 }
  0xc0   : > { %7429 = vmatprep.mubr.msk.bf16.mxu1 %vm656_vm1, %v8884_v56 }
  0xc1   : > { %7392 = vmatmul.mubr.msk.bf16.gmra.mxu0 %vm656_vm1, %v8838_v1  ;;  %v7926_v1 = vld [vmem:[%s8092_s16 + $0x28] sm:$0xf] }
  0xc2   : > { %7395 = vmatprep.mubr.msk.bf16.mxu0 %vm656_vm1, %v8879_v55  ;;  %v2429_v62 = vrot.slane %v7926_v1, 5  ;;  %v6547_v55 = vrot.slane %v7927_v47, 9  ;;  %v2452_v1 = vrot.slane %v2450_v33, 4  ;;  %v2459_v47 = vrot.slane %v2457_v20, 4 }
  0xc4   : > { %v2431_v12 = vrot.slane %v2429_v62, 4  ;;  %v2430_v9 = vsel %vm8696_vm7, %v6547_v55, %v2429_v62  ;;  %v11528_v62 = vld [vmem:[#allocation27_spill] sm:$0xff]  ;;  %v11529_v55 = vld [vmem:[#allocation28_spill] sm:$0xff] }
  0xc5   : > { %v2453_v21 = vrot.slane %v11528_v62, 5 }
  0xc6   : > { %v2433_v57 = vsel %vm8696_vm7, %v2431_v12, %v2432_v8  ;;  %v2460_v12 = vrot.slane %v11529_v55, 5 }
  0xc7   : > { %7430 = vmatmul.mubr.msk.bf16.gmra.mxu1 %vm656_vm1, %v8903_v35  ;;  %v9043_v39 = vcombine.low %v2430_v9, %v2433_v57  ;;  %v2454_v9 = vsel %vm8696_vm7, %v2452_v1, %v2453_v21  ;;  %v7936_v57 = vld [vmem:[%s8092_s16 + $0x64] sm:$0xf] }
  0xc8   : > { %7433 = vmatprep.mubr.msk.bf16.mxu1 %vm656_vm1, %v8704_v5  ;;  %v2464_v16 = vrot.slane %v7936_v57, 5 }
  0xc9   : > { %7396 = vmatmul.mubr.msk.bf16.gmra.mxu0 %vm656_vm1, %v8884_v56  ;;  %v7928_v56 = vld [vmem:[%s8092_s16 + $0x34] sm:$0xf] }
  0xca   : > { %7399 = vmatprep.mubr.msk.bf16.mxu0 %vm656_vm1, %v8903_v35  ;;  %v2436_v11 = vrot.slane %v7928_v56, 5  ;;  %v11524_v35 = vcombine.low %v8712_v45, %v8725_v10  ;;  %v9054_v45 = vld [vmem:[%s11310_s5 + $0xc] sm:$0x3] }
  0xcb   : > { %v3830_v13 = vsel %vm705_vm0, %v9054_v45, 0 }
  0xcc   : > { %v2438_v44 = vrot.slane %v2436_v11, 4  ;;  %v2437_v36 = vsel %vm8696_vm7, %v6548_v14, %v2436_v11  ;;  %v2451_v11 = vsel %vm8696_vm7, %v6550_v58, %v2450_v33  ;;  %v2461_v14 = vsel %vm8696_vm7, %v2459_v47, %v2460_v12 }
  0xcd   : > { %v9117_v6 = vcombine.low %v2451_v11, %v2454_v9 }
  0xce   : > { %v2440_v28 = vsel %vm8696_vm7, %v2438_v44, %v2439_v7  ;;  %v7937_v44 = vld [vmem:[%s8092_s16 + $0x70] sm:$0xf] }
  0xcf   : > { %7434 = vmatmul.mubr.msk.bf16.gmra.mxu1 %vm656_vm1, %v6527_v52  ;;  %v9081_v15 = vcombine.low %v2437_v36, %v2440_v28  ;;  %v2471_v32 = vrot.slane %v7937_v44, 5  ;;  %v2466_v36 = vrot.slane %v2464_v16, 4  ;;  %v11530_v28 = vld [vmem:[#allocation29_spill] sm:$0xff] }
  0xd0   : > { %7473 = vmatprep.mubr.msk.bf16.mxu1 %vm656_vm1, %v8750_v30  ;;  %v2467_v29 = vrot.slane %v11530_v28, 5 }
  0xd1   : > { %7400 = vmatmul.mubr.msk.bf16.gmra.mxu0 %vm656_vm1, %v8704_v5  ;;  %v2445_v5 = vrot.slane %v2443_v42, 4 }
  0xd2   : > { %7439 = vmatprep.mubr.msk.bf16.mxu0 %vm656_vm1, %v11524_v35  ;;  %v2468_v62 = vsel %vm8696_vm7, %v2466_v36, %v2467_v29 }
  0xd3   : > { %v2447_v4 = vsel %vm8696_vm7, %v2445_v5, %v2446_v34  ;;  %v7938_v5 = vld [vmem:[%s8092_s16 + $0x60] sm:$0xf] }
  0xd4   : > { %v9088_v54 = vcombine.low %v2444_v38, %v2447_v4  ;;  %v6552_v41 = vrot.slane %v7938_v5, 9  ;;  %v2473_v4 = vrot.slane %v2471_v32, 4 }
  0xd6   : > { %v7237_v18 = vpop.f32.mrf.mxu0  ;;  %v2465_v1 = vsel %vm8696_vm7, %v6552_v41, %v2464_v16 }
  0xd7   : > { %v7271_v10 = vpop.f32.mrf.mxu1  ;;  %7474 = vmatmul.mubr.msk.bf16.vlgmr.msra.gmra.mxu1 %vm656_vm1, %v11527_v37 }
  0xd8   : > { %7540 = vmatpush3.bf16.msra.mxu1 %v3418_v53  ;;  %7477 = vmatprep.mubr.msk.bf16.mxu1 %vm656_vm1, %v9043_v39  ;;  %v9084_v3 = vadd.f32 %v7271_v10, %v7237_v18  ;;  %v743_v52 = vpop.f32.mrf.mxu0 }
  0xd9   : > { %v915_v31 = vpop.f32.mrf.mxu1  ;;  %7856 = vmatprep.subr.msk.bf16.mxu1 %vm705_vm0, %v9054_v45  ;;  %7440 = vmatmul.mubr.msk.bf16.vlgmr.msra.gmra.mxu0 %vm656_vm1, %v8750_v30  ;;  %v7935_v30 = vld [vmem:[%s8092_s16 + $0x54] sm:$0xf]  ;;  %v9316_v45 = vld [vmem:[%s9238_s22 + $0x28] sm:$0xf] }
  0xda   : > { %7506 = vmatpush3.bf16.msra.mxu0 %v3039_v51  ;;  %7443 = vmatprep.mubr.msk.bf16.mxu0 %vm656_vm1, %v11527_v37  ;;  %v6551_v17 = vrot.slane %v7935_v30, 9  ;;  %v9095_v0 = vadd.f32 %v915_v31, %v743_v52  ;;  %v7238_v8 = vpop.f32.mrf.mxu0  ;;  %v7939_v31 = vld [vmem:[%s8092_s16 + $0x6c] sm:$0xf]  ;;  %11541 = vst [vmem:[#allocation19_spill] sm:$0xff] %v9316_v45 }
  0xdb   : > { %v7272_v59 = vpop.f32.mrf.mxu1  ;;  %7855 = vmatprep.subr.msk.bf16.mxu0 %vm705_vm0, %v9077_v23  ;;  %v6553_v38 = vrot.slane %v7939_v31, 9 }
  0xdc   : > { %v9099_v56 = vadd.f32 %v7272_v59, %v7238_v8  ;;  %v746_v42 = vpop.f32.mrf.mxu0  ;;  %v2458_v26 = vsel %vm8696_vm7, %v6551_v17, %v2457_v20  ;;  %v2474_v20 = vrot.slane %v11531_v24, 5  ;;  %v7940_v17 = vld [vmem:[%s8092_s16 + $0x88] sm:$0xf] }
  0xdd   : > { %v918_v19 = vpop.f32.mrf.mxu1  ;;  %v9124_v10 = vcombine.low %v2458_v26, %v2461_v14  ;;  %v2485_v47 = vrot.slane %v7940_v17, 5  ;;  %v11532_v14 = vld [vmem:[#allocation4_spill] sm:$0xff] }
  0xde   : > { %v9113_v7 = vadd.f32 %v918_v19, %v746_v42  ;;  %v7241_v53 = vpop.f32.mrf.mxu0  ;;  %v2472_v19 = vsel %vm8696_vm7, %v6553_v38, %v2471_v32  ;;  %v2475_v30 = vsel %vm8696_vm7, %v2473_v4, %v2474_v20  ;;  %v7941_v42 = vld [vmem:[%s8092_s16 + $0x84] sm:$0xf]  ;;  %v2488_v44 = vrot.slane %v11532_v14, 5 }
  0xdf   : > { %v7275_v27 = vpop.f32.mrf.mxu1  ;;  %7478 = vmatmul.mubr.msk.bf16.gmra.mxu1 %vm656_vm1, %v9081_v15  ;;  %v9156_v9 = vcombine.low %v2472_v19, %v2475_v30  ;;  %v2487_v26 = vrot.slane %v2485_v47, 4 }
  0xe0   : > { %7481 = vmatprep.mubr.msk.bf16.mxu1 %vm656_vm1, %v9088_v54  ;;  %v9120_v34 = vadd.f32 %v7275_v27, %v7241_v53  ;;  %v759_v33 = vpop.f32.mrf.mxu0  ;;  %v9150_v27 = vcombine.low %v2465_v1, %v2468_v62  ;;  %v7943_v1 = vld [vmem:[%s8092_s16 + $0x9c] sm:$0xf] }
  0xe1   : > { %v931_v35 = vpop.f32.mrf.mxu1  ;;  %7444 = vmatmul.mubr.msk.bf16.gmra.mxu0 %vm656_vm1, %v9043_v39  ;;  %v2489_v29 = vsel %vm8696_vm7, %v2487_v26, %v2488_v44  ;;  %v6557_v62 = vrot.slane %v7943_v1, 9 }
  0xe2   : > { %7447 = vmatprep.mubr.msk.bf16.mxu0 %vm656_vm1, %v9081_v15  ;;  %v9129_v18 = vadd.f32 %v931_v35, %v759_v33  ;;  %v7242_v59 = vpop.f32.mrf.mxu0  ;;  %v6555_v35 = vrot.slane %v7941_v42, 9  ;;  %v7942_v33 = vld [vmem:[%s8092_s16 + $0xa0] sm:$0xf] }
  0xe3   : > { %v7276_v49 = vpop.f32.mrf.mxu1 }
  0xe4   : > { %v9133_v58 = vadd.f32 %v7276_v49, %v7242_v59  ;;  %v762_v21 = vpop.f32.mrf.mxu0  ;;  %v2486_v28 = vsel %vm8696_vm7, %v6555_v35, %v2485_v47 }
  0xe5   : > { %v934_v51 = vpop.f32.mrf.mxu1  ;;  %v9181_v20 = vcombine.low %v2486_v28, %v2489_v29 }
  0xe6   : > { %v9146_v55 = vadd.f32 %v934_v51, %v762_v21  ;;  %v7245_v12 = vpop.f32.mrf.mxu0  ;;  %v2499_v51 = vrot.slane %v7942_v33, 5  ;;  %v2516_v33 = vrot.slane %v8845_v2, 5 }
  0xe7   : > { %v7279_v50 = vpop.f32.mrf.mxu1  ;;  %7482 = vmatmul.mubr.msk.bf16.gmra.mxu1 %vm656_vm1, %v9117_v6 }
  0xe8   : > { %7485 = vmatprep.mubr.msk.bf16.mxu1 %vm656_vm1, %v9124_v10  ;;  %v9152_v11 = vadd.f32 %v7279_v50, %v7245_v12  ;;  %v775_v57 = vpop.f32.mrf.mxu0  ;;  %v2501_v21 = vrot.slane %v2499_v51, 4 }
  0xe9   : > { %v947_v52 = vpop.f32.mrf.mxu1  ;;  %7448 = vmatmul.mubr.msk.bf16.gmra.mxu0 %vm656_vm1, %v9088_v54 }
  0xea   : > { %7451 = vmatprep.mubr.msk.bf16.mxu0 %vm656_vm1, %v9117_v6  ;;  %v9160_v32 = vadd.f32 %v947_v52, %v775_v57  ;;  %v7246_v53 = vpop.f32.mrf.mxu0  ;;  %v2502_v52 = vrot.slane %v8793_v40, 5  ;;  %v2500_v57 = vsel %vm8696_vm7, %v6557_v62, %v2499_v51 }
  0xeb   : > { %v7280_v8 = vpop.f32.mrf.mxu1 }
  0xec   : > { %v9164_v5 = vadd.f32 %v7280_v8, %v7246_v53  ;;  %v778_v41 = vpop.f32.mrf.mxu0  ;;  %v2503_v40 = vsel %vm8696_vm7, %v2501_v21, %v2502_v52 }
  0xed   : > { %v950_v16 = vpop.f32.mrf.mxu1  ;;  %v9206_v53 = vcombine.low %v2500_v57, %v2503_v40 }
  0xee   : > { %v9173_v31 = vadd.f32 %v950_v16, %v778_v41  ;;  %v7249_v38 = vpop.f32.mrf.mxu0  ;;  %v7944_v16 = vld [vmem:[%s8092_s16 + $0xb8] sm:$0xf] }
  0xef   : > { %v7283_v49 = vpop.f32.mrf.mxu1  ;;  %7486 = vmatmul.mubr.msk.bf16.gmra.mxu1 %vm656_vm1, %v9150_v27  ;;  %v2513_v42 = vrot.slane %v7944_v16, 5 }
  0xf0   : > { %7489 = vmatprep.mubr.msk.bf16.mxu1 %vm656_vm1, %v9156_v9  ;;  %v9177_v24 = vadd.f32 %v7283_v49, %v7249_v38  ;;  %v791_v59 = vpop.f32.mrf.mxu0 }
  0xf1   : > { %v963_v36 = vpop.f32.mrf.mxu1  ;;  %7452 = vmatmul.mubr.msk.bf16.gmra.mxu0 %vm656_vm1, %v9124_v10  ;;  %v2515_v29 = vrot.slane %v2513_v42, 4 }
  0xf2   : > { %7455 = vmatprep.mubr.msk.bf16.mxu0 %vm656_vm1, %v9150_v27  ;;  %v9185_v19 = vadd.f32 %v963_v36, %v791_v59  ;;  %v7250_v30 = vpop.f32.mrf.mxu0  ;;  %v7945_v36 = vld [vmem:[%s8092_s16 + $0xb4] sm:$0xf] }
  0xf3   : > { %v7284_v4 = vpop.f32.mrf.mxu1  ;;  %v6559_v28 = vrot.slane %v7945_v36, 9  ;;  %v2517_v2 = vsel %vm8696_vm7, %v2515_v29, %v2516_v33  ;;  %v9250_v36 = vld [vmem:[%s9238_s22 + $0x4] sm:$0xf] }
  0xf4   : > { %v9189_v47 = vadd.f32 %v7284_v4, %v7250_v30  ;;  %v794_v12 = vpop.f32.mrf.mxu0  ;;  %11534 = vst [vmem:[#allocation3_spill] sm:$0xff] %v9250_v36 }
  0xf5   : > { %v966_v50 = vpop.f32.mrf.mxu1  ;;  %v2514_v62 = vsel %vm8696_vm7, %v6559_v28, %v2513_v42 }
  0xf6   : > { %v9198_v35 = vadd.f32 %v966_v50, %v794_v12  ;;  %v7253_v26 = vpop.f32.mrf.mxu0  ;;  %v9230_v12 = vcombine.low %v2514_v62, %v2517_v2 }
  0xf7   : > { %v7287_v17 = vpop.f32.mrf.mxu1  ;;  %7490 = vmatmul.mubr.msk.bf16.gmra.mxu1 %vm656_vm1, %v8847_v61 }
  0xf8   : > { %7493 = vmatprep.mubr.msk.bf16.mxu1 %vm656_vm1, %v9181_v20  ;;  %v9202_v44 = vadd.f32 %v7287_v17, %v7253_v26  ;;  %v807_v49 = vpop.f32.mrf.mxu0 }
  0xf9   : > { %v979_v8 = vpop.f32.mrf.mxu1  ;;  %7456 = vmatmul.mubr.msk.bf16.gmra.mxu0 %vm656_vm1, %v9156_v9 }
  0xfa   : > { %7459 = vmatprep.mubr.msk.bf16.mxu0 %vm656_vm1, %v8847_v61  ;;  %v9210_v51 = vadd.f32 %v979_v8, %v807_v49  ;;  %v7254_v38 = vpop.f32.mrf.mxu0 }
  0xfb   : > { %v7288_v14 = vpop.f32.mrf.mxu1 }
  0xfc   : > { %v9214_v59 = vadd.f32 %v7288_v14, %v7254_v38  ;;  %v810_v50 = vpop.f32.mrf.mxu0 }
  0xfd   : > { %v982_v41 = vpop.f32.mrf.mxu1 }
  0xfe   : > { %v9222_v21 = vadd.f32 %v982_v41, %v810_v50  ;;  %v7257_v52 = vpop.f32.mrf.mxu0  ;;  %v9247_v41 = vld [vmem:[%s9238_s22] sm:$0xf] }
  0xff   : > { %v7291_v4 = vpop.f32.mrf.mxu1  ;;  %7494 = vmatmul.mubr.msk.bf16.gmra.mxu1 %vm656_vm1, %v8873_v46  ;;  %11533 = vst [vmem:[#allocation7_spill] sm:$0xff] %v9247_v41 }
 0x100   : > { %7497 = vmatprep.mubr.msk.bf16.mxu1 %vm656_vm1, %v9206_v53  ;;  %v9226_v17 = vadd.f32 %v7291_v4, %v7257_v52  ;;  %v823_v8 = vpop.f32.mrf.mxu0  ;;  %v6631_v4 = vcombine.low %v9247_v41, %v9250_v36 }
 0x101   : > { %v995_v1 = vpop.f32.mrf.mxu1  ;;  %7460 = vmatmul.mubr.msk.bf16.gmra.mxu0 %vm656_vm1, %v9181_v20 }
 0x102   : > { %7463 = vmatprep.mubr.msk.bf16.mxu0 %vm656_vm1, %v8873_v46  ;;  %v9232_v40 = vadd.f32 %v995_v1, %v823_v8  ;;  %v7258_v16 = vpop.f32.mrf.mxu0  ;;  %v9270_v8 = vld [vmem:[%s9238_s22 + $0xc] sm:$0xf] }
 0x103   : > { %v7292_v30 = vpop.f32.mrf.mxu1  ;;  %11535 = vst [vmem:[#allocation2_spill] sm:$0xff] %v9270_v8 }
 0x104   : > { %v9242_v26 = vadd.f32 %v7292_v30, %v7258_v16  ;;  %v826_v14 = vpop.f32.mrf.mxu0 }
 0x105   : > { %v998_v57 = vpop.f32.mrf.mxu1 }
 0x106   : > { %v9252_v28 = vadd.f32 %v998_v57, %v826_v14  ;;  %v7261_v29 = vpop.f32.mrf.mxu0  ;;  %v9273_v57 = vld [vmem:[%s9238_s22 + $0x10] sm:$0xf]  ;;  %v9276_v14 = vld [vmem:[%s9238_s22 + $0x18] sm:$0xf] }
 0x107   : > { %v7295_v42 = vpop.f32.mrf.mxu1  ;;  %7498 = vmatmul.mubr.msk.bf16.gmra.mxu1 %vm656_vm1, %v8898_v48  ;;  %11536 = vst [vmem:[#allocation10_spill] sm:$0xff] %v9273_v57 }
 0x108   : > { %7501 = vmatprep.mubr.msk.bf16.mxu1 %vm656_vm1, %v9230_v12  ;;  %v9256_v38 = vadd.f32 %v7295_v42, %v7261_v29  ;;  %v839_v50 = vpop.f32.mrf.mxu0  ;;  %v9279_v29 = vld [vmem:[%s9238_s22 + $0x1c] sm:$0xf] }
 0x109   : > { %v1011_v49 = vpop.f32.mrf.mxu1  ;;  %7464 = vmatmul.mubr.msk.bf16.gmra.mxu0 %vm656_vm1, %v9206_v53  ;;  %11537 = vst [vmem:[#allocation5_spill] sm:$0xff] %v9279_v29 }
 0x10a   : > { %7467 = vmatprep.mubr.msk.bf16.mxu0 %vm656_vm1, %v8898_v48  ;;  %v9262_v62 = vadd.f32 %v1011_v49, %v839_v50  ;;  %v7262_v2 = vpop.f32.mrf.mxu0 }
 0x10b   : > { %v7296_v33 = vpop.f32.mrf.mxu1 }
 0x10c   : > { %v9266_v30 = vadd.f32 %v7296_v33, %v7262_v2  ;;  %v842_v16 = vpop.f32.mrf.mxu0 }
 0x10d   : > { %v1014_v1 = vpop.f32.mrf.mxu1 }
 0x10e   : > { %v9281_v49 = vadd.f32 %v1014_v1, %v842_v16  ;;  %v7265_v50 = vpop.f32.mrf.mxu0  ;;  %v9295_v1 = vcombine.low %v9276_v14, %v9279_v29 }
 0x10f   : > { %v7299_v52 = vpop.f32.mrf.mxu1  ;;  %7502 = vmatmul.mubr.msk.bf16.gmra.mxu1 %vm656_vm1, %v8925_v63 }
 0x110   : > { %7541 = vmatprep.mubr.msk.bf16.mxu1 %vm656_vm1, %v6631_v4  ;;  %v9287_v4 = vcombine.low %v9270_v8, %v9273_v57  ;;  %v9289_v2 = vadd.f32 %v7299_v52, %v7265_v50  ;;  %v855_v16 = vpop.f32.mrf.mxu0  ;;  %v9304_v52 = vld [vmem:[%s11310_s5 + $0x8] sm:$0x3]  ;;  %v9313_v8 = vld [vmem:[%s9238_s22 + $0x24] sm:$0xf] }
 0x111   : > { %v1027_v42 = vpop.f32.mrf.mxu1  ;;  %7468 = vmatmul.mubr.msk.bf16.gmra.mxu0 %vm656_vm1, %v9230_v12  ;;  %11540 = vst [vmem:[#allocation18_spill] sm:$0xff] %v9313_v8 }
 0x112   : > { %7507 = vmatprep.mubr.msk.bf16.mxu0 %vm656_vm1, %v11527_v37  ;;  %v9299_v36 = vadd.f32 %v1027_v42, %v855_v16  ;;  %v7266_v50 = vpop.f32.mrf.mxu0  ;;  %v3624_v16 = vsel %vm705_vm0, %v9077_v23, 0 }
 0x113   : > { %v7300_v33 = vpop.f32.mrf.mxu1 }
 0x114   : > { %11538 = vst [vmem:[#allocation14_spill] sm:$0xff] %v9299_v36  ;;  %v9308_v57 = vadd.f32 %v7300_v33, %v7266_v50  ;;  %v858_v42 = vpop.f32.mrf.mxu0  ;;  %v9324_v36 = vld [vmem:[%s9238_s22 + $0x34] sm:$0xf]  ;;  %v9333_v33 = vld [vmem:[%s11310_s5 + $0x2] sm:$0x3] }
 0x115   : > { %v1030_v43 = vpop.f32.mrf.mxu1  ;;  %11543 = vst [vmem:[#allocation6_spill] sm:$0xff] %v9324_v36 }
 0x116   : > { %11539 = vst [vmem:[#allocation17_spill] sm:$0xff] %v9308_v57  ;;  %v7305_v50 = vpop.f32.mrf.mxu0  ;;  %v9339_v57 = vcombine.low %v9313_v8, %v9316_v45 }
 0x117   : > { %v7339_v37 = vpop.f32.mrf.mxu1  ;;  %7542 = vmatmul.mubr.msk.bf16.vlgmr.msra.gmra.mxu1 %vm656_vm1, %v9287_v4  ;;  %v1218_v29 = vadd.f32 %v7305_v50, %v9084_v3 }
 0x118   : > { %7608 = vmatpush3.bf16.msra.mxu1 %v3830_v13  ;;  %7545 = vmatprep.mubr.msk.bf16.mxu1 %vm656_vm1, %v9295_v1  ;;  %v9328_v13 = vadd.f32 %v1030_v43, %v858_v42  ;;  %v9346_v43 = vcombine.low %v9321_v60, %v9324_v36  ;;  %v1089_v42 = vpop.f32.mrf.mxu0  ;;  %v9361_v36 = vld [vmem:[%s9238_s22 + $0x3c] sm:$0xf]  ;;  %v9364_v60 = vld [vmem:[%s9238_s22 + $0x40] sm:$0xf] }
 0x119   : > { %v1818_v41 = vpop.f32.mrf.mxu1  ;;  %7858 = vmatprep.subr.msk.bf16.mxu1 %vm705_vm0, %v9304_v52  ;;  %7508 = vmatmul.mubr.msk.bf16.vlgmr.msra.gmra.mxu0 %vm656_vm1, %v9043_v39  ;;  %v9350_v45 = vadd.f32 %v7339_v37, %v1218_v29  ;;  %v1216_v3 = vadd.f32 %v1089_v42, %v9095_v0  ;;  %11547 = vst [vmem:[#allocation15_spill] sm:$0xff] %v9361_v36  ;;  %11548 = vst [vmem:[#allocation16_spill] sm:$0xff] %v9364_v60  ;;  %v9370_v0 = vld [vmem:[%s9238_s22 + $0x4c] sm:$0xf] }
 0x11a   : > { %11544 = vst [vmem:[#allocation9_spill] sm:$0xff] %v9328_v13  ;;  %7574 = vmatpush3.bf16.msra.mxu0 %v3624_v16  ;;  %7511 = vmatprep.mubr.msk.bf16.mxu0 %vm656_vm1, %v9081_v15  ;;  %v7306_v50 = vpop.f32.mrf.mxu0  ;;  %11550 = vst [vmem:[#allocation22_spill] sm:$0xff] %v9370_v0 }
 0x11b   : > { %v7340_v23 = vpop.f32.mrf.mxu1  ;;  %7857 = vmatprep.subr.msk.bf16.mxu0 %vm705_vm0, %v9333_v33  ;;  %11545 = vst [vmem:[#allocation20_spill] sm:$0xff] %v9350_v45  ;;  %v9355_v15 = vadd.f32 %v1818_v41, %v1216_v3  ;;  %v1219_v8 = vadd.f32 %v7306_v50, %v9099_v56  ;;  %v9367_v45 = vld [vmem:[%s9238_s22 + $0x48] sm:$0xf]  ;;  %v9379_v50 = vcombine.low %v9361_v36, %v9364_v60  ;;  %v9407_v36 = vld [vmem:[%s9238_s22 + $0x60] sm:$0xf] }
 0x11c   : > { %v1092_v29 = vpop.f32.mrf.mxu0  ;;  %11549 = vst [vmem:[#allocation21_spill] sm:$0xff] %v9367_v45 }
 0x11d   : > { %v1821_v39 = vpop.f32.mrf.mxu1  ;;  %11546 = vst [vmem:[#allocation11_spill] sm:$0xff] %v9355_v15  ;;  %v9372_v42 = vadd.f32 %v7340_v23, %v1219_v8  ;;  %v1217_v41 = vadd.f32 %v1092_v29, %v9113_v7  ;;  %v9388_v7 = vcombine.low %v9367_v45, %v9370_v0 }
 0x11e   : > { %v7309_v3 = vpop.f32.mrf.mxu0 }
 0x11f   : > { %v7343_v16 = vpop.f32.mrf.mxu1  ;;  %7546 = vmatmul.mubr.msk.bf16.gmra.mxu1 %vm656_vm1, %v9339_v57  ;;  %v9381_v15 = vadd.f32 %v1821_v39, %v1217_v41  ;;  %v1222_v13 = vadd.f32 %v7309_v3, %v9120_v34  ;;  %v9401_v41 = vld [vmem:[%s9238_s22 + $0x54] sm:$0xf]  ;;  %v9404_v3 = vld [vmem:[%s9238_s22 + $0x58] sm:$0xf] }
 0x120   : > { %7549 = vmatprep.mubr.msk.bf16.mxu1 %vm656_vm1, %v9346_v43  ;;  %11551 = vst [vmem:[#allocation24_spill] sm:$0xff] %v9401_v41  ;;  %11552 = vst [vmem:[#allocation23_spill] sm:$0xff] %v9404_v3 }
 0x121   : > { %v1834_v37 = vpop.f32.mrf.mxu1  ;;  %7512 = vmatmul.mubr.msk.bf16.gmra.mxu0 %vm656_vm1, %v9088_v54  ;;  %v1105_v54 = vpop.f32.mrf.mxu0  ;;  %v9390_v23 = vadd.f32 %v7343_v16, %v1222_v13 }
 0x122   : > { %7515 = vmatprep.mubr.msk.bf16.mxu0 %vm656_vm1, %v9117_v6  ;;  %v1220_v29 = vadd.f32 %v1105_v54, %v9129_v18  ;;  %v9410_v18 = vld [vmem:[%s9238_s22 + $0x64] sm:$0xf] }
 0x123   : > { %v7344_v56 = vpop.f32.mrf.mxu1  ;;  %v7310_v60 = vpop.f32.mrf.mxu0  ;;  %11553 = vst [vmem:[#allocation25_spill] sm:$0xff] %v9410_v18 }
 0x124   : > { %v9395_v34 = vadd.f32 %v1834_v37, %v1220_v29  ;;  %v1223_v6 = vadd.f32 %v7310_v60, %v9133_v58  ;;  %v9419_v58 = vcombine.low %v9401_v41, %v9404_v3  ;;  %v9447_v41 = vld [vmem:[%s9238_s22 + $0x78] sm:$0xf] }
 0x125   : > { %v1837_v8 = vpop.f32.mrf.mxu1  ;;  %v1108_v13 = vpop.f32.mrf.mxu0 }
 0x126   : > { %v9412_v54 = vadd.f32 %v7344_v56, %v1223_v6  ;;  %v1221_v37 = vadd.f32 %v1108_v13, %v9146_v55  ;;  %v9428_v55 = vcombine.low %v9407_v36, %v9410_v18 }
 0x127   : > { %v7347_v39 = vpop.f32.mrf.mxu1  ;;  %7550 = vmatmul.mubr.msk.bf16.gmra.mxu1 %vm656_vm1, %v9379_v50 }
 0x128   : > { %7553 = vmatprep.mubr.msk.bf16.mxu1 %vm656_vm1, %v9388_v7  ;;  %v9421_v0 = vadd.f32 %v1837_v8, %v1221_v37  ;;  %v9441_v37 = vld [vmem:[%s9238_s22 + $0x6c] sm:$0xf] }
 0x129   : > { %v1850_v16 = vpop.f32.mrf.mxu1  ;;  %v7313_v29 = vpop.f32.mrf.mxu0  ;;  %7516 = vmatmul.mubr.msk.bf16.gmra.mxu0 %vm656_vm1, %v9124_v10  ;;  %11555 = vst [vmem:[#allocation8_spill] sm:$0xff] %v9441_v37 }
 0x12a   : > { %v1226_v45 = vadd.f32 %v7313_v29, %v9152_v11  ;;  %7519 = vmatprep.mubr.msk.bf16.mxu0 %vm656_vm1, %v9150_v27  ;;  %v9444_v29 = vld [vmem:[%s9238_s22 + $0x70] sm:$0xf] }
 0x12b   : > { %v7348_v60 = vpop.f32.mrf.mxu1  ;;  %v1121_v10 = vpop.f32.mrf.mxu0  ;;  %11556 = vst [vmem:[#allocation27_spill] sm:$0xff] %v9444_v29 }
 0x12c   : > { %v9430_v6 = vadd.f32 %v7347_v39, %v1226_v45  ;;  %v1224_v13 = vadd.f32 %v1121_v10, %v9160_v32  ;;  %v9450_v32 = vld [vmem:[%s9238_s22 + $0x7c] sm:$0xf] }
 0x12d   : > { %v1853_v56 = vpop.f32.mrf.mxu1  ;;  %v7314_v3 = vpop.f32.mrf.mxu0 }
 0x12e   : > { %v9435_v11 = vadd.f32 %v1850_v16, %v1224_v13  ;;  %v1227_v27 = vadd.f32 %v7314_v3, %v9164_v5  ;;  %v9459_v3 = vcombine.low %v9441_v37, %v9444_v29  ;;  %v9487_v37 = vld [vmem:[%s9238_s22 + $0x90] sm:$0xf] }
 0x12f   : > { %v7351_v8 = vpop.f32.mrf.mxu1  ;;  %7554 = vmatmul.mubr.msk.bf16.gmra.mxu1 %vm656_vm1, %v9419_v58  ;;  %v1124_v45 = vpop.f32.mrf.mxu0 }
 0x130   : > { %11554 = vst [vmem:[#allocation26_spill] sm:$0xff] %v9435_v11  ;;  %7557 = vmatprep.mubr.msk.bf16.mxu1 %vm656_vm1, %v9428_v55  ;;  %v9452_v10 = vadd.f32 %v7348_v60, %v1227_v27  ;;  %v1225_v16 = vadd.f32 %v1124_v45, %v9173_v31  ;;  %v9468_v31 = vcombine.low %v9447_v41, %v9450_v32 }
 0x131   : > { %v1866_v39 = vpop.f32.mrf.mxu1  ;;  %v7317_v13 = vpop.f32.mrf.mxu0  ;;  %7520 = vmatmul.mubr.msk.bf16.gmra.mxu0 %vm656_vm1, %v9156_v9 }
 0x132   : > { %v9461_v11 = vadd.f32 %v1853_v56, %v1225_v16  ;;  %v1230_v18 = vadd.f32 %v7317_v13, %v9177_v24  ;;  %7523 = vmatprep.mubr.msk.bf16.mxu0 %vm656_vm1, %v8847_v61  ;;  %v9481_v16 = vld [vmem:[%s9238_s22 + $0x84] sm:$0xf]  ;;  %v9484_v13 = vld [vmem:[%s9238_s22 + $0x88] sm:$0xf] }
 0x133   : > { %v7352_v5 = vpop.f32.mrf.mxu1  ;;  %v1137_v9 = vpop.f32.mrf.mxu0  ;;  %11559 = vst [vmem:[#allocation30_spill] sm:$0xff] %v9481_v16  ;;  %11560 = vst [vmem:[#allocation4_spill] sm:$0xff] %v9484_v13 }
 0x134   : > { %v9470_v27 = vadd.f32 %v7351_v8, %v1230_v18  ;;  %v1228_v45 = vadd.f32 %v1137_v9, %v9185_v19  ;;  %v9490_v19 = vld [vmem:[%s9238_s22 + $0x94] sm:$0xf] }
 0x135   : > { %v1869_v60 = vpop.f32.mrf.mxu1  ;;  %v7318_v29 = vpop.f32.mrf.mxu0 }
 0x136   : > { %11557 = vst [vmem:[#allocation28_spill] sm:$0xff] %v9470_v27  ;;  %v9475_v24 = vadd.f32 %v1866_v39, %v1228_v45  ;;  %v1231_v61 = vadd.f32 %v7318_v29, %v9189_v47  ;;  %v9499_v29 = vcombine.low %v9481_v16, %v9484_v13 }
 0x137   : > { %v7355_v56 = vpop.f32.mrf.mxu1  ;;  %7558 = vmatmul.mubr.msk.bf16.gmra.mxu1 %vm656_vm1, %v9459_v3  ;;  %v1140_v18 = vpop.f32.mrf.mxu0 }
 0x138   : > { %11558 = vst [vmem:[#allocation29_spill] sm:$0xff] %v9475_v24  ;;  %7561 = vmatprep.mubr.msk.bf16.mxu1 %vm656_vm1, %v9468_v31  ;;  %v9492_v9 = vadd.f32 %v7352_v5, %v1231_v61  ;;  %v1229_v39 = vadd.f32 %v1140_v18, %v9198_v35  ;;  %v9508_v35 = vcombine.low %v9487_v37, %v9490_v19 }
 0x139   : > { %v1882_v8 = vpop.f32.mrf.mxu1  ;;  %v7321_v45 = vpop.f32.mrf.mxu0  ;;  %7524 = vmatmul.mubr.msk.bf16.gmra.mxu0 %vm656_vm1, %v9181_v20 }
 0x13a   : > { %v9501_v24 = vadd.f32 %v1869_v60, %v1229_v39  ;;  %v1234_v27 = vadd.f32 %v7321_v45, %v9202_v44  ;;  %7527 = vmatprep.mubr.msk.bf16.mxu0 %vm656_vm1, %v8873_v46  ;;  %v9521_v39 = vld [vmem:[%s9238_s22 + $0x9c] sm:$0xf]  ;;  %v3274_v45 = vld [vmem:[%s9238_s22 + $0xa0] sm:$0xf] }
 0x13b   : > { %v7356_v47 = vpop.f32.mrf.mxu1  ;;  %v1153_v20 = vpop.f32.mrf.mxu0  ;;  %11563 = vst [vmem:[#allocation34_spill] sm:$0xff] %v9521_v39 }
 0x13c   : > { %v9510_v61 = vadd.f32 %v7355_v56, %v1234_v27  ;;  %v1232_v18 = vadd.f32 %v1153_v20, %v9210_v51  ;;  %v9525_v56 = vld [vmem:[%s9238_s22 + $0xa8] sm:$0xf]  ;;  %v9528_v51 = vld [vmem:[%s9238_s22 + $0xac] sm:$0xf] }
 0x13d   : > { %v1885_v5 = vpop.f32.mrf.mxu1  ;;  %v7322_v13 = vpop.f32.mrf.mxu0 }
 0x13e   : > { %11561 = vst [vmem:[#allocation32_spill] sm:$0xff] %v9510_v61  ;;  %v9515_v44 = vadd.f32 %v1882_v8, %v1232_v18  ;;  %v1235_v46 = vadd.f32 %v7322_v13, %v9214_v59  ;;  %v9536_v13 = vcombine.low %v9521_v39, %v3274_v45 }
 0x13f   : > { %v7359_v60 = vpop.f32.mrf.mxu1  ;;  %7562 = vmatmul.mubr.msk.bf16.gmra.mxu1 %vm656_vm1, %v9499_v29  ;;  %v1156_v16 = vpop.f32.mrf.mxu0 }
 0x140   : > { %11562 = vst [vmem:[#allocation33_spill] sm:$0xff] %v9515_v44  ;;  %7565 = vmatprep.mubr.msk.bf16.mxu1 %vm656_vm1, %v9508_v35  ;;  %v9530_v20 = vadd.f32 %v7356_v47, %v1235_v46  ;;  %v1233_v61 = vadd.f32 %v1156_v16, %v9222_v21  ;;  %v9545_v21 = vcombine.low %v9525_v56, %v9528_v51 }
 0x141   : > { %v1898_v27 = vpop.f32.mrf.mxu1  ;;  %v7325_v8 = vpop.f32.mrf.mxu0  ;;  %7528 = vmatmul.mubr.msk.bf16.gmra.mxu0 %vm656_vm1, %v9206_v53 }
 0x142   : > { %v9538_v18 = vadd.f32 %v1885_v5, %v1233_v61  ;;  %v1238_v44 = vadd.f32 %v7325_v8, %v9226_v17  ;;  %7531 = vmatprep.mubr.msk.bf16.mxu0 %vm656_vm1, %v8898_v48  ;;  %v3279_v48 = vld [vmem:[%s9238_s22 + $0xb4] sm:$0xf]  ;;  %v3280_v61 = vld [vmem:[%s9238_s22 + $0xb8] sm:$0xf] }
 0x143   : > { %v7360_v59 = vpop.f32.mrf.mxu1  ;;  %v1169_v16 = vpop.f32.mrf.mxu0 }
 0x144   : > { %11564 = vst [vmem:[#allocation35_spill] sm:$0xff] %v9538_v18  ;;  %v9547_v53 = vadd.f32 %v7359_v60, %v1238_v44  ;;  %v1236_v46 = vadd.f32 %v1169_v16, %v9232_v40 }
 0x145   : > { %v1901_v47 = vpop.f32.mrf.mxu1  ;;  %v7326_v45 = vpop.f32.mrf.mxu0 }
 0x146   : > { %v9552_v5 = vadd.f32 %v1898_v27, %v1236_v46  ;;  %v1239_v17 = vadd.f32 %v7326_v45, %v9242_v26  ;;  %v9564_v27 = vcombine.low %v3279_v48, %v3280_v61 }
 0x147   : > { %v7363_v39 = vpop.f32.mrf.mxu1  ;;  %7566 = vmatmul.mubr.msk.bf16.gmra.mxu1 %vm656_vm1, %v9536_v13  ;;  %v1172_v8 = vpop.f32.mrf.mxu0 }
 0x148   : > { %11565 = vst [vmem:[#allocation36_spill] sm:$0xff] %v9552_v5  ;;  %7569 = vmatprep.mubr.msk.bf16.mxu1 %vm656_vm1, %v9545_v21  ;;  %v9559_v60 = vadd.f32 %v7360_v59, %v1239_v17  ;;  %v1237_v40 = vadd.f32 %v1172_v8, %v9252_v28 }
 0x149   : > { %v1914_v18 = vpop.f32.mrf.mxu1  ;;  %v7329_v44 = vpop.f32.mrf.mxu0  ;;  %7532 = vmatmul.mubr.msk.bf16.gmra.mxu0 %vm656_vm1, %v9230_v12 }
 0x14a   : > { %v9566_v46 = vadd.f32 %v1901_v47, %v1237_v40  ;;  %v1242_v26 = vadd.f32 %v7329_v44, %v9256_v38  ;;  %7535 = vmatprep.mubr.msk.bf16.mxu0 %vm656_vm1, %v8925_v63 }
 0x14b   : > { %v7364_v16 = vpop.f32.mrf.mxu1  ;;  %v1185_v45 = vpop.f32.mrf.mxu0 }
 0x14c   : > { %v9571_v59 = vadd.f32 %v7363_v39, %v1242_v26  ;;  %v1240_v28 = vadd.f32 %v1185_v45, %v9262_v62  ;;  %v11566_v62 = vcombine.low %v9024_v22, %v9033_v25  ;;  %v11567_v26 = vld [vmem:[#allocation5_spill] sm:$0xff]  ;;  %v4760_v25 = vsel %vm705_vm0, %v9304_v52, 0 }
 0x14d   : > { %v1917_v5 = vpop.f32.mrf.mxu1  ;;  %v7330_v17 = vpop.f32.mrf.mxu0  ;;  %v4087_v45 = vshrl.u32 %v11567_v26, 16 }
 0x14e   : > { %v9576_v12 = vadd.f32 %v1914_v18, %v1240_v28  ;;  %v1243_v47 = vadd.f32 %v7330_v17, %v9266_v30  ;;  %v4074_v18 = vshrl.u32 %v9276_v14, 16 }
 0x14f   : > { %v7367_v8 = vpop.f32.mrf.mxu1  ;;  %7570 = vmatmul.mubr.msk.bf16.gmra.mxu1 %vm656_vm1, %v9564_v27  ;;  %v1188_v38 = vpop.f32.mrf.mxu0 }
 0x150   : > { %7609 = vmatprep.mubr.msk.bf16.mxu1 %vm656_vm1, %v9295_v1  ;;  %v9581_v48 = vadd.f32 %v7364_v16, %v1243_v47  ;;  %v1241_v39 = vadd.f32 %v1188_v38, %v9281_v49  ;;  %v4077_v16 = vshll.u32 %v9276_v14, 16  ;;  %v4083_v49 = vshll.u32 %v11567_v26, 16 }
 0x151   : > { %v1930_v63 = vpop.f32.mrf.mxu1  ;;  %v7333_v61 = vpop.f32.mrf.mxu0  ;;  %7536 = vmatmul.mubr.msk.bf16.gmra.mxu0 %vm656_vm1, %v11566_v62  ;;  %v4076_v38 = vrot.slane %v4074_v18, 4 }
 0x152   : > { %v9589_v44 = vadd.f32 %v1917_v5, %v1241_v39  ;;  %v1246_v30 = vadd.f32 %v7333_v61, %v9289_v2  ;;  %7575 = vmatprep.mubr.msk.bf16.mxu0 %vm656_vm1, %v9287_v4  ;;  %v11568_v5 = vld [vmem:[#allocation14_spill] sm:$0xff]  ;;  %v11570_v61 = vld [vmem:[#allocation17_spill] sm:$0xff]  ;;  %v9614_v62 = vrot.slane %v4083_v49, 5 }
 0x153   : > { %v7368_v40 = vpop.f32.mrf.mxu1  ;;  %v1201_v28 = vpop.f32.mrf.mxu0  ;;  %v9605_v2 = vld [vmem:[%s11310_s5 + $0x4] sm:$0x3] }
 0x154   : > { %v9599_v17 = vadd.f32 %v7367_v8, %v1246_v30  ;;  %v1244_v47 = vadd.f32 %v1201_v28, %v11568_v5  ;;  %v4079_v8 = vrot.slane %v4077_v16, 5  ;;  %v4089_v30 = vrot.slane %v4087_v45, 4  ;;  %v9627_v16 = vld [vmem:[%s11310_s5 + $0xe] sm:$0x3] }
 0x155   : > { %v1933_v22 = vpop.f32.mrf.mxu1  ;;  %v7334_v14 = vpop.f32.mrf.mxu0  ;;  %v4556_v28 = vsel %vm705_vm0, %v9333_v33, 0 }
 0x156   : > { %v9609_v39 = vadd.f32 %v1930_v63, %v1244_v47  ;;  %v1247_v52 = vadd.f32 %v7334_v14, %v11570_v61  ;;  %v3242_v63 = vld [vmem:[%s9238_s22 + $0x20] sm:$0x1]  ;;  %v11572_v47 = vld [vmem:[#allocation9_spill] sm:$0xff]  ;;  %v11574_v14 = vld [vmem:[#allocation20_spill] sm:$0xff] }
 0x157   : > { %v7407_v4 = vpop.f32.mrf.mxu1  ;;  %7610 = vmatmul.mubr.msk.bf16.vlgmr.msra.gmra.mxu1 %vm656_vm1, %v9339_v57  ;;  %v1204_v26 = vpop.f32.mrf.mxu0 }
 0x158   : > { %11569 = vst [vmem:[#allocation5_spill] sm:$0xff] %v9609_v39  ;;  %7676 = vmatpush3.bf16.msra.mxu1 %v4760_v25  ;;  %7613 = vmatprep.mubr.msk.bf16.mxu1 %vm656_vm1, %v9346_v43  ;;  %v9621_v18 = vadd.f32 %v7368_v40, %v1247_v52  ;;  %v1245_v25 = vadd.f32 %v1204_v26, %v11572_v47  ;;  %v4093_v26 = vshll.u32 %v3242_v63, 16 }
 0x159   : > { %v2226_v5 = vpop.f32.mrf.mxu1  ;;  %7860 = vmatprep.subr.msk.bf16.mxu1 %vm705_vm0, %v9605_v2  ;;  %v7373_v49 = vpop.f32.mrf.mxu0  ;;  %7576 = vmatmul.mubr.msk.bf16.vlgmr.msra.gmra.mxu0 %vm656_vm1, %v9295_v1  ;;  %v4080_v40 = vor.u32 %v4079_v8, %v4076_v38  ;;  %v4090_v52 = vor.u32 %v4089_v30, %v9614_v62  ;;  %v11576_v1 = vld [vmem:[#allocation11_spill] sm:$0xff] }
 0x15a   : > { %11571 = vst [vmem:[#allocation14_spill] sm:$0xff] %v9621_v18  ;;  %v9631_v33 = vadd.f32 %v1933_v22, %v1245_v25  ;;  %v2151_v61 = vadd.f32 %v7373_v49, %v11574_v14  ;;  %7642 = vmatpush3.bf16.msra.mxu0 %v4556_v28  ;;  %7579 = vmatprep.mubr.msk.bf16.mxu0 %vm656_vm1, %v9339_v57  ;;  %v4095_v30 = vrot.slane %v4093_v26, 5 }
 0x15b   : > { %v7408_v45 = vpop.f32.mrf.mxu1  ;;  %v2022_v47 = vpop.f32.mrf.mxu0  ;;  %7859 = vmatprep.subr.msk.bf16.mxu0 %vm705_vm0, %v9627_v16  ;;  %v4081_v38 = vrot.slane %v4080_v40, 4  ;;  %v4091_v8 = vrot.slane %v4090_v52, 4 }
 0x15c   : > { %11573 = vst [vmem:[#allocation17_spill] sm:$0xff] %v9631_v33  ;;  %v9639_v39 = vadd.f32 %v7407_v4, %v2151_v61  ;;  %v2149_v22 = vadd.f32 %v2022_v47, %v11576_v1  ;;  %v11581_v1 = vld [vmem:[#allocation13_spill] sm:$0xff] }
 0x15d   : > { %v2229_v18 = vpop.f32.mrf.mxu1  ;;  %v7374_v25 = vpop.f32.mrf.mxu0  ;;  %v4086_v52 = vsel %vm8321_vm4, %v4081_v38, %v9614_v62 }
 0x15e   : > { %11575 = vst [vmem:[#allocation9_spill] sm:$0xff] %v9639_v39  ;;  %v9644_v28 = vadd.f32 %v2226_v5, %v2149_v22  ;;  %v2152_v57 = vadd.f32 %v7374_v25, %v9372_v42  ;;  %v4122_v22 = vshrl.u32 %v11581_v1, 16  ;;  %v11583_v25 = vld [vmem:[#allocation7_spill] sm:$0xff] }
 0x15f   : > { %v7411_v33 = vpop.f32.mrf.mxu1  ;;  %7614 = vmatmul.mubr.msk.bf16.gmra.mxu1 %vm656_vm1, %v9379_v50  ;;  %v2025_v63 = vpop.f32.mrf.mxu0 }
 0x160   : > { %11577 = vst [vmem:[#allocation20_spill] sm:$0xff] %v9644_v28  ;;  %7617 = vmatprep.mubr.msk.bf16.mxu1 %vm656_vm1, %v9388_v7  ;;  %v9649_v49 = vadd.f32 %v7408_v45, %v2152_v57  ;;  %v2150_v14 = vadd.f32 %v2025_v63, %v9381_v15  ;;  %v4096_v45 = vsel %vm8321_vm4, %v4091_v8, %v4095_v30  ;;  %v11585_v8 = vld [vmem:[#allocation21_spill] sm:$0xff]  ;;  %v11588_v57 = vld [vmem:[#allocation22_spill] sm:$0xff]  ;;  %v9686_v28 = vrot.slane %v4122_v22, 4 }
 0x161   : > { %v2242_v4 = vpop.f32.mrf.mxu1  ;;  %v7377_v61 = vpop.f32.mrf.mxu0  ;;  %7580 = vmatmul.mubr.msk.bf16.gmra.mxu0 %vm656_vm1, %v9346_v43  ;;  %v4125_v43 = vshll.u32 %v11581_v1, 16  ;;  %v4170_v30 = vshrl.u32 %v11585_v8, 16 }
 0x162   : > { %11578 = vst [vmem:[#allocation11_spill] sm:$0xff] %v9649_v49  ;;  %v9654_v47 = vadd.f32 %v2229_v18, %v2150_v14  ;;  %v2155_v42 = vadd.f32 %v7377_v61, %v9390_v23  ;;  %7583 = vmatprep.mubr.msk.bf16.mxu0 %vm656_vm1, %v9379_v50  ;;  %v11584_v50 = vld [vmem:[#allocation6_spill] sm:$0xff]  ;;  %v4173_v61 = vshll.u32 %v11585_v8, 16 }
 0x163   : > { %v7412_v5 = vpop.f32.mrf.mxu1  ;;  %v2038_v15 = vpop.f32.mrf.mxu0  ;;  %v4131_v63 = vshll.u32 %v11584_v50, 16  ;;  %v4135_v14 = vshrl.u32 %v11584_v50, 16  ;;  %v9683_v50 = vcombine.low %v4086_v52, %v4096_v45  ;;  %v9688_v8 = vrot.slane %v4125_v43, 5 }
 0x164   : > { %11579 = vst [vmem:[#allocation37_spill] sm:$0xff] %v9654_v47  ;;  %v9666_v18 = vadd.f32 %v7411_v33, %v2155_v42  ;;  %v2153_v23 = vadd.f32 %v2038_v15, %v9395_v34  ;;  %v11587_v42 = vld [vmem:[#allocation3_spill] sm:$0xff]  ;;  %v4183_v15 = vshrl.u32 %v11588_v57, 16  ;;  %v4218_v52 = vshrl.u32 %v9407_v36, 16 }
 0x165   : > { %v2245_v26 = vpop.f32.mrf.mxu1  ;;  %v7378_v62 = vpop.f32.mrf.mxu0  ;;  %v9701_v34 = vrot.slane %v4170_v30, 4  ;;  %v9703_v43 = vrot.slane %v4173_v61, 5  ;;  %v4266_v61 = vshrl.u32 %v9447_v41, 16 }
 0x166   : > { %11582 = vst [vmem:[#allocation12_spill] sm:$0xff] %v9666_v18  ;;  %v9676_v1 = vadd.f32 %v2242_v4, %v2153_v23  ;;  %v2156_v33 = vadd.f32 %v7378_v62, %v9412_v54  ;;  %v4179_v18 = vshll.u32 %v11588_v57, 16  ;;  %v9693_v23 = vrot.slane %v4131_v63, 5  ;;  %v11591_v63 = vld [vmem:[#allocation25_spill] sm:$0xff] }
 0x167   : > { %v7415_v38 = vpop.f32.mrf.mxu1  ;;  %7618 = vmatmul.mubr.msk.bf16.gmra.mxu1 %vm656_vm1, %v9419_v58  ;;  %v2041_v47 = vpop.f32.mrf.mxu0  ;;  %v9695_v62 = vrot.slane %v4135_v14, 4  ;;  %v4221_v57 = vshll.u32 %v9407_v36, 16  ;;  %v4227_v14 = vshll.u32 %v11591_v63, 16  ;;  %v4275_v36 = vshll.u32 %v9450_v32, 16 }
 0x168   : > { %11586 = vst [vmem:[#allocation13_spill] sm:$0xff] %v9676_v1  ;;  %7621 = vmatprep.mubr.msk.bf16.mxu1 %vm656_vm1, %v9428_v55  ;;  %v9690_v4 = vadd.f32 %v7412_v5, %v2156_v33  ;;  %v2154_v54 = vadd.f32 %v2041_v47, %v9421_v0  ;;  %v9710_v47 = vrot.slane %v4179_v18, 5  ;;  %v4279_v18 = vshrl.u32 %v9450_v32, 16 }
 0x169   : > { %v2258_v49 = vpop.f32.mrf.mxu1  ;;  %v7381_v45 = vpop.f32.mrf.mxu0  ;;  %7584 = vmatmul.mubr.msk.bf16.gmra.mxu0 %vm656_vm1, %v9388_v7  ;;  %v4231_v7 = vshrl.u32 %v11591_v63, 16  ;;  %v4314_v1 = vshrl.u32 %v9487_v37, 16  ;;  %v9742_v39 = vrot.slane %v4266_v61, 4  ;;  %v4035_v61 = vshll.u32 %v11587_v42, 16 }
 0x16a   : > { %11589 = vst [vmem:[#allocation7_spill] sm:$0xff] %v9690_v4  ;;  %v9705_v5 = vadd.f32 %v2245_v26, %v2154_v54  ;;  %v2159_v0 = vadd.f32 %v7381_v45, %v9430_v6  ;;  %7587 = vmatprep.mubr.msk.bf16.mxu0 %vm656_vm1, %v9419_v58  ;;  %v4269_v26 = vshll.u32 %v9447_v41, 16  ;;  %v11593_v6 = vld [vmem:[#allocation26_spill] sm:$0xff]  ;;  %v9722_v58 = vrot.slane %v4218_v52, 4 }
 0x16b   : > { %v7416_v22 = vpop.f32.mrf.mxu1  ;;  %v2054_v33 = vpop.f32.mrf.mxu0  ;;  %v4317_v41 = vshll.u32 %v9487_v37, 16  ;;  %v9735_v52 = vrot.slane %v4221_v57, 5  ;;  %v9739_v32 = vrot.slane %v4231_v7, 4  ;;  %v9751_v57 = vrot.slane %v4279_v18, 4 }
 0x16c   : > { %11590 = vst [vmem:[#allocation6_spill] sm:$0xff] %v9705_v5  ;;  %v9717_v54 = vadd.f32 %v7415_v38, %v2159_v0  ;;  %v2157_v45 = vadd.f32 %v2054_v33, %v11593_v6  ;;  %v9720_v5 = vrot.slane %v4183_v15, 4  ;;  %v9737_v0 = vrot.slane %v4227_v14, 5 }
 0x16d   : > { %v2261_v30 = vpop.f32.mrf.mxu1  ;;  %v7382_v4 = vpop.f32.mrf.mxu0  ;;  %v4323_v33 = vshll.u32 %v9490_v19, 16  ;;  %v9744_v37 = vrot.slane %v4269_v26, 5  ;;  %11598 = vst [vmem:[#allocation38_spill] sm:$0xff] %v9751_v57  ;;  %v4327_v14 = vshrl.u32 %v9490_v19, 16  ;;  %v9759_v26 = vrot.slane %v4317_v41, 5 }
 0x16e   : > { %11592 = vst [vmem:[#allocation21_spill] sm:$0xff] %v9717_v54  ;;  %v9730_v38 = vadd.f32 %v2258_v49, %v2157_v45  ;;  %v2160_v15 = vadd.f32 %v7382_v4, %v9452_v10  ;;  %v9749_v4 = vrot.slane %v4275_v36, 5  ;;  %v4362_v18 = vshrl.u32 %v9525_v56, 16 }
 0x16f   : > { %v7419_v63 = vpop.f32.mrf.mxu1  ;;  %7622 = vmatmul.mubr.msk.bf16.gmra.mxu1 %vm656_vm1, %v9459_v3  ;;  %v2057_v6 = vpop.f32.mrf.mxu0  ;;  %11595 = vst [vmem:[#allocation22_spill] sm:$0xff] %v9744_v37  ;;  %11600 = vst [vmem:[#allocation40_spill] sm:$0xff] %v9759_v26  ;;  %v9766_v19 = vrot.slane %v4323_v33, 5  ;;  %v9781_v26 = vld [vmem:[%s9238_s22 + $0x8] sm:$0x1] }
 0x170   : > { %11594 = vst [vmem:[#allocation3_spill] sm:$0xff] %v9730_v38  ;;  %7625 = vmatprep.mubr.msk.bf16.mxu1 %vm656_vm1, %v9468_v31  ;;  %v9746_v49 = vadd.f32 %v7416_v22, %v2160_v15  ;;  %v2158_v10 = vadd.f32 %v2057_v6, %v9461_v11  ;;  %11597 = vst [vmem:[#allocation26_spill] sm:$0xff] %v9749_v4  ;;  %v9757_v38 = vrot.slane %v4314_v1, 4  ;;  %v11602_v11 = vld [vmem:[#allocation28_spill] sm:$0xff]  ;;  %v11604_v6 = vld [vmem:[#allocation2_spill] sm:$0xff] }
 0x171   : > { %v2274_v54 = vpop.f32.mrf.mxu1  ;;  %v7385_v7 = vpop.f32.mrf.mxu0  ;;  %7588 = vmatmul.mubr.msk.bf16.gmra.mxu0 %vm656_vm1, %v9428_v55  ;;  %11603 = vst [vmem:[#allocation28_spill] sm:$0xff] %v9766_v19  ;;  %v4053_v1 = vshll.u32 %v11604_v6, 16 }
 0x172   : > { %11596 = vst [vmem:[#allocation25_spill] sm:$0xff] %v9746_v49  ;;  %11599 = vst [vmem:[#allocation39_spill] sm:$0xff] %v9757_v38  ;;  %v9761_v22 = vadd.f32 %v2261_v30, %v2158_v10  ;;  %v2163_v36 = vadd.f32 %v7385_v7, %v11602_v11  ;;  %7591 = vmatprep.mubr.msk.bf16.mxu0 %vm656_vm1, %v9459_v3  ;;  %v4050_v49 = vshrl.u32 %v11604_v6, 16  ;;  %v11606_v30 = vld [vmem:[#allocation29_spill] sm:$0xff]  ;;  %v11608_v11 = vshll.u32 %v11583_v25, 16  ;;  %v11611_v6 = vld [vmem:[#allocation10_spill] sm:$0xff] }
 0x173   : > { %v7420_v45 = vpop.f32.mrf.mxu1  ;;  %v2070_v55 = vpop.f32.mrf.mxu0  ;;  %11609 = vst [vmem:[#allocation29_spill] sm:$0xff] %v9781_v26  ;;  %v9783_v38 = vrot.slane %v4035_v61, 5  ;;  %v9797_v61 = vrot.slane %v4362_v18, 4 }
 0x174   : > { %11601 = vst [vmem:[#allocation41_spill] sm:$0xff] %v9761_v22  ;;  %v9771_v41 = vadd.f32 %v7419_v63, %v2163_v36  ;;  %v2161_v10 = vadd.f32 %v2070_v55, %v11606_v30  ;;  %v11607_v22 = vshrl.u32 %v11583_v25, 16  ;;  %v4031_v3 = vrot.slane %v11608_v11, 5 }
 0x175   : > { %v2277_v15 = vpop.f32.mrf.mxu1  ;;  %v7386_v33 = vpop.f32.mrf.mxu0  ;;  %v11610_v63 = vshrl.u32 %v11587_v42, 16  ;;  %v4059_v55 = vshll.u32 %v11611_v6, 16  ;;  %v4063_v30 = vshrl.u32 %v11611_v6, 16  ;;  %v4365_v25 = vshll.u32 %v9525_v56, 16  ;;  %11614 = vst [vmem:[#allocation43_spill] sm:$0xff] %v9797_v61 }
 0x176   : > { %11605 = vst [vmem:[#allocation2_spill] sm:$0xff] %v9771_v41  ;;  %v4028_v7 = vrot.slane %v11607_v22, 4  ;;  %v9789_v22 = vrot.slane %v4327_v14, 4  ;;  %v9792_v11 = vadd.f32 %v2274_v54, %v2161_v10  ;;  %v2164_v41 = vadd.f32 %v7386_v33, %v9492_v9  ;;  %v9840_v61 = vld [vmem:[%s9812_s15 + $0x4] sm:$0xf] }
 0x177   : > { %v7423_v19 = vpop.f32.mrf.mxu1  ;;  %7626 = vmatmul.mubr.msk.bf16.gmra.mxu1 %vm656_vm1, %v9499_v29  ;;  %v4041_v36 = vrot.slane %v11610_v63, 4  ;;  %v4371_v42 = vshll.u32 %v9528_v51, 16  ;;  %v4375_v63 = vshrl.u32 %v9528_v51, 16  ;;  %v2073_v57 = vpop.f32.mrf.mxu0  ;;  %v4052_v14 = vrot.slane %v4050_v49, 4 }
 0x178   : > { %11612 = vst [vmem:[#allocation10_spill] sm:$0xff] %v9789_v22  ;;  %11613 = vst [vmem:[#allocation42_spill] sm:$0xff] %v9792_v11  ;;  %7629 = vmatprep.mubr.msk.bf16.mxu1 %vm656_vm1, %v9508_v35  ;;  %v9801_v22 = vadd.f32 %v7420_v45, %v2164_v41  ;;  %v2162_v56 = vadd.f32 %v2073_v57, %v9501_v24  ;;  %v4032_v54 = vor.u32 %v4031_v3, %v4028_v7  ;;  %v11617_v41 = vld [vmem:[#allocation32_spill] sm:$0xff]  ;;  %v11619_v3 = vld [vmem:[#allocation18_spill] sm:$0xff] }
 0x179   : > { %v2290_v6 = vpop.f32.mrf.mxu1  ;;  %v4045_v9 = vshll.u32 %v9781_v26, 16  ;;  %v7389_v10 = vpop.f32.mrf.mxu0  ;;  %7592 = vmatmul.mubr.msk.bf16.gmra.mxu0 %vm656_vm1, %v9468_v31  ;;  %v4042_v51 = vor.u32 %v4041_v36, %v9783_v38  ;;  %v4055_v49 = vrot.slane %v4053_v1, 5  ;;  %v9815_v45 = vrot.slane %v4059_v55, 5  ;;  %v9823_v31 = vld [vmem:[%s9238_s22 + $0x14] sm:$0x1] }
 0x17a   : > { %11615 = vst [vmem:[#allocation44_spill] sm:$0xff] %v9801_v22  ;;  %v4065_v24 = vrot.slane %v4063_v30, 4  ;;  %v9817_v57 = vadd.f32 %v2277_v15, %v2162_v56  ;;  %v2167_v7 = vadd.f32 %v7389_v10, %v11617_v41  ;;  %7595 = vmatprep.mubr.msk.bf16.mxu0 %vm656_vm1, %v9499_v29  ;;  %11618 = vst [vmem:[#allocation32_spill] sm:$0xff] %v9823_v31  ;;  %v4098_v33 = vshrl.u32 %v11619_v3, 16  ;;  %v11622_v30 = vld [vmem:[#allocation19_spill] sm:$0xff]  ;;  %v11624_v29 = vld [vmem:[#allocation33_spill] sm:$0xff] }
 0x17b   : > { %v7424_v18 = vpop.f32.mrf.mxu1  ;;  %v4101_v26 = vshll.u32 %v11619_v3, 16  ;;  %v9827_v1 = vrot.slane %v4365_v25, 5  ;;  %v9829_v36 = vrot.slane %v4371_v42, 5  ;;  %v2086_v55 = vpop.f32.mrf.mxu0  ;;  %v4107_v56 = vshll.u32 %v11622_v30, 16  ;;  %v9837_v22 = vld [vmem:[%s9812_s15] sm:$0xf] }
 0x17c   : > { %11616 = vst [vmem:[#allocation45_spill] sm:$0xff] %v9817_v57  ;;  %v4111_v10 = vshrl.u32 %v11622_v30, 16  ;;  %v9833_v41 = vadd.f32 %v7423_v19, %v2167_v7  ;;  %v2165_v57 = vadd.f32 %v2086_v55, %v11624_v29  ;;  %v9842_v3 = vrot.slane %v4032_v54, 4  ;;  %v9852_v19 = vld [vmem:[%s9812_s15 + $0x10] sm:$0xf] }
 0x17d   : > { %11620 = vst [vmem:[#allocation18_spill] sm:$0xff] %v9827_v1  ;;  %11621 = vst [vmem:[#allocation46_spill] sm:$0xff] %v9829_v36  ;;  %v2293_v15 = vpop.f32.mrf.mxu1  ;;  %v9844_v25 = vrot.slane %v4045_v9, 5  ;;  %v7390_v42 = vpop.f32.mrf.mxu0  ;;  %v9849_v1 = vld [vmem:[%s9812_s15 + $0xc] sm:$0xf]  ;;  %v9854_v7 = vrot.slane %v4042_v51, 4  ;;  %v4056_v55 = vor.u32 %v4055_v49, %v4052_v14  ;;  %v4066_v30 = vor.u32 %v4065_v24, %v9815_v45 }
 0x17e   : > { %11623 = vst [vmem:[#allocation19_spill] sm:$0xff] %v9833_v41  ;;  %v4069_v54 = vshll.u32 %v9823_v31, 16  ;;  %v9858_v29 = vadd.f32 %v2290_v6, %v2165_v57  ;;  %v2168_v9 = vadd.f32 %v7390_v42, %v9530_v20  ;;  %v4100_v41 = vrot.slane %v4098_v33, 4  ;;  %v9870_v49 = vld [vmem:[%s9238_s22 + $0x2c] sm:$0x1] }
 0x17f   : > { %v7427_v36 = vpop.f32.mrf.mxu1  ;;  %7630 = vmatmul.mubr.msk.bf16.gmra.mxu1 %vm656_vm1, %v9536_v13  ;;  %v4103_v11 = vrot.slane %v4101_v26, 5  ;;  %v9863_v4 = vrot.slane %v4375_v63, 4  ;;  %v2089_v37 = vpop.f32.mrf.mxu0  ;;  %v9867_v14 = vcombine.low %v9837_v22, %v9840_v61  ;;  %11626 = vst [vmem:[#allocation47_spill] sm:$0xff] %v9870_v49  ;;  %v9872_v6 = vrot.slane %v4107_v56, 5  ;;  %v11628_v20 = vld [vmem:[#allocation35_spill] sm:$0xff] }
 0x180   : > { %11625 = vst [vmem:[#allocation33_spill] sm:$0xff] %v9858_v29  ;;  %7633 = vmatprep.mubr.msk.bf16.mxu1 %vm656_vm1, %v9545_v21  ;;  %v4113_v24 = vrot.slane %v4111_v10, 4  ;;  %v9874_v57 = vadd.f32 %v7424_v18, %v2168_v9  ;;  %v2166_v42 = vadd.f32 %v2089_v37, %v11628_v20  ;;  %v4038_v63 = vsel %vm8321_vm4, %v9842_v3, %v9783_v38  ;;  %v9884_v33 = vld [vmem:[%s9238_s22 + $0x38] sm:$0x1] }
 0x181   : > { %v2306_v51 = vpop.f32.mrf.mxu1  ;;  %11629 = vst [vmem:[#allocation35_spill] sm:$0xff] %v9884_v33  ;;  %v7393_v31 = vpop.f32.mrf.mxu0  ;;  %7596 = vmatmul.mubr.msk.bf16.gmra.mxu0 %vm656_vm1, %v9508_v35  ;;  %v4048_v37 = vsel %vm8321_vm4, %v9854_v7, %v9844_v25  ;;  %v4057_v18 = vrot.slane %v4056_v55, 4  ;;  %v4067_v10 = vrot.slane %v4066_v30, 4  ;;  %v4071_v9 = vrot.slane %v4069_v54, 5 }
 0x182   : > { %11627 = vst [vmem:[#allocation48_spill] sm:$0xff] %v9874_v57  ;;  %v9892_v20 = vadd.f32 %v2293_v15, %v2166_v42  ;;  %v2171_v26 = vadd.f32 %v7393_v31, %v9547_v53  ;;  %7599 = vmatprep.mubr.msk.bf16.mxu0 %vm656_vm1, %v9536_v13  ;;  %v4104_v38 = vor.u32 %v4103_v11, %v4100_v41  ;;  %v4117_v3 = vshll.u32 %v9870_v49, 16  ;;  %v11630_v53 = vld [vmem:[#allocation36_spill] sm:$0xff]  ;;  %v11631_v13 = vld [vmem:[#allocation15_spill] sm:$0xff] }
 0x183   : > { %v7428_v56 = vpop.f32.mrf.mxu1  ;;  %v2102_v35 = vpop.f32.mrf.mxu0  ;;  %v4114_v29 = vor.u32 %v4113_v24, %v9872_v6  ;;  %v4128_v25 = vor.u32 %v9688_v8, %v9686_v28  ;;  %v4138_v7 = vor.u32 %v9695_v62, %v9693_v23  ;;  %v4141_v15 = vshll.u32 %v9884_v33, 16  ;;  %v11632_v62 = vld [vmem:[#allocation16_spill] sm:$0xff] }
 0x184   : > { %v9904_v55 = vadd.f32 %v7427_v36, %v2171_v26  ;;  %v2169_v31 = vadd.f32 %v2102_v35, %v11630_v53  ;;  %v4146_v11 = vshrl.u32 %v11631_v13, 16  ;;  %v4149_v41 = vshll.u32 %v11631_v13, 16 }
 0x185   : > { %v2309_v57 = vpop.f32.mrf.mxu1  ;;  %v7394_v30 = vpop.f32.mrf.mxu0  ;;  %v4062_v28 = vsel %vm8321_vm4, %v4057_v18, %v9815_v45  ;;  %v4072_v8 = vsel %vm8321_vm4, %v4067_v10, %v4071_v9  ;;  %v4155_v36 = vshll.u32 %v11632_v62, 16  ;;  %v4159_v24 = vshrl.u32 %v11632_v62, 16 }
 0x186   : > { %v9918_v42 = vadd.f32 %v2306_v51, %v2169_v31  ;;  %v2172_v26 = vadd.f32 %v7394_v30, %v9559_v60  ;;  %v4105_v35 = vrot.slane %v4104_v38, 4  ;;  %v4119_v53 = vrot.slane %v4117_v3, 5  ;;  %v9930_v30 = vld [vmem:[%s9238_s22 + $0x44] sm:$0x1] }
 0x187   : > { %v7431_v54 = vpop.f32.mrf.mxu1  ;;  %7634 = vmatmul.mubr.msk.bf16.gmra.mxu1 %vm656_vm1, %v9564_v27  ;;  %v2105_v13 = vpop.f32.mrf.mxu0  ;;  %v4115_v45 = vrot.slane %v4114_v29, 4  ;;  %v4129_v18 = vrot.slane %v4128_v25, 4  ;;  %v4139_v49 = vrot.slane %v4138_v7, 4  ;;  %v4143_v10 = vrot.slane %v4141_v15, 5 }
 0x188   : > { %11633 = vst [vmem:[#allocation36_spill] sm:$0xff] %v9918_v42  ;;  %7637 = vmatprep.mubr.msk.bf16.mxu1 %vm656_vm1, %v9867_v14  ;;  %v9923_v9 = vadd.f32 %v7428_v56, %v2172_v26  ;;  %v2170_v62 = vadd.f32 %v2105_v13, %v9566_v46  ;;  %v4148_v51 = vrot.slane %v4146_v11, 4  ;;  %v4151_v31 = vrot.slane %v4149_v41, 5 }
 0x189   : > { %v2322_v33 = vpop.f32.mrf.mxu1  ;;  %v7397_v42 = vpop.f32.mrf.mxu0  ;;  %7600 = vmatmul.mubr.msk.bf16.gmra.mxu0 %vm656_vm1, %v9545_v21  ;;  %v6700_v3 = vcombine.low %v4038_v63, %v4048_v37  ;;  %v9932_v29 = vrot.slane %v4155_v36, 5  ;;  %v4161_v25 = vrot.slane %v4159_v24, 4  ;;  %v9939_v46 = vcombine.low %v4062_v28, %v4072_v8 }
 0x18a   : > { %v9934_v7 = vadd.f32 %v2309_v57, %v2170_v62  ;;  %v2175_v56 = vadd.f32 %v7397_v42, %v9571_v59  ;;  %7603 = vmatprep.mubr.msk.bf16.mxu0 %vm656_vm1, %v9564_v27  ;;  %v9943_v21 = vsel %vm705_vm0, %v9627_v16, 0  ;;  %v4110_v37 = vsel %vm8321_vm4, %v4105_v35, %v9872_v6  ;;  %v9974_v35 = vld [vmem:[%s9238_s22 + $0x50] sm:$0x1] }
 0x18b   : > { %v7432_v60 = vpop.f32.mrf.mxu1  ;;  %v2118_v15 = vpop.f32.mrf.mxu0  ;;  %v4120_v57 = vsel %vm8321_vm4, %v4115_v45, %v4119_v53  ;;  %v4134_v59 = vsel %vm8321_vm4, %v4129_v18, %v9693_v23  ;;  %v4144_v27 = vsel %vm8321_vm4, %v4139_v49, %v4143_v10  ;;  %v4152_v41 = vor.u32 %v4151_v31, %v4148_v51  ;;  %v11635_v49 = vld [vmem:[#allocation24_spill] sm:$0xff] }
 0x18c   : > { %v9955_v11 = vadd.f32 %v7431_v54, %v2175_v56  ;;  %v2173_v16 = vadd.f32 %v2118_v15, %v9576_v12  ;;  %v4165_v28 = vshll.u32 %v9930_v30, 16  ;;  %v11634_v36 = vcombine.low %v9849_v1, %v9852_v19  ;;  %v11636_v1 = vld [vmem:[#allocation23_spill] sm:$0xff] }
 0x18d   : > { %v2325_v63 = vpop.f32.mrf.mxu1  ;;  %v7398_v8 = vpop.f32.mrf.mxu0  ;;  %v5402_v23 = vsel %vm705_vm0, %v9605_v2, 0  ;;  %v4162_v24 = vor.u32 %v4161_v25, %v9932_v29  ;;  %v4194_v54 = vshrl.u32 %v11635_v49, 16  ;;  %v4197_v42 = vshll.u32 %v11635_v49, 16 }
 0x18e   : > { %v9968_v12 = vadd.f32 %v2322_v33, %v2173_v16  ;;  %v2176_v26 = vadd.f32 %v7398_v8, %v9581_v48  ;;  %v4203_v19 = vshll.u32 %v11636_v1, 16  ;;  %v4207_v53 = vshrl.u32 %v11636_v1, 16  ;;  %v9999_v16 = vld [vmem:[%s9238_s22 + $0x5c] sm:$0x1]  ;;  %v11639_v8 = vld [vmem:[#allocation27_spill] sm:$0xff] }
 0x18f   : > { %v7435_v6 = vpop.f32.mrf.mxu1  ;;  %7638 = vmatmul.mubr.msk.bf16.gmra.mxu1 %vm656_vm1, %v11634_v36  ;;  %v2121_v2 = vpop.f32.mrf.mxu0  ;;  %v9978_v45 = vcombine.low %v4110_v37, %v4120_v57  ;;  %v9980_v18 = vcombine.low %v4134_v59, %v4144_v27  ;;  %v4176_v33 = vor.u32 %v9703_v43, %v9701_v34  ;;  %v4186_v48 = vor.u32 %v9720_v5, %v9710_v47 }
 0x190   : > { %7677 = vmatprep.mubr.msk.bf16.mxu1 %vm656_vm1, %v9939_v46  ;;  %v9986_v10 = vadd.f32 %v7432_v60, %v2176_v26  ;;  %v2174_v62 = vadd.f32 %v2121_v2, %v9589_v44  ;;  %v4153_v51 = vrot.slane %v4152_v41, 4  ;;  %v4167_v31 = vrot.slane %v4165_v28, 5  ;;  %11637 = vst [vmem:[#allocation15_spill] sm:$0xff] %v9999_v16 }
 0x191   : > { %v2338_v13 = vpop.f32.mrf.mxu1  ;;  %v7401_v25 = vpop.f32.mrf.mxu0  ;;  %7604 = vmatmul.mubr.msk.bf16.gmra.mxu0 %vm656_vm1, %v9867_v14  ;;  %v4163_v15 = vrot.slane %v4162_v24, 4  ;;  %v4189_v37 = vshll.u32 %v9974_v35, 16  ;;  %v4196_v57 = vrot.slane %v4194_v54, 4  ;;  %v4199_v34 = vrot.slane %v4197_v42, 5  ;;  %v11638_v14 = vld [vmem:[#allocation8_spill] sm:$0xff] }
 0x192   : > { %v9992_v43 = vadd.f32 %v2325_v63, %v2174_v62  ;;  %v2179_v5 = vadd.f32 %v7401_v25, %v9599_v17  ;;  %7643 = vmatprep.mubr.msk.bf16.mxu0 %vm656_vm1, %v6700_v3  ;;  %v9996_v44 = vrot.slane %v4203_v19, 5  ;;  %v4209_v60 = vrot.slane %v4207_v53, 4  ;;  %v11640_v17 = vld [vmem:[#allocation5_spill] sm:$0xff]  ;;  %v10015_v42 = vld [vmem:[%s11310_s5 + $0x10] sm:$0x3] }
 0x193   : > { %v7436_v56 = vpop.f32.mrf.mxu1  ;;  %v2134_v59 = vpop.f32.mrf.mxu0  ;;  %v4242_v41 = vshrl.u32 %v11638_v14, 16  ;;  %v4245_v28 = vshll.u32 %v11638_v14, 16  ;;  %v4251_v36 = vshll.u32 %v11639_v8, 16  ;;  %v4255_v63 = vshrl.u32 %v11639_v8, 16  ;;  %v10050_v8 = vld [vmem:[%s9238_s22 + $0x74] sm:$0x1] }
 0x194   : > { %v10005_v24 = vadd.f32 %v7435_v6, %v2179_v5  ;;  %v2177_v49 = vadd.f32 %v2134_v59, %v11640_v17  ;;  %v10008_v3 = vrot.slane %v4176_v33, 4  ;;  %v10010_v54 = vrot.slane %v4186_v48, 4  ;;  %v11641_v48 = vld [vmem:[#allocation14_spill] sm:$0xff]  ;;  %v10034_v59 = vld [vmem:[%s9238_s22 + $0x68] sm:$0x1]  ;;  %11645 = vst [vmem:[#allocation23_spill] sm:$0xff] %v10050_v8 }
 0x195   : > { %v2341_v27 = vpop.f32.mrf.mxu1  ;;  %v7402_v26 = vpop.f32.mrf.mxu0  ;;  %v4158_v6 = vsel %vm8321_vm4, %v4153_v51, %v9932_v29  ;;  %v4168_v19 = vsel %vm8321_vm4, %v4163_v15, %v4167_v31  ;;  %v10024_v53 = vrot.slane %v4189_v37, 5  ;;  %v4200_v2 = vor.u32 %v4199_v34, %v4196_v57  ;;  %11642 = vst [vmem:[#allocation16_spill] sm:$0xff] %v10034_v59  ;;  %v11643_v57 = vld [vmem:[#allocation17_spill] sm:$0xff] }
 0x196   : > { %v10026_v33 = vadd.f32 %v2338_v13, %v2177_v49  ;;  %v2180_v62 = vadd.f32 %v7402_v26, %v11641_v48  ;;  %v4210_v25 = vor.u32 %v4209_v60, %v9996_v44  ;;  %v4213_v5 = vshll.u32 %v9999_v16, 16  ;;  %v11648_v48 = vld [vmem:[#allocation30_spill] sm:$0xff] }
 0x197   : > { %v7475_v1 = vpop.f32.mrf.mxu1  ;;  %7678 = vmatmul.mubr.msk.bf16.vlgmr.msra.gmra.mxu1 %vm656_vm1, %v9683_v50  ;;  %v2137_v29 = vpop.f32.mrf.mxu0  ;;  %v4244_v31 = vrot.slane %v4242_v41, 4  ;;  %v4247_v15 = vrot.slane %v4245_v28, 5  ;;  %v10036_v37 = vrot.slane %v4251_v36, 5  ;;  %v4257_v13 = vrot.slane %v4255_v63, 4  ;;  %v10055_v41 = vld [vmem:[%s11310_s5 + $0xa] sm:$0x3] }
 0x198   : > { %7744 = vmatpush3.bf16.msra.mxu1 %v5402_v23  ;;  %7681 = vmatprep.mubr.msk.bf16.mxu1 %vm656_vm1, %v9978_v45  ;;  %v10040_v23 = vadd.f32 %v7436_v56, %v2180_v62  ;;  %v2178_v34 = vadd.f32 %v2137_v29, %v11643_v57  ;;  %v10043_v14 = vcombine.low %v4158_v6, %v4168_v19  ;;  %v4201_v63 = vrot.slane %v4200_v2, 4 }
 0x199   : > { %v2871_v51 = vpop.f32.mrf.mxu1  ;;  %7862 = vmatprep.subr.msk.bf16.mxu1 %vm705_vm0, %v10015_v42  ;;  %v4182_v60 = vsel %vm8321_vm4, %v10008_v3, %v9710_v47  ;;  %v7441_v28 = vpop.f32.mrf.mxu0  ;;  %7644 = vmatmul.mubr.msk.bf16.vlgmr.msra.gmra.mxu0 %vm656_vm1, %v9939_v46  ;;  %v4192_v36 = vsel %vm8321_vm4, %v10010_v54, %v10024_v53  ;;  %v4224_v47 = vor.u32 %v9735_v52, %v9722_v58  ;;  %v11646_v3 = vld [vmem:[#allocation9_spill] sm:$0xff]  ;;  %v4215_v46 = vrot.slane %v4213_v5, 5 }
 0x19a   : > { %11644 = vst [vmem:[#allocation24_spill] sm:$0xff] %v10043_v14  ;;  %v4234_v17 = vor.u32 %v9739_v32, %v9737_v0  ;;  %v10067_v49 = vadd.f32 %v2341_v27, %v2178_v34  ;;  %v2796_v26 = vadd.f32 %v7441_v28, %v11646_v3  ;;  %7710 = vmatpush3.bf16.msra.mxu0 %v9943_v21  ;;  %v4237_v6 = vshll.u32 %v10034_v59, 16  ;;  %v11647_v21 = vld [vmem:[#allocation20_spill] sm:$0xff]  ;;  %v11650_v28 = vld [vmem:[#allocation11_spill] sm:$0xff] }
 0x19b   : > { %v7476_v56 = vpop.f32.mrf.mxu1  ;;  %7647 = vmatprep.mubr.msk.bf16.mxu0 %vm656_vm1, %v9683_v50  ;;  %v2667_v54 = vpop.f32.mrf.mxu0  ;;  %v4211_v53 = vrot.slane %v4210_v25, 4  ;;  %v4248_v2 = vor.u32 %v4247_v15, %v4244_v31  ;;  %v4258_v58 = vor.u32 %v4257_v13, %v10036_v37  ;;  %v4261_v52 = vshll.u32 %v10050_v8, 16  ;;  %7861 = vmatprep.subr.msk.bf16.mxu0 %vm705_vm0, %v10055_v41  ;;  %v11649_v15 = vld [vmem:[#allocation4_spill] sm:$0xff] }
 0x19c   : > { %v10078_v32 = vadd.f32 %v7475_v1, %v2796_v26  ;;  %v2794_v27 = vadd.f32 %v2667_v54, %v11647_v21  ;;  %v4290_v62 = vshrl.u32 %v11648_v48, 16  ;;  %v4293_v5 = vshll.u32 %v11648_v48, 16 }
 0x19d   : > { %v2874_v19 = vpop.f32.mrf.mxu1  ;;  %v7442_v29 = vpop.f32.mrf.mxu0  ;;  %v4206_v25 = vsel %vm8321_vm4, %v4201_v63, %v9996_v44  ;;  %v4225_v31 = vrot.slane %v4224_v47, 4  ;;  %v4299_v1 = vshll.u32 %v11649_v15, 16  ;;  %v4303_v13 = vshrl.u32 %v11649_v15, 16  ;;  %v11651_v15 = vld [vmem:[#allocation37_spill] sm:$0xff] }
 0x19e   : > { %v10090_v34 = vadd.f32 %v2871_v51, %v2794_v27  ;;  %v2797_v3 = vadd.f32 %v7442_v29, %v11650_v28  ;;  %v4235_v26 = vrot.slane %v4234_v17, 4  ;;  %v4239_v54 = vrot.slane %v4237_v6, 5  ;;  %v10101_v27 = vld [vmem:[%s9238_s22 + $0x80] sm:$0x1] }
 0x19f   : > { %v7479_v57 = vpop.f32.mrf.mxu1  ;;  %7682 = vmatmul.mubr.msk.bf16.gmra.mxu1 %vm656_vm1, %v9980_v18  ;;  %v2670_v21 = vpop.f32.mrf.mxu0  ;;  %v4216_v44 = vsel %vm8321_vm4, %v4211_v53, %v4215_v46  ;;  %v4249_v63 = vrot.slane %v4248_v2, 4  ;;  %v4259_v47 = vrot.slane %v4258_v58, 4  ;;  %v4263_v38 = vrot.slane %v4261_v52, 5  ;;  %11652 = vst [vmem:[#allocation8_spill] sm:$0xff] %v10101_v27  ;;  %v11655_v58 = vld [vmem:[#allocation12_spill] sm:$0xff] }
 0x1a0   : > { %7685 = vmatprep.mubr.msk.bf16.mxu1 %vm656_vm1, %v10043_v14  ;;  %v10097_v8 = vadd.f32 %v7476_v56, %v2797_v3  ;;  %v2795_v51 = vadd.f32 %v2670_v21, %v11651_v15  ;;  %v4292_v29 = vrot.slane %v4290_v62, 4  ;;  %v4295_v28 = vrot.slane %v4293_v5, 5 }
 0x1a1   : > { %v2887_v48 = vpop.f32.mrf.mxu1  ;;  %v7445_v59 = vpop.f32.mrf.mxu0  ;;  %7648 = vmatmul.mubr.msk.bf16.gmra.mxu0 %vm656_vm1, %v9978_v45  ;;  %v10105_v6 = vcombine.low %v4182_v60, %v4192_v36  ;;  %v4230_v46 = vsel %vm8321_vm4, %v4225_v31, %v9737_v0  ;;  %v10110_v56 = vrot.slane %v4299_v1, 5  ;;  %v4305_v53 = vrot.slane %v4303_v13, 4  ;;  %v10122_v36 = vld [vmem:[%s9238_s22 + $0x8c] sm:$0x1]  ;;  %v11659_v1 = vld [vmem:[#allocation38_spill] sm:$0xff] }
 0x1a2   : > { %v10112_v2 = vadd.f32 %v2874_v19, %v2795_v51  ;;  %v2800_v52 = vadd.f32 %v7445_v59, %v11655_v58  ;;  %7651 = vmatprep.mubr.msk.bf16.mxu0 %vm656_vm1, %v9980_v18  ;;  %v10117_v62 = vcombine.low %v4206_v25, %v4216_v44  ;;  %v4240_v60 = vsel %vm8321_vm4, %v4235_v26, %v4239_v54  ;;  %v11657_v19 = vld [vmem:[#allocation22_spill] sm:$0xff]  ;;  %v11661_v26 = vld [vmem:[#allocation13_spill] sm:$0xff] }
 0x1a3   : > { %v7480_v17 = vpop.f32.mrf.mxu1  ;;  %11653 = vst [vmem:[#allocation27_spill] sm:$0xff] %v10105_v6  ;;  %11656 = vst [vmem:[#allocation14_spill] sm:$0xff] %v10122_v36  ;;  %v2683_v5 = vpop.f32.mrf.mxu0  ;;  %v4254_v0 = vsel %vm8321_vm4, %v4249_v63, %v10036_v37  ;;  %v4272_v31 = vor.u32 %v11657_v19, %v9742_v39  ;;  %v11658_v59 = vld [vmem:[#allocation26_spill] sm:$0xff]  ;;  %v4285_v25 = vshll.u32 %v10101_v27, 16  ;;  %v4264_v44 = vsel %vm8321_vm4, %v4259_v47, %v4263_v38 }
 0x1a4   : > { %11654 = vst [vmem:[#allocation5_spill] sm:$0xff] %v10112_v2  ;;  %v4282_v13 = vor.u32 %v11659_v1, %v11658_v59  ;;  %v10132_v21 = vadd.f32 %v7479_v57, %v2800_v52  ;;  %v2798_v54 = vadd.f32 %v2683_v5, %v11661_v26  ;;  %v4296_v15 = vor.u32 %v4295_v28, %v4292_v29  ;;  %v11662_v63 = vld [vmem:[#allocation34_spill] sm:$0xff]  ;;  %v11664_v5 = vld [vmem:[#allocation7_spill] sm:$0xff] }
 0x1a5   : > { %v2890_v3 = vpop.f32.mrf.mxu1  ;;  %v7446_v51 = vpop.f32.mrf.mxu0  ;;  %v4306_v39 = vor.u32 %v4305_v53, %v10110_v56  ;;  %v4309_v37 = vshll.u32 %v10122_v36, 16  ;;  %v4338_v19 = vshrl.u32 %v11662_v63, 16  ;;  %v4341_v57 = vshll.u32 %v11662_v63, 16  ;;  %v10149_v38 = vld [vmem:[%s9238_s22 + $0xa0] sm:$0xf] }
 0x1a6   : > { %11660 = vst [vmem:[#allocation17_spill] sm:$0xff] %v10132_v21  ;;  %v10143_v52 = vadd.f32 %v2887_v48, %v2798_v54  ;;  %v2801_v1 = vadd.f32 %v7446_v51, %v11664_v5  ;;  %11665 = vst [vmem:[#allocation20_spill] sm:$0xff] %v10149_v38  ;;  %v4347_v47 = vshll.u32 %v10149_v38, 16  ;;  %v4351_v29 = vshrl.u32 %v10149_v38, 16  ;;  %v11668_v51 = vld [vmem:[#allocation6_spill] sm:$0xff] }
 0x1a7   : > { %v7483_v58 = vpop.f32.mrf.mxu1  ;;  %7686 = vmatmul.mubr.msk.bf16.gmra.mxu1 %vm656_vm1, %v10105_v6  ;;  %v2686_v28 = vpop.f32.mrf.mxu0  ;;  %v10153_v26 = vcombine.low %v4230_v46, %v4240_v60  ;;  %v4273_v36 = vrot.slane %v4272_v31, 4  ;;  %v4283_v27 = vrot.slane %v4282_v13, 4  ;;  %v4287_v48 = vrot.slane %v4285_v25, 5  ;;  %v11670_v25 = vld [vmem:[#allocation21_spill] sm:$0xff] }
 0x1a8   : > { %11663 = vst [vmem:[#allocation9_spill] sm:$0xff] %v10143_v52  ;;  %7689 = vmatprep.mubr.msk.bf16.mxu1 %vm656_vm1, %v10117_v62  ;;  %v10155_v54 = vadd.f32 %v7480_v17, %v2801_v1  ;;  %v2799_v63 = vadd.f32 %v2686_v28, %v11668_v51  ;;  %v10158_v5 = vcombine.low %v4254_v0, %v4264_v44  ;;  %v4297_v52 = vrot.slane %v4296_v15, 4  ;;  %v10168_v17 = vld [vmem:[%s9238_s22 + $0x98] sm:$0x1]  ;;  %v10171_v0 = vld [vmem:[%s9238_s22 + $0xa4] sm:$0x1] }
 0x1a9   : > { %v2903_v53 = vpop.f32.mrf.mxu1  ;;  %11666 = vst [vmem:[#allocation30_spill] sm:$0xff] %v10153_v26  ;;  %v7449_v21 = vpop.f32.mrf.mxu0  ;;  %7652 = vmatmul.mubr.msk.bf16.gmra.mxu0 %vm656_vm1, %v10043_v14  ;;  %v4307_v16 = vrot.slane %v4306_v39, 4  ;;  %v4311_v46 = vrot.slane %v4309_v37, 5  ;;  %v4340_v60 = vrot.slane %v4338_v19, 4  ;;  %v4343_v31 = vrot.slane %v4341_v57, 5  ;;  %11671 = vst [vmem:[#allocation37_spill] sm:$0xff] %v10168_v17 }
 0x1aa   : > { %11667 = vst [vmem:[#allocation4_spill] sm:$0xff] %v10155_v54  ;;  %v10162_v13 = vadd.f32 %v2890_v3, %v2799_v63  ;;  %v2804_v2 = vadd.f32 %v7449_v21, %v11670_v25  ;;  %7655 = vmatprep.mubr.msk.bf16.mxu0 %vm656_vm1, %v10105_v6  ;;  %11672 = vst [vmem:[#allocation12_spill] sm:$0xff] %v10171_v0  ;;  %v10173_v44 = vrot.slane %v4347_v47, 5  ;;  %v4353_v15 = vrot.slane %v4351_v29, 4  ;;  %v11674_v28 = vld [vmem:[#allocation3_spill] sm:$0xff]  ;;  %v11676_v63 = vld [vmem:[#allocation40_spill] sm:$0xff] }
 0x1ab   : > { %v7484_v38 = vpop.f32.mrf.mxu1  ;;  %v2699_v37 = vpop.f32.mrf.mxu0  ;;  %v4278_v3 = vsel %vm8321_vm4, %v4273_v36, %v11658_v59  ;;  %v4288_v21 = vsel %vm8321_vm4, %v4283_v27, %v4287_v48  ;;  %v11675_v47 = vld [vmem:[#allocation39_spill] sm:$0xff]  ;;  %v11677_v25 = vld [vmem:[#allocation28_spill] sm:$0xff]  ;;  %v11678_v1 = vld [vmem:[#allocation10_spill] sm:$0xff]  ;;  %v4302_v27 = vsel %vm8321_vm4, %v4297_v52, %v10110_v56  ;;  %v4333_v36 = vshll.u32 %v10168_v17, 16 }
 0x1ac   : > { %11669 = vst [vmem:[#allocation11_spill] sm:$0xff] %v10162_v13  ;;  %v10182_v57 = vadd.f32 %v7483_v58, %v2804_v2  ;;  %v2802_v51 = vadd.f32 %v2699_v37, %v11674_v28  ;;  %v4320_v29 = vor.u32 %v11676_v63, %v11675_v47  ;;  %v4330_v39 = vor.u32 %v11678_v1, %v11677_v25  ;;  %v11680_v48 = vld [vmem:[#allocation25_spill] sm:$0xff]  ;;  %v10205_v56 = vld [vmem:[%s9238_s22 + $0xb4] sm:$0xf] }
 0x1ad   : > { %v2906_v19 = vpop.f32.mrf.mxu1  ;;  %v7450_v13 = vpop.f32.mrf.mxu0  ;;  %v4312_v2 = vsel %vm8321_vm4, %v4307_v16, %v4311_v46  ;;  %v4357_v59 = vshll.u32 %v10171_v0, 16  ;;  %v4344_v37 = vor.u32 %v4343_v31, %v4340_v60  ;;  %v4354_v28 = vor.u32 %v4353_v15, %v10173_v44  ;;  %11681 = vst [vmem:[#allocation38_spill] sm:$0xff] %v10205_v56  ;;  %v10210_v46 = vld [vmem:[%s9238_s22 + $0xb8] sm:$0xf] }
 0x1ae   : > { %11673 = vst [vmem:[#allocation22_spill] sm:$0xff] %v10182_v57  ;;  %v10198_v58 = vadd.f32 %v2903_v53, %v2802_v51  ;;  %v2805_v1 = vadd.f32 %v7450_v13, %v11680_v48  ;;  %v4386_v16 = vshrl.u32 %v10205_v56, 16  ;;  %v4389_v52 = vshll.u32 %v10205_v56, 16  ;;  %11682 = vst [vmem:[#allocation13_spill] sm:$0xff] %v10210_v46  ;;  %v11684_v48 = vld [vmem:[#allocation41_spill] sm:$0xff] }
 0x1af   : > { %v7487_v54 = vpop.f32.mrf.mxu1  ;;  %7690 = vmatmul.mubr.msk.bf16.gmra.mxu1 %vm656_vm1, %v10153_v26  ;;  %v2702_v47 = vpop.f32.mrf.mxu0  ;;  %v4395_v53 = vshll.u32 %v10210_v46, 16  ;;  %v4399_v13 = vshrl.u32 %v10210_v46, 16  ;;  %v10217_v31 = vcombine.low %v4278_v3, %v4288_v21  ;;  %v4321_v15 = vrot.slane %v4320_v29, 4 }
 0x1b0   : > { %11679 = vst [vmem:[#allocation26_spill] sm:$0xff] %v10198_v58  ;;  %7693 = vmatprep.mubr.msk.bf16.mxu1 %vm656_vm1, %v10158_v5  ;;  %v10214_v51 = vadd.f32 %v7484_v38, %v2805_v1  ;;  %v2803_v60 = vadd.f32 %v2702_v47, %v11684_v48  ;;  %v10221_v56 = vcombine.low %v4302_v27, %v4312_v2  ;;  %v4331_v58 = vrot.slane %v4330_v39, 4  ;;  %v11686_v38 = vld [vmem:[#allocation2_spill] sm:$0xff]  ;;  %v10229_v48 = vld [vmem:[%s9238_s22 + $0xb0] sm:$0x1] }
 0x1b1   : > { %v2919_v63 = vpop.f32.mrf.mxu1  ;;  %v7453_v0 = vpop.f32.mrf.mxu0  ;;  %7656 = vmatmul.mubr.msk.bf16.gmra.mxu0 %vm656_vm1, %v10117_v62  ;;  %v4335_v57 = vrot.slane %v4333_v36, 5  ;;  %v4359_v6 = vrot.slane %v4357_v59, 5  ;;  %v4345_v3 = vrot.slane %v4344_v37, 4  ;;  %v4355_v21 = vrot.slane %v4354_v28, 4  ;;  %11687 = vst [vmem:[#allocation6_spill] sm:$0xff] %v10229_v48 }
 0x1b2   : > { %11683 = vst [vmem:[#allocation34_spill] sm:$0xff] %v10214_v51  ;;  %v10223_v14 = vadd.f32 %v2906_v19, %v2803_v60  ;;  %v2808_v1 = vadd.f32 %v7453_v0, %v11686_v38  ;;  %7659 = vmatprep.mubr.msk.bf16.mxu0 %vm656_vm1, %v10153_v26  ;;  %v4388_v46 = vrot.slane %v4386_v16, 4  ;;  %v4391_v27 = vrot.slane %v4389_v52, 5  ;;  %v11690_v60 = vld [vmem:[#allocation42_spill] sm:$0xff]  ;;  %v10242_v28 = vld [vmem:[%s9238_s22 + $0xbc] sm:$0x1] }
 0x1b3   : > { %v7488_v17 = vpop.f32.mrf.mxu1  ;;  %v2715_v29 = vpop.f32.mrf.mxu0  ;;  %v10231_v2 = vrot.slane %v4395_v53, 5  ;;  %v4401_v39 = vrot.slane %v4399_v13, 4  ;;  %v11688_v19 = vshrl.u32 %v9837_v22, 16  ;;  %v4423_v0 = vshrl.u32 %v9840_v61, 16  ;;  %11691 = vst [vmem:[#allocation3_spill] sm:$0xff] %v10242_v28  ;;  %v11692_v53 = vld [vmem:[#allocation43_spill] sm:$0xff] }
 0x1b4   : > { %11685 = vst [vmem:[#allocation7_spill] sm:$0xff] %v10223_v14  ;;  %v10238_v59 = vadd.f32 %v7487_v54, %v2808_v1  ;;  %v2806_v37 = vadd.f32 %v2715_v29, %v11690_v60  ;;  %v4326_v16 = vsel %vm8321_vm4, %v4321_v15, %v11677_v25  ;;  %v4336_v52 = vsel %vm8321_vm4, %v4331_v58, %v4335_v57  ;;  %v11693_v13 = vld [vmem:[#allocation18_spill] sm:$0xff]  ;;  %v11696_v60 = vld [vmem:[#allocation44_spill] sm:$0xff] }
 0x1b5   : > { %v2922_v47 = vpop.f32.mrf.mxu1  ;;  %v10235_v36 = vrot.slane %v11688_v19, 4  ;;  %v7454_v38 = vpop.f32.mrf.mxu0  ;;  %v4368_v54 = vor.u32 %v11693_v13, %v11692_v53  ;;  %v11694_v1 = vld [vmem:[#allocation46_spill] sm:$0xff]  ;;  %v4350_v25 = vsel %vm8321_vm4, %v4345_v3, %v10173_v44  ;;  %v4381_v15 = vshll.u32 %v10229_v48, 16  ;;  %v11699_v3 = vld [vmem:[#allocation45_spill] sm:$0xff] }
 0x1b6   : > { %11689 = vst [vmem:[#allocation21_spill] sm:$0xff] %v10238_v59  ;;  %v4378_v29 = vor.u32 %v9863_v4, %v11694_v1  ;;  %v10255_v19 = vadd.f32 %v2919_v63, %v2806_v37  ;;  %v2809_v59 = vadd.f32 %v7454_v38, %v11696_v60  ;;  %v4360_v53 = vsel %vm8321_vm4, %v4355_v21, %v4359_v6 }
 0x1b7   : > { %v7491_v14 = vpop.f32.mrf.mxu1  ;;  %7694 = vmatmul.mubr.msk.bf16.gmra.mxu1 %vm656_vm1, %v10217_v31  ;;  %v2718_v57 = vpop.f32.mrf.mxu0  ;;  %v4392_v13 = vor.u32 %v4391_v27, %v4388_v46  ;;  %v4402_v4 = vor.u32 %v4401_v39, %v10231_v2  ;;  %v4405_v63 = vshll.u32 %v10242_v28, 16  ;;  %v11697_v37 = vshll.u32 %v9837_v22, 16  ;;  %v10289_v28 = vld [vmem:[%s9812_s15 + $0x8] sm:$0x1] }
 0x1b8   : > { %11695 = vst [vmem:[#allocation39_spill] sm:$0xff] %v10255_v19  ;;  %7697 = vmatprep.mubr.msk.bf16.mxu1 %vm656_vm1, %v10221_v56  ;;  %v11698_v60 = vshll.u32 %v9840_v61, 16  ;;  %v10274_v44 = vadd.f32 %v7488_v17, %v2809_v59  ;;  %v2807_v48 = vadd.f32 %v2718_v57, %v11699_v3  ;;  %v4425_v51 = vrot.slane %v4423_v0, 4  ;;  %v11700_v61 = vld [vmem:[#allocation19_spill] sm:$0xff]  ;;  %11701 = vst [vmem:[#allocation40_spill] sm:$0xff] %v10289_v28 }
 0x1b9   : > { %v2935_v58 = vpop.f32.mrf.mxu1  ;;  %v4415_v38 = vrot.slane %v11697_v37, 5  ;;  %v7457_v26 = vpop.f32.mrf.mxu0  ;;  %7660 = vmatmul.mubr.msk.bf16.gmra.mxu0 %vm656_vm1, %v10158_v5  ;;  %v10279_v46 = vcombine.low %v4326_v16, %v4336_v52  ;;  %v4369_v21 = vrot.slane %v4368_v54, 4  ;;  %v4379_v22 = vrot.slane %v4378_v29, 4  ;;  %v11702_v52 = vld [vmem:[#allocation33_spill] sm:$0xff] }
 0x1ba   : > { %v10272_v19 = vrot.slane %v11698_v60, 5  ;;  %v10281_v27 = vadd.f32 %v2922_v47, %v2807_v48  ;;  %v2812_v39 = vadd.f32 %v7457_v26, %v11700_v61  ;;  %7663 = vmatprep.mubr.msk.bf16.mxu0 %vm656_vm1, %v10217_v31  ;;  %v10286_v17 = vcombine.low %v4350_v25, %v4360_v53 }
 0x1bb   : > { %v7492_v6 = vpop.f32.mrf.mxu1  ;;  %v4383_v0 = vrot.slane %v4381_v15, 5  ;;  %v2731_v59 = vpop.f32.mrf.mxu0  ;;  %v4393_v37 = vrot.slane %v4392_v13, 4  ;;  %v4403_v60 = vrot.slane %v4402_v4, 4  ;;  %v4407_v3 = vrot.slane %v4405_v63, 5 }
 0x1bc   : > { %v10291_v16 = vadd.f32 %v7491_v14, %v2812_v39  ;;  %v2810_v47 = vadd.f32 %v2731_v59, %v11702_v52  ;;  %v4374_v54 = vsel %vm8321_vm4, %v4369_v21, %v11694_v1  ;;  %v4416_v29 = vor.u32 %v4415_v38, %v10235_v36  ;;  %v11703_v14 = vld [vmem:[#allocation48_spill] sm:$0xff]  ;;  %v7949_v1 = vld [vmem:[%s9238_s22 + $0x4] sm:$0xf] }
 0x1bd   : > { %v2938_v57 = vpop.f32.mrf.mxu1  ;;  %v7458_v48 = vpop.f32.mrf.mxu0  ;;  %v4426_v25 = vor.u32 %v4425_v51, %v10272_v19  ;;  %v4384_v13 = vsel %vm8321_vm4, %v4379_v22, %v4383_v0  ;;  %v4429_v4 = vshll.u32 %v10289_v28, 16  ;;  %v4398_v36 = vsel %vm8321_vm4, %v4393_v37, %v10231_v2 }
 0x1be   : > { %v10301_v15 = vadd.f32 %v2935_v58, %v2810_v47  ;;  %v2813_v53 = vadd.f32 %v7458_v48, %v11703_v14  ;;  %v4408_v51 = vsel %vm8321_vm4, %v4403_v60, %v4407_v3  ;;  %v5179_v58 = vrot.slane %v7949_v1, 5  ;;  %v7950_v47 = vld [vmem:[%s9238_s22] sm:$0xf] }
 0x1bf   : > { %v7495_v26 = vpop.f32.mrf.mxu1  ;;  %7698 = vmatmul.mubr.msk.bf16.gmra.mxu1 %vm656_vm1, %v10279_v46  ;;  %v2734_v63 = vpop.f32.mrf.mxu0  ;;  %v10320_v0 = vcombine.low %v4374_v54, %v4384_v13  ;;  %v4417_v59 = vrot.slane %v4416_v29, 4  ;;  %v4427_v2 = vrot.slane %v4426_v25, 4  ;;  %v6768_v48 = vrot.slane %v7950_v47, 9  ;;  %v11704_v54 = vld [vmem:[#allocation29_spill] sm:$0xff]  ;;  %v11705_v29 = vld [vmem:[#allocation36_spill] sm:$0xff] }
 0x1c0   : > { %7701 = vmatprep.mubr.msk.bf16.mxu1 %vm656_vm1, %v10286_v17  ;;  %v10315_v38 = vadd.f32 %v7492_v6, %v2813_v53  ;;  %v2811_v21 = vadd.f32 %v2734_v63, %v9892_v20  ;;  %v10327_v6 = vcombine.low %v4398_v36, %v4408_v51  ;;  %v4431_v20 = vrot.slane %v4429_v4, 5  ;;  %v7951_v25 = vld [vmem:[%s9238_s22 + $0x10] sm:$0xf]  ;;  %v7952_v47 = vld [vmem:[%s9238_s22 + $0x1c] sm:$0xf] }
 0x1c1   : > { %v2951_v61 = vpop.f32.mrf.mxu1  ;;  %v7461_v39 = vpop.f32.mrf.mxu0  ;;  %7664 = vmatmul.mubr.msk.bf16.gmra.mxu0 %vm656_vm1, %v10221_v56  ;;  %v5181_v14 = vrot.slane %v5179_v58, 4  ;;  %v5182_v53 = vrot.slane %v11704_v54, 5 }
 0x1c2   : > { %v10322_v37 = vadd.f32 %v2938_v57, %v2811_v21  ;;  %v2816_v60 = vadd.f32 %v7461_v39, %v9904_v55  ;;  %7667 = vmatprep.mubr.msk.bf16.mxu0 %vm656_vm1, %v10279_v46  ;;  %v5186_v55 = vrot.slane %v7951_v25, 5  ;;  %v4432_v51 = vsel %vm8321_vm4, %v4427_v2, %v4431_v20 }
 0x1c3   : > { %v7496_v22 = vpop.f32.mrf.mxu1  ;;  %v2747_v3 = vpop.f32.mrf.mxu0 }
 0x1c4   : > { %v10331_v13 = vadd.f32 %v7495_v26, %v2816_v60  ;;  %v2814_v57 = vadd.f32 %v2747_v3, %v11705_v29  ;;  %v4422_v26 = vsel %vm8321_vm4, %v4417_v59, %v10272_v19  ;;  %v5180_v3 = vsel %vm8696_vm7, %v6768_v48, %v5179_v58  ;;  %v11707_v59 = vld [vmem:[#allocation32_spill] sm:$0xff] }
 0x1c5   : > { %v2954_v52 = vpop.f32.mrf.mxu1  ;;  %v7462_v63 = vpop.f32.mrf.mxu0  ;;  %v5189_v2 = vrot.slane %v11707_v59, 5  ;;  %v10359_v48 = vcombine.low %v4422_v26, %v4432_v51 }
 0x1c6   : > { %v10337_v4 = vadd.f32 %v2951_v61, %v2814_v57  ;;  %v2817_v36 = vadd.f32 %v7462_v63, %v9923_v9  ;;  %v5183_v61 = vsel %vm8696_vm7, %v5181_v14, %v5182_v53  ;;  %v5193_v9 = vrot.slane %v7952_v47, 5  ;;  %v7953_v57 = vld [vmem:[%s9238_s22 + $0xc] sm:$0xf] }
 0x1c7   : > { %v7499_v1 = vpop.f32.mrf.mxu1  ;;  %7702 = vmatmul.mubr.msk.bf16.gmra.mxu1 %vm656_vm1, %v10320_v0  ;;  %v2750_v21 = vpop.f32.mrf.mxu0  ;;  %v6769_v19 = vrot.slane %v7953_v57, 9  ;;  %v5188_v14 = vrot.slane %v5186_v55, 4  ;;  %v7955_v57 = vld [vmem:[%s9238_s22 + $0x20] sm:$0x1] }
 0x1c8   : > { %7705 = vmatprep.mubr.msk.bf16.mxu1 %vm656_vm1, %v10327_v6  ;;  %v10352_v54 = vadd.f32 %v7496_v22, %v2817_v36  ;;  %v2815_v29 = vadd.f32 %v2750_v21, %v9934_v7  ;;  %v6787_v7 = vcombine.low %v5180_v3, %v5183_v61  ;;  %v7954_v36 = vld [vmem:[%s9238_s22 + $0x18] sm:$0xf]  ;;  %v5195_v47 = vrot.slane %v5193_v9, 4 }
 0x1c9   : > { %v2967_v39 = vpop.f32.mrf.mxu1  ;;  %v7465_v20 = vpop.f32.mrf.mxu0  ;;  %7668 = vmatmul.mubr.msk.bf16.gmra.mxu0 %vm656_vm1, %v10286_v17  ;;  %v6770_v21 = vrot.slane %v7954_v36, 9  ;;  %v5196_v59 = vrot.slane %v7955_v57, 5  ;;  %v5190_v3 = vsel %vm8696_vm7, %v5188_v14, %v5189_v2  ;;  %v11708_v14 = vld [vmem:[#allocation47_spill] sm:$0xff] }
 0x1ca   : > { %v10361_v53 = vadd.f32 %v2954_v52, %v2815_v29  ;;  %v2820_v22 = vadd.f32 %v7465_v20, %v9955_v11  ;;  %7671 = vmatprep.mubr.msk.bf16.mxu0 %vm656_vm1, %v10320_v0  ;;  %v5187_v11 = vsel %vm8696_vm7, %v6769_v19, %v5186_v55 }
 0x1cb   : > { %v7500_v58 = vpop.f32.mrf.mxu1  ;;  %v2763_v25 = vpop.f32.mrf.mxu0  ;;  %v5194_v55 = vsel %vm8696_vm7, %v6770_v21, %v5193_v9  ;;  %v5197_v19 = vsel %vm8696_vm7, %v5195_v47, %v5196_v59  ;;  %v7958_v9 = vld [vmem:[%s9238_s22 + $0x24] sm:$0xf] }
 0x1cc   : > { %v10368_v28 = vadd.f32 %v7499_v1, %v2820_v22  ;;  %v2818_v52 = vadd.f32 %v2763_v25, %v9968_v12  ;;  %v7956_v1 = vld [vmem:[%s9238_s22 + $0x28] sm:$0xf]  ;;  %v7957_v25 = vld [vmem:[%s9238_s22 + $0x34] sm:$0xf]  ;;  %v6771_v21 = vrot.slane %v7958_v9, 9 }
 0x1cd   : > { %v2970_v63 = vpop.f32.mrf.mxu1  ;;  %v7466_v26 = vpop.f32.mrf.mxu0  ;;  %v5200_v12 = vrot.slane %v7956_v1, 5  ;;  %v5207_v36 = vrot.slane %v7957_v25, 5  ;;  %v11709_v25 = vld [vmem:[#allocation35_spill] sm:$0xff] }
 0x1ce   : > { %v10377_v61 = vadd.f32 %v2967_v39, %v2818_v52  ;;  %v2821_v29 = vadd.f32 %v7466_v26, %v9986_v10  ;;  %v10390_v10 = vcombine.low %v5187_v11, %v5190_v3  ;;  %v5810_v3 = vsel %vm705_vm0, %v10015_v42, 0 }
 0x1cf   : > { %v7503_v51 = vpop.f32.mrf.mxu1  ;;  %7706 = vmatmul.mubr.msk.bf16.gmra.mxu1 %vm656_vm1, %v10359_v48  ;;  %v2766_v20 = vpop.f32.mrf.mxu0 }
 0x1d0   : > { %7745 = vmatprep.mubr.msk.bf16.mxu1 %vm656_vm1, %v6787_v7  ;;  %v10387_v2 = vadd.f32 %v7500_v58, %v2821_v29  ;;  %v2819_v39 = vadd.f32 %v2766_v20, %v9992_v43  ;;  %v5203_v7 = vrot.slane %v11708_v14, 5  ;;  %v10401_v43 = vcombine.low %v5194_v55, %v5197_v19  ;;  %v7959_v29 = vld [vmem:[%s9238_s22 + $0x30] sm:$0xf] }
 0x1d1   : > { %v2983_v22 = vpop.f32.mrf.mxu1  ;;  %v7469_v57 = vpop.f32.mrf.mxu0  ;;  %7672 = vmatmul.mubr.msk.bf16.gmra.mxu0 %vm656_vm1, %v10327_v6  ;;  %v5202_v58 = vrot.slane %v5200_v12, 4  ;;  %v6772_v1 = vrot.slane %v7959_v29, 9  ;;  %v5209_v20 = vrot.slane %v5207_v36, 4  ;;  %v5201_v55 = vsel %vm8696_vm7, %v6771_v21, %v5200_v12 }
 0x1d2   : > { %v10396_v26 = vadd.f32 %v2970_v63, %v2819_v39  ;;  %v2824_v47 = vadd.f32 %v7469_v57, %v10005_v24  ;;  %7711 = vmatprep.mubr.msk.bf16.mxu0 %vm656_vm1, %v9683_v50  ;;  %v5210_v63 = vrot.slane %v11709_v25, 5 }
 0x1d3   : > { %v7504_v52 = vpop.f32.mrf.mxu1  ;;  %v2779_v59 = vpop.f32.mrf.mxu0  ;;  %v5208_v12 = vsel %vm8696_vm7, %v6772_v1, %v5207_v36  ;;  %v7962_v36 = vld [vmem:[%s9238_s22 + $0x3c] sm:$0xf] }
 0x1d4   : > { %v10407_v39 = vadd.f32 %v7503_v51, %v2824_v47  ;;  %v2822_v24 = vadd.f32 %v2779_v59, %v10026_v33  ;;  %v5204_v33 = vsel %vm8696_vm7, %v5202_v58, %v5203_v7  ;;  %v7960_v51 = vld [vmem:[%s9238_s22 + $0x40] sm:$0xf]  ;;  %v5606_v47 = vsel %vm705_vm0, %v10055_v41, 0 }
 0x1d5   : > { %v2986_v11 = vpop.f32.mrf.mxu1  ;;  %v7470_v14 = vpop.f32.mrf.mxu0  ;;  %v5214_v57 = vrot.slane %v7960_v51, 5  ;;  %v5217_v58 = vrot.slane %v9930_v30, 5  ;;  %v10435_v25 = vcombine.low %v5201_v55, %v5204_v33  ;;  %v6773_v1 = vrot.slane %v7962_v36, 9 }
 0x1d6   : > { %v10414_v42 = vadd.f32 %v2983_v22, %v2822_v24  ;;  %v2825_v19 = vadd.f32 %v7470_v14, %v10040_v23  ;;  %v5211_v23 = vsel %vm8696_vm7, %v5209_v20, %v5210_v63  ;;  %v7961_v22 = vld [vmem:[%s9238_s22 + $0x4c] sm:$0xf] }
 0x1d7   : > { %v7543_v50 = vpop.f32.mrf.mxu1  ;;  %7746 = vmatmul.mubr.msk.bf16.vlgmr.msra.gmra.mxu1 %vm656_vm1, %v10390_v10  ;;  %v2782_v9 = vpop.f32.mrf.mxu0  ;;  %v5221_v21 = vrot.slane %v7961_v22, 5  ;;  %v5216_v30 = vrot.slane %v5214_v57, 4 }
 0x1d8   : > { %7812 = vmatpush3.bf16.msra.mxu1 %v5810_v3  ;;  %7749 = vmatprep.mubr.msk.bf16.mxu1 %vm656_vm1, %v10401_v43  ;;  %v10429_v3 = vadd.f32 %v7504_v52, %v2825_v19  ;;  %v2823_v7 = vadd.f32 %v2782_v9, %v10067_v49  ;;  %v10443_v49 = vcombine.low %v5208_v12, %v5211_v23  ;;  %v5224_v19 = vrot.slane %v9974_v35, 5 }
 0x1d9   : > { %v3454_v59 = vpop.f32.mrf.mxu1  ;;  %v7509_v29 = vpop.f32.mrf.mxu0  ;;  %7712 = vmatmul.mubr.msk.bf16.vlgmr.msra.gmra.mxu0 %vm656_vm1, %v9978_v45  ;;  %v7963_v45 = vld [vmem:[%s9238_s22 + $0x48] sm:$0xf]  ;;  %v5223_v55 = vrot.slane %v5221_v21, 4  ;;  %v5218_v35 = vsel %vm8696_vm7, %v5216_v30, %v5217_v58  ;;  %v11712_v30 = vld [vmem:[#allocation24_spill] sm:$0xff] }
 0x1da   : > { %v10438_v24 = vadd.f32 %v2986_v11, %v2823_v7  ;;  %v3204_v20 = vadd.f32 %v7509_v29, %v10078_v32  ;;  %7778 = vmatpush3.bf16.msra.mxu0 %v5606_v47  ;;  %7715 = vmatprep.mubr.msk.bf16.mxu0 %vm656_vm1, %v9980_v18  ;;  %v6774_v14 = vrot.slane %v7963_v45, 9  ;;  %v5215_v18 = vsel %vm8696_vm7, %v6773_v1, %v5214_v57  ;;  %v11710_v29 = vld [vmem:[#allocation5_spill] sm:$0xff]  ;;  %v11711_v1 = vld [vmem:[#allocation15_spill] sm:$0xff] }
 0x1db   : > { %v7544_v41 = vpop.f32.mrf.mxu1  ;;  %v3075_v52 = vpop.f32.mrf.mxu0  ;;  %v5225_v57 = vsel %vm8696_vm7, %v5223_v55, %v5224_v19  ;;  %v5231_v58 = vrot.slane %v11711_v1, 5  ;;  %v10473_v45 = vcombine.low %v5215_v18, %v5218_v35  ;;  %v11714_v55 = vld [vmem:[#allocation17_spill] sm:$0xff]  ;;  %v11717_v18 = vld [vmem:[#allocation16_spill] sm:$0xff] }
 0x1dc   : > { %v10447_v33 = vadd.f32 %v7543_v50, %v3204_v20  ;;  %v3202_v32 = vadd.f32 %v3075_v52, %v10090_v34  ;;  %v7964_v34 = vld [vmem:[%s9238_s22 + $0x58] sm:$0xf]  ;;  %v5222_v22 = vsel %vm8696_vm7, %v6774_v14, %v5221_v21  ;;  %v7966_v21 = vld [vmem:[%s9238_s22 + $0x54] sm:$0xf]  ;;  %v5238_v35 = vrot.slane %v11717_v18, 5 }
 0x1dd   : > { %v3457_v63 = vpop.f32.mrf.mxu1  ;;  %v7510_v11 = vpop.f32.mrf.mxu0  ;;  %v5228_v50 = vrot.slane %v7964_v34, 5  ;;  %v6775_v14 = vrot.slane %v7966_v21, 9 }
 0x1de   : > { %v10454_v9 = vadd.f32 %v3454_v59, %v3202_v32  ;;  %v3205_v47 = vadd.f32 %v7510_v11, %v10097_v8  ;;  %v7965_v59 = vld [vmem:[%s9238_s22 + $0x64] sm:$0xf]  ;;  %v10481_v11 = vcombine.low %v5222_v22, %v5225_v57 }
 0x1df   : > { %v7547_v51 = vpop.f32.mrf.mxu1  ;;  %7750 = vmatmul.mubr.msk.bf16.gmra.mxu1 %vm656_vm1, %v10435_v25  ;;  %v3078_v12 = vpop.f32.mrf.mxu0  ;;  %v5235_v7 = vrot.slane %v7965_v59, 5  ;;  %v7967_v59 = vld [vmem:[%s9238_s22 + $0x60] sm:$0xf]  ;;  %v5229_v22 = vsel %vm8696_vm7, %v6775_v14, %v5228_v50 }
 0x1e0   : > { %7753 = vmatprep.mubr.msk.bf16.mxu1 %vm656_vm1, %v10443_v49  ;;  %v10467_v8 = vadd.f32 %v7544_v41, %v3205_v47  ;;  %v3203_v36 = vadd.f32 %v3078_v12, %v11710_v29  ;;  %v11715_v41 = vld [vmem:[#allocation27_spill] sm:$0xff]  ;;  %11716 = vst [vmem:[#allocation10_spill] sm:$0xff] %v10481_v11  ;;  %v5230_v47 = vrot.slane %v5228_v50, 4  ;;  %v6776_v29 = vrot.slane %v7967_v59, 9 }
 0x1e1   : > { %v3470_v23 = vpop.f32.mrf.mxu1  ;;  %v7513_v20 = vpop.f32.mrf.mxu0  ;;  %7716 = vmatmul.mubr.msk.bf16.gmra.mxu0 %vm656_vm1, %v11712_v30  ;;  %v5237_v1 = vrot.slane %v5235_v7, 4 }
 0x1e2   : > { %v10476_v32 = vadd.f32 %v3457_v63, %v3203_v36  ;;  %v3208_v19 = vadd.f32 %v7513_v20, %v11714_v55  ;;  %7719 = vmatprep.mubr.msk.bf16.mxu0 %vm656_vm1, %v11715_v41  ;;  %v11719_v63 = vld [vmem:[#allocation9_spill] sm:$0xff]  ;;  %v11721_v55 = vld [vmem:[#allocation4_spill] sm:$0xff] }
 0x1e3   : > { %v7548_v52 = vpop.f32.mrf.mxu1  ;;  %v3091_v34 = vpop.f32.mrf.mxu0  ;;  %v5239_v50 = vsel %vm8696_vm7, %v5237_v1, %v5238_v35  ;;  %v11726_v1 = vld [vmem:[#allocation22_spill] sm:$0xff] }
 0x1e4   : > { %11713 = vst [vmem:[#allocation28_spill] sm:$0xff] %v10476_v32  ;;  %v10485_v30 = vadd.f32 %v7547_v51, %v3208_v19  ;;  %v3206_v36 = vadd.f32 %v3091_v34, %v11719_v63  ;;  %v5232_v51 = vsel %vm8696_vm7, %v5230_v47, %v5231_v58  ;;  %v7968_v19 = vld [vmem:[%s9238_s22 + $0x70] sm:$0xf]  ;;  %v5236_v63 = vsel %vm8696_vm7, %v6776_v29, %v5235_v7  ;;  %v7970_v7 = vld [vmem:[%s9238_s22 + $0x6c] sm:$0xf] }
 0x1e5   : > { %v3473_v12 = vpop.f32.mrf.mxu1  ;;  %v7514_v20 = vpop.f32.mrf.mxu0  ;;  %v5242_v34 = vrot.slane %v7968_v19, 5  ;;  %v6777_v29 = vrot.slane %v7970_v7, 9 }
 0x1e6   : > { %11718 = vst [vmem:[#allocation25_spill] sm:$0xff] %v10485_v30  ;;  %v10492_v57 = vadd.f32 %v3470_v23, %v3206_v36  ;;  %v3209_v41 = vadd.f32 %v7514_v20, %v11721_v55  ;;  %v7969_v23 = vld [vmem:[%s9238_s22 + $0x7c] sm:$0xf]  ;;  %v11723_v20 = vld [vmem:[#allocation11_spill] sm:$0xff]  ;;  %v10511_v30 = vcombine.low %v5229_v22, %v5232_v51  ;;  %v11728_v22 = vld [vmem:[#allocation8_spill] sm:$0xff] }
 0x1e7   : > { %v7551_v21 = vpop.f32.mrf.mxu1  ;;  %7754 = vmatmul.mubr.msk.bf16.gmra.mxu1 %vm656_vm1, %v10473_v45  ;;  %v3094_v59 = vpop.f32.mrf.mxu0  ;;  %v5249_v14 = vrot.slane %v7969_v23, 5  ;;  %v5252_v51 = vrot.slane %v11728_v22, 5 }
 0x1e8   : > { %11720 = vst [vmem:[#allocation41_spill] sm:$0xff] %v10492_v57  ;;  %7757 = vmatprep.mubr.msk.bf16.mxu1 %vm656_vm1, %v10481_v11  ;;  %v10505_v36 = vadd.f32 %v7548_v52, %v3209_v41  ;;  %v3207_v55 = vadd.f32 %v3094_v59, %v11723_v20  ;;  %v11724_v57 = vld [vmem:[#allocation23_spill] sm:$0xff]  ;;  %v11727_v52 = vld [vmem:[#allocation30_spill] sm:$0xff]  ;;  %v10519_v41 = vcombine.low %v5236_v63, %v5239_v50  ;;  %v5244_v59 = vrot.slane %v5242_v34, 4  ;;  %v7971_v20 = vld [vmem:[%s9238_s22 + $0x78] sm:$0xf] }
 0x1e9   : > { %v3486_v18 = vpop.f32.mrf.mxu1  ;;  %v5245_v58 = vrot.slane %v11724_v57, 5  ;;  %v7517_v47 = vpop.f32.mrf.mxu0  ;;  %7720 = vmatmul.mubr.msk.bf16.gmra.mxu0 %vm656_vm1, %v10117_v62  ;;  %v6778_v62 = vrot.slane %v7971_v20, 9  ;;  %v5243_v63 = vsel %vm8696_vm7, %v6777_v29, %v5242_v34 }
 0x1ea   : > { %11722 = vst [vmem:[#allocation2_spill] sm:$0xff] %v10505_v36  ;;  %v10514_v32 = vadd.f32 %v3473_v12, %v3207_v55  ;;  %v3212_v35 = vadd.f32 %v7517_v47, %v11726_v1  ;;  %7723 = vmatprep.mubr.msk.bf16.mxu0 %vm656_vm1, %v11727_v52  ;;  %v5251_v36 = vrot.slane %v5249_v14, 4  ;;  %v11730_v12 = vld [vmem:[#allocation26_spill] sm:$0xff] }
 0x1eb   : > { %v7552_v19 = vpop.f32.mrf.mxu1  ;;  %v3107_v57 = vpop.f32.mrf.mxu0  ;;  %v11732_v1 = vld [vmem:[#allocation34_spill] sm:$0xff] }
 0x1ec   : > { %11725 = vst [vmem:[#allocation42_spill] sm:$0xff] %v10514_v32  ;;  %v10523_v11 = vadd.f32 %v7551_v21, %v3212_v35  ;;  %v3210_v55 = vadd.f32 %v3107_v57, %v11730_v12  ;;  %v5246_v21 = vsel %vm8696_vm7, %v5244_v59, %v5245_v58  ;;  %v7972_v35 = vld [vmem:[%s9238_s22 + $0x88] sm:$0xf]  ;;  %v5250_v12 = vsel %vm8696_vm7, %v6778_v62, %v5249_v14  ;;  %v7974_v14 = vld [vmem:[%s9238_s22 + $0x84] sm:$0xf] }
 0x1ed   : > { %v3489_v23 = vpop.f32.mrf.mxu1  ;;  %v7518_v47 = vpop.f32.mrf.mxu0  ;;  %v5256_v57 = vrot.slane %v7972_v35, 5  ;;  %v5253_v34 = vsel %vm8696_vm7, %v5251_v36, %v5252_v51  ;;  %v6779_v62 = vrot.slane %v7974_v14, 9  ;;  %v11737_v51 = vld [vmem:[#allocation21_spill] sm:$0xff]  ;;  %v11741_v14 = vld [vmem:[#allocation39_spill] sm:$0xff] }
 0x1ee   : > { %11729 = vst [vmem:[#allocation43_spill] sm:$0xff] %v10523_v11  ;;  %v10530_v50 = vadd.f32 %v3486_v18, %v3210_v55  ;;  %v3213_v52 = vadd.f32 %v7518_v47, %v11732_v1  ;;  %v7973_v18 = vld [vmem:[%s9238_s22 + $0x94] sm:$0xf]  ;;  %v11734_v47 = vld [vmem:[#allocation7_spill] sm:$0xff]  ;;  %v10549_v11 = vcombine.low %v5243_v63, %v5246_v21  ;;  %v11739_v63 = vld [vmem:[#allocation37_spill] sm:$0xff] }
 0x1ef   : > { %v7555_v7 = vpop.f32.mrf.mxu1  ;;  %7758 = vmatmul.mubr.msk.bf16.gmra.mxu1 %vm656_vm1, %v10511_v30  ;;  %v3110_v20 = vpop.f32.mrf.mxu0  ;;  %v5263_v29 = vrot.slane %v7973_v18, 5  ;;  %v5266_v21 = vrot.slane %v11739_v63, 5 }
 0x1f0   : > { %11731 = vst [vmem:[#allocation18_spill] sm:$0xff] %v10530_v50  ;;  %7761 = vmatprep.mubr.msk.bf16.mxu1 %vm656_vm1, %v10519_v41  ;;  %v10543_v55 = vadd.f32 %v7552_v19, %v3213_v52  ;;  %v3211_v1 = vadd.f32 %v3110_v20, %v11734_v47  ;;  %v11735_v50 = vld [vmem:[#allocation14_spill] sm:$0xff]  ;;  %v10557_v52 = vcombine.low %v5250_v12, %v5253_v34  ;;  %v7975_v47 = vld [vmem:[%s9238_s22 + $0x90] sm:$0xf] }
 0x1f1   : > { %v3502_v22 = vpop.f32.mrf.mxu1  ;;  %v5259_v58 = vrot.slane %v11735_v50, 5  ;;  %v7521_v59 = vpop.f32.mrf.mxu0  ;;  %7724 = vmatmul.mubr.msk.bf16.gmra.mxu0 %vm656_vm1, %v10158_v5  ;;  %v5258_v50 = vrot.slane %v5256_v57, 4  ;;  %v6780_v5 = vrot.slane %v7975_v47, 9  ;;  %v11745_v47 = vld [vmem:[#allocation12_spill] sm:$0xff] }
 0x1f2   : > { %11733 = vst [vmem:[#allocation46_spill] sm:$0xff] %v10543_v55  ;;  %v10552_v36 = vadd.f32 %v3489_v23, %v3211_v1  ;;  %v3216_v19 = vadd.f32 %v7521_v59, %v11737_v51  ;;  %7727 = vmatprep.mubr.msk.bf16.mxu0 %vm656_vm1, %v10217_v31  ;;  %11738 = vst [vmem:[#allocation45_spill] sm:$0xff] %v10557_v52  ;;  %v5265_v55 = vrot.slane %v5263_v29, 4  ;;  %v11742_v1 = vld [vmem:[#allocation20_spill] sm:$0xff]  ;;  %v10566_v59 = vld [vmem:[%s9812_s15 + $0xc] sm:$0xf] }
 0x1f3   : > { %v7556_v35 = vpop.f32.mrf.mxu1  ;;  %v3123_v20 = vpop.f32.mrf.mxu0  ;;  %11743 = vst [vmem:[#allocation33_spill] sm:$0xff] %v10566_v59  ;;  %v4434_v31 = vshrl.u32 %v10566_v59, 16  ;;  %v5273_v63 = vrot.slane %v11745_v47, 5  ;;  %v10592_v47 = vld [vmem:[%s9812_s15 + $0x10] sm:$0xf] }
 0x1f4   : > { %11736 = vst [vmem:[#allocation44_spill] sm:$0xff] %v10552_v36  ;;  %v10561_v32 = vadd.f32 %v7555_v7, %v3216_v19  ;;  %v3214_v23 = vadd.f32 %v3123_v20, %v11741_v14  ;;  %v5270_v36 = vrot.slane %v11742_v1, 5  ;;  %v5257_v19 = vsel %vm8696_vm7, %v6779_v62, %v5256_v57  ;;  %v7978_v57 = vld [vmem:[%s9238_s22 + $0x9c] sm:$0xf]  ;;  %11747 = vst [vmem:[#allocation36_spill] sm:$0xff] %v10592_v47 }
 0x1f5   : > { %v3505_v18 = vpop.f32.mrf.mxu1  ;;  %v7522_v12 = vpop.f32.mrf.mxu0  ;;  %v5260_v20 = vsel %vm8696_vm7, %v5258_v50, %v5259_v58  ;;  %v6781_v62 = vrot.slane %v7978_v57, 9  ;;  %v4437_v50 = vshll.u32 %v10566_v59, 16  ;;  %v7980_v57 = vld [vmem:[%s9238_s22 + $0xa8] sm:$0xf] }
 0x1f6   : > { %11740 = vst [vmem:[#allocation19_spill] sm:$0xff] %v10561_v32  ;;  %v10571_v51 = vadd.f32 %v3502_v22, %v3214_v23  ;;  %v3217_v7 = vadd.f32 %v7522_v12, %v10274_v44  ;;  %v5264_v22 = vsel %vm8696_vm7, %v6780_v5, %v5263_v29  ;;  %v5267_v44 = vsel %vm8696_vm7, %v5265_v55, %v5266_v21  ;;  %v7977_v23 = vld [vmem:[%s9238_s22 + $0xac] sm:$0xf] }
 0x1f7   : > { %v7559_v34 = vpop.f32.mrf.mxu1  ;;  %7762 = vmatmul.mubr.msk.bf16.gmra.mxu1 %vm656_vm1, %v10549_v11  ;;  %v3126_v14 = vpop.f32.mrf.mxu0  ;;  %v5277_v12 = vrot.slane %v7977_v23, 5  ;;  %v5272_v58 = vrot.slane %v5270_v36, 4  ;;  %v10597_v5 = vcombine.low %v5257_v19, %v5260_v20  ;;  %v6782_v59 = vrot.slane %v7980_v57, 9 }
 0x1f8   : > { %11744 = vst [vmem:[#allocation48_spill] sm:$0xff] %v10571_v51  ;;  %7765 = vmatprep.mubr.msk.bf16.mxu1 %vm656_vm1, %v10557_v52  ;;  %v10586_v51 = vadd.f32 %v7556_v35, %v3217_v7  ;;  %v3215_v32 = vadd.f32 %v3126_v14, %v10281_v27  ;;  %v4447_v52 = vshrl.u32 %v10592_v47, 16  ;;  %v4443_v35 = vshll.u32 %v10592_v47, 16 }
 0x1f9   : > { %v3518_v1 = vpop.f32.mrf.mxu1  ;;  %v7525_v29 = vpop.f32.mrf.mxu0  ;;  %7728 = vmatmul.mubr.msk.bf16.gmra.mxu0 %vm656_vm1, %v10221_v56  ;;  %v10605_v7 = vcombine.low %v5264_v22, %v5267_v44  ;;  %v11748_v56 = vld [vmem:[#allocation6_spill] sm:$0xff]  ;;  %v4436_v44 = vrot.slane %v4434_v31, 4 }
 0x1fa   : > { %11746 = vst [vmem:[#allocation29_spill] sm:$0xff] %v10586_v51  ;;  %v10600_v27 = vadd.f32 %v3505_v18, %v3215_v32  ;;  %v3220_v21 = vadd.f32 %v7525_v29, %v10291_v16  ;;  %7731 = vmatprep.mubr.msk.bf16.mxu0 %vm656_vm1, %v10279_v46  ;;  %v5279_v51 = vrot.slane %v5277_v12, 4  ;;  %v5280_v19 = vrot.slane %v11748_v56, 5 }
 0x1fb   : > { %v7560_v55 = vpop.f32.mrf.mxu1  ;;  %v3139_v14 = vpop.f32.mrf.mxu0  ;;  %v5271_v16 = vsel %vm8696_vm7, %v6781_v62, %v5270_v36  ;;  %v5274_v46 = vsel %vm8696_vm7, %v5272_v58, %v5273_v63  ;;  %v4439_v29 = vrot.slane %v4437_v50, 5  ;;  %v4445_v57 = vrot.slane %v4443_v35, 5  ;;  %v11750_v36 = vld [vmem:[#allocation13_spill] sm:$0xff] }
 0x1fc   : > { %v10609_v20 = vadd.f32 %v7559_v34, %v3220_v21  ;;  %v3218_v32 = vadd.f32 %v3139_v14, %v10301_v15  ;;  %v4449_v47 = vrot.slane %v4447_v52, 4  ;;  %v10624_v15 = vld [vmem:[%s9812_s15 + $0x14] sm:$0x1]  ;;  %v5284_v63 = vrot.slane %v11750_v36, 5  ;;  %v11751_v52 = vld [vmem:[#allocation3_spill] sm:$0xff] }
 0x1fd   : > { %v3521_v23 = vpop.f32.mrf.mxu1  ;;  %v7526_v18 = vpop.f32.mrf.mxu0  ;;  %v5278_v21 = vsel %vm8696_vm7, %v6782_v59, %v5277_v12  ;;  %v5281_v31 = vsel %vm8696_vm7, %v5279_v51, %v5280_v19  ;;  %v10635_v35 = vcombine.low %v5271_v16, %v5274_v46  ;;  %v4453_v59 = vshll.u32 %v10624_v15, 16  ;;  %v11752_v12 = vld [vmem:[#allocation38_spill] sm:$0xff] }
 0x1fe   : > { %v10618_v56 = vadd.f32 %v3518_v1, %v3218_v32  ;;  %v3221_v34 = vadd.f32 %v7526_v18, %v10315_v38  ;;  %v5287_v1 = vrot.slane %v11751_v52, 5  ;;  %v4440_v18 = vor.u32 %v4439_v29, %v4436_v44 }
 0x1ff   : > { %v7563_v22 = vpop.f32.mrf.mxu1  ;;  %7766 = vmatmul.mubr.msk.bf16.gmra.mxu1 %vm656_vm1, %v10597_v5  ;;  %v3142_v62 = vpop.f32.mrf.mxu0  ;;  %v4450_v36 = vor.u32 %v4449_v47, %v4445_v57  ;;  %v5286_v19 = vrot.slane %v5284_v63, 4 }
 0x200   : > { %11749 = vst [vmem:[#allocation31_spill] sm:$0xff] %v10618_v56  ;;  %7769 = vmatprep.mubr.msk.bf16.mxu1 %vm656_vm1, %v10605_v7  ;;  %v10632_v50 = vadd.f32 %v7560_v55, %v3221_v34  ;;  %v3219_v38 = vadd.f32 %v3142_v62, %v10322_v37  ;;  %v6783_v56 = vrot.slane %v11752_v12, 9  ;;  %v10646_v37 = vcombine.low %v5278_v21, %v5281_v31 }
 0x201   : > { %v3534_v58 = vpop.f32.mrf.mxu1  ;;  %v7529_v14 = vpop.f32.mrf.mxu0  ;;  %7732 = vmatmul.mubr.msk.bf16.gmra.mxu0 %vm656_vm1, %v10286_v17  ;;  %v4451_v34 = vrot.slane %v4450_v36, 4 }
 0x202   : > { %v10641_v51 = vadd.f32 %v3521_v23, %v3219_v38  ;;  %v3224_v55 = vadd.f32 %v7529_v14, %v10331_v13  ;;  %7735 = vmatprep.mubr.msk.bf16.mxu0 %vm656_vm1, %v10320_v0  ;;  %v4441_v23 = vrot.slane %v4440_v18, 4  ;;  %v4455_v13 = vrot.slane %v4453_v59, 5 }
 0x203   : > { %v7564_v32 = vpop.f32.mrf.mxu1  ;;  %v3155_v16 = vpop.f32.mrf.mxu0 }
 0x204   : > { %v10648_v17 = vadd.f32 %v7563_v22, %v3224_v55  ;;  %v3222_v47 = vadd.f32 %v3155_v16, %v10337_v4  ;;  %v5285_v22 = vsel %vm8696_vm7, %v6783_v56, %v5284_v63  ;;  %v5288_v4 = vsel %vm8696_vm7, %v5286_v19, %v5287_v1 }
 0x205   : > { %v3537_v46 = vpop.f32.mrf.mxu1  ;;  %v7530_v44 = vpop.f32.mrf.mxu0  ;;  %v4446_v63 = vsel %vm8321_vm4, %v4441_v23, %v4445_v57 }
 0x206   : > { %v10653_v62 = vadd.f32 %v3534_v58, %v3222_v47  ;;  %v3225_v0 = vadd.f32 %v7530_v44, %v10352_v54  ;;  %v10667_v58 = vcombine.low %v5285_v22, %v5288_v4 }
 0x207   : > { %v7567_v29 = vpop.f32.mrf.mxu1  ;;  %7770 = vmatmul.mubr.msk.bf16.gmra.mxu1 %vm656_vm1, %v10635_v35  ;;  %v3158_v21 = vpop.f32.mrf.mxu0 }
 0x208   : > { %7773 = vmatprep.mubr.msk.bf16.mxu1 %vm656_vm1, %v10646_v37  ;;  %v10662_v52 = vadd.f32 %v7564_v32, %v3225_v0  ;;  %v3223_v38 = vadd.f32 %v3158_v21, %v10361_v53  ;;  %v4456_v53 = vsel %vm8321_vm4, %v4451_v34, %v4455_v13 }
 0x209   : > { %v3550_v31 = vpop.f32.mrf.mxu1  ;;  %v7533_v14 = vpop.f32.mrf.mxu0  ;;  %7736 = vmatmul.mubr.msk.bf16.gmra.mxu0 %vm656_vm1, %v10327_v6  ;;  %v6751_v55 = vcombine.low %v4446_v63, %v4456_v53 }
 0x20a   : > { %v10669_v18 = vadd.f32 %v3537_v46, %v3223_v38  ;;  %v3228_v56 = vadd.f32 %v7533_v14, %v10368_v28  ;;  %7739 = vmatprep.mubr.msk.bf16.mxu0 %vm656_vm1, %v10359_v48 }
 0x20b   : > { %v7568_v54 = vpop.f32.mrf.mxu1  ;;  %v3171_v1 = vpop.f32.mrf.mxu0 }
 0x20c   : > { %v10678_v36 = vadd.f32 %v7567_v29, %v3228_v56  ;;  %v3226_v6 = vadd.f32 %v3171_v1, %v10377_v61 }
 0x20d   : > { %v3553_v32 = vpop.f32.mrf.mxu1  ;;  %v7534_v59 = vpop.f32.mrf.mxu0 }
 0x20e   : > { %v10683_v28 = vadd.f32 %v3550_v31, %v3226_v6  ;;  %v3229_v48 = vadd.f32 %v7534_v59, %v10387_v2  ;;  %v11754_v59 = vld [vmem:[#allocation28_spill] sm:$0xff] }
 0x20f   : > { %v7571_v12 = vpop.f32.mrf.mxu1  ;;  %7774 = vmatmul.mubr.msk.bf16.gmra.mxu1 %vm656_vm1, %v10667_v58  ;;  %v3174_v40 = vpop.f32.mrf.mxu0 }
 0x210   : > { %7813 = vmatprep.mubr.msk.bf16.mxu1 %vm656_vm1, %v10401_v43  ;;  %v10688_v19 = vadd.f32 %v7568_v54, %v3229_v48  ;;  %v3227_v16 = vadd.f32 %v3174_v40, %v10396_v26  ;;  %v11755_v40 = vld [vmem:[#allocation25_spill] sm:$0xff] }
 0x211   : > { %v3566_v57 = vpop.f32.mrf.mxu1  ;;  %v7537_v61 = vpop.f32.mrf.mxu0  ;;  %7740 = vmatmul.mubr.msk.bf16.gmra.mxu0 %vm656_vm1, %v6751_v55 }
 0x212   : > { %v10692_v47 = vadd.f32 %v3553_v32, %v3227_v16  ;;  %v3232_v44 = vadd.f32 %v7537_v61, %v10407_v39  ;;  %7779 = vmatprep.mubr.msk.bf16.mxu0 %vm656_vm1, %v10390_v10  ;;  %v11753_v32 = vld [vmem:[#allocation10_spill] sm:$0xff] }
 0x213   : > { %v7572_v46 = vpop.f32.mrf.mxu1  ;;  %v3187_v2 = vpop.f32.mrf.mxu0 }
 0x214   : > { %v10697_v23 = vadd.f32 %v7571_v12, %v3232_v44  ;;  %v3230_v34 = vadd.f32 %v3187_v2, %v10414_v42 }
 0x215   : > { %v3569_v29 = vpop.f32.mrf.mxu1  ;;  %v7538_v13 = vpop.f32.mrf.mxu0 }
 0x216   : > { %v10702_v26 = vadd.f32 %v3566_v57, %v3230_v34  ;;  %v3233_v22 = vadd.f32 %v7538_v13, %v10429_v3  ;;  %v11757_v34 = vld [vmem:[#allocation2_spill] sm:$0xff] }
 0x217   : > { %v7611_v0 = vpop.f32.mrf.mxu1  ;;  %7814 = vmatmul.mubr.msk.bf16.vlgmr.msra.gmra.mxu1 %vm656_vm1, %v10435_v25  ;;  %v3190_v39 = vpop.f32.mrf.mxu0 }
 0x218   : > { %7817 = vmatprep.mubr.msk.bf16.mxu1 %vm656_vm1, %v10443_v49  ;;  %v10707_v4 = vadd.f32 %v7572_v46, %v3233_v22  ;;  %v3231_v21 = vadd.f32 %v3190_v39, %v10438_v24  ;;  %v11756_v46 = vld [vmem:[#allocation41_spill] sm:$0xff]  ;;  %v11758_v39 = vld [vmem:[#allocation42_spill] sm:$0xff] }
 0x219   : > { %v3866_v10 = vpop.f32.mrf.mxu1  ;;  %v7577_v31 = vpop.f32.mrf.mxu0  ;;  %7780 = vmatmul.mubr.msk.bf16.vlgmr.msra.gmra.mxu0 %vm656_vm1, %v10401_v43 }
 0x21a   : > { %v10712_v38 = vadd.f32 %v3569_v29, %v3231_v21  ;;  %v3789_v14 = vadd.f32 %v7577_v31, %v10447_v33  ;;  %7783 = vmatprep.mubr.msk.bf16.mxu0 %vm656_vm1, %v10435_v25 }
 0x21b   : > { %v7612_v42 = vpop.f32.mrf.mxu1  ;;  %v3660_v3 = vpop.f32.mrf.mxu0 }
 0x21c   : > { %v10717_v56 = vadd.f32 %v7611_v0, %v3789_v14  ;;  %v3787_v63 = vadd.f32 %v3660_v3, %v10454_v9  ;;  %v11759_v14 = vld [vmem:[#allocation43_spill] sm:$0xff] }
 0x21d   : > { %v3869_v54 = vpop.f32.mrf.mxu1  ;;  %v7578_v53 = vpop.f32.mrf.mxu0 }
 0x21e   : > { %v10722_v43 = vadd.f32 %v3866_v10, %v3787_v63  ;;  %v3790_v1 = vadd.f32 %v7578_v53, %v10467_v8 }
 0x21f   : > { %v7615_v24 = vpop.f32.mrf.mxu1  ;;  %7818 = vmatmul.mubr.msk.bf16.gmra.mxu1 %vm656_vm1, %v10473_v45  ;;  %v3663_v33 = vpop.f32.mrf.mxu0 }
 0x220   : > { %7821 = vmatprep.mubr.msk.bf16.mxu1 %vm656_vm1, %v11753_v32  ;;  %v10727_v6 = vadd.f32 %v7612_v42, %v3790_v1  ;;  %v3788_v12 = vadd.f32 %v3663_v33, %v11754_v59  ;;  %v11761_v59 = vld [vmem:[#allocation46_spill] sm:$0xff] }
 0x221   : > { %v3882_v25 = vpop.f32.mrf.mxu1  ;;  %v7581_v55 = vpop.f32.mrf.mxu0  ;;  %7784 = vmatmul.mubr.msk.bf16.gmra.mxu0 %vm656_vm1, %v10443_v49 }
 0x222   : > { %v10732_v48 = vadd.f32 %v3869_v54, %v3788_v12  ;;  %v3793_v57 = vadd.f32 %v7581_v55, %v11755_v40  ;;  %7787 = vmatprep.mubr.msk.bf16.mxu0 %vm656_vm1, %v10473_v45  ;;  %v11762_v55 = vld [vmem:[#allocation45_spill] sm:$0xff] }
 0x223   : > { %v7616_v9 = vpop.f32.mrf.mxu1  ;;  %v3676_v8 = vpop.f32.mrf.mxu0 }
 0x224   : > { %v10737_v61 = vadd.f32 %v7615_v24, %v3793_v57  ;;  %v3791_v44 = vadd.f32 %v3676_v8, %v11756_v46  ;;  %v11760_v24 = vld [vmem:[#allocation18_spill] sm:$0xff]  ;;  %v11763_v57 = vld [vmem:[#allocation44_spill] sm:$0xff] }
 0x225   : > { %v3885_v16 = vpop.f32.mrf.mxu1  ;;  %v7582_v2 = vpop.f32.mrf.mxu0 }
 0x226   : > { %v10742_v49 = vadd.f32 %v3882_v25, %v3791_v44  ;;  %v3794_v13 = vadd.f32 %v7582_v2, %v11757_v34  ;;  %v11764_v2 = vld [vmem:[#allocation19_spill] sm:$0xff] }
 0x227   : > { %v7619_v29 = vpop.f32.mrf.mxu1  ;;  %7822 = vmatmul.mubr.msk.bf16.gmra.mxu1 %vm656_vm1, %v10511_v30  ;;  %v3679_v0 = vpop.f32.mrf.mxu0 }
 0x228   : > { %7825 = vmatprep.mubr.msk.bf16.mxu1 %vm656_vm1, %v10519_v41  ;;  %v10747_v22 = vadd.f32 %v7616_v9, %v3794_v13  ;;  %v3792_v10 = vadd.f32 %v3679_v0, %v11758_v39 }
 0x229   : > { %v3898_v45 = vpop.f32.mrf.mxu1  ;;  %v7585_v21 = vpop.f32.mrf.mxu0  ;;  %7788 = vmatmul.mubr.msk.bf16.gmra.mxu0 %vm656_vm1, %v11753_v32 }
 0x22a   : > { %v10752_v42 = vadd.f32 %v3885_v16, %v3792_v10  ;;  %v3797_v3 = vadd.f32 %v7585_v21, %v11759_v14  ;;  %7791 = vmatprep.mubr.msk.bf16.mxu0 %vm656_vm1, %v10511_v30 }
 0x22b   : > { %v7620_v31 = vpop.f32.mrf.mxu1  ;;  %v3692_v54 = vpop.f32.mrf.mxu0 }
 0x22c   : > { %v10757_v53 = vadd.f32 %v7619_v29, %v3797_v3  ;;  %v3795_v1 = vadd.f32 %v3692_v54, %v11760_v24  ;;  %v7981_v54 = vld [vmem:[%s9812_s15 + $0x4] sm:$0xf] }
 0x22d   : > { %v3901_v63 = vpop.f32.mrf.mxu1  ;;  %v7586_v33 = vpop.f32.mrf.mxu0 }
 0x22e   : > { %v10762_v32 = vadd.f32 %v3898_v45, %v3795_v1  ;;  %v3798_v12 = vadd.f32 %v7586_v33, %v11761_v59  ;;  %v11765_v45 = vld [vmem:[#allocation48_spill] sm:$0xff] }
 0x22f   : > { %v7623_v25 = vpop.f32.mrf.mxu1  ;;  %7826 = vmatmul.mubr.msk.bf16.gmra.mxu1 %vm656_vm1, %v10549_v11  ;;  %v3695_v9 = vpop.f32.mrf.mxu0 }
 0x230   : > { %7829 = vmatprep.mubr.msk.bf16.mxu1 %vm656_vm1, %v11762_v55  ;;  %v10767_v40 = vadd.f32 %v7620_v31, %v3798_v12  ;;  %v3796_v8 = vadd.f32 %v3695_v9, %v11763_v57  ;;  %v11766_v31 = vld [vmem:[#allocation29_spill] sm:$0xff]  ;;  %v7982_v57 = vld [vmem:[%s9812_s15] sm:$0xf] }
 0x231   : > { %v3914_v30 = vpop.f32.mrf.mxu1  ;;  %v7589_v16 = vpop.f32.mrf.mxu0  ;;  %7792 = vmatmul.mubr.msk.bf16.gmra.mxu0 %vm656_vm1, %v10519_v41 }
 0x232   : > { %v10772_v44 = vadd.f32 %v3901_v63, %v3796_v8  ;;  %v3801_v29 = vadd.f32 %v7589_v16, %v11764_v2  ;;  %7795 = vmatprep.mubr.msk.bf16.mxu0 %vm656_vm1, %v10549_v11  ;;  %v5291_v63 = vrot.slane %v7981_v54, 5  ;;  %v6784_v8 = vrot.slane %v7982_v57, 9 }
 0x233   : > { %v7624_v46 = vpop.f32.mrf.mxu1  ;;  %v3708_v34 = vpop.f32.mrf.mxu0 }
 0x234   : > { %v10777_v0 = vadd.f32 %v7623_v25, %v3801_v29  ;;  %v3799_v39 = vadd.f32 %v3708_v34, %v11765_v45  ;;  %v5293_v16 = vrot.slane %v5291_v63, 4  ;;  %v11768_v29 = vld [vmem:[#allocation31_spill] sm:$0xff] }
 0x235   : > { %v3917_v13 = vpop.f32.mrf.mxu1  ;;  %v7590_v10 = vpop.f32.mrf.mxu0 }
 0x236   : > { %v10782_v41 = vadd.f32 %v3914_v30, %v3799_v39  ;;  %v3802_v14 = vadd.f32 %v7590_v10, %v11766_v31 }
 0x237   : > { %v7627_v21 = vpop.f32.mrf.mxu1  ;;  %7830 = vmatmul.mubr.msk.bf16.gmra.mxu1 %vm656_vm1, %v10597_v5  ;;  %v3711_v11 = vpop.f32.mrf.mxu0 }
 0x238   : > { %7833 = vmatprep.mubr.msk.bf16.mxu1 %vm656_vm1, %v10605_v7  ;;  %v10788_v24 = vadd.f32 %v7624_v46, %v3802_v14  ;;  %v3800_v1 = vadd.f32 %v3711_v11, %v10600_v27  ;;  %v11767_v46 = vld [vmem:[#allocation40_spill] sm:$0xff] }
 0x239   : > { %v3930_v3 = vpop.f32.mrf.mxu1  ;;  %v7593_v33 = vpop.f32.mrf.mxu0  ;;  %7796 = vmatmul.mubr.msk.bf16.gmra.mxu0 %vm656_vm1, %v11762_v55  ;;  %v5294_v2 = vrot.slane %v11767_v46, 5 }
 0x23a   : > { %v10793_v59 = vadd.f32 %v3917_v13, %v3800_v1  ;;  %v3805_v12 = vadd.f32 %v7593_v33, %v10609_v20  ;;  %7799 = vmatprep.mubr.msk.bf16.mxu0 %vm656_vm1, %v10597_v5  ;;  %v11769_v20 = vld [vmem:[#allocation36_spill] sm:$0xff] }
 0x23b   : > { %v7628_v25 = vpop.f32.mrf.mxu1  ;;  %v3724_v9 = vpop.f32.mrf.mxu0  ;;  %v5298_v13 = vrot.slane %v11769_v20, 5  ;;  %v5295_v14 = vsel %vm8696_vm7, %v5293_v16, %v5294_v2 }
 0x23c   : > { %v10800_v27 = vadd.f32 %v7627_v21, %v3805_v12  ;;  %v3803_v34 = vadd.f32 %v3724_v9, %v11768_v29  ;;  %v5292_v21 = vsel %vm8696_vm7, %v6784_v8, %v5291_v63 }
 0x23d   : > { %v3933_v30 = vpop.f32.mrf.mxu1  ;;  %v7594_v55 = vpop.f32.mrf.mxu0  ;;  %v5300_v12 = vrot.slane %v5298_v13, 4  ;;  %v6820_v63 = vcombine.low %v5292_v21, %v5295_v14 }
 0x23e   : > { %v10806_v39 = vadd.f32 %v3930_v3, %v3803_v34  ;;  %v3806_v5 = vadd.f32 %v7594_v55, %v10632_v50  ;;  %v11770_v3 = vld [vmem:[#allocation33_spill] sm:$0xff] }
 0x23f   : > { %v7631_v45 = vpop.f32.mrf.mxu1  ;;  %7834 = vmatmul.mubr.msk.bf16.gmra.mxu1 %vm656_vm1, %v10635_v35  ;;  %v3727_v10 = vpop.f32.mrf.mxu0  ;;  %v6785_v33 = vrot.slane %v11770_v3, 9 }
 0x240   : > { %7837 = vmatprep.mubr.msk.bf16.mxu1 %vm656_vm1, %v10646_v37  ;;  %v10815_v11 = vadd.f32 %v7628_v25, %v3806_v5  ;;  %v3804_v54 = vadd.f32 %v3727_v10, %v10641_v51  ;;  %v5301_v25 = vrot.slane %v10624_v15, 5 }
 0x241   : > { %v3946_v31 = vpop.f32.mrf.mxu1  ;;  %v7597_v1 = vpop.f32.mrf.mxu0  ;;  %7800 = vmatmul.mubr.msk.bf16.gmra.mxu0 %vm656_vm1, %v10605_v7  ;;  %v5299_v15 = vsel %vm8696_vm7, %v6785_v33, %v5298_v13 }
 0x242   : > { %v10821_v9 = vadd.f32 %v3933_v30, %v3804_v54  ;;  %v3809_v57 = vadd.f32 %v7597_v1, %v10648_v17  ;;  %7803 = vmatprep.mubr.msk.bf16.mxu0 %vm656_vm1, %v10635_v35  ;;  %v5302_v35 = vsel %vm8696_vm7, %v5300_v12, %v5301_v25 }
 0x243   : > { %v7632_v50 = vpop.f32.mrf.mxu1  ;;  %v3740_v8 = vpop.f32.mrf.mxu0 }
 0x244   : > { %v10827_v16 = vadd.f32 %v7631_v45, %v3809_v57  ;;  %v3807_v7 = vadd.f32 %v3740_v8, %v10653_v62 }
 0x245   : > { %v3949_v51 = vpop.f32.mrf.mxu1  ;;  %v7598_v46 = vpop.f32.mrf.mxu0 }
 0x246   : > { %v10832_v30 = vadd.f32 %v3946_v31, %v3807_v7  ;;  %v3810_v17 = vadd.f32 %v7598_v46, %v10662_v52  ;;  %v6838_v52 = vcombine.low %v5299_v15, %v5302_v35 }
 0x247   : > { %v7635_v2 = vpop.f32.mrf.mxu1  ;;  %7838 = vmatmul.mubr.msk.bf16.gmra.mxu1 %vm656_vm1, %v10667_v58  ;;  %v3743_v29 = vpop.f32.mrf.mxu0 }
 0x248   : > { %7841 = vmatprep.mubr.msk.bf16.mxu1 %vm656_vm1, %v6820_v63  ;;  %v10840_v62 = vadd.f32 %v7632_v50, %v3810_v17  ;;  %v3808_v55 = vadd.f32 %v3743_v29, %v10669_v18 }
 0x249   : > { %v3962_v34 = vpop.f32.mrf.mxu1  ;;  %v7601_v45 = vpop.f32.mrf.mxu0  ;;  %7804 = vmatmul.mubr.msk.bf16.gmra.mxu0 %vm656_vm1, %v10646_v37 }
 0x24a   : > { %v10845_v5 = vadd.f32 %v3949_v51, %v3808_v55  ;;  %v3813_v10 = vadd.f32 %v7601_v45, %v10678_v36  ;;  %7807 = vmatprep.mubr.msk.bf16.mxu0 %vm656_vm1, %v10667_v58 }
 0x24b   : > { %v7636_v20 = vpop.f32.mrf.mxu1  ;;  %v3756_v60 = vpop.f32.mrf.mxu0 }
 0x24c   : > { %v10850_v31 = vadd.f32 %v7635_v2, %v3813_v10  ;;  %v3811_v21 = vadd.f32 %v3756_v60, %v10683_v28 }
 0x24d   : > { %v3965_v13 = vpop.f32.mrf.mxu1  ;;  %v7602_v18 = vpop.f32.mrf.mxu0 }
 0x24e   : > { %v10854_v37 = vadd.f32 %v3962_v34, %v3811_v21  ;;  %v3814_v54 = vadd.f32 %v7602_v18, %v10688_v19 }
 0x24f   : > { %v7639_v14 = vpop.f32.mrf.mxu1  ;;  %7842 = vmatmul.mubr.msk.bf16.gmra.mxu1 %vm656_vm1, %v6838_v52  ;;  %v3759_v1 = vpop.f32.mrf.mxu0 }
 0x250   : > { %v10857_v36 = vadd.f32 %v7636_v20, %v3814_v54  ;;  %v3812_v58 = vadd.f32 %v3759_v1, %v10692_v47 }
 0x251   : > { %v3978_v50 = vpop.f32.mrf.mxu1  ;;  %v7605_v3 = vpop.f32.mrf.mxu0  ;;  %7808 = vmatmul.mubr.msk.bf16.gmra.mxu0 %vm656_vm1, %v6820_v63 }
 0x252   : > { %v10861_v12 = vadd.f32 %v3965_v13, %v3812_v58  ;;  %v3817_v28 = vadd.f32 %v7605_v3, %v10697_v23 }
 0x253   : > { %v7640_v33 = vpop.f32.mrf.mxu1  ;;  %v3772_v57 = vpop.f32.mrf.mxu0 }
 0x254   : > { %v10864_v8 = vadd.f32 %v7639_v14, %v3817_v28  ;;  %v3815_v19 = vadd.f32 %v3772_v57, %v10702_v26 }
 0x255   : > { %v3981_v25 = vpop.f32.mrf.mxu1  ;;  %v7606_v51 = vpop.f32.mrf.mxu0 }
 0x256   : > { %v10867_v46 = vadd.f32 %v3978_v50, %v3815_v19  ;;  %v3818_v47 = vadd.f32 %v7606_v51, %v10707_v4 }
 0x257   : > { %v7679_v7 = vpop.f32.mrf.mxu1  ;;  %v3775_v2 = vpop.f32.mrf.mxu0 }
 0x258   : > { %v10870_v63 = vadd.f32 %v7640_v33, %v3818_v47  ;;  %v3816_v15 = vadd.f32 %v3775_v2, %v10712_v38 }
 0x259   : > { %v4796_v17 = vpop.f32.mrf.mxu1  ;;  %v7645_v35 = vpop.f32.mrf.mxu0 }
 0x25a   : > { %v10873_v29 = vadd.f32 %v3981_v25, %v3816_v15  ;;  %v4721_v34 = vadd.f32 %v7645_v35, %v10717_v56 }
 0x25b   : > { %v7680_v23 = vpop.f32.mrf.mxu1  ;;  %v4592_v55 = vpop.f32.mrf.mxu0 }
 0x25c   : > { %v10876_v45 = vadd.f32 %v7679_v7, %v4721_v34  ;;  %v4719_v20 = vadd.f32 %v4592_v55, %v10722_v43 }
 0x25d   : > { %v4799_v26 = vpop.f32.mrf.mxu1  ;;  %v7646_v52 = vpop.f32.mrf.mxu0 }
 0x25e   : > { %v10879_v10 = vadd.f32 %v4796_v17, %v4719_v20  ;;  %v4722_v60 = vadd.f32 %v7646_v52, %v10727_v6 }
 0x25f   : > { %v7683_v4 = vpop.f32.mrf.mxu1  ;;  %v4595_v13 = vpop.f32.mrf.mxu0 }
 0x260   : > { %v10882_v21 = vadd.f32 %v7680_v23, %v4722_v60  ;;  %v4720_v18 = vadd.f32 %v4595_v13, %v10732_v48 }
 0x261   : > { %v4812_v38 = vpop.f32.mrf.mxu1  ;;  %v7649_v14 = vpop.f32.mrf.mxu0 }
 0x262   : > { %v10885_v54 = vadd.f32 %v4799_v26, %v4720_v18  ;;  %v4725_v1 = vadd.f32 %v7649_v14, %v10737_v61 }
 0x263   : > { %v7684_v56 = vpop.f32.mrf.mxu1  ;;  %v4608_v50 = vpop.f32.mrf.mxu0 }
 0x264   : > { %v10888_v58 = vadd.f32 %v7683_v4, %v4725_v1  ;;  %v4723_v3 = vadd.f32 %v4608_v50, %v10742_v49 }
 0x265   : > { %v4815_v43 = vpop.f32.mrf.mxu1  ;;  %v7650_v33 = vpop.f32.mrf.mxu0 }
 0x266   : > { %v10891_v28 = vadd.f32 %v4812_v38, %v4723_v3  ;;  %v4726_v57 = vadd.f32 %v7650_v33, %v10747_v22 }
 0x267   : > { %v7687_v6 = vpop.f32.mrf.mxu1  ;;  %v4611_v25 = vpop.f32.mrf.mxu0 }
 0x268   : > { %v10894_v19 = vadd.f32 %v7684_v56, %v4726_v57  ;;  %v4724_v51 = vadd.f32 %v4611_v25, %v10752_v42 }
 0x269   : > { %v4828_v48 = vpop.f32.mrf.mxu1  ;;  %v7653_v7 = vpop.f32.mrf.mxu0 }
 0x26a   : > { %v10897_v47 = vadd.f32 %v4815_v43, %v4724_v51  ;;  %v4729_v2 = vadd.f32 %v7653_v7, %v10757_v53 }
 0x26b   : > { %v7688_v61 = vpop.f32.mrf.mxu1  ;;  %v4624_v17 = vpop.f32.mrf.mxu0 }
 0x26c   : > { %v10900_v15 = vadd.f32 %v7687_v6, %v4729_v2  ;;  %v4727_v35 = vadd.f32 %v4624_v17, %v10762_v32 }
 0x26d   : > { %v4831_v49 = vpop.f32.mrf.mxu1  ;;  %v7654_v23 = vpop.f32.mrf.mxu0 }
 0x26e   : > { %v10903_v34 = vadd.f32 %v4828_v48, %v4727_v35  ;;  %v4730_v55 = vadd.f32 %v7654_v23, %v10767_v40 }
 0x26f   : > { %v7691_v22 = vpop.f32.mrf.mxu1  ;;  %v4627_v26 = vpop.f32.mrf.mxu0 }
 0x270   : > { %v10906_v20 = vadd.f32 %v7688_v61, %v4730_v55  ;;  %v4728_v52 = vadd.f32 %v4627_v26, %v10772_v44 }
 0x271   : > { %v4844_v42 = vpop.f32.mrf.mxu1  ;;  %v7657_v4 = vpop.f32.mrf.mxu0 }
 0x272   : > { %v10909_v60 = vadd.f32 %v4831_v49, %v4728_v52  ;;  %v4733_v13 = vadd.f32 %v7657_v4, %v10777_v0 }
 0x273   : > { %v7692_v53 = vpop.f32.mrf.mxu1  ;;  %v4640_v38 = vpop.f32.mrf.mxu0 }
 0x274   : > { %v10912_v18 = vadd.f32 %v7691_v22, %v4733_v13  ;;  %v4731_v14 = vadd.f32 %v4640_v38, %v10782_v41 }
 0x275   : > { %v4847_v32 = vpop.f32.mrf.mxu1  ;;  %v7658_v56 = vpop.f32.mrf.mxu0 }
 0x276   : > { %v10915_v1 = vadd.f32 %v4844_v42, %v4731_v14  ;;  %v4734_v50 = vadd.f32 %v7658_v56, %v10788_v24 }
 0x277   : > { %v7695_v40 = vpop.f32.mrf.mxu1  ;;  %v4643_v43 = vpop.f32.mrf.mxu0 }
 0x278   : > { %v10918_v3 = vadd.f32 %v7692_v53, %v4734_v50  ;;  %v4732_v33 = vadd.f32 %v4643_v43, %v10793_v59 }
 0x279   : > { %v4860_v44 = vpop.f32.mrf.mxu1  ;;  %v7661_v6 = vpop.f32.mrf.mxu0 }
 0x27a   : > { %v10921_v57 = vadd.f32 %v4847_v32, %v4732_v33  ;;  %v4737_v25 = vadd.f32 %v7661_v6, %v10800_v27 }
 0x27b   : > { %v7696_v0 = vpop.f32.mrf.mxu1  ;;  %v4656_v48 = vpop.f32.mrf.mxu0 }
 0x27c   : > { %v10924_v51 = vadd.f32 %v7695_v40, %v4737_v25  ;;  %v4735_v7 = vadd.f32 %v4656_v48, %v10806_v39 }
 0x27d   : > { %v4863_v41 = vpop.f32.mrf.mxu1  ;;  %v7662_v61 = vpop.f32.mrf.mxu0 }
 0x27e   : > { %v10927_v2 = vadd.f32 %v4860_v44, %v4735_v7  ;;  %v4738_v17 = vadd.f32 %v7662_v61, %v10815_v11 }
 0x27f   : > { %v7699_v24 = vpop.f32.mrf.mxu1  ;;  %v4659_v49 = vpop.f32.mrf.mxu0 }
 0x280   : > { %v10930_v35 = vadd.f32 %v7696_v0, %v4738_v17  ;;  %v4736_v23 = vadd.f32 %v4659_v49, %v10821_v9 }
 0x281   : > { %v4876_v59 = vpop.f32.mrf.mxu1  ;;  %v7665_v22 = vpop.f32.mrf.mxu0 }
 0x282   : > { %11771 = vst [vmem:[#allocation32_spill] sm:$0xff] %v10930_v35  ;;  %v10933_v55 = vadd.f32 %v4863_v41, %v4736_v23  ;;  %v4741_v26 = vadd.f32 %v7665_v22, %v10827_v16 }
 0x283   : > { %v7700_v27 = vpop.f32.mrf.mxu1  ;;  %v4672_v42 = vpop.f32.mrf.mxu0 }
 0x284   : > { %11772 = vst [vmem:[#allocation47_spill] sm:$0xff] %v10933_v55  ;;  %v10936_v52 = vadd.f32 %v7699_v24, %v4741_v26  ;;  %v4739_v4 = vadd.f32 %v4672_v42, %v10832_v30 }
 0x285   : > { %v4879_v39 = vpop.f32.mrf.mxu1  ;;  %v7666_v53 = vpop.f32.mrf.mxu0 }
 0x286   : > { %11773 = vst [vmem:[#allocation35_spill] sm:$0xff] %v10936_v52  ;;  %v10939_v13 = vadd.f32 %v4876_v59, %v4739_v4  ;;  %v4742_v38 = vadd.f32 %v7666_v53, %v10840_v62 }
 0x287   : > { %v7703_v11 = vpop.f32.mrf.mxu1  ;;  %v4675_v32 = vpop.f32.mrf.mxu0 }
 0x288   : > { %11774 = vst [vmem:[#allocation5_spill] sm:$0xff] %v10939_v13  ;;  %v10942_v14 = vadd.f32 %v7700_v27, %v4742_v38  ;;  %v4740_v56 = vadd.f32 %v4675_v32, %v10845_v5 }
 0x289   : > { %v4892_v9 = vpop.f32.mrf.mxu1  ;;  %v7669_v40 = vpop.f32.mrf.mxu0 }
 0x28a   : > { %11775 = vst [vmem:[#allocation15_spill] sm:$0xff] %v10942_v14  ;;  %v10945_v50 = vadd.f32 %v4879_v39, %v4740_v56  ;;  %v4745_v43 = vadd.f32 %v7669_v40, %v10850_v31 }
 0x28b   : > { %v7704_v16 = vpop.f32.mrf.mxu1  ;;  %v4688_v44 = vpop.f32.mrf.mxu0 }
 0x28c   : > { %11776 = vst [vmem:[#allocation24_spill] sm:$0xff] %v10945_v50  ;;  %v10948_v33 = vadd.f32 %v7703_v11, %v4745_v43  ;;  %v4743_v6 = vadd.f32 %v4688_v44, %v10854_v37 }
 0x28d   : > { %v4895_v30 = vpop.f32.mrf.mxu1  ;;  %v7670_v0 = vpop.f32.mrf.mxu0 }
 0x28e   : > { %11777 = vst [vmem:[#allocation17_spill] sm:$0xff] %v10948_v33  ;;  %v10951_v25 = vadd.f32 %v4892_v9, %v4743_v6  ;;  %v4746_v48 = vadd.f32 %v7670_v0, %v10857_v36 }
 0x28f   : > { %v7707_v62 = vpop.f32.mrf.mxu1  ;;  %v4691_v41 = vpop.f32.mrf.mxu0 }
 0x290   : > { %11778 = vst [vmem:[#allocation27_spill] sm:$0xff] %v10951_v25  ;;  %v10954_v7 = vadd.f32 %v7704_v16, %v4746_v48  ;;  %v4744_v61 = vadd.f32 %v4691_v41, %v10861_v12 }
 0x291   : > { %v4908_v5 = vpop.f32.mrf.mxu1  ;;  %v7673_v24 = vpop.f32.mrf.mxu0 }
 0x292   : > { %11779 = vst [vmem:[#allocation16_spill] sm:$0xff] %v10954_v7  ;;  %v10957_v17 = vadd.f32 %v4895_v30, %v4744_v61  ;;  %v4749_v49 = vadd.f32 %v7673_v24, %v10864_v8 }
 0x293   : > { %v7708_v31 = vpop.f32.mrf.mxu1  ;;  %v4704_v59 = vpop.f32.mrf.mxu0 }
 0x294   : > { %11780 = vst [vmem:[#allocation9_spill] sm:$0xff] %v10957_v17  ;;  %v10960_v23 = vadd.f32 %v7707_v62, %v4749_v49  ;;  %v4747_v22 = vadd.f32 %v4704_v59, %v10867_v46 }
 0x295   : > { %v4911_v37 = vpop.f32.mrf.mxu1  ;;  %v7674_v27 = vpop.f32.mrf.mxu0 }
 0x296   : > { %11781 = vst [vmem:[#allocation4_spill] sm:$0xff] %v10960_v23  ;;  %v10965_v26 = vadd.f32 %v4908_v5, %v4747_v22  ;;  %v4750_v42 = vadd.f32 %v7674_v27, %v10870_v63 }
 0x297   : > { %v10963_v36 = vpop.f32.mrf.mxu1  ;;  %v4707_v12 = vpop.f32.mrf.mxu0 }
 0x298   : > { %11782 = vst [vmem:[#allocation11_spill] sm:$0xff] %v10965_v26  ;;  %v10970_v4 = vadd.f32 %v7708_v31, %v4750_v42  ;;  %v4748_v8 = vadd.f32 %v4707_v12, %v10873_v29 }
 0x299   : > { %v10968_v39 = vpop.f32.mrf.mxu1  ;;  %v7713_v53 = vpop.f32.mrf.mxu0 }
 0x29a   : > { %11783 = vst [vmem:[#allocation23_spill] sm:$0xff] %v10970_v4  ;;  %v10975_v38 = vadd.f32 %v4911_v37, %v4748_v8 }
 0x29b   : > { %v10973_v11 = vpop.f32.mrf.mxu1  ;;  %v5000_v46 = vpop.f32.mrf.mxu0 }
 0x29c   : > { %11784 = vst [vmem:[#allocation22_spill] sm:$0xff] %v10975_v38 }
 0x29d   : > { %v10977_v32 = vpop.f32.mrf.mxu1  ;;  %v10979_v9 = vpop.f32.mrf.mxu0 }
 0x29f   : > { %v10981_v56 = vpop.f32.mrf.mxu1  ;;  %v10983_v63 = vpop.f32.mrf.mxu0 }
 0x2a1   : > { %v10985_v40 = vpop.f32.mrf.mxu1  ;;  %v10987_v16 = vpop.f32.mrf.mxu0 }
 0x2a3   : > { %v10989_v43 = vpop.f32.mrf.mxu1  ;;  %v10991_v29 = vpop.f32.mrf.mxu0 }
 0x2a5   : > { %v10993_v44 = vpop.f32.mrf.mxu1  ;;  %v10995_v30 = vpop.f32.mrf.mxu0 }
 0x2a7   : > { %v10997_v6 = vpop.f32.mrf.mxu1  ;;  %v10999_v0 = vpop.f32.mrf.mxu0 }
 0x2a9   : > { %v11001_v62 = vpop.f32.mrf.mxu1  ;;  %v11003_v48 = vpop.f32.mrf.mxu0 }
 0x2ab   : > { %v11005_v41 = vpop.f32.mrf.mxu1  ;;  %v11007_v5 = vpop.f32.mrf.mxu0 }
 0x2ad   : > { %v11009_v61 = vpop.f32.mrf.mxu1  ;;  %v11011_v24 = vpop.f32.mrf.mxu0 }
 0x2af   : > { %v11013_v31 = vpop.f32.mrf.mxu1  ;;  %v11015_v49 = vpop.f32.mrf.mxu0 }
 0x2b1   : > { %v11017_v59 = vpop.f32.mrf.mxu1  ;;  %v11019_v37 = vpop.f32.mrf.mxu0 }
 0x2b3   : > { %v11021_v22 = vpop.f32.mrf.mxu1  ;;  %v11023_v27 = vpop.f32.mrf.mxu0 }
 0x2b5   : > { %v11025_v42 = vpop.f32.mrf.mxu1  ;;  %v11027_v12 = vpop.f32.mrf.mxu0 }
 0x2b7   : > { %v11029_v8 = vpop.f32.mrf.mxu1  ;;  %v11031_v38 = vpop.f32.mrf.mxu0 }
 0x2b9   : > { %v11033_v4 = vpop.f32.mrf.mxu1  ;;  %v11035_v26 = vpop.f32.mrf.mxu0 }
 0x2ba   : > { %11785 = vst [vmem:[#allocation30_spill] sm:$0xff] %v11033_v4 }
 0x2bb   : > { %v11037_v23 = vpop.f32.mrf.mxu1  ;;  %v11039_v17 = vpop.f32.mrf.mxu0 }
 0x2bc   : > { %11786 = vst [vmem:[#allocation8_spill] sm:$0xff] %v11037_v23 }
 0x2bd   : > { %v11041_v7 = vpop.f32.mrf.mxu1  ;;  %v11043_v25 = vpop.f32.mrf.mxu0 }
 0x2be   : > { %11787 = vst [vmem:[#allocation26_spill] sm:$0xff] %v11041_v7  ;;  %11788 = vst [vmem:[#allocation34_spill] sm:$0xff] %v11043_v25 }
 0x2bf   : > { %v11045_v33 = vpop.f32.mrf.mxu1  ;;  %v11047_v50 = vpop.f32.mrf.mxu0 }
 0x2c0   : > { %11789 = vst [vmem:[#allocation7_spill] sm:$0xff] %v11045_v33  ;;  %11790 = vst [vmem:[#allocation14_spill] sm:$0xff] %v11047_v50 }
 0x2c1   : > { %v11049_v14 = vpop.f32.mrf.mxu1  ;;  %v11051_v13 = vpop.f32.mrf.mxu0 }
 0x2c2   : > { %11791 = vst [vmem:[#allocation21_spill] sm:$0xff] %v11049_v14  ;;  %11792 = vst [vmem:[#allocation37_spill] sm:$0xff] %v11051_v13 }
 0x2c3   : > { %v11053_v52 = vpop.f32.mrf.mxu1  ;;  %v11055_v55 = vpop.f32.mrf.mxu0 }
 0x2c4   : > { %11793 = vst [vmem:[#allocation39_spill] sm:$0xff] %v11053_v52  ;;  %11794 = vst [vmem:[#allocation20_spill] sm:$0xff] %v11055_v55 }
 0x2c5   : > { %v11057_v4 = vpop.f32.mrf.mxu1  ;;  %v11059_v23 = vpop.f32.mrf.mxu0 }
 0x2c6   : > { %11795 = vst [vmem:[#allocation12_spill] sm:$0xff] %v11057_v4  ;;  %11796 = vst [vmem:[#allocation6_spill] sm:$0xff] %v11059_v23 }
 0x2c7   : > { %v11061_v35 = vpop.f32.mrf.mxu1  ;;  %v11063_v7 = vpop.f32.mrf.mxu0 }
 0x2c8   : > { %11797 = vst [vmem:[#allocation13_spill] sm:$0xff] %v11061_v35  ;;  %11798 = vst [vmem:[#allocation3_spill] sm:$0xff] %v11063_v7 }
 0x2c9   : > { %v11065_v25 = vpop.f32.mrf.mxu1  ;;  %v11067_v33 = vpop.f32.mrf.mxu0 }
 0x2ca   : > { %11799 = vst [vmem:[#allocation38_spill] sm:$0xff] %v11065_v25  ;;  %11800 = vst [vmem:[#allocation10_spill] sm:$0xff] %v11067_v33 }
 0x2cb   : > { %v11069_v50 = vpop.f32.mrf.mxu1  ;;  %v11071_v14 = vpop.f32.mrf.mxu0 }
 0x2cc   : > { %11801 = vst [vmem:[#allocation28_spill] sm:$0xff] %v11069_v50  ;;  %11802 = vst [vmem:[#allocation25_spill] sm:$0xff] %v11071_v14  ;;  %v5129_v50 = vadd.f32 %v7713_v53, %v10876_v45  ;;  %v5128_v45 = vadd.f32 %v10983_v63, %v10885_v54 }
 0x2cd   : > { %v11073_v13 = vpop.f32.mrf.mxu1  ;;  %v11075_v52 = vpop.f32.mrf.mxu0 }
 0x2ce   : > { %11803 = vst [vmem:[#allocation41_spill] sm:$0xff] %v11073_v13  ;;  %11804 = vst [vmem:[#allocation2_spill] sm:$0xff] %v11075_v52  ;;  %v5127_v52 = vadd.f32 %v5000_v46, %v10879_v10  ;;  %v11106_v10 = vld [vmem:[%s11311_s6] ss:$0 sm:$0xff] }
 0x2cf   : > { %v11077_v55 = vpop.f32.mrf.mxu1  ;;  %v11079_v4 = vpop.f32.mrf.mxu0 }
 0x2d0   : > { %11805 = vst [vmem:[#allocation42_spill] sm:$0xff] %v11077_v55  ;;  %11806 = vst [vmem:[#allocation43_spill] sm:$0xff] %v11079_v4 }
 0x2d1   : > { %v11081_v23 = vpop.f32.mrf.mxu1  ;;  %v11083_v35 = vpop.f32.mrf.mxu0 }
 0x2d2   : > { %11807 = vst [vmem:[#allocation18_spill] sm:$0xff] %v11081_v23  ;;  %11808 = vst [vmem:[#allocation46_spill] sm:$0xff] %v11083_v35  ;;  %v5567_v23 = vadd.f32 %v10963_v36, %v5129_v50  ;;  %v5130_v35 = vadd.f32 %v10979_v9, %v10882_v21  ;;  %v5133_v9 = vadd.f32 %v10987_v16, %v10888_v58 }
 0x2d3   : > { %v11085_v7 = vpop.f32.mrf.mxu1  ;;  %v11087_v25 = vpop.f32.mrf.mxu0 }
 0x2d4   : > { %11809 = vst [vmem:[#allocation45_spill] sm:$0xff] %v11085_v7  ;;  %11810 = vst [vmem:[#allocation44_spill] sm:$0xff] %v11087_v25  ;;  %v5568_v50 = vadd.f32 %v10973_v11, %v5130_v35  ;;  %v5134_v35 = vadd.f32 %v10995_v30, %v10894_v19 }
 0x2d5   : > { %v11089_v33 = vpop.f32.mrf.mxu1  ;;  %v11092_v14 = vpop.f32.mrf.mxu0 }
 0x2d6   : > { %11811 = vst [vmem:[#allocation19_spill] sm:$0xff] %v11089_v33  ;;  %11812 = vst [vmem:[#allocation48_spill] sm:$0xff] %v11092_v14  ;;  %v5565_v33 = vadd.f32 %v10968_v39, %v5127_v52  ;;  %v5131_v52 = vadd.f32 %v10991_v29, %v10891_v28  ;;  %v5571_v28 = vadd.f32 %v10981_v56, %v5133_v9 }
 0x2d7   : > { %v7815_v13 = vpop.f32.mrf.mxu1  ;;  %v11095_v55 = vpop.f32.mrf.mxu0  ;;  %v5572_v56 = vadd.f32 %v10989_v43, %v5134_v35  ;;  %v5135_v35 = vadd.f32 %v11007_v5, %v10903_v34 }
 0x2d8   : > { %11813 = vst [vmem:[#allocation29_spill] sm:$0xff] %v11095_v55  ;;  %v5569_v29 = vadd.f32 %v10985_v40, %v5131_v52 }
 0x2d9   : > { %v5846_v4 = vpop.f32.mrf.mxu1  ;;  %v7781_v7 = vpop.f32.mrf.mxu0 }
 0x2da   : > { %v5771_v53 = vadd.f32 %v7781_v7, %v5567_v23  ;;  %v5566_v7 = vadd.f32 %v10977_v32, %v5128_v45  ;;  %v5132_v32 = vadd.f32 %v10999_v0, %v10897_v47  ;;  %v5137_v47 = vadd.f32 %v11003_v48, %v10900_v15 }
 0x2db   : > { %v7816_v25 = vpop.f32.mrf.mxu1  ;;  %v5642_v46 = vpop.f32.mrf.mxu0 }
 0x2dc   : > { %v5975_v36 = vadd.f32 %v7815_v13, %v5771_v53  ;;  %v5769_v21 = vadd.f32 %v5642_v46, %v5565_v33  ;;  %v5570_v52 = vadd.f32 %v10993_v44, %v5132_v32 }
 0x2dd   : > { %v5849_v55 = vpop.f32.mrf.mxu1  ;;  %v7782_v39 = vpop.f32.mrf.mxu0 }
 0x2de   : > { %v6014_v23 = vadd.f32 %v11106_v10, %v5975_v36  ;;  %v5973_v63 = vadd.f32 %v5846_v4, %v5769_v21  ;;  %v5772_v14 = vadd.f32 %v7782_v39, %v5568_v50 }
 0x2df   : > { %v7819_v54 = vpop.f32.mrf.mxu1  ;;  %v5645_v13 = vpop.f32.mrf.mxu0 }
 0x2e0   : > { %v6046_v11 = vmax.f32 %v6014_v23, 0.0  ;;  %v6012_v58 = vadd.f32 %v11106_v10, %v5973_v63  ;;  %v5976_v16 = vadd.f32 %v7816_v25, %v5772_v14  ;;  %v5770_v53 = vadd.f32 %v5645_v13, %v5566_v7 }
 0x2e1   : > { %v5862_v33 = vpop.f32.mrf.mxu1  ;;  %v7785_v19 = vpop.f32.mrf.mxu0  ;;  %v5575_v63 = vadd.f32 %v10997_v6, %v5137_v47  ;;  %v5138_v13 = vadd.f32 %v11011_v24, %v10906_v20  ;;  %v5136_v6 = vadd.f32 %v11015_v49, %v10909_v60 }
 0x2e2   : > { %v6897_v30 = vpack.c.bf16 %v6046_v11, %v6046_v11  ;;  %v6044_v45 = vmax.f32 %v6012_v58, 0.0  ;;  %v6015_v14 = vadd.f32 %v11106_v10, %v5976_v16  ;;  %v5974_v25 = vadd.f32 %v5849_v55, %v5770_v53 }
 0x2e3   : > { %v7820_v4 = vpop.f32.mrf.mxu1  ;;  %v5775_v40 = vadd.f32 %v7785_v19, %v5571_v28  ;;  %v5658_v0 = vpop.f32.mrf.mxu0  ;;  %v5573_v19 = vadd.f32 %v11001_v62, %v5135_v35  ;;  %v5139_v62 = vadd.f32 %v11023_v27, %v10915_v1 }
 0x2e4   : > { %6207 = vst.msk [vmem:[%s11126_s23 + $0x8] sm:$0xf] %vm6204_vm8, %v6897_v30  ;;  %v6895_v50 = vpack.c.bf16 %v6044_v45, %v6044_v45  ;;  %v6047_v36 = vmax.f32 %v6015_v14, 0.0  ;;  %v6013_v21 = vadd.f32 %v11106_v10, %v5974_v25  ;;  %v5773_v9 = vadd.f32 %v5658_v0, %v5569_v29 }
 0x2e5   : > { %v5865_v46 = vpop.f32.mrf.mxu1  ;;  %v5979_v39 = vadd.f32 %v7819_v54, %v5775_v40  ;;  %v7786_v55 = vpop.f32.mrf.mxu0  ;;  %v5141_v30 = vadd.f32 %v11019_v37, %v10912_v18  ;;  %v5574_v40 = vadd.f32 %v11009_v61, %v5136_v6 }
 0x2e6   : > { %6205 = vst.msk [vmem:[%s11126_s23] sm:$0xf] %vm6204_vm8, %v6895_v50  ;;  %v6898_v43 = vpack.c.bf16 %v6047_v36, %v6047_v36  ;;  %v6045_v15 = vmax.f32 %v6013_v21, 0.0  ;;  %v5977_v48 = vadd.f32 %v5862_v33, %v5773_v9  ;;  %v5776_v23 = vadd.f32 %v7786_v55, %v5572_v56 }
 0x2e7   : > { %v7823_v7 = vpop.f32.mrf.mxu1  ;;  %v6018_v44 = vadd.f32 %v11106_v10, %v5979_v39  ;;  %v5661_v54 = vpop.f32.mrf.mxu0  ;;  %v5579_v21 = vadd.f32 %v11013_v31, %v5141_v30 }
 0x2e8   : > { %6208 = vst.msk [vmem:[%s11126_s23 + $0xc] sm:$0xf] %vm6204_vm8, %v6898_v43  ;;  %v6896_v58 = vpack.c.bf16 %v6045_v15, %v6045_v15  ;;  %v6016_v16 = vadd.f32 %v11106_v10, %v5977_v48  ;;  %v5980_v33 = vadd.f32 %v7820_v4, %v5776_v23  ;;  %v5774_v53 = vadd.f32 %v5661_v54, %v5570_v52 }
 0x2e9   : > { %v5878_v11 = vpop.f32.mrf.mxu1  ;;  %v6050_v28 = vmax.f32 %v6018_v44, 0.0  ;;  %v7789_v29 = vpop.f32.mrf.mxu0  ;;  %v5576_v4 = vadd.f32 %v11005_v41, %v5138_v13  ;;  %v5142_v43 = vadd.f32 %v11027_v12, %v10918_v3  ;;  %v5140_v15 = vadd.f32 %v11031_v38, %v10921_v57 }
 0x2ea   : > { %6206 = vst.msk [vmem:[%s11126_s23 + $0x4] sm:$0xf] %vm6204_vm8, %v6896_v58  ;;  %v6048_v20 = vmax.f32 %v6016_v16, 0.0  ;;  %v6019_v5 = vadd.f32 %v11106_v10, %v5980_v33  ;;  %v5978_v24 = vadd.f32 %v5865_v46, %v5774_v53  ;;  %v5779_v32 = vadd.f32 %v7789_v29, %v5575_v63 }
 0x2eb   : > { %v7824_v34 = vpop.f32.mrf.mxu1  ;;  %v6901_v60 = vpack.c.bf16 %v6050_v28, %v6050_v28  ;;  %v5674_v49 = vpop.f32.mrf.mxu0  ;;  %v5580_v16 = vadd.f32 %v11021_v22, %v5142_v43  ;;  %v5578_v33 = vadd.f32 %v11025_v42, %v5140_v15  ;;  %v5143_v53 = vadd.f32 %v11039_v17, %v10927_v2  ;;  %v11823_v43 = vld [vmem:[#allocation20_spill] sm:$0xff] }
 0x2ec   : > { %v6899_v14 = vpack.c.bf16 %v6048_v20, %v6048_v20  ;;  %v6051_v25 = vmax.f32 %v6019_v5, 0.0  ;;  %v6017_v56 = vadd.f32 %v11106_v10, %v5978_v24  ;;  %v5983_v47 = vadd.f32 %v7823_v7, %v5779_v32  ;;  %v11814_v24 = vld [vmem:[#allocation32_spill] sm:$0xff]  ;;  %v11815_v32 = vld [vmem:[#allocation34_spill] sm:$0xff] }
 0x2ed   : > { %v5881_v45 = vpop.f32.mrf.mxu1  ;;  %6211 = vst.msk [vmem:[%s11126_s23 + $0x18] sm:$0xf] %vm6204_vm8, %v6901_v60  ;;  %v5777_v41 = vadd.f32 %v5674_v49, %v5573_v19  ;;  %v7790_v0 = vpop.f32.mrf.mxu0  ;;  %v5577_v7 = vadd.f32 %v11017_v59, %v5139_v62  ;;  %v5145_v59 = vadd.f32 %v11035_v26, %v10924_v51  ;;  %v5146_v22 = vadd.f32 %v11815_v32, %v11814_v24  ;;  %v11816_v49 = vld [vmem:[#allocation30_spill] sm:$0xff] }
 0x2ee   : > { %6209 = vst.msk [vmem:[%s11126_s23 + $0x10] sm:$0xf] %vm6204_vm8, %v6899_v14  ;;  %v6902_v18 = vpack.c.bf16 %v6051_v25, %v6051_v25  ;;  %v6049_v37 = vmax.f32 %v6017_v56, 0.0  ;;  %v6022_v50 = vadd.f32 %v11106_v10, %v5983_v47  ;;  %v5780_v36 = vadd.f32 %v7790_v0, %v5576_v4 }
 0x2ef   : > { %v7827_v46 = vpop.f32.mrf.mxu1  ;;  %v5981_v9 = vadd.f32 %v5878_v11, %v5777_v41  ;;  %v5677_v61 = vpop.f32.mrf.mxu0  ;;  %v5583_v5 = vadd.f32 %v11029_v8, %v5145_v59  ;;  %v11817_v41 = vld [vmem:[#allocation8_spill] sm:$0xff]  ;;  %v11824_v59 = vld [vmem:[#allocation26_spill] sm:$0xff] }
 0x2f0   : > { %6212 = vst.msk [vmem:[%s11126_s23 + $0x1c] sm:$0xf] %vm6204_vm8, %v6902_v18  ;;  %v6900_v1 = vpack.c.bf16 %v6049_v37, %v6049_v37  ;;  %v6054_v27 = vmax.f32 %v6022_v50, 0.0  ;;  %v5984_v39 = vadd.f32 %v7824_v34, %v5780_v36  ;;  %v5778_v55 = vadd.f32 %v5677_v61, %v5574_v40  ;;  %v11819_v18 = vld [vmem:[#allocation14_spill] sm:$0xff]  ;;  %v11820_v50 = vld [vmem:[#allocation35_spill] sm:$0xff]  ;;  %v11821_v36 = vld [vmem:[#allocation37_spill] sm:$0xff] }
 0x2f1   : > { %v5894_v52 = vpop.f32.mrf.mxu1  ;;  %v6020_v31 = vadd.f32 %v11106_v10, %v5981_v9  ;;  %v7793_v48 = vpop.f32.mrf.mxu0  ;;  %v5584_v0 = vadd.f32 %v11817_v41, %v5146_v22  ;;  %v11834_v41 = vld [vmem:[#allocation10_spill] sm:$0xff] }
 0x2f2   : > { %6210 = vst.msk [vmem:[%s11126_s23 + $0x14] sm:$0xf] %vm6204_vm8, %v6900_v1  ;;  %v6905_v63 = vpack.c.bf16 %v6054_v27, %v6054_v27  ;;  %v6023_v35 = vadd.f32 %v11106_v10, %v5984_v39  ;;  %v5982_v13 = vadd.f32 %v5881_v45, %v5778_v55  ;;  %v5783_v44 = vadd.f32 %v7793_v48, %v5579_v21 }
 0x2f3   : > { %v7828_v23 = vpop.f32.mrf.mxu1  ;;  %v6052_v54 = vmax.f32 %v6020_v31, 0.0  ;;  %v5690_v11 = vpop.f32.mrf.mxu0  ;;  %v5581_v45 = vadd.f32 %v11816_v49, %v5143_v53  ;;  %v5149_v21 = vadd.f32 %v11821_v36, %v11820_v50 }
 0x2f4   : > { %6215 = vst.msk [vmem:[%s11126_s23 + $0x28] sm:$0xf] %vm6204_vm8, %v6905_v63  ;;  %v6055_v57 = vmax.f32 %v6023_v35, 0.0  ;;  %v6021_v38 = vadd.f32 %v11106_v10, %v5982_v13  ;;  %v5987_v12 = vadd.f32 %v7827_v46, %v5783_v44  ;;  %v5781_v58 = vadd.f32 %v5690_v11, %v5577_v7  ;;  %v11818_v46 = vld [vmem:[#allocation47_spill] sm:$0xff]  ;;  %v11822_v7 = vld [vmem:[#allocation5_spill] sm:$0xff] }
 0x2f5   : > { %v5897_v3 = vpop.f32.mrf.mxu1  ;;  %v6903_v51 = vpack.c.bf16 %v6052_v54, %v6052_v54  ;;  %v7794_v26 = vpop.f32.mrf.mxu0  ;;  %v5144_v37 = vadd.f32 %v11819_v18, %v11818_v46  ;;  %v5147_v15 = vadd.f32 %v11823_v43, %v11822_v7  ;;  %v11825_v11 = vld [vmem:[#allocation7_spill] sm:$0xff]  ;;  %v11836_v18 = vld [vmem:[#allocation25_spill] sm:$0xff] }
 0x2f6   : > { %v6906_v28 = vpack.c.bf16 %v6055_v57, %v6055_v57  ;;  %v6053_v29 = vmax.f32 %v6021_v38, 0.0  ;;  %v6026_v34 = vadd.f32 %v11106_v10, %v5987_v12  ;;  %v5985_v20 = vadd.f32 %v5894_v52, %v5781_v58  ;;  %v11826_v57 = vld [vmem:[#allocation15_spill] sm:$0xff]  ;;  %v11827_v38 = vld [vmem:[#allocation6_spill] sm:$0xff] }
 0x2f7   : > { %v7831_v6 = vpop.f32.mrf.mxu1  ;;  %6213 = vst.msk [vmem:[%s11126_s23 + $0x20] sm:$0xf] %vm6204_vm8, %v6903_v51  ;;  %v5784_v42 = vadd.f32 %v7794_v26, %v5580_v16  ;;  %v5693_v19 = vpop.f32.mrf.mxu0  ;;  %v5582_v54 = vadd.f32 %v11824_v59, %v5144_v37  ;;  %v5150_v12 = vadd.f32 %v11827_v38, %v11826_v57  ;;  %v11835_v46 = vld [vmem:[#allocation27_spill] sm:$0xff] }
 0x2f8   : > { %6216 = vst.msk [vmem:[%s11126_s23 + $0x2c] sm:$0xf] %vm6204_vm8, %v6906_v28  ;;  %v6904_v2 = vpack.c.bf16 %v6053_v29, %v6053_v29  ;;  %v6058_v17 = vmax.f32 %v6026_v34, 0.0  ;;  %v6024_v30 = vadd.f32 %v11106_v10, %v5985_v20  ;;  %v5782_v60 = vadd.f32 %v5693_v19, %v5578_v33  ;;  %v11828_v28 = vld [vmem:[#allocation21_spill] sm:$0xff]  ;;  %v11829_v34 = vld [vmem:[#allocation24_spill] sm:$0xff]  ;;  %v11830_v20 = vld [vmem:[#allocation3_spill] sm:$0xff] }
 0x2f9   : > { %v5910_v4 = vpop.f32.mrf.mxu1  ;;  %v5988_v14 = vadd.f32 %v7828_v23, %v5784_v42  ;;  %v7797_v8 = vpop.f32.mrf.mxu0  ;;  %v5585_v29 = vadd.f32 %v11828_v28, %v5147_v15  ;;  %v5151_v37 = vadd.f32 %v11836_v18, %v11835_v46  ;;  %v11845_v28 = vld [vmem:[#allocation46_spill] sm:$0xff] }
 0x2fa   : > { %6214 = vst.msk [vmem:[%s11126_s23 + $0x24] sm:$0xf] %vm6204_vm8, %v6904_v2  ;;  %v6909_v56 = vpack.c.bf16 %v6058_v17, %v6058_v17  ;;  %v6056_v47 = vmax.f32 %v6024_v30, 0.0  ;;  %v5986_v40 = vadd.f32 %v5897_v3, %v5782_v60  ;;  %v5787_v62 = vadd.f32 %v7797_v8, %v5583_v5  ;;  %v11831_v17 = vld [vmem:[#allocation39_spill] sm:$0xff] }
 0x2fb   : > { %v7832_v25 = vpop.f32.mrf.mxu1  ;;  %v6027_v9 = vadd.f32 %v11106_v10, %v5988_v14  ;;  %v5706_v61 = vpop.f32.mrf.mxu0  ;;  %v5587_v3 = vadd.f32 %v11825_v11, %v5149_v21  ;;  %v5148_v5 = vadd.f32 %v11830_v20, %v11829_v34  ;;  %v5588_v30 = vadd.f32 %v11831_v17, %v5150_v12  ;;  %v11842_v11 = vld [vmem:[#allocation43_spill] sm:$0xff] }
 0x2fc   : > { %6219 = vst.msk [vmem:[%s11126_s23 + $0x38] sm:$0xf] %vm6204_vm8, %v6909_v56  ;;  %v6907_v1 = vpack.c.bf16 %v6056_v47, %v6056_v47  ;;  %v6025_v27 = vadd.f32 %v11106_v10, %v5986_v40  ;;  %v5991_v39 = vadd.f32 %v7831_v6, %v5787_v62  ;;  %v5785_v55 = vadd.f32 %v5706_v61, %v5581_v45  ;;  %v11832_v47 = vld [vmem:[#allocation12_spill] sm:$0xff]  ;;  %v11833_v62 = vld [vmem:[#allocation17_spill] sm:$0xff] }
 0x2fd   : > { %v5913_v52 = vpop.f32.mrf.mxu1  ;;  %v6059_v31 = vmax.f32 %v6027_v9, 0.0  ;;  %v7798_v48 = vpop.f32.mrf.mxu0  ;;  %v5586_v40 = vadd.f32 %v11832_v47, %v5148_v5  ;;  %v11849_v47 = vld [vmem:[#allocation44_spill] sm:$0xff] }
 0x2fe   : > { %6217 = vst.msk [vmem:[%s11126_s23 + $0x30] sm:$0xf] %vm6204_vm8, %v6907_v1  ;;  %v6057_v63 = vmax.f32 %v6025_v27, 0.0  ;;  %v6030_v35 = vadd.f32 %v11106_v10, %v5991_v39  ;;  %v5989_v13 = vadd.f32 %v5910_v4, %v5785_v55  ;;  %v5788_v44 = vadd.f32 %v7798_v48, %v5584_v0  ;;  %v11837_v27 = vld [vmem:[#allocation16_spill] sm:$0xff]  ;;  %v11838_v39 = vld [vmem:[#allocation2_spill] sm:$0xff] }
 0x2ff   : > { %v7835_v23 = vpop.f32.mrf.mxu1  ;;  %v6910_v58 = vpack.c.bf16 %v6059_v31, %v6059_v31  ;;  %v5709_v16 = vpop.f32.mrf.mxu0  ;;  %v5153_v0 = vadd.f32 %v11834_v41, %v11833_v62  ;;  %v5154_v55 = vadd.f32 %v11838_v39, %v11837_v27  ;;  %v11850_v62 = vld [vmem:[#allocation23_spill] sm:$0xff]  ;;  %v11851_v41 = vld [vmem:[#allocation48_spill] sm:$0xff] }
 0x300   : > { %v6908_v53 = vpack.c.bf16 %v6057_v63, %v6057_v63  ;;  %v6062_v51 = vmax.f32 %v6030_v35, 0.0  ;;  %v6028_v26 = vadd.f32 %v11106_v10, %v5989_v13  ;;  %v5992_v6 = vadd.f32 %v7832_v25, %v5788_v44  ;;  %v11839_v35 = vld [vmem:[#allocation13_spill] sm:$0xff]  ;;  %v11840_v44 = vld [vmem:[#allocation38_spill] sm:$0xff] }
 0x301   : > { %v5926_v33 = vpop.f32.mrf.mxu1  ;;  %6220 = vst.msk [vmem:[%s11126_s23 + $0x3c] sm:$0xf] %vm6204_vm8, %v6910_v58  ;;  %v5786_v24 = vadd.f32 %v5709_v16, %v5582_v54  ;;  %v7801_v32 = vpop.f32.mrf.mxu0  ;;  %v5591_v13 = vadd.f32 %v11839_v35, %v5153_v0  ;;  %v5589_v59 = vadd.f32 %v11840_v44, %v5151_v37  ;;  %v11841_v54 = vld [vmem:[#allocation9_spill] sm:$0xff]  ;;  %v5158_v0 = vadd.f32 %v11851_v41, %v11850_v62 }
 0x302   : > { %6218 = vst.msk [vmem:[%s11126_s23 + $0x34] sm:$0xf] %vm6204_vm8, %v6908_v53  ;;  %v6913_v42 = vpack.c.bf16 %v6062_v51, %v6062_v51  ;;  %v6060_v19 = vmax.f32 %v6028_v26, 0.0  ;;  %v6031_v4 = vadd.f32 %v11106_v10, %v5992_v6  ;;  %v5791_v2 = vadd.f32 %v7801_v32, %v5587_v3  ;;  %v11843_v51 = vld [vmem:[#allocation28_spill] sm:$0xff] }
 0x303   : > { %v7836_v22 = vpop.f32.mrf.mxu1  ;;  %v5990_v60 = vadd.f32 %v5913_v52, %v5786_v24  ;;  %v5722_v49 = vpop.f32.mrf.mxu0  ;;  %v5152_v3 = vadd.f32 %v11842_v11, %v11841_v54  ;;  %v5592_v26 = vadd.f32 %v11843_v51, %v5154_v55  ;;  %v11844_v6 = vld [vmem:[#allocation4_spill] sm:$0xff] }
 0x304   : > { %6223 = vst.msk [vmem:[%s11126_s23 + $0x48] sm:$0xf] %vm6204_vm8, %v6913_v42  ;;  %v6911_v14 = vpack.c.bf16 %v6060_v19, %v6060_v19  ;;  %v6063_v8 = vmax.f32 %v6031_v4, 0.0  ;;  %v5995_v25 = vadd.f32 %v7835_v23, %v5791_v2  ;;  %v5789_v56 = vadd.f32 %v5722_v49, %v5585_v29  ;;  %v11846_v19 = vld [vmem:[#allocation41_spill] sm:$0xff] }
 0x305   : > { %v5929_v45 = vpop.f32.mrf.mxu1  ;;  %v6029_v50 = vadd.f32 %v11106_v10, %v5990_v60  ;;  %v7802_v36 = vpop.f32.mrf.mxu0  ;;  %v5157_v29 = vadd.f32 %v11845_v28, %v11844_v6  ;;  %v5590_v4 = vadd.f32 %v11846_v19, %v5152_v3  ;;  %v11856_v3 = vld [vmem:[#allocation19_spill] sm:$0xff] }
 0x306   : > { %6221 = vst.msk [vmem:[%s11126_s23 + $0x40] sm:$0xf] %vm6204_vm8, %v6911_v14  ;;  %v6914_v9 = vpack.c.bf16 %v6063_v8, %v6063_v8  ;;  %v6034_v61 = vadd.f32 %v11106_v10, %v5995_v25  ;;  %v5993_v52 = vadd.f32 %v5926_v33, %v5789_v56  ;;  %v5792_v1 = vadd.f32 %v7802_v36, %v5588_v30  ;;  %v11847_v8 = vld [vmem:[#allocation42_spill] sm:$0xff]  ;;  %v11848_v56 = vld [vmem:[#allocation11_spill] sm:$0xff] }
 0x307   : > { %v7839_v21 = vpop.f32.mrf.mxu1  ;;  %v6061_v7 = vmax.f32 %v6029_v50, 0.0  ;;  %v5725_v43 = vpop.f32.mrf.mxu0  ;;  %v5595_v25 = vadd.f32 %v11847_v8, %v5157_v29 }
 0x308   : > { %6224 = vst.msk [vmem:[%s11126_s23 + $0x4c] sm:$0xf] %vm6204_vm8, %v6914_v9  ;;  %v6066_v31 = vmax.f32 %v6034_v61, 0.0  ;;  %v6032_v48 = vadd.f32 %v11106_v10, %v5993_v52  ;;  %v5996_v23 = vadd.f32 %v7836_v22, %v5792_v1  ;;  %v5790_v63 = vadd.f32 %v5725_v43, %v5586_v40  ;;  %v11852_v9 = vld [vmem:[#allocation22_spill] sm:$0xff]  ;;  %v11853_v61 = vld [vmem:[#allocation29_spill] sm:$0xff] }
 0x309   : > { %v5942_v15 = vpop.f32.mrf.mxu1  ;;  %v6912_v57 = vpack.c.bf16 %v6061_v7, %v6061_v7  ;;  %v7805_v38 = vpop.f32.mrf.mxu0  ;;  %v5155_v40 = vadd.f32 %v11849_v47, %v11848_v56  ;;  %v5156_v52 = vadd.f32 %v11853_v61, %v11852_v9 }
 0x30a   : > { %v6917_v58 = vpack.c.bf16 %v6066_v31, %v6066_v31  ;;  %v6064_v16 = vmax.f32 %v6032_v48, 0.0  ;;  %v6035_v33 = vadd.f32 %v11106_v10, %v5996_v23  ;;  %v5994_v53 = vadd.f32 %v5929_v45, %v5790_v63  ;;  %v11854_v31 = vld [vmem:[#allocation18_spill] sm:$0xff]  ;;  %v11855_v23 = vld [vmem:[#allocation45_spill] sm:$0xff] }
 0x30b   : > { %v7840_v12 = vpop.f32.mrf.mxu1  ;;  %6222 = vst.msk [vmem:[%s11126_s23 + $0x44] sm:$0xf] %vm6204_vm8, %v6912_v57  ;;  %v5795_v34 = vadd.f32 %v7805_v38, %v5591_v13  ;;  %v5738_v20 = vpop.f32.mrf.mxu0  ;;  %v5593_v48 = vadd.f32 %v11854_v31, %v5155_v40  ;;  %v5596_v63 = vadd.f32 %v11855_v23, %v5158_v0  ;;  %v5594_v57 = vadd.f32 %v11856_v3, %v5156_v52 }
 0x30c   : > { %6227 = vst.msk [vmem:[%s11126_s23 + $0x58] sm:$0xf] %vm6204_vm8, %v6917_v58  ;;  %v6915_v24 = vpack.c.bf16 %v6064_v16, %v6064_v16  ;;  %v6067_v32 = vmax.f32 %v6035_v33, 0.0  ;;  %v6033_v22 = vadd.f32 %v11106_v10, %v5994_v53  ;;  %v5793_v42 = vadd.f32 %v5738_v20, %v5589_v59 }
 0x30d   : > { %v5945_v5 = vpop.f32.mrf.mxu1  ;;  %v5999_v2 = vadd.f32 %v7839_v21, %v5795_v34  ;;  %v7806_v17 = vpop.f32.mrf.mxu0 }
 0x30e   : > { %6225 = vst.msk [vmem:[%s11126_s23 + $0x50] sm:$0xf] %vm6204_vm8, %v6915_v24  ;;  %v6918_v60 = vpack.c.bf16 %v6067_v32, %v6067_v32  ;;  %v6065_v49 = vmax.f32 %v6033_v22, 0.0  ;;  %v5997_v45 = vadd.f32 %v5942_v15, %v5793_v42  ;;  %v5796_v14 = vadd.f32 %v7806_v17, %v5592_v26 }
 0x30f   : > { %v7843_v30 = vpop.f32.mrf.mxu1  ;;  %v6038_v46 = vadd.f32 %v11106_v10, %v5999_v2  ;;  %v5741_v18 = vpop.f32.mrf.mxu0 }
 0x310   : > { %6228 = vst.msk [vmem:[%s11126_s23 + $0x5c] sm:$0xf] %vm6204_vm8, %v6918_v60  ;;  %v6916_v37 = vpack.c.bf16 %v6065_v49, %v6065_v49  ;;  %v6036_v50 = vadd.f32 %v11106_v10, %v5997_v45  ;;  %v6000_v36 = vadd.f32 %v7840_v12, %v5796_v14  ;;  %v5794_v21 = vadd.f32 %v5741_v18, %v5590_v4 }
 0x311   : > { %v6070_v1 = vmax.f32 %v6038_v46, 0.0  ;;  %v7809_v27 = vpop.f32.mrf.mxu0  ;;  %v5958_v39 = vpop.f32.mrf.mxu1 }
 0x312   : > { %6226 = vst.msk [vmem:[%s11126_s23 + $0x54] sm:$0xf] %vm6204_vm8, %v6916_v37  ;;  %v6068_v55 = vmax.f32 %v6036_v50, 0.0  ;;  %v6039_v7 = vadd.f32 %v11106_v10, %v6000_v36  ;;  %v5998_v43 = vadd.f32 %v5945_v5, %v5794_v21  ;;  %v5799_v15 = vadd.f32 %v7809_v27, %v5595_v25 }
 0x313   : > { %v6921_v35 = vpack.c.bf16 %v6070_v1, %v6070_v1  ;;  %v5754_v13 = vpop.f32.mrf.mxu0  ;;  %v7844_v58 = vpop.f32.mrf.mxu1 }
 0x314   : > { %v6919_v44 = vpack.c.bf16 %v6068_v55, %v6068_v55  ;;  %v6071_v59 = vmax.f32 %v6039_v7, 0.0  ;;  %v6037_v54 = vadd.f32 %v11106_v10, %v5998_v43  ;;  %v6003_v11 = vadd.f32 %v7843_v30, %v5799_v15 }
 0x315   : > { %6231 = vst.msk [vmem:[%s11126_s23 + $0x68] sm:$0xf] %vm6204_vm8, %v6921_v35  ;;  %v5797_v38 = vadd.f32 %v5754_v13, %v5593_v48  ;;  %v7810_v12 = vpop.f32.mrf.mxu0  ;;  %v5961_v24 = vpop.f32.mrf.mxu1 }
 0x316   : > { %6229 = vst.msk [vmem:[%s11126_s23 + $0x60] sm:$0xf] %vm6204_vm8, %v6919_v44  ;;  %v6922_v16 = vpack.c.bf16 %v6071_v59, %v6071_v59  ;;  %v6069_v33 = vmax.f32 %v6037_v54, 0.0  ;;  %v6042_v53 = vadd.f32 %v11106_v10, %v6003_v11  ;;  %v5800_v51 = vadd.f32 %v7810_v12, %v5596_v63 }
 0x317   : > { %v6001_v26 = vadd.f32 %v5958_v39, %v5797_v38  ;;  %v5757_v6 = vpop.f32.mrf.mxu0 }
 0x318   : > { %6232 = vst.msk [vmem:[%s11126_s23 + $0x6c] sm:$0xf] %vm6204_vm8, %v6922_v16  ;;  %v6920_v28 = vpack.c.bf16 %v6069_v33, %v6069_v33  ;;  %v6074_v29 = vmax.f32 %v6042_v53, 0.0  ;;  %v6004_v34 = vadd.f32 %v7844_v58, %v5800_v51  ;;  %v5798_v20 = vadd.f32 %v5757_v6, %v5594_v57 }
 0x319   : > { %v6040_v5 = vadd.f32 %v11106_v10, %v6001_v26 }
 0x31a   : > { %6230 = vst.msk [vmem:[%s11126_s23 + $0x64] sm:$0xf] %vm6204_vm8, %v6920_v28  ;;  %v6925_v32 = vpack.c.bf16 %v6074_v29, %v6074_v29  ;;  %v6043_v22 = vadd.f32 %v11106_v10, %v6004_v34  ;;  %v6002_v42 = vadd.f32 %v5961_v24, %v5798_v20 }
 0x31b   : > { %v6072_v19 = vmax.f32 %v6040_v5, 0.0 }
 0x31c   : > { %6235 = vst.msk [vmem:[%s11126_s23 + $0x78] sm:$0xf] %vm6204_vm8, %v6925_v32  ;;  %v6075_v4 = vmax.f32 %v6043_v22, 0.0  ;;  %v6041_v2 = vadd.f32 %v11106_v10, %v6002_v42 }
 0x31d   : > { %v6923_v17 = vpack.c.bf16 %v6072_v19, %v6072_v19 }
 0x31e   : > { %v6926_v30 = vpack.c.bf16 %v6075_v4, %v6075_v4  ;;  %v6073_v60 = vmax.f32 %v6041_v2, 0.0 }
 0x31f   : > { %6233 = vst.msk [vmem:[%s11126_s23 + $0x70] sm:$0xf] %vm6204_vm8, %v6923_v17 }
 0x320   : > { %6236 = vst.msk [vmem:[%s11126_s23 + $0x7c] sm:$0xf] %vm6204_vm8, %v6926_v30  ;;  %v6924_v49 = vpack.c.bf16 %v6073_v60, %v6073_v60 }
 0x322   : > { %6234 = vst.msk [vmem:[%s11126_s23 + $0x74] sm:$0xf] %vm6204_vm8, %v6924_v49 }
 0x323 PF: > { %s17_s26 = sadd.s32 1, %s8005_s26   ;;  %s11857_s24 = smov %s8001_s25 }
 0x324   : > { %p14_p5 = scmp.ge.s32.totalorder %s17_s26, 4   ;;  %s11858_s25 = smov %s11860_s27 }
 0x326   :  { %16 = sbr.rel (!%p14_p5) target bundleno = 2 (0x2), region = 103 }

</bundles_post_ra>
